<compile_context>
chip_gen: v7x
topology: tpu7x:2x2x1
jax: 0.10.0
libtpu: 0.0.40
codegen_flags: <defaults>
</compile_context>

<pallas_src>
import functools

import jax
import jax.numpy as jnp
from jax.experimental import pallas as pl
from jax.experimental.pallas import tpu as pltpu

NEG_SLOPE = 0.01  # PyTorch nn.LeakyReLU default
_VMEM_LIMIT = 32 * 1024 * 1024
_COMPILER_PARAMS = pltpu.CompilerParams(
    dimension_semantics=("parallel",), vmem_limit_bytes=_VMEM_LIMIT)


def _leaky(v):
    return jnp.where(v > 0, v, NEG_SLOPE * v)


# ----------------------------------------------------------------------------
# Kernel C: M-tiled fused matmul + bias (+ LeakyReLU)
#   used for the stride-2 4x4 convs (im2col path) and the final Linear.
# ----------------------------------------------------------------------------
def _matmul_kernel(x_ref, w_ref, b_ref, o_ref, *, post_act):
    acc = jnp.dot(x_ref[...], w_ref[...], preferred_element_type=jnp.float32)
    acc = acc + b_ref[...]
    if post_act:
        acc = _leaky(acc)
    o_ref[...] = acc.astype(o_ref.dtype)


def fused_matmul(x_bf, w_bf, bias_f32, *, post_act=False, tm=512):
    """x_bf: [M, K] bf16, w_bf: [K, N] bf16, bias: [1, N] f32 -> [M, N] f32."""
    M, K = x_bf.shape
    K2, N = w_bf.shape
    assert K == K2
    TM = M if M <= tm else tm            # TM == M (full dim) or a multiple of 8
    grid = (pl.cdiv(M, TM),)
    kernel = functools.partial(_matmul_kernel, post_act=post_act)
    return pl.pallas_call(
        kernel,
        out_shape=jax.ShapeDtypeStruct((M, N), jnp.float32),
        grid=grid,
        in_specs=[pl.BlockSpec((TM, K), lambda i: (i, 0)),
                  pl.BlockSpec((K, N), lambda i: (0, 0)),
                  pl.BlockSpec((1, N), lambda i: (0, 0))],
        out_specs=pl.BlockSpec((TM, N), lambda i: (i, 0)),
        compiler_params=_COMPILER_PARAMS,
    )(x_bf, w_bf, bias_f32)


# ----------------------------------------------------------------------------
# Padded, row-flattened layout helpers (host-side glue, cheap XLA ops only)
#   [B,H,W,C] -> zero-pad spatial by 1 -> flatten to [B, Hp*Wp (+8 tail), C].
# A 3x3 conv output at flat position p uses flat inputs p + i*Wp + j, so each
# tap is one contiguous slice; output columns W..W+1 of every row are wrap
# garbage and are dropped by _unflatten.
# ----------------------------------------------------------------------------
def _pad_flat(x_nhwc):
    B, H, W, C = x_nhwc.shape
    xp = jnp.pad(x_nhwc, ((0, 0), (1, 1), (1, 1), (0, 0)))
    xf = xp.reshape(B, (H + 2) * (W + 2), C)
    return jnp.pad(xf, ((0, 0), (0, 8), (0, 0)))   # tail pad for tap overreach


def _unflatten(y_flat, H, W):
    B, _, Cout = y_flat.shape
    return y_flat.reshape(B, H, W + 2, Cout)[:, :, :W, :]


# ----------------------------------------------------------------------------
# Kernel A: direct 3x3 / stride-1 / pad-1 conv (+ optional LeakyReLU)
#   grid over batch; one image per block; no im2col materialization.
#   weight layout: [9, Cin, Cout] (one tap per leading index).
# ----------------------------------------------------------------------------
def _conv3x3_kernel(xf_ref, w_ref, b_ref, o_ref, *, H, Wp, post_act):
    L = H * Wp
    a = xf_ref[...].astype(jnp.bfloat16)   # [Lp, C] (zero padded)
    w = w_ref[...]                          # [9, C, Cout] bf16
    Cout = w.shape[2]
    acc = jnp.zeros((L, Cout), jnp.float32)
    for i in range(3):
        for j in range(3):
            d = i * Wp + j
            t = i * 3 + j
            acc = acc + jnp.dot(a[d:d + L, :], w[t],
                                preferred_element_type=jnp.float32)
    acc = acc + b_ref[...]
    if post_act:
        acc = _leaky(acc)
    o_ref[...] = acc.astype(o_ref.dtype)


def conv3x3_direct(x_nhwc, w_taps, bias, *, post_act=False):
    B, H, W, C = x_nhwc.shape
    Wp = W + 2
    Cout = w_taps.shape[2]
    xf = _pad_flat(x_nhwc)
    Lp = xf.shape[1]
    L = H * Wp
    kernel = functools.partial(_conv3x3_kernel, H=H, Wp=Wp, post_act=post_act)
    y = pl.pallas_call(
        kernel,
        out_shape=jax.ShapeDtypeStruct((B, L, Cout), jnp.float32),
        grid=(B,),
        in_specs=[pl.BlockSpec((None, Lp, C), lambda b: (b, 0, 0)),
                  pl.BlockSpec((9, C, Cout), lambda b: (0, 0, 0)),
                  pl.BlockSpec((1, Cout), lambda b: (0, 0))],
        out_specs=pl.BlockSpec((None, L, Cout), lambda b: (b, 0, 0)),
        compiler_params=_COMPILER_PARAMS,
    )(xf, w_taps, bias)
    return _unflatten(y, H, W)


# ----------------------------------------------------------------------------
# Kernel B: fused ResBlock
#   LeakyReLU -> 3x3 conv -> LeakyReLU -> 1x1 conv -> +residual
#   One pallas_call per ResBlock; the hidden activation never leaves VMEM.
# ----------------------------------------------------------------------------
def _resblock_kernel(xf_ref, w1_ref, b1_ref, w2_ref, b2_ref, o_ref, *, H, Wp):
    L = H * Wp
    x = xf_ref[...]                               # [Lp, C] f32 (zero padded)
    a = _leaky(x).astype(jnp.bfloat16)            # leaky(0)=0 keeps padding zero
    w1 = w1_ref[...]                              # [9, C, Hd] bf16
    Hd = w1.shape[2]
    acc = jnp.zeros((L, Hd), jnp.float32)
    for i in range(3):
        for j in range(3):
            d = i * Wp + j
            t = i * 3 + j
            acc = acc + jnp.dot(a[d:d + L, :], w1[t],
                                preferred_element_type=jnp.float32)
    h = _leaky(acc + b1_ref[...]).astype(jnp.bfloat16)   # [L, Hd], stays on-chip
    out = jnp.dot(h, w2_ref[...],
                  preferred_element_type=jnp.float32) + b2_ref[...]
    out = out + x[Wp + 1: Wp + 1 + L, :]                 # residual add
    o_ref[...] = out.astype(o_ref.dtype)


def resblock_fused(x_nhwc, w1_taps, b1, w2_mat, b2):
    B, H, W, C = x_nhwc.shape
    Wp = W + 2
    Hd = w1_taps.shape[2]
    xf = _pad_flat(x_nhwc)
    Lp = xf.shape[1]
    L = H * Wp
    kernel = functools.partial(_resblock_kernel, H=H, Wp=Wp)
    y = pl.pallas_call(
        kernel,
        out_shape=jax.ShapeDtypeStruct((B, L, C), jnp.float32),
        grid=(B,),
        in_specs=[pl.BlockSpec((None, Lp, C), lambda b: (b, 0, 0)),
                  pl.BlockSpec((9, C, Hd), lambda b: (0, 0, 0)),
                  pl.BlockSpec((1, Hd), lambda b: (0, 0)),
                  pl.BlockSpec((Hd, C), lambda b: (0, 0)),
                  pl.BlockSpec((1, C), lambda b: (0, 0))],
        out_specs=pl.BlockSpec((None, L, C), lambda b: (b, 0, 0)),
        compiler_params=_COMPILER_PARAMS,
    )(xf, w1_taps, b1, w2_mat, b2)
    return _unflatten(y, H, W)


# ----------------------------------------------------------------------------
# Stride-2 conv: NHWC im2col (bf16 patches) + M-tiled fused matmul
# (patch extraction is cheap XLA slicing; the compute runs in Kernel C)
# ----------------------------------------------------------------------------
def conv_im2col(x_nhwc, w_mat, bias, *, kh, kw, stride, padding, post_act=False):
    B, H, W, C = x_nhwc.shape
    Cout = w_mat.shape[1]
    xp = jnp.pad(x_nhwc, ((0, 0), (padding, padding), (padding, padding), (0, 0)))
    Ho = (H + 2 * padding - kh) // stride + 1
    Wo = (W + 2 * padding - kw) // stride + 1
    cols = []
    for i in range(kh):
        for j in range(kw):
            cols.append(xp[:, i:i + stride * Ho:stride, j:j + stride * Wo:stride, :])
    col = jnp.stack(cols, axis=3)                       # [B, Ho, Wo, kh*kw, C]
    patches = col.reshape(B * Ho * Wo, kh * kw * C).astype(jnp.bfloat16)
    y = fused_matmul(patches, w_mat, bias, post_act=post_act)
    return y.reshape(B, Ho, Wo, Cout)


# ----------------------------------------------------------------------------
# Parameters: deterministic synthetic init (PyTorch layout) + one-time repack
# ----------------------------------------------------------------------------
def init_encoder_params(key, img_size, in_channel, out_channel, n_res_block):
    b1 = out_channel // 16
    b2 = out_channel // 8
    b3 = out_channel // 4
    cur = img_size // 8
    fin = cur * cur * b3

    def conv_init(k, cin, cout, ksz):
        k1, k2 = jax.random.split(k)
        w = jax.random.normal(k1, (cout, cin, ksz, ksz), jnp.float32) * 0.1
        bb = jax.random.normal(k2, (cout,), jnp.float32) * 0.1
        return w, bb

    keys = jax.random.split(key, 64)
    it = iter(keys)
    p = {}
    p['c1'] = conv_init(next(it), in_channel, b1, 3)
    p['c2'] = conv_init(next(it), b1, b2, 4)
    p['c3'] = conv_init(next(it), b2, b2, 3)
    for i in range(n_res_block):
        w1, bb1 = conv_init(next(it), b2, out_channel, 3)
        w2, bb2 = conv_init(next(it), out_channel, b2, 1)
        p[f'res1_{i}'] = (w1, bb1, w2, bb2)
    p['c4'] = conv_init(next(it), b2, b2, 3)
    p['c5'] = conv_init(next(it), b2, b3, 4)
    p['c6'] = conv_init(next(it), b3, b3, 3)
    for i in range(n_res_block):
        w1, bb1 = conv_init(next(it), b3, out_channel, 3)
        w2, bb2 = conv_init(next(it), out_channel, b3, 1)
        p[f'res2_{i}'] = (w1, bb1, w2, bb2)
    p['c7'] = conv_init(next(it), b3, b3, 3)
    p['c8'] = conv_init(next(it), b3, b3, 4)
    p['c9'] = conv_init(next(it), b3, b3, 3)
    k1, k2 = jax.random.split(next(it))
    p['linear'] = (jax.random.normal(k1, (out_channel, fin), jnp.float32) * 0.1,
                   jax.random.normal(k2, (out_channel,), jnp.float32) * 0.1)
    return p


def _pack_conv_mat(w, b):
    """[Cout,Cin,kh,kw] -> ([kh*kw*Cin, Cout] bf16, [1, Cout] f32); K = (i,j,c)."""
    cout, cin, kh, kw = w.shape
    w_mat = w.transpose(2, 3, 1, 0).reshape(kh * kw * cin, cout)
    return w_mat.astype(jnp.bfloat16), b.reshape(1, cout).astype(jnp.float32)


def _pack_conv3_taps(w, b):
    """[Cout,Cin,3,3] -> ([9, Cin, Cout] bf16, [1, Cout] f32); tap t = 3*i + j."""
    cout, cin, kh, kw = w.shape
    assert kh == 3 and kw == 3
    w_t = w.transpose(2, 3, 1, 0).reshape(9, cin, cout)
    return w_t.astype(jnp.bfloat16), b.reshape(1, cout).astype(jnp.float32)


def prepare_params(p, img_size, out_channel, n_res_block):
    """One-time (hoisted) weight repack into kernel-ready bf16 layouts."""
    b3 = out_channel // 4
    cur = img_size // 8
    q = {}
    for name in ('c1', 'c3', 'c4', 'c6', 'c7', 'c9'):       # 3x3 direct path
        q[name] = _pack_conv3_taps(*p[name])
    for name in ('c2', 'c5', 'c8'):                          # 4x4 stride-2 im2col
        q[name] = _pack_conv_mat(*p[name])
    for i in range(n_res_block):
        for pre in ('res1_', 'res2_'):
            w1, bb1, w2, bb2 = p[pre + str(i)]
            q[pre + str(i)] = (_pack_conv3_taps(w1, bb1), _pack_conv_mat(w2, bb2))
    wlin, blin = p['linear']
    # Permute Linear columns from PyTorch NCHW-flatten order to NHWC order.
    wl = wlin.reshape(out_channel, b3, cur, cur).transpose(2, 3, 1, 0)
    q['linear'] = (wl.reshape(cur * cur * b3, out_channel).astype(jnp.bfloat16),
                   blin.reshape(1, out_channel).astype(jnp.float32))
    return q


# ----------------------------------------------------------------------------
# Encoder forward pass (Pallas)
# ----------------------------------------------------------------------------
def encoder_forward(q, x_nchw, n_res_block):
    x = x_nchw.transpose(0, 2, 3, 1)                     # NCHW -> NHWC, once
    x = conv3x3_direct(x, *q['c1'], post_act=True)
    x = conv_im2col(x, *q['c2'], kh=4, kw=4, stride=2, padding=1, post_act=True)
    x = conv3x3_direct(x, *q['c3'])
    for i in range(n_res_block):
        (w1, b1), (w2, b2) = q[f'res1_{i}']
        x = resblock_fused(x, w1, b1, w2, b2)
    x = conv3x3_direct(x, *q['c4'], post_act=True)
    x = conv_im2col(x, *q['c5'], kh=4, kw=4, stride=2, padding=1, post_act=True)
    x = conv3x3_direct(x, *q['c6'])
    for i in range(n_res_block):
        (w1, b1), (w2, b2) = q[f'res2_{i}']
        x = resblock_fused(x, w1, b1, w2, b2)
    x = conv3x3_direct(x, *q['c7'], post_act=True)
    x = conv_im2col(x, *q['c8'], kh=4, kw=4, stride=2, padding=1, post_act=True)
    x = conv3x3_direct(x, *q['c9'])
    # Flatten (NHWC order; the Linear weight was permuted to match) + Linear.
    B = x.shape[0]
    flat = x.reshape(B, -1).astype(jnp.bfloat16)
    wl, bl = q['linear']
    return fused_matmul(flat, wl, bl, post_act=True)


# ----------------------------------------------------------------------------
# Pure-JAX reference (lax.conv, f32, NCHW) for correctness checking
# ----------------------------------------------------------------------------
def _ref_conv(v, w, b, stride, padding):
    y = jax.lax.conv_general_dilated(
        v, w, (stride, stride), ((padding, padding), (padding, padding)),
        dimension_numbers=('NCHW', 'OIHW', 'NCHW'))
    return y + b.reshape(1, -1, 1, 1)


def ref_forward(params, x, n_res_block):
    p = params
    x = _leaky(_ref_conv(x, *p['c1'], 1, 1))
    x = _leaky(_ref_conv(x, *p['c2'], 2, 1))
    x = _ref_conv(x, *p['c3'], 1, 1)
    for i in range(n_res_block):
        w1, b1, w2, b2 = p[f'res1_{i}']
        h = _leaky(_ref_conv(_leaky(x), w1, b1, 1, 1))
        x = _ref_conv(h, w2, b2, 1, 0) + x
    x = _leaky(_ref_conv(x, *p['c4'], 1, 1))
    x = _leaky(_ref_conv(x, *p['c5'], 2, 1))
    x = _ref_conv(x, *p['c6'], 1, 1)
    for i in range(n_res_block):
        w1, b1, w2, b2 = p[f'res2_{i}']
        h = _leaky(_ref_conv(_leaky(x), w1, b1, 1, 1))
        x = _ref_conv(h, w2, b2, 1, 0) + x
    x = _leaky(_ref_conv(x, *p['c7'], 1, 1))
    x = _leaky(_ref_conv(x, *p['c8'], 2, 1))
    x = _ref_conv(x, *p['c9'], 1, 1)
    flat = x.reshape(x.shape[0], -1)
    wlin, blin = p['linear']
    return _leaky(flat @ wlin.T + blin)


# ----------------------------------------------------------------------------
if __name__ == "__main__":
    B, IMG, C_IN, C_OUT, N_RES = 2, 16, 4, 32, 1

    key = jax.random.PRNGKey(0)
    kp, kx = jax.random.split(key)
    params = init_encoder_params(kp, IMG, C_IN, C_OUT, N_RES)
    prepared = prepare_params(params, IMG, C_OUT, N_RES)
    x = jax.random.normal(kx, (B, C_IN, IMG, IMG), jnp.float32)

    fwd = jax.jit(encoder_forward, static_argnums=2)
    out = jax.block_until_ready(fwd(prepared, x, N_RES))
    assert out.shape == (B, C_OUT), out.shape

    ref = jax.block_until_ready(ref_forward(params, x, N_RES))
    # bf16 MXU operands (f32 accumulation) -> loosened tolerance vs f32 reference
    assert jnp.allclose(out, ref, atol=2e-2, rtol=2e-2), \
        float(jnp.max(jnp.abs(out - ref)))

    print("KERNEL_OK")
</pallas_src>

<mosaic_0001>
module attributes {stable_mosaic.version = 11 : i64} {
  func.func @_conv3x3_kernel(%arg0: i32, %arg1: memref<1x332x4xf32, #tpu.memory_space<vmem>>, %arg2: memref<9x4x2xbf16, #tpu.memory_space<vmem>>, %arg3: memref<1x2xf32, #tpu.memory_space<vmem>>, %arg4: memref<1x288x2xf32, #tpu.memory_space<vmem>>) attributes {dimension_semantics = [#tpu.dimension_semantics<parallel>], iteration_bounds = array<i64: 2>, scalar_prefetch = 0 : i64, scratch_operands = 0 : i64, tpu.core_type = #tpu.core_type<tc>, window_params = [{transform_indices = @transform_0, window_bounds = array<i64: 1, 332, 4>}, {pipeline_mode = #tpu.pipeline_mode<synchronous>, transform_indices = @transform_1, window_bounds = array<i64: 9, 4, 2>}, {pipeline_mode = #tpu.pipeline_mode<synchronous>, transform_indices = @transform_2, window_bounds = array<i64: 1, 2>}, {transform_indices = @transform_3, window_bounds = array<i64: 1, 288, 2>}]} {
    %c0 = arith.constant 0 : index
    %c0_0 = arith.constant 0 : index
    %c0_1 = arith.constant 0 : index
    %0 = vector.load %arg1[%c0, %c0_0, %c0_1] : memref<1x332x4xf32, #tpu.memory_space<vmem>>, vector<1x332x4xf32>
    %1 = vector.shape_cast %0 : vector<1x332x4xf32> to vector<332x4xf32>
    %2 = arith.truncf %1 : vector<332x4xf32> to vector<332x4xbf16>
    %c0_2 = arith.constant 0 : index
    %c0_3 = arith.constant 0 : index
    %c0_4 = arith.constant 0 : index
    %3 = vector.load %arg2[%c0_2, %c0_3, %c0_4] : memref<9x4x2xbf16, #tpu.memory_space<vmem>>, vector<9x4x2xbf16>
    %cst = arith.constant 0.000000e+00 : f32
    %4 = vector.broadcast %cst : f32 to vector<288x2xf32>
    %5 = vector.extract_strided_slice %2 {offsets = [0, 0], sizes = [288, 4], strides = [1, 1]} : vector<332x4xbf16> to vector<288x4xbf16>
    %6 = vector.extract_strided_slice %3 {offsets = [0, 0, 0], sizes = [1, 4, 2], strides = [1, 1, 1]} : vector<9x4x2xbf16> to vector<1x4x2xbf16>
    %7 = vector.shape_cast %6 : vector<1x4x2xbf16> to vector<4x2xbf16>
    %cst_5 = arith.constant dense<0.000000e+00> : vector<288x2xf32>
    %8 = tpu.matmul %5, %7, %cst_5 {dimension_numbers = #tpu.dot_dimension_numbers<[1], [0], [0], [1], [0, 0, 1, 1], [], []>} : vector<288x4xbf16>, vector<4x2xbf16>, vector<288x2xf32> -> vector<288x2xf32>
    %9 = arith.addf %4, %8 : vector<288x2xf32>
    %10 = vector.extract_strided_slice %2 {offsets = [1, 0], sizes = [288, 4], strides = [1, 1]} : vector<332x4xbf16> to vector<288x4xbf16>
    %11 = vector.extract_strided_slice %3 {offsets = [1, 0, 0], sizes = [1, 4, 2], strides = [1, 1, 1]} : vector<9x4x2xbf16> to vector<1x4x2xbf16>
    %12 = vector.shape_cast %11 : vector<1x4x2xbf16> to vector<4x2xbf16>
    %cst_6 = arith.constant dense<0.000000e+00> : vector<288x2xf32>
    %13 = tpu.matmul %10, %12, %cst_6 {dimension_numbers = #tpu.dot_dimension_numbers<[1], [0], [0], [1], [0, 0, 1, 1], [], []>} : vector<288x4xbf16>, vector<4x2xbf16>, vector<288x2xf32> -> vector<288x2xf32>
    %14 = arith.addf %9, %13 : vector<288x2xf32>
    %15 = vector.extract_strided_slice %2 {offsets = [2, 0], sizes = [288, 4], strides = [1, 1]} : vector<332x4xbf16> to vector<288x4xbf16>
    %16 = vector.extract_strided_slice %3 {offsets = [2, 0, 0], sizes = [1, 4, 2], strides = [1, 1, 1]} : vector<9x4x2xbf16> to vector<1x4x2xbf16>
    %17 = vector.shape_cast %16 : vector<1x4x2xbf16> to vector<4x2xbf16>
    %cst_7 = arith.constant dense<0.000000e+00> : vector<288x2xf32>
    %18 = tpu.matmul %15, %17, %cst_7 {dimension_numbers = #tpu.dot_dimension_numbers<[1], [0], [0], [1], [0, 0, 1, 1], [], []>} : vector<288x4xbf16>, vector<4x2xbf16>, vector<288x2xf32> -> vector<288x2xf32>
    %19 = arith.addf %14, %18 : vector<288x2xf32>
    %20 = vector.extract_strided_slice %2 {offsets = [18, 0], sizes = [288, 4], strides = [1, 1]} : vector<332x4xbf16> to vector<288x4xbf16>
    %21 = vector.extract_strided_slice %3 {offsets = [3, 0, 0], sizes = [1, 4, 2], strides = [1, 1, 1]} : vector<9x4x2xbf16> to vector<1x4x2xbf16>
    %22 = vector.shape_cast %21 : vector<1x4x2xbf16> to vector<4x2xbf16>
    %cst_8 = arith.constant dense<0.000000e+00> : vector<288x2xf32>
    %23 = tpu.matmul %20, %22, %cst_8 {dimension_numbers = #tpu.dot_dimension_numbers<[1], [0], [0], [1], [0, 0, 1, 1], [], []>} : vector<288x4xbf16>, vector<4x2xbf16>, vector<288x2xf32> -> vector<288x2xf32>
    %24 = arith.addf %19, %23 : vector<288x2xf32>
    %25 = vector.extract_strided_slice %2 {offsets = [19, 0], sizes = [288, 4], strides = [1, 1]} : vector<332x4xbf16> to vector<288x4xbf16>
    %26 = vector.extract_strided_slice %3 {offsets = [4, 0, 0], sizes = [1, 4, 2], strides = [1, 1, 1]} : vector<9x4x2xbf16> to vector<1x4x2xbf16>
    %27 = vector.shape_cast %26 : vector<1x4x2xbf16> to vector<4x2xbf16>
    %cst_9 = arith.constant dense<0.000000e+00> : vector<288x2xf32>
    %28 = tpu.matmul %25, %27, %cst_9 {dimension_numbers = #tpu.dot_dimension_numbers<[1], [0], [0], [1], [0, 0, 1, 1], [], []>} : vector<288x4xbf16>, vector<4x2xbf16>, vector<288x2xf32> -> vector<288x2xf32>
    %29 = arith.addf %24, %28 : vector<288x2xf32>
    %30 = vector.extract_strided_slice %2 {offsets = [20, 0], sizes = [288, 4], strides = [1, 1]} : vector<332x4xbf16> to vector<288x4xbf16>
    %31 = vector.extract_strided_slice %3 {offsets = [5, 0, 0], sizes = [1, 4, 2], strides = [1, 1, 1]} : vector<9x4x2xbf16> to vector<1x4x2xbf16>
    %32 = vector.shape_cast %31 : vector<1x4x2xbf16> to vector<4x2xbf16>
    %cst_10 = arith.constant dense<0.000000e+00> : vector<288x2xf32>
    %33 = tpu.matmul %30, %32, %cst_10 {dimension_numbers = #tpu.dot_dimension_numbers<[1], [0], [0], [1], [0, 0, 1, 1], [], []>} : vector<288x4xbf16>, vector<4x2xbf16>, vector<288x2xf32> -> vector<288x2xf32>
    %34 = arith.addf %29, %33 : vector<288x2xf32>
    %35 = vector.extract_strided_slice %2 {offsets = [36, 0], sizes = [288, 4], strides = [1, 1]} : vector<332x4xbf16> to vector<288x4xbf16>
    %36 = vector.extract_strided_slice %3 {offsets = [6, 0, 0], sizes = [1, 4, 2], strides = [1, 1, 1]} : vector<9x4x2xbf16> to vector<1x4x2xbf16>
    %37 = vector.shape_cast %36 : vector<1x4x2xbf16> to vector<4x2xbf16>
    %cst_11 = arith.constant dense<0.000000e+00> : vector<288x2xf32>
    %38 = tpu.matmul %35, %37, %cst_11 {dimension_numbers = #tpu.dot_dimension_numbers<[1], [0], [0], [1], [0, 0, 1, 1], [], []>} : vector<288x4xbf16>, vector<4x2xbf16>, vector<288x2xf32> -> vector<288x2xf32>
    %39 = arith.addf %34, %38 : vector<288x2xf32>
    %40 = vector.extract_strided_slice %2 {offsets = [37, 0], sizes = [288, 4], strides = [1, 1]} : vector<332x4xbf16> to vector<288x4xbf16>
    %41 = vector.extract_strided_slice %3 {offsets = [7, 0, 0], sizes = [1, 4, 2], strides = [1, 1, 1]} : vector<9x4x2xbf16> to vector<1x4x2xbf16>
    %42 = vector.shape_cast %41 : vector<1x4x2xbf16> to vector<4x2xbf16>
    %cst_12 = arith.constant dense<0.000000e+00> : vector<288x2xf32>
    %43 = tpu.matmul %40, %42, %cst_12 {dimension_numbers = #tpu.dot_dimension_numbers<[1], [0], [0], [1], [0, 0, 1, 1], [], []>} : vector<288x4xbf16>, vector<4x2xbf16>, vector<288x2xf32> -> vector<288x2xf32>
    %44 = arith.addf %39, %43 : vector<288x2xf32>
    %45 = vector.extract_strided_slice %2 {offsets = [38, 0], sizes = [288, 4], strides = [1, 1]} : vector<332x4xbf16> to vector<288x4xbf16>
    %46 = vector.extract_strided_slice %3 {offsets = [8, 0, 0], sizes = [1, 4, 2], strides = [1, 1, 1]} : vector<9x4x2xbf16> to vector<1x4x2xbf16>
    %47 = vector.shape_cast %46 : vector<1x4x2xbf16> to vector<4x2xbf16>
    %cst_13 = arith.constant dense<0.000000e+00> : vector<288x2xf32>
    %48 = tpu.matmul %45, %47, %cst_13 {dimension_numbers = #tpu.dot_dimension_numbers<[1], [0], [0], [1], [0, 0, 1, 1], [], []>} : vector<288x4xbf16>, vector<4x2xbf16>, vector<288x2xf32> -> vector<288x2xf32>
    %49 = arith.addf %44, %48 : vector<288x2xf32>
    %c0_14 = arith.constant 0 : index
    %c0_15 = arith.constant 0 : index
    %50 = vector.load %arg3[%c0_14, %c0_15] : memref<1x2xf32, #tpu.memory_space<vmem>>, vector<1x2xf32>
    %51 = vector.broadcast %50 : vector<1x2xf32> to vector<288x2xf32>
    %52 = arith.addf %49, %51 : vector<288x2xf32>
    %cst_16 = arith.constant 0.000000e+00 : f32
    %53 = vector.broadcast %cst_16 : f32 to vector<288x2xf32>
    %54 = arith.cmpf ogt, %52, %53 : vector<288x2xf32>
    %cst_17 = arith.constant 0.00999999977 : f32
    %55 = vector.broadcast %cst_17 : f32 to vector<288x2xf32>
    %56 = arith.mulf %55, %52 : vector<288x2xf32>
    %57 = arith.select %54, %52, %56 : vector<288x2xi1>, vector<288x2xf32>
    %c0_18 = arith.constant 0 : index
    %c0_19 = arith.constant 0 : index
    %c0_20 = arith.constant 0 : index
    %58 = vector.load %arg4[%c0_18, %c0_19, %c0_20] : memref<1x288x2xf32, #tpu.memory_space<vmem>>, vector<1x288x2xf32>
    %59 = vector.shape_cast %58 : vector<1x288x2xf32> to vector<288x2xf32>
    %60 = vector.shape_cast %57 : vector<288x2xf32> to vector<1x288x2xf32>
    tpu.vector_store %arg4[%c0_18, %c0_19, %c0_20], %60 {strides = array<i32>} : memref<1x288x2xf32, #tpu.memory_space<vmem>>, vector<1x288x2xf32>,
    return
  }
  func.func @transform_0(%arg0: i32) -> (i32, i32, i32) {
    %c0_i32 = arith.constant 0 : i32
    %c0_i32_0 = arith.constant 0 : i32
    %c0_i32_1 = arith.constant 0 : i32
    return %arg0, %c0_i32, %c0_i32_0 : i32, i32, i32
  }
  func.func @transform_1(%arg0: i32) -> (i32, i32, i32) {
    %c0_i32 = arith.constant 0 : i32
    %c0_i32_0 = arith.constant 0 : i32
    %c0_i32_1 = arith.constant 0 : i32
    %c0_i32_2 = arith.constant 0 : i32
    return %c0_i32, %c0_i32_0, %c0_i32_1 : i32, i32, i32
  }
  func.func @transform_2(%arg0: i32) -> (i32, i32) {
    %c0_i32 = arith.constant 0 : i32
    %c0_i32_0 = arith.constant 0 : i32
    %c0_i32_1 = arith.constant 0 : i32
    return %c0_i32, %c0_i32_0 : i32, i32
  }
  func.func @transform_3(%arg0: i32) -> (i32, i32, i32) {
    %c0_i32 = arith.constant 0 : i32
    %c0_i32_0 = arith.constant 0 : i32
    %c0_i32_1 = arith.constant 0 : i32
    return %arg0, %c0_i32, %c0_i32_0 : i32, i32, i32
  }
}

module attributes {stable_mosaic.version = 11 : i64} {
  func.func @_matmul_kernel(%arg0: i32, %arg1: memref<128x32xbf16, #tpu.memory_space<vmem>>, %arg2: memref<32x4xbf16, #tpu.memory_space<vmem>>, %arg3: memref<1x4xf32, #tpu.memory_space<vmem>>, %arg4: memref<128x4xf32, #tpu.memory_space<vmem>>) attributes {dimension_semantics = [#tpu.dimension_semantics<parallel>], iteration_bounds = array<i64: 1>, scalar_prefetch = 0 : i64, scratch_operands = 0 : i64, tpu.core_type = #tpu.core_type<tc>, window_params = [{transform_indices = @transform_0, window_bounds = array<i64: 128, 32>}, {pipeline_mode = #tpu.pipeline_mode<synchronous>, transform_indices = @transform_1, window_bounds = array<i64: 32, 4>}, {pipeline_mode = #tpu.pipeline_mode<synchronous>, transform_indices = @transform_2, window_bounds = array<i64: 1, 4>}, {transform_indices = @transform_3, window_bounds = array<i64: 128, 4>}]} {
    %c0 = arith.constant 0 : index
    %c0_0 = arith.constant 0 : index
    %0 = vector.load %arg1[%c0, %c0_0] : memref<128x32xbf16, #tpu.memory_space<vmem>>, vector<128x32xbf16>
    %c0_1 = arith.constant 0 : index
    %c0_2 = arith.constant 0 : index
    %1 = vector.load %arg2[%c0_1, %c0_2] : memref<32x4xbf16, #tpu.memory_space<vmem>>, vector<32x4xbf16>
    %cst = arith.constant dense<0.000000e+00> : vector<128x4xf32>
    %2 = tpu.matmul %0, %1, %cst {dimension_numbers = #tpu.dot_dimension_numbers<[1], [0], [0], [1], [0, 0, 1, 1], [], []>} : vector<128x32xbf16>, vector<32x4xbf16>, vector<128x4xf32> -> vector<128x4xf32>
    %c0_3 = arith.constant 0 : index
    %c0_4 = arith.constant 0 : index
    %3 = vector.load %arg3[%c0_3, %c0_4] : memref<1x4xf32, #tpu.memory_space<vmem>>, vector<1x4xf32>
    %4 = vector.broadcast %3 : vector<1x4xf32> to vector<128x4xf32>
    %5 = arith.addf %2, %4 : vector<128x4xf32>
    %cst_5 = arith.constant 0.000000e+00 : f32
    %6 = vector.broadcast %cst_5 : f32 to vector<128x4xf32>
    %7 = arith.cmpf ogt, %5, %6 : vector<128x4xf32>
    %cst_6 = arith.constant 0.00999999977 : f32
    %8 = vector.broadcast %cst_6 : f32 to vector<128x4xf32>
    %9 = arith.mulf %8, %5 : vector<128x4xf32>
    %10 = arith.select %7, %5, %9 : vector<128x4xi1>, vector<128x4xf32>
    %c0_7 = arith.constant 0 : index
    %c0_8 = arith.constant 0 : index
    %11 = vector.load %arg4[%c0_7, %c0_8] : memref<128x4xf32, #tpu.memory_space<vmem>>, vector<128x4xf32>
    tpu.vector_store %arg4[%c0_7, %c0_8], %10 {strides = array<i32>} : memref<128x4xf32, #tpu.memory_space<vmem>>, vector<128x4xf32>,
    return
  }
  func.func @transform_0(%arg0: i32) -> (i32, i32) {
    %c0_i32 = arith.constant 0 : i32
    %c0_i32_0 = arith.constant 0 : i32
    return %arg0, %c0_i32 : i32, i32
  }
  func.func @transform_1(%arg0: i32) -> (i32, i32) {
    %c0_i32 = arith.constant 0 : i32
    %c0_i32_0 = arith.constant 0 : i32
    %c0_i32_1 = arith.constant 0 : i32
    return %c0_i32, %c0_i32_0 : i32, i32
  }
  func.func @transform_2(%arg0: i32) -> (i32, i32) {
    %c0_i32 = arith.constant 0 : i32
    %c0_i32_0 = arith.constant 0 : i32
    %c0_i32_1 = arith.constant 0 : i32
    return %c0_i32, %c0_i32_0 : i32, i32
  }
  func.func @transform_3(%arg0: i32) -> (i32, i32) {
    %c0_i32 = arith.constant 0 : i32
    %c0_i32_0 = arith.constant 0 : i32
    return %arg0, %c0_i32 : i32, i32
  }
}

module attributes {stable_mosaic.version = 11 : i64} {
  func.func @_conv3x3_kernel(%arg0: i32, %arg1: memref<1x108x4xf32, #tpu.memory_space<vmem>>, %arg2: memref<9x4x4xbf16, #tpu.memory_space<vmem>>, %arg3: memref<1x4xf32, #tpu.memory_space<vmem>>, %arg4: memref<1x80x4xf32, #tpu.memory_space<vmem>>) attributes {dimension_semantics = [#tpu.dimension_semantics<parallel>], iteration_bounds = array<i64: 2>, scalar_prefetch = 0 : i64, scratch_operands = 0 : i64, tpu.core_type = #tpu.core_type<tc>, window_params = [{transform_indices = @transform_0, window_bounds = array<i64: 1, 108, 4>}, {pipeline_mode = #tpu.pipeline_mode<synchronous>, transform_indices = @transform_1, window_bounds = array<i64: 9, 4, 4>}, {pipeline_mode = #tpu.pipeline_mode<synchronous>, transform_indices = @transform_2, window_bounds = array<i64: 1, 4>}, {transform_indices = @transform_3, window_bounds = array<i64: 1, 80, 4>}]} {
    %c0 = arith.constant 0 : index
    %c0_0 = arith.constant 0 : index
    %c0_1 = arith.constant 0 : index
    %0 = vector.load %arg1[%c0, %c0_0, %c0_1] : memref<1x108x4xf32, #tpu.memory_space<vmem>>, vector<1x108x4xf32>
    %1 = vector.shape_cast %0 : vector<1x108x4xf32> to vector<108x4xf32>
    %2 = arith.truncf %1 : vector<108x4xf32> to vector<108x4xbf16>
    %c0_2 = arith.constant 0 : index
    %c0_3 = arith.constant 0 : index
    %c0_4 = arith.constant 0 : index
    %3 = vector.load %arg2[%c0_2, %c0_3, %c0_4] : memref<9x4x4xbf16, #tpu.memory_space<vmem>>, vector<9x4x4xbf16>
    %cst = arith.constant 0.000000e+00 : f32
    %4 = vector.broadcast %cst : f32 to vector<80x4xf32>
    %5 = vector.extract_strided_slice %2 {offsets = [0, 0], sizes = [80, 4], strides = [1, 1]} : vector<108x4xbf16> to vector<80x4xbf16>
    %6 = vector.extract_strided_slice %3 {offsets = [0, 0, 0], sizes = [1, 4, 4], strides = [1, 1, 1]} : vector<9x4x4xbf16> to vector<1x4x4xbf16>
    %7 = vector.shape_cast %6 : vector<1x4x4xbf16> to vector<4x4xbf16>
    %cst_5 = arith.constant dense<0.000000e+00> : vector<80x4xf32>
    %8 = tpu.matmul %5, %7, %cst_5 {dimension_numbers = #tpu.dot_dimension_numbers<[1], [0], [0], [1], [0, 0, 1, 1], [], []>} : vector<80x4xbf16>, vector<4x4xbf16>, vector<80x4xf32> -> vector<80x4xf32>
    %9 = arith.addf %4, %8 : vector<80x4xf32>
    %10 = vector.extract_strided_slice %2 {offsets = [1, 0], sizes = [80, 4], strides = [1, 1]} : vector<108x4xbf16> to vector<80x4xbf16>
    %11 = vector.extract_strided_slice %3 {offsets = [1, 0, 0], sizes = [1, 4, 4], strides = [1, 1, 1]} : vector<9x4x4xbf16> to vector<1x4x4xbf16>
    %12 = vector.shape_cast %11 : vector<1x4x4xbf16> to vector<4x4xbf16>
    %cst_6 = arith.constant dense<0.000000e+00> : vector<80x4xf32>
    %13 = tpu.matmul %10, %12, %cst_6 {dimension_numbers = #tpu.dot_dimension_numbers<[1], [0], [0], [1], [0, 0, 1, 1], [], []>} : vector<80x4xbf16>, vector<4x4xbf16>, vector<80x4xf32> -> vector<80x4xf32>
    %14 = arith.addf %9, %13 : vector<80x4xf32>
    %15 = vector.extract_strided_slice %2 {offsets = [2, 0], sizes = [80, 4], strides = [1, 1]} : vector<108x4xbf16> to vector<80x4xbf16>
    %16 = vector.extract_strided_slice %3 {offsets = [2, 0, 0], sizes = [1, 4, 4], strides = [1, 1, 1]} : vector<9x4x4xbf16> to vector<1x4x4xbf16>
    %17 = vector.shape_cast %16 : vector<1x4x4xbf16> to vector<4x4xbf16>
    %cst_7 = arith.constant dense<0.000000e+00> : vector<80x4xf32>
    %18 = tpu.matmul %15, %17, %cst_7 {dimension_numbers = #tpu.dot_dimension_numbers<[1], [0], [0], [1], [0, 0, 1, 1], [], []>} : vector<80x4xbf16>, vector<4x4xbf16>, vector<80x4xf32> -> vector<80x4xf32>
    %19 = arith.addf %14, %18 : vector<80x4xf32>
    %20 = vector.extract_strided_slice %2 {offsets = [10, 0], sizes = [80, 4], strides = [1, 1]} : vector<108x4xbf16> to vector<80x4xbf16>
    %21 = vector.extract_strided_slice %3 {offsets = [3, 0, 0], sizes = [1, 4, 4], strides = [1, 1, 1]} : vector<9x4x4xbf16> to vector<1x4x4xbf16>
    %22 = vector.shape_cast %21 : vector<1x4x4xbf16> to vector<4x4xbf16>
    %cst_8 = arith.constant dense<0.000000e+00> : vector<80x4xf32>
    %23 = tpu.matmul %20, %22, %cst_8 {dimension_numbers = #tpu.dot_dimension_numbers<[1], [0], [0], [1], [0, 0, 1, 1], [], []>} : vector<80x4xbf16>, vector<4x4xbf16>, vector<80x4xf32> -> vector<80x4xf32>
    %24 = arith.addf %19, %23 : vector<80x4xf32>
    %25 = vector.extract_strided_slice %2 {offsets = [11, 0], sizes = [80, 4], strides = [1, 1]} : vector<108x4xbf16> to vector<80x4xbf16>
    %26 = vector.extract_strided_slice %3 {offsets = [4, 0, 0], sizes = [1, 4, 4], strides = [1, 1, 1]} : vector<9x4x4xbf16> to vector<1x4x4xbf16>
    %27 = vector.shape_cast %26 : vector<1x4x4xbf16> to vector<4x4xbf16>
    %cst_9 = arith.constant dense<0.000000e+00> : vector<80x4xf32>
    %28 = tpu.matmul %25, %27, %cst_9 {dimension_numbers = #tpu.dot_dimension_numbers<[1], [0], [0], [1], [0, 0, 1, 1], [], []>} : vector<80x4xbf16>, vector<4x4xbf16>, vector<80x4xf32> -> vector<80x4xf32>
    %29 = arith.addf %24, %28 : vector<80x4xf32>
    %30 = vector.extract_strided_slice %2 {offsets = [12, 0], sizes = [80, 4], strides = [1, 1]} : vector<108x4xbf16> to vector<80x4xbf16>
    %31 = vector.extract_strided_slice %3 {offsets = [5, 0, 0], sizes = [1, 4, 4], strides = [1, 1, 1]} : vector<9x4x4xbf16> to vector<1x4x4xbf16>
    %32 = vector.shape_cast %31 : vector<1x4x4xbf16> to vector<4x4xbf16>
    %cst_10 = arith.constant dense<0.000000e+00> : vector<80x4xf32>
    %33 = tpu.matmul %30, %32, %cst_10 {dimension_numbers = #tpu.dot_dimension_numbers<[1], [0], [0], [1], [0, 0, 1, 1], [], []>} : vector<80x4xbf16>, vector<4x4xbf16>, vector<80x4xf32> -> vector<80x4xf32>
    %34 = arith.addf %29, %33 : vector<80x4xf32>
    %35 = vector.extract_strided_slice %2 {offsets = [20, 0], sizes = [80, 4], strides = [1, 1]} : vector<108x4xbf16> to vector<80x4xbf16>
    %36 = vector.extract_strided_slice %3 {offsets = [6, 0, 0], sizes = [1, 4, 4], strides = [1, 1, 1]} : vector<9x4x4xbf16> to vector<1x4x4xbf16>
    %37 = vector.shape_cast %36 : vector<1x4x4xbf16> to vector<4x4xbf16>
    %cst_11 = arith.constant dense<0.000000e+00> : vector<80x4xf32>
    %38 = tpu.matmul %35, %37, %cst_11 {dimension_numbers = #tpu.dot_dimension_numbers<[1], [0], [0], [1], [0, 0, 1, 1], [], []>} : vector<80x4xbf16>, vector<4x4xbf16>, vector<80x4xf32> -> vector<80x4xf32>
    %39 = arith.addf %34, %38 : vector<80x4xf32>
    %40 = vector.extract_strided_slice %2 {offsets = [21, 0], sizes = [80, 4], strides = [1, 1]} : vector<108x4xbf16> to vector<80x4xbf16>
    %41 = vector.extract_strided_slice %3 {offsets = [7, 0, 0], sizes = [1, 4, 4], strides = [1, 1, 1]} : vector<9x4x4xbf16> to vector<1x4x4xbf16>
    %42 = vector.shape_cast %41 : vector<1x4x4xbf16> to vector<4x4xbf16>
    %cst_12 = arith.constant dense<0.000000e+00> : vector<80x4xf32>
    %43 = tpu.matmul %40, %42, %cst_12 {dimension_numbers = #tpu.dot_dimension_numbers<[1], [0], [0], [1], [0, 0, 1, 1], [], []>} : vector<80x4xbf16>, vector<4x4xbf16>, vector<80x4xf32> -> vector<80x4xf32>
    %44 = arith.addf %39, %43 : vector<80x4xf32>
    %45 = vector.extract_strided_slice %2 {offsets = [22, 0], sizes = [80, 4], strides = [1, 1]} : vector<108x4xbf16> to vector<80x4xbf16>
    %46 = vector.extract_strided_slice %3 {offsets = [8, 0, 0], sizes = [1, 4, 4], strides = [1, 1, 1]} : vector<9x4x4xbf16> to vector<1x4x4xbf16>
    %47 = vector.shape_cast %46 : vector<1x4x4xbf16> to vector<4x4xbf16>
    %cst_13 = arith.constant dense<0.000000e+00> : vector<80x4xf32>
    %48 = tpu.matmul %45, %47, %cst_13 {dimension_numbers = #tpu.dot_dimension_numbers<[1], [0], [0], [1], [0, 0, 1, 1], [], []>} : vector<80x4xbf16>, vector<4x4xbf16>, vector<80x4xf32> -> vector<80x4xf32>
    %49 = arith.addf %44, %48 : vector<80x4xf32>
    %c0_14 = arith.constant 0 : index
    %c0_15 = arith.constant 0 : index
    %50 = vector.load %arg3[%c0_14, %c0_15] : memref<1x4xf32, #tpu.memory_space<vmem>>, vector<1x4xf32>
    %51 = vector.broadcast %50 : vector<1x4xf32> to vector<80x4xf32>
    %52 = arith.addf %49, %51 : vector<80x4xf32>
    %c0_16 = arith.constant 0 : index
    %c0_17 = arith.constant 0 : index
    %c0_18 = arith.constant 0 : index
    %53 = vector.load %arg4[%c0_16, %c0_17, %c0_18] : memref<1x80x4xf32, #tpu.memory_space<vmem>>, vector<1x80x4xf32>
    %54 = vector.shape_cast %53 : vector<1x80x4xf32> to vector<80x4xf32>
    %55 = vector.shape_cast %52 : vector<80x4xf32> to vector<1x80x4xf32>
    tpu.vector_store %arg4[%c0_16, %c0_17, %c0_18], %55 {strides = array<i32>} : memref<1x80x4xf32, #tpu.memory_space<vmem>>, vector<1x80x4xf32>,
    return
  }
  func.func @transform_0(%arg0: i32) -> (i32, i32, i32) {
    %c0_i32 = arith.constant 0 : i32
    %c0_i32_0 = arith.constant 0 : i32
    %c0_i32_1 = arith.constant 0 : i32
    return %arg0, %c0_i32, %c0_i32_0 : i32, i32, i32
  }
  func.func @transform_1(%arg0: i32) -> (i32, i32, i32) {
    %c0_i32 = arith.constant 0 : i32
    %c0_i32_0 = arith.constant 0 : i32
    %c0_i32_1 = arith.constant 0 : i32
    %c0_i32_2 = arith.constant 0 : i32
    return %c0_i32, %c0_i32_0, %c0_i32_1 : i32, i32, i32
  }
  func.func @transform_2(%arg0: i32) -> (i32, i32) {
    %c0_i32 = arith.constant 0 : i32
    %c0_i32_0 = arith.constant 0 : i32
    %c0_i32_1 = arith.constant 0 : i32
    return %c0_i32, %c0_i32_0 : i32, i32
  }
  func.func @transform_3(%arg0: i32) -> (i32, i32, i32) {
    %c0_i32 = arith.constant 0 : i32
    %c0_i32_0 = arith.constant 0 : i32
    %c0_i32_1 = arith.constant 0 : i32
    return %arg0, %c0_i32, %c0_i32_0 : i32, i32, i32
  }
}

module attributes {stable_mosaic.version = 11 : i64} {
  func.func @_conv3x3_kernel(%arg0: i32, %arg1: memref<1x108x4xf32, #tpu.memory_space<vmem>>, %arg2: memref<9x4x4xbf16, #tpu.memory_space<vmem>>, %arg3: memref<1x4xf32, #tpu.memory_space<vmem>>, %arg4: memref<1x80x4xf32, #tpu.memory_space<vmem>>) attributes {dimension_semantics = [#tpu.dimension_semantics<parallel>], iteration_bounds = array<i64: 2>, scalar_prefetch = 0 : i64, scratch_operands = 0 : i64, tpu.core_type = #tpu.core_type<tc>, window_params = [{transform_indices = @transform_0, window_bounds = array<i64: 1, 108, 4>}, {pipeline_mode = #tpu.pipeline_mode<synchronous>, transform_indices = @transform_1, window_bounds = array<i64: 9, 4, 4>}, {pipeline_mode = #tpu.pipeline_mode<synchronous>, transform_indices = @transform_2, window_bounds = array<i64: 1, 4>}, {transform_indices = @transform_3, window_bounds = array<i64: 1, 80, 4>}]} {
    %c0 = arith.constant 0 : index
    %c0_0 = arith.constant 0 : index
    %c0_1 = arith.constant 0 : index
    %0 = vector.load %arg1[%c0, %c0_0, %c0_1] : memref<1x108x4xf32, #tpu.memory_space<vmem>>, vector<1x108x4xf32>
    %1 = vector.shape_cast %0 : vector<1x108x4xf32> to vector<108x4xf32>
    %2 = arith.truncf %1 : vector<108x4xf32> to vector<108x4xbf16>
    %c0_2 = arith.constant 0 : index
    %c0_3 = arith.constant 0 : index
    %c0_4 = arith.constant 0 : index
    %3 = vector.load %arg2[%c0_2, %c0_3, %c0_4] : memref<9x4x4xbf16, #tpu.memory_space<vmem>>, vector<9x4x4xbf16>
    %cst = arith.constant 0.000000e+00 : f32
    %4 = vector.broadcast %cst : f32 to vector<80x4xf32>
    %5 = vector.extract_strided_slice %2 {offsets = [0, 0], sizes = [80, 4], strides = [1, 1]} : vector<108x4xbf16> to vector<80x4xbf16>
    %6 = vector.extract_strided_slice %3 {offsets = [0, 0, 0], sizes = [1, 4, 4], strides = [1, 1, 1]} : vector<9x4x4xbf16> to vector<1x4x4xbf16>
    %7 = vector.shape_cast %6 : vector<1x4x4xbf16> to vector<4x4xbf16>
    %cst_5 = arith.constant dense<0.000000e+00> : vector<80x4xf32>
    %8 = tpu.matmul %5, %7, %cst_5 {dimension_numbers = #tpu.dot_dimension_numbers<[1], [0], [0], [1], [0, 0, 1, 1], [], []>} : vector<80x4xbf16>, vector<4x4xbf16>, vector<80x4xf32> -> vector<80x4xf32>
    %9 = arith.addf %4, %8 : vector<80x4xf32>
    %10 = vector.extract_strided_slice %2 {offsets = [1, 0], sizes = [80, 4], strides = [1, 1]} : vector<108x4xbf16> to vector<80x4xbf16>
    %11 = vector.extract_strided_slice %3 {offsets = [1, 0, 0], sizes = [1, 4, 4], strides = [1, 1, 1]} : vector<9x4x4xbf16> to vector<1x4x4xbf16>
    %12 = vector.shape_cast %11 : vector<1x4x4xbf16> to vector<4x4xbf16>
    %cst_6 = arith.constant dense<0.000000e+00> : vector<80x4xf32>
    %13 = tpu.matmul %10, %12, %cst_6 {dimension_numbers = #tpu.dot_dimension_numbers<[1], [0], [0], [1], [0, 0, 1, 1], [], []>} : vector<80x4xbf16>, vector<4x4xbf16>, vector<80x4xf32> -> vector<80x4xf32>
    %14 = arith.addf %9, %13 : vector<80x4xf32>
    %15 = vector.extract_strided_slice %2 {offsets = [2, 0], sizes = [80, 4], strides = [1, 1]} : vector<108x4xbf16> to vector<80x4xbf16>
    %16 = vector.extract_strided_slice %3 {offsets = [2, 0, 0], sizes = [1, 4, 4], strides = [1, 1, 1]} : vector<9x4x4xbf16> to vector<1x4x4xbf16>
    %17 = vector.shape_cast %16 : vector<1x4x4xbf16> to vector<4x4xbf16>
    %cst_7 = arith.constant dense<0.000000e+00> : vector<80x4xf32>
    %18 = tpu.matmul %15, %17, %cst_7 {dimension_numbers = #tpu.dot_dimension_numbers<[1], [0], [0], [1], [0, 0, 1, 1], [], []>} : vector<80x4xbf16>, vector<4x4xbf16>, vector<80x4xf32> -> vector<80x4xf32>
    %19 = arith.addf %14, %18 : vector<80x4xf32>
    %20 = vector.extract_strided_slice %2 {offsets = [10, 0], sizes = [80, 4], strides = [1, 1]} : vector<108x4xbf16> to vector<80x4xbf16>
    %21 = vector.extract_strided_slice %3 {offsets = [3, 0, 0], sizes = [1, 4, 4], strides = [1, 1, 1]} : vector<9x4x4xbf16> to vector<1x4x4xbf16>
    %22 = vector.shape_cast %21 : vector<1x4x4xbf16> to vector<4x4xbf16>
    %cst_8 = arith.constant dense<0.000000e+00> : vector<80x4xf32>
    %23 = tpu.matmul %20, %22, %cst_8 {dimension_numbers = #tpu.dot_dimension_numbers<[1], [0], [0], [1], [0, 0, 1, 1], [], []>} : vector<80x4xbf16>, vector<4x4xbf16>, vector<80x4xf32> -> vector<80x4xf32>
    %24 = arith.addf %19, %23 : vector<80x4xf32>
    %25 = vector.extract_strided_slice %2 {offsets = [11, 0], sizes = [80, 4], strides = [1, 1]} : vector<108x4xbf16> to vector<80x4xbf16>
    %26 = vector.extract_strided_slice %3 {offsets = [4, 0, 0], sizes = [1, 4, 4], strides = [1, 1, 1]} : vector<9x4x4xbf16> to vector<1x4x4xbf16>
    %27 = vector.shape_cast %26 : vector<1x4x4xbf16> to vector<4x4xbf16>
    %cst_9 = arith.constant dense<0.000000e+00> : vector<80x4xf32>
    %28 = tpu.matmul %25, %27, %cst_9 {dimension_numbers = #tpu.dot_dimension_numbers<[1], [0], [0], [1], [0, 0, 1, 1], [], []>} : vector<80x4xbf16>, vector<4x4xbf16>, vector<80x4xf32> -> vector<80x4xf32>
    %29 = arith.addf %24, %28 : vector<80x4xf32>
    %30 = vector.extract_strided_slice %2 {offsets = [12, 0], sizes = [80, 4], strides = [1, 1]} : vector<108x4xbf16> to vector<80x4xbf16>
    %31 = vector.extract_strided_slice %3 {offsets = [5, 0, 0], sizes = [1, 4, 4], strides = [1, 1, 1]} : vector<9x4x4xbf16> to vector<1x4x4xbf16>
    %32 = vector.shape_cast %31 : vector<1x4x4xbf16> to vector<4x4xbf16>
    %cst_10 = arith.constant dense<0.000000e+00> : vector<80x4xf32>
    %33 = tpu.matmul %30, %32, %cst_10 {dimension_numbers = #tpu.dot_dimension_numbers<[1], [0], [0], [1], [0, 0, 1, 1], [], []>} : vector<80x4xbf16>, vector<4x4xbf16>, vector<80x4xf32> -> vector<80x4xf32>
    %34 = arith.addf %29, %33 : vector<80x4xf32>
    %35 = vector.extract_strided_slice %2 {offsets = [20, 0], sizes = [80, 4], strides = [1, 1]} : vector<108x4xbf16> to vector<80x4xbf16>
    %36 = vector.extract_strided_slice %3 {offsets = [6, 0, 0], sizes = [1, 4, 4], strides = [1, 1, 1]} : vector<9x4x4xbf16> to vector<1x4x4xbf16>
    %37 = vector.shape_cast %36 : vector<1x4x4xbf16> to vector<4x4xbf16>
    %cst_11 = arith.constant dense<0.000000e+00> : vector<80x4xf32>
    %38 = tpu.matmul %35, %37, %cst_11 {dimension_numbers = #tpu.dot_dimension_numbers<[1], [0], [0], [1], [0, 0, 1, 1], [], []>} : vector<80x4xbf16>, vector<4x4xbf16>, vector<80x4xf32> -> vector<80x4xf32>
    %39 = arith.addf %34, %38 : vector<80x4xf32>
    %40 = vector.extract_strided_slice %2 {offsets = [21, 0], sizes = [80, 4], strides = [1, 1]} : vector<108x4xbf16> to vector<80x4xbf16>
    %41 = vector.extract_strided_slice %3 {offsets = [7, 0, 0], sizes = [1, 4, 4], strides = [1, 1, 1]} : vector<9x4x4xbf16> to vector<1x4x4xbf16>
    %42 = vector.shape_cast %41 : vector<1x4x4xbf16> to vector<4x4xbf16>
    %cst_12 = arith.constant dense<0.000000e+00> : vector<80x4xf32>
    %43 = tpu.matmul %40, %42, %cst_12 {dimension_numbers = #tpu.dot_dimension_numbers<[1], [0], [0], [1], [0, 0, 1, 1], [], []>} : vector<80x4xbf16>, vector<4x4xbf16>, vector<80x4xf32> -> vector<80x4xf32>
    %44 = arith.addf %39, %43 : vector<80x4xf32>
    %45 = vector.extract_strided_slice %2 {offsets = [22, 0], sizes = [80, 4], strides = [1, 1]} : vector<108x4xbf16> to vector<80x4xbf16>
    %46 = vector.extract_strided_slice %3 {offsets = [8, 0, 0], sizes = [1, 4, 4], strides = [1, 1, 1]} : vector<9x4x4xbf16> to vector<1x4x4xbf16>
    %47 = vector.shape_cast %46 : vector<1x4x4xbf16> to vector<4x4xbf16>
    %cst_13 = arith.constant dense<0.000000e+00> : vector<80x4xf32>
    %48 = tpu.matmul %45, %47, %cst_13 {dimension_numbers = #tpu.dot_dimension_numbers<[1], [0], [0], [1], [0, 0, 1, 1], [], []>} : vector<80x4xbf16>, vector<4x4xbf16>, vector<80x4xf32> -> vector<80x4xf32>
    %49 = arith.addf %44, %48 : vector<80x4xf32>
    %c0_14 = arith.constant 0 : index
    %c0_15 = arith.constant 0 : index
    %50 = vector.load %arg3[%c0_14, %c0_15] : memref<1x4xf32, #tpu.memory_space<vmem>>, vector<1x4xf32>
    %51 = vector.broadcast %50 : vector<1x4xf32> to vector<80x4xf32>
    %52 = arith.addf %49, %51 : vector<80x4xf32>
    %cst_16 = arith.constant 0.000000e+00 : f32
    %53 = vector.broadcast %cst_16 : f32 to vector<80x4xf32>
    %54 = arith.cmpf ogt, %52, %53 : vector<80x4xf32>
    %cst_17 = arith.constant 0.00999999977 : f32
    %55 = vector.broadcast %cst_17 : f32 to vector<80x4xf32>
    %56 = arith.mulf %55, %52 : vector<80x4xf32>
    %57 = arith.select %54, %52, %56 : vector<80x4xi1>, vector<80x4xf32>
    %c0_18 = arith.constant 0 : index
    %c0_19 = arith.constant 0 : index
    %c0_20 = arith.constant 0 : index
    %58 = vector.load %arg4[%c0_18, %c0_19, %c0_20] : memref<1x80x4xf32, #tpu.memory_space<vmem>>, vector<1x80x4xf32>
    %59 = vector.shape_cast %58 : vector<1x80x4xf32> to vector<80x4xf32>
    %60 = vector.shape_cast %57 : vector<80x4xf32> to vector<1x80x4xf32>
    tpu.vector_store %arg4[%c0_18, %c0_19, %c0_20], %60 {strides = array<i32>} : memref<1x80x4xf32, #tpu.memory_space<vmem>>, vector<1x80x4xf32>,
    return
  }
  func.func @transform_0(%arg0: i32) -> (i32, i32, i32) {
    %c0_i32 = arith.constant 0 : i32
    %c0_i32_0 = arith.constant 0 : i32
    %c0_i32_1 = arith.constant 0 : i32
    return %arg0, %c0_i32, %c0_i32_0 : i32, i32, i32
  }
  func.func @transform_1(%arg0: i32) -> (i32, i32, i32) {
    %c0_i32 = arith.constant 0 : i32
    %c0_i32_0 = arith.constant 0 : i32
    %c0_i32_1 = arith.constant 0 : i32
    %c0_i32_2 = arith.constant 0 : i32
    return %c0_i32, %c0_i32_0, %c0_i32_1 : i32, i32, i32
  }
  func.func @transform_2(%arg0: i32) -> (i32, i32) {
    %c0_i32 = arith.constant 0 : i32
    %c0_i32_0 = arith.constant 0 : i32
    %c0_i32_1 = arith.constant 0 : i32
    return %c0_i32, %c0_i32_0 : i32, i32
  }
  func.func @transform_3(%arg0: i32) -> (i32, i32, i32) {
    %c0_i32 = arith.constant 0 : i32
    %c0_i32_0 = arith.constant 0 : i32
    %c0_i32_1 = arith.constant 0 : i32
    return %arg0, %c0_i32, %c0_i32_0 : i32, i32, i32
  }
}

module attributes {stable_mosaic.version = 11 : i64} {
  func.func @_resblock_kernel(%arg0: i32, %arg1: memref<1x108x4xf32, #tpu.memory_space<vmem>>, %arg2: memref<9x4x32xbf16, #tpu.memory_space<vmem>>, %arg3: memref<1x32xf32, #tpu.memory_space<vmem>>, %arg4: memref<32x4xbf16, #tpu.memory_space<vmem>>, %arg5: memref<1x4xf32, #tpu.memory_space<vmem>>, %arg6: memref<1x80x4xf32, #tpu.memory_space<vmem>>) attributes {dimension_semantics = [#tpu.dimension_semantics<parallel>], iteration_bounds = array<i64: 2>, scalar_prefetch = 0 : i64, scratch_operands = 0 : i64, tpu.core_type = #tpu.core_type<tc>, window_params = [{transform_indices = @transform_0, window_bounds = array<i64: 1, 108, 4>}, {pipeline_mode = #tpu.pipeline_mode<synchronous>, transform_indices = @transform_1, window_bounds = array<i64: 9, 4, 32>}, {pipeline_mode = #tpu.pipeline_mode<synchronous>, transform_indices = @transform_2, window_bounds = array<i64: 1, 32>}, {pipeline_mode = #tpu.pipeline_mode<synchronous>, transform_indices = @transform_3, window_bounds = array<i64: 32, 4>}, {pipeline_mode = #tpu.pipeline_mode<synchronous>, transform_indices = @transform_4, window_bounds = array<i64: 1, 4>}, {transform_indices = @transform_5, window_bounds = array<i64: 1, 80, 4>}]} {
    %c0 = arith.constant 0 : index
    %c0_0 = arith.constant 0 : index
    %c0_1 = arith.constant 0 : index
    %0 = vector.load %arg1[%c0, %c0_0, %c0_1] : memref<1x108x4xf32, #tpu.memory_space<vmem>>, vector<1x108x4xf32>
    %1 = vector.shape_cast %0 : vector<1x108x4xf32> to vector<108x4xf32>
    %cst = arith.constant 0.000000e+00 : f32
    %2 = vector.broadcast %cst : f32 to vector<108x4xf32>
    %3 = arith.cmpf ogt, %1, %2 : vector<108x4xf32>
    %cst_2 = arith.constant 0.00999999977 : f32
    %4 = vector.broadcast %cst_2 : f32 to vector<108x4xf32>
    %5 = arith.mulf %4, %1 : vector<108x4xf32>
    %6 = arith.select %3, %1, %5 : vector<108x4xi1>, vector<108x4xf32>
    %7 = arith.truncf %6 : vector<108x4xf32> to vector<108x4xbf16>
    %c0_3 = arith.constant 0 : index
    %c0_4 = arith.constant 0 : index
    %c0_5 = arith.constant 0 : index
    %8 = vector.load %arg2[%c0_3, %c0_4, %c0_5] : memref<9x4x32xbf16, #tpu.memory_space<vmem>>, vector<9x4x32xbf16>
    %cst_6 = arith.constant 0.000000e+00 : f32
    %9 = vector.broadcast %cst_6 : f32 to vector<80x32xf32>
    %10 = vector.extract_strided_slice %7 {offsets = [0, 0], sizes = [80, 4], strides = [1, 1]} : vector<108x4xbf16> to vector<80x4xbf16>
    %11 = vector.extract_strided_slice %8 {offsets = [0, 0, 0], sizes = [1, 4, 32], strides = [1, 1, 1]} : vector<9x4x32xbf16> to vector<1x4x32xbf16>
    %12 = vector.shape_cast %11 : vector<1x4x32xbf16> to vector<4x32xbf16>
    %cst_7 = arith.constant dense<0.000000e+00> : vector<80x32xf32>
    %13 = tpu.matmul %10, %12, %cst_7 {dimension_numbers = #tpu.dot_dimension_numbers<[1], [0], [0], [1], [0, 0, 1, 1], [], []>} : vector<80x4xbf16>, vector<4x32xbf16>, vector<80x32xf32> -> vector<80x32xf32>
    %14 = arith.addf %9, %13 : vector<80x32xf32>
    %15 = vector.extract_strided_slice %7 {offsets = [1, 0], sizes = [80, 4], strides = [1, 1]} : vector<108x4xbf16> to vector<80x4xbf16>
    %16 = vector.extract_strided_slice %8 {offsets = [1, 0, 0], sizes = [1, 4, 32], strides = [1, 1, 1]} : vector<9x4x32xbf16> to vector<1x4x32xbf16>
    %17 = vector.shape_cast %16 : vector<1x4x32xbf16> to vector<4x32xbf16>
    %cst_8 = arith.constant dense<0.000000e+00> : vector<80x32xf32>
    %18 = tpu.matmul %15, %17, %cst_8 {dimension_numbers = #tpu.dot_dimension_numbers<[1], [0], [0], [1], [0, 0, 1, 1], [], []>} : vector<80x4xbf16>, vector<4x32xbf16>, vector<80x32xf32> -> vector<80x32xf32>
    %19 = arith.addf %14, %18 : vector<80x32xf32>
    %20 = vector.extract_strided_slice %7 {offsets = [2, 0], sizes = [80, 4], strides = [1, 1]} : vector<108x4xbf16> to vector<80x4xbf16>
    %21 = vector.extract_strided_slice %8 {offsets = [2, 0, 0], sizes = [1, 4, 32], strides = [1, 1, 1]} : vector<9x4x32xbf16> to vector<1x4x32xbf16>
    %22 = vector.shape_cast %21 : vector<1x4x32xbf16> to vector<4x32xbf16>
    %cst_9 = arith.constant dense<0.000000e+00> : vector<80x32xf32>
    %23 = tpu.matmul %20, %22, %cst_9 {dimension_numbers = #tpu.dot_dimension_numbers<[1], [0], [0], [1], [0, 0, 1, 1], [], []>} : vector<80x4xbf16>, vector<4x32xbf16>, vector<80x32xf32> -> vector<80x32xf32>
    %24 = arith.addf %19, %23 : vector<80x32xf32>
    %25 = vector.extract_strided_slice %7 {offsets = [10, 0], sizes = [80, 4], strides = [1, 1]} : vector<108x4xbf16> to vector<80x4xbf16>
    %26 = vector.extract_strided_slice %8 {offsets = [3, 0, 0], sizes = [1, 4, 32], strides = [1, 1, 1]} : vector<9x4x32xbf16> to vector<1x4x32xbf16>
    %27 = vector.shape_cast %26 : vector<1x4x32xbf16> to vector<4x32xbf16>
    %cst_10 = arith.constant dense<0.000000e+00> : vector<80x32xf32>
    %28 = tpu.matmul %25, %27, %cst_10 {dimension_numbers = #tpu.dot_dimension_numbers<[1], [0], [0], [1], [0, 0, 1, 1], [], []>} : vector<80x4xbf16>, vector<4x32xbf16>, vector<80x32xf32> -> vector<80x32xf32>
    %29 = arith.addf %24, %28 : vector<80x32xf32>
    %30 = vector.extract_strided_slice %7 {offsets = [11, 0], sizes = [80, 4], strides = [1, 1]} : vector<108x4xbf16> to vector<80x4xbf16>
    %31 = vector.extract_strided_slice %8 {offsets = [4, 0, 0], sizes = [1, 4, 32], strides = [1, 1, 1]} : vector<9x4x32xbf16> to vector<1x4x32xbf16>
    %32 = vector.shape_cast %31 : vector<1x4x32xbf16> to vector<4x32xbf16>
    %cst_11 = arith.constant dense<0.000000e+00> : vector<80x32xf32>
    %33 = tpu.matmul %30, %32, %cst_11 {dimension_numbers = #tpu.dot_dimension_numbers<[1], [0], [0], [1], [0, 0, 1, 1], [], []>} : vector<80x4xbf16>, vector<4x32xbf16>, vector<80x32xf32> -> vector<80x32xf32>
    %34 = arith.addf %29, %33 : vector<80x32xf32>
    %35 = vector.extract_strided_slice %7 {offsets = [12, 0], sizes = [80, 4], strides = [1, 1]} : vector<108x4xbf16> to vector<80x4xbf16>
    %36 = vector.extract_strided_slice %8 {offsets = [5, 0, 0], sizes = [1, 4, 32], strides = [1, 1, 1]} : vector<9x4x32xbf16> to vector<1x4x32xbf16>
    %37 = vector.shape_cast %36 : vector<1x4x32xbf16> to vector<4x32xbf16>
    %cst_12 = arith.constant dense<0.000000e+00> : vector<80x32xf32>
    %38 = tpu.matmul %35, %37, %cst_12 {dimension_numbers = #tpu.dot_dimension_numbers<[1], [0], [0], [1], [0, 0, 1, 1], [], []>} : vector<80x4xbf16>, vector<4x32xbf16>, vector<80x32xf32> -> vector<80x32xf32>
    %39 = arith.addf %34, %38 : vector<80x32xf32>
    %40 = vector.extract_strided_slice %7 {offsets = [20, 0], sizes = [80, 4], strides = [1, 1]} : vector<108x4xbf16> to vector<80x4xbf16>
    %41 = vector.extract_strided_slice %8 {offsets = [6, 0, 0], sizes = [1, 4, 32], strides = [1, 1, 1]} : vector<9x4x32xbf16> to vector<1x4x32xbf16>
    %42 = vector.shape_cast %41 : vector<1x4x32xbf16> to vector<4x32xbf16>
    %cst_13 = arith.constant dense<0.000000e+00> : vector<80x32xf32>
    %43 = tpu.matmul %40, %42, %cst_13 {dimension_numbers = #tpu.dot_dimension_numbers<[1], [0], [0], [1], [0, 0, 1, 1], [], []>} : vector<80x4xbf16>, vector<4x32xbf16>, vector<80x32xf32> -> vector<80x32xf32>
    %44 = arith.addf %39, %43 : vector<80x32xf32>
    %45 = vector.extract_strided_slice %7 {offsets = [21, 0], sizes = [80, 4], strides = [1, 1]} : vector<108x4xbf16> to vector<80x4xbf16>
    %46 = vector.extract_strided_slice %8 {offsets = [7, 0, 0], sizes = [1, 4, 32], strides = [1, 1, 1]} : vector<9x4x32xbf16> to vector<1x4x32xbf16>
    %47 = vector.shape_cast %46 : vector<1x4x32xbf16> to vector<4x32xbf16>
    %cst_14 = arith.constant dense<0.000000e+00> : vector<80x32xf32>
    %48 = tpu.matmul %45, %47, %cst_14 {dimension_numbers = #tpu.dot_dimension_numbers<[1], [0], [0], [1], [0, 0, 1, 1], [], []>} : vector<80x4xbf16>, vector<4x32xbf16>, vector<80x32xf32> -> vector<80x32xf32>
    %49 = arith.addf %44, %48 : vector<80x32xf32>
    %50 = vector.extract_strided_slice %7 {offsets = [22, 0], sizes = [80, 4], strides = [1, 1]} : vector<108x4xbf16> to vector<80x4xbf16>
    %51 = vector.extract_strided_slice %8 {offsets = [8, 0, 0], sizes = [1, 4, 32], strides = [1, 1, 1]} : vector<9x4x32xbf16> to vector<1x4x32xbf16>
    %52 = vector.shape_cast %51 : vector<1x4x32xbf16> to vector<4x32xbf16>
    %cst_15 = arith.constant dense<0.000000e+00> : vector<80x32xf32>
    %53 = tpu.matmul %50, %52, %cst_15 {dimension_numbers = #tpu.dot_dimension_numbers<[1], [0], [0], [1], [0, 0, 1, 1], [], []>} : vector<80x4xbf16>, vector<4x32xbf16>, vector<80x32xf32> -> vector<80x32xf32>
    %54 = arith.addf %49, %53 : vector<80x32xf32>
    %c0_16 = arith.constant 0 : index
    %c0_17 = arith.constant 0 : index
    %55 = vector.load %arg3[%c0_16, %c0_17] : memref<1x32xf32, #tpu.memory_space<vmem>>, vector<1x32xf32>
    %56 = vector.broadcast %55 : vector<1x32xf32> to vector<80x32xf32>
    %57 = arith.addf %54, %56 : vector<80x32xf32>
    %cst_18 = arith.constant 0.000000e+00 : f32
    %58 = vector.broadcast %cst_18 : f32 to vector<80x32xf32>
    %59 = arith.cmpf ogt, %57, %58 : vector<80x32xf32>
    %cst_19 = arith.constant 0.00999999977 : f32
    %60 = vector.broadcast %cst_19 : f32 to vector<80x32xf32>
    %61 = arith.mulf %60, %57 : vector<80x32xf32>
    %62 = arith.select %59, %57, %61 : vector<80x32xi1>, vector<80x32xf32>
    %63 = arith.truncf %62 : vector<80x32xf32> to vector<80x32xbf16>
    %c0_20 = arith.constant 0 : index
    %c0_21 = arith.constant 0 : index
    %64 = vector.load %arg4[%c0_20, %c0_21] : memref<32x4xbf16, #tpu.memory_space<vmem>>, vector<32x4xbf16>
    %cst_22 = arith.constant dense<0.000000e+00> : vector<80x4xf32>
    %65 = tpu.matmul %63, %64, %cst_22 {dimension_numbers = #tpu.dot_dimension_numbers<[1], [0], [0], [1], [0, 0, 1, 1], [], []>} : vector<80x32xbf16>, vector<32x4xbf16>, vector<80x4xf32> -> vector<80x4xf32>
    %c0_23 = arith.constant 0 : index
    %c0_24 = arith.constant 0 : index
    %66 = vector.load %arg5[%c0_23, %c0_24] : memref<1x4xf32, #tpu.memory_space<vmem>>, vector<1x4xf32>
    %67 = vector.broadcast %66 : vector<1x4xf32> to vector<80x4xf32>
    %68 = arith.addf %65, %67 : vector<80x4xf32>
    %69 = vector.extract_strided_slice %1 {offsets = [11, 0], sizes = [80, 4], strides = [1, 1]} : vector<108x4xf32> to vector<80x4xf32>
    %70 = arith.addf %68, %69 : vector<80x4xf32>
    %c0_25 = arith.constant 0 : index
    %c0_26 = arith.constant 0 : index
    %c0_27 = arith.constant 0 : index
    %71 = vector.load %arg6[%c0_25, %c0_26, %c0_27] : memref<1x80x4xf32, #tpu.memory_space<vmem>>, vector<1x80x4xf32>
    %72 = vector.shape_cast %71 : vector<1x80x4xf32> to vector<80x4xf32>
    %73 = vector.shape_cast %70 : vector<80x4xf32> to vector<1x80x4xf32>
    tpu.vector_store %arg6[%c0_25, %c0_26, %c0_27], %73 {strides = array<i32>} : memref<1x80x4xf32, #tpu.memory_space<vmem>>, vector<1x80x4xf32>,
    return
  }
  func.func @transform_0(%arg0: i32) -> (i32, i32, i32) {
    %c0_i32 = arith.constant 0 : i32
    %c0_i32_0 = arith.constant 0 : i32
    %c0_i32_1 = arith.constant 0 : i32
    return %arg0, %c0_i32, %c0_i32_0 : i32, i32, i32
  }
  func.func @transform_1(%arg0: i32) -> (i32, i32, i32) {
    %c0_i32 = arith.constant 0 : i32
    %c0_i32_0 = arith.constant 0 : i32
    %c0_i32_1 = arith.constant 0 : i32
    %c0_i32_2 = arith.constant 0 : i32
    return %c0_i32, %c0_i32_0, %c0_i32_1 : i32, i32, i32
  }
  func.func @transform_2(%arg0: i32) -> (i32, i32) {
    %c0_i32 = arith.constant 0 : i32
    %c0_i32_0 = arith.constant 0 : i32
    %c0_i32_1 = arith.constant 0 : i32
    return %c0_i32, %c0_i32_0 : i32, i32
  }
  func.func @transform_3(%arg0: i32) -> (i32, i32) {
    %c0_i32 = arith.constant 0 : i32
    %c0_i32_0 = arith.constant 0 : i32
    %c0_i32_1 = arith.constant 0 : i32
    return %c0_i32, %c0_i32_0 : i32, i32
  }
  func.func @transform_4(%arg0: i32) -> (i32, i32) {
    %c0_i32 = arith.constant 0 : i32
    %c0_i32_0 = arith.constant 0 : i32
    %c0_i32_1 = arith.constant 0 : i32
    return %c0_i32, %c0_i32_0 : i32, i32
  }
  func.func @transform_5(%arg0: i32) -> (i32, i32, i32) {
    %c0_i32 = arith.constant 0 : i32
    %c0_i32_0 = arith.constant 0 : i32
    %c0_i32_1 = arith.constant 0 : i32
    return %arg0, %c0_i32, %c0_i32_0 : i32, i32, i32
  }
}

module attributes {stable_mosaic.version = 11 : i64} {
  func.func @_matmul_kernel(%arg0: i32, %arg1: memref<32x64xbf16, #tpu.memory_space<vmem>>, %arg2: memref<64x8xbf16, #tpu.memory_space<vmem>>, %arg3: memref<1x8xf32, #tpu.memory_space<vmem>>, %arg4: memref<32x8xf32, #tpu.memory_space<vmem>>) attributes {dimension_semantics = [#tpu.dimension_semantics<parallel>], iteration_bounds = array<i64: 1>, scalar_prefetch = 0 : i64, scratch_operands = 0 : i64, tpu.core_type = #tpu.core_type<tc>, window_params = [{transform_indices = @transform_0, window_bounds = array<i64: 32, 64>}, {pipeline_mode = #tpu.pipeline_mode<synchronous>, transform_indices = @transform_1, window_bounds = array<i64: 64, 8>}, {pipeline_mode = #tpu.pipeline_mode<synchronous>, transform_indices = @transform_2, window_bounds = array<i64: 1, 8>}, {transform_indices = @transform_3, window_bounds = array<i64: 32, 8>}]} {
    %c0 = arith.constant 0 : index
    %c0_0 = arith.constant 0 : index
    %0 = vector.load %arg1[%c0, %c0_0] : memref<32x64xbf16, #tpu.memory_space<vmem>>, vector<32x64xbf16>
    %c0_1 = arith.constant 0 : index
    %c0_2 = arith.constant 0 : index
    %1 = vector.load %arg2[%c0_1, %c0_2] : memref<64x8xbf16, #tpu.memory_space<vmem>>, vector<64x8xbf16>
    %cst = arith.constant dense<0.000000e+00> : vector<32x8xf32>
    %2 = tpu.matmul %0, %1, %cst {dimension_numbers = #tpu.dot_dimension_numbers<[1], [0], [0], [1], [0, 0, 1, 1], [], []>} : vector<32x64xbf16>, vector<64x8xbf16>, vector<32x8xf32> -> vector<32x8xf32>
    %c0_3 = arith.constant 0 : index
    %c0_4 = arith.constant 0 : index
    %3 = vector.load %arg3[%c0_3, %c0_4] : memref<1x8xf32, #tpu.memory_space<vmem>>, vector<1x8xf32>
    %4 = vector.broadcast %3 : vector<1x8xf32> to vector<32x8xf32>
    %5 = arith.addf %2, %4 : vector<32x8xf32>
    %cst_5 = arith.constant 0.000000e+00 : f32
    %6 = vector.broadcast %cst_5 : f32 to vector<32x8xf32>
    %7 = arith.cmpf ogt, %5, %6 : vector<32x8xf32>
    %cst_6 = arith.constant 0.00999999977 : f32
    %8 = vector.broadcast %cst_6 : f32 to vector<32x8xf32>
    %9 = arith.mulf %8, %5 : vector<32x8xf32>
    %10 = arith.select %7, %5, %9 : vector<32x8xi1>, vector<32x8xf32>
    %c0_7 = arith.constant 0 : index
    %c0_8 = arith.constant 0 : index
    %11 = vector.load %arg4[%c0_7, %c0_8] : memref<32x8xf32, #tpu.memory_space<vmem>>, vector<32x8xf32>
    tpu.vector_store %arg4[%c0_7, %c0_8], %10 {strides = array<i32>} : memref<32x8xf32, #tpu.memory_space<vmem>>, vector<32x8xf32>,
    return
  }
  func.func @transform_0(%arg0: i32) -> (i32, i32) {
    %c0_i32 = arith.constant 0 : i32
    %c0_i32_0 = arith.constant 0 : i32
    return %arg0, %c0_i32 : i32, i32
  }
  func.func @transform_1(%arg0: i32) -> (i32, i32) {
    %c0_i32 = arith.constant 0 : i32
    %c0_i32_0 = arith.constant 0 : i32
    %c0_i32_1 = arith.constant 0 : i32
    return %c0_i32, %c0_i32_0 : i32, i32
  }
  func.func @transform_2(%arg0: i32) -> (i32, i32) {
    %c0_i32 = arith.constant 0 : i32
    %c0_i32_0 = arith.constant 0 : i32
    %c0_i32_1 = arith.constant 0 : i32
    return %c0_i32, %c0_i32_0 : i32, i32
  }
  func.func @transform_3(%arg0: i32) -> (i32, i32) {
    %c0_i32 = arith.constant 0 : i32
    %c0_i32_0 = arith.constant 0 : i32
    return %arg0, %c0_i32 : i32, i32
  }
}

module attributes {stable_mosaic.version = 11 : i64} {
  func.func @_resblock_kernel(%arg0: i32, %arg1: memref<1x44x8xf32, #tpu.memory_space<vmem>>, %arg2: memref<9x8x32xbf16, #tpu.memory_space<vmem>>, %arg3: memref<1x32xf32, #tpu.memory_space<vmem>>, %arg4: memref<32x8xbf16, #tpu.memory_space<vmem>>, %arg5: memref<1x8xf32, #tpu.memory_space<vmem>>, %arg6: memref<1x24x8xf32, #tpu.memory_space<vmem>>) attributes {dimension_semantics = [#tpu.dimension_semantics<parallel>], iteration_bounds = array<i64: 2>, scalar_prefetch = 0 : i64, scratch_operands = 0 : i64, tpu.core_type = #tpu.core_type<tc>, window_params = [{transform_indices = @transform_0, window_bounds = array<i64: 1, 44, 8>}, {pipeline_mode = #tpu.pipeline_mode<synchronous>, transform_indices = @transform_1, window_bounds = array<i64: 9, 8, 32>}, {pipeline_mode = #tpu.pipeline_mode<synchronous>, transform_indices = @transform_2, window_bounds = array<i64: 1, 32>}, {pipeline_mode = #tpu.pipeline_mode<synchronous>, transform_indices = @transform_3, window_bounds = array<i64: 32, 8>}, {pipeline_mode = #tpu.pipeline_mode<synchronous>, transform_indices = @transform_4, window_bounds = array<i64: 1, 8>}, {transform_indices = @transform_5, window_bounds = array<i64: 1, 24, 8>}]} {
    %c0 = arith.constant 0 : index
    %c0_0 = arith.constant 0 : index
    %c0_1 = arith.constant 0 : index
    %0 = vector.load %arg1[%c0, %c0_0, %c0_1] : memref<1x44x8xf32, #tpu.memory_space<vmem>>, vector<1x44x8xf32>
    %1 = vector.shape_cast %0 : vector<1x44x8xf32> to vector<44x8xf32>
    %cst = arith.constant 0.000000e+00 : f32
    %2 = vector.broadcast %cst : f32 to vector<44x8xf32>
    %3 = arith.cmpf ogt, %1, %2 : vector<44x8xf32>
    %cst_2 = arith.constant 0.00999999977 : f32
    %4 = vector.broadcast %cst_2 : f32 to vector<44x8xf32>
    %5 = arith.mulf %4, %1 : vector<44x8xf32>
    %6 = arith.select %3, %1, %5 : vector<44x8xi1>, vector<44x8xf32>
    %7 = arith.truncf %6 : vector<44x8xf32> to vector<44x8xbf16>
    %c0_3 = arith.constant 0 : index
    %c0_4 = arith.constant 0 : index
    %c0_5 = arith.constant 0 : index
    %8 = vector.load %arg2[%c0_3, %c0_4, %c0_5] : memref<9x8x32xbf16, #tpu.memory_space<vmem>>, vector<9x8x32xbf16>
    %cst_6 = arith.constant 0.000000e+00 : f32
    %9 = vector.broadcast %cst_6 : f32 to vector<24x32xf32>
    %10 = vector.extract_strided_slice %7 {offsets = [0, 0], sizes = [24, 8], strides = [1, 1]} : vector<44x8xbf16> to vector<24x8xbf16>
    %11 = vector.extract_strided_slice %8 {offsets = [0, 0, 0], sizes = [1, 8, 32], strides = [1, 1, 1]} : vector<9x8x32xbf16> to vector<1x8x32xbf16>
    %12 = vector.shape_cast %11 : vector<1x8x32xbf16> to vector<8x32xbf16>
    %cst_7 = arith.constant dense<0.000000e+00> : vector<24x32xf32>
    %13 = tpu.matmul %10, %12, %cst_7 {dimension_numbers = #tpu.dot_dimension_numbers<[1], [0], [0], [1], [0, 0, 1, 1], [], []>} : vector<24x8xbf16>, vector<8x32xbf16>, vector<24x32xf32> -> vector<24x32xf32>
    %14 = arith.addf %9, %13 : vector<24x32xf32>
    %15 = vector.extract_strided_slice %7 {offsets = [1, 0], sizes = [24, 8], strides = [1, 1]} : vector<44x8xbf16> to vector<24x8xbf16>
    %16 = vector.extract_strided_slice %8 {offsets = [1, 0, 0], sizes = [1, 8, 32], strides = [1, 1, 1]} : vector<9x8x32xbf16> to vector<1x8x32xbf16>
    %17 = vector.shape_cast %16 : vector<1x8x32xbf16> to vector<8x32xbf16>
    %cst_8 = arith.constant dense<0.000000e+00> : vector<24x32xf32>
    %18 = tpu.matmul %15, %17, %cst_8 {dimension_numbers = #tpu.dot_dimension_numbers<[1], [0], [0], [1], [0, 0, 1, 1], [], []>} : vector<24x8xbf16>, vector<8x32xbf16>, vector<24x32xf32> -> vector<24x32xf32>
    %19 = arith.addf %14, %18 : vector<24x32xf32>
    %20 = vector.extract_strided_slice %7 {offsets = [2, 0], sizes = [24, 8], strides = [1, 1]} : vector<44x8xbf16> to vector<24x8xbf16>
    %21 = vector.extract_strided_slice %8 {offsets = [2, 0, 0], sizes = [1, 8, 32], strides = [1, 1, 1]} : vector<9x8x32xbf16> to vector<1x8x32xbf16>
    %22 = vector.shape_cast %21 : vector<1x8x32xbf16> to vector<8x32xbf16>
    %cst_9 = arith.constant dense<0.000000e+00> : vector<24x32xf32>
    %23 = tpu.matmul %20, %22, %cst_9 {dimension_numbers = #tpu.dot_dimension_numbers<[1], [0], [0], [1], [0, 0, 1, 1], [], []>} : vector<24x8xbf16>, vector<8x32xbf16>, vector<24x32xf32> -> vector<24x32xf32>
    %24 = arith.addf %19, %23 : vector<24x32xf32>
    %25 = vector.extract_strided_slice %7 {offsets = [6, 0], sizes = [24, 8], strides = [1, 1]} : vector<44x8xbf16> to vector<24x8xbf16>
    %26 = vector.extract_strided_slice %8 {offsets = [3, 0, 0], sizes = [1, 8, 32], strides = [1, 1, 1]} : vector<9x8x32xbf16> to vector<1x8x32xbf16>
    %27 = vector.shape_cast %26 : vector<1x8x32xbf16> to vector<8x32xbf16>
    %cst_10 = arith.constant dense<0.000000e+00> : vector<24x32xf32>
    %28 = tpu.matmul %25, %27, %cst_10 {dimension_numbers = #tpu.dot_dimension_numbers<[1], [0], [0], [1], [0, 0, 1, 1], [], []>} : vector<24x8xbf16>, vector<8x32xbf16>, vector<24x32xf32> -> vector<24x32xf32>
    %29 = arith.addf %24, %28 : vector<24x32xf32>
    %30 = vector.extract_strided_slice %7 {offsets = [7, 0], sizes = [24, 8], strides = [1, 1]} : vector<44x8xbf16> to vector<24x8xbf16>
    %31 = vector.extract_strided_slice %8 {offsets = [4, 0, 0], sizes = [1, 8, 32], strides = [1, 1, 1]} : vector<9x8x32xbf16> to vector<1x8x32xbf16>
    %32 = vector.shape_cast %31 : vector<1x8x32xbf16> to vector<8x32xbf16>
    %cst_11 = arith.constant dense<0.000000e+00> : vector<24x32xf32>
    %33 = tpu.matmul %30, %32, %cst_11 {dimension_numbers = #tpu.dot_dimension_numbers<[1], [0], [0], [1], [0, 0, 1, 1], [], []>} : vector<24x8xbf16>, vector<8x32xbf16>, vector<24x32xf32> -> vector<24x32xf32>
    %34 = arith.addf %29, %33 : vector<24x32xf32>
    %35 = vector.extract_strided_slice %7 {offsets = [8, 0], sizes = [24, 8], strides = [1, 1]} : vector<44x8xbf16> to vector<24x8xbf16>
    %36 = vector.extract_strided_slice %8 {offsets = [5, 0, 0], sizes = [1, 8, 32], strides = [1, 1, 1]} : vector<9x8x32xbf16> to vector<1x8x32xbf16>
    %37 = vector.shape_cast %36 : vector<1x8x32xbf16> to vector<8x32xbf16>
    %cst_12 = arith.constant dense<0.000000e+00> : vector<24x32xf32>
    %38 = tpu.matmul %35, %37, %cst_12 {dimension_numbers = #tpu.dot_dimension_numbers<[1], [0], [0], [1], [0, 0, 1, 1], [], []>} : vector<24x8xbf16>, vector<8x32xbf16>, vector<24x32xf32> -> vector<24x32xf32>
    %39 = arith.addf %34, %38 : vector<24x32xf32>
    %40 = vector.extract_strided_slice %7 {offsets = [12, 0], sizes = [24, 8], strides = [1, 1]} : vector<44x8xbf16> to vector<24x8xbf16>
    %41 = vector.extract_strided_slice %8 {offsets = [6, 0, 0], sizes = [1, 8, 32], strides = [1, 1, 1]} : vector<9x8x32xbf16> to vector<1x8x32xbf16>
    %42 = vector.shape_cast %41 : vector<1x8x32xbf16> to vector<8x32xbf16>
    %cst_13 = arith.constant dense<0.000000e+00> : vector<24x32xf32>
    %43 = tpu.matmul %40, %42, %cst_13 {dimension_numbers = #tpu.dot_dimension_numbers<[1], [0], [0], [1], [0, 0, 1, 1], [], []>} : vector<24x8xbf16>, vector<8x32xbf16>, vector<24x32xf32> -> vector<24x32xf32>
    %44 = arith.addf %39, %43 : vector<24x32xf32>
    %45 = vector.extract_strided_slice %7 {offsets = [13, 0], sizes = [24, 8], strides = [1, 1]} : vector<44x8xbf16> to vector<24x8xbf16>
    %46 = vector.extract_strided_slice %8 {offsets = [7, 0, 0], sizes = [1, 8, 32], strides = [1, 1, 1]} : vector<9x8x32xbf16> to vector<1x8x32xbf16>
    %47 = vector.shape_cast %46 : vector<1x8x32xbf16> to vector<8x32xbf16>
    %cst_14 = arith.constant dense<0.000000e+00> : vector<24x32xf32>
    %48 = tpu.matmul %45, %47, %cst_14 {dimension_numbers = #tpu.dot_dimension_numbers<[1], [0], [0], [1], [0, 0, 1, 1], [], []>} : vector<24x8xbf16>, vector<8x32xbf16>, vector<24x32xf32> -> vector<24x32xf32>
    %49 = arith.addf %44, %48 : vector<24x32xf32>
    %50 = vector.extract_strided_slice %7 {offsets = [14, 0], sizes = [24, 8], strides = [1, 1]} : vector<44x8xbf16> to vector<24x8xbf16>
    %51 = vector.extract_strided_slice %8 {offsets = [8, 0, 0], sizes = [1, 8, 32], strides = [1, 1, 1]} : vector<9x8x32xbf16> to vector<1x8x32xbf16>
    %52 = vector.shape_cast %51 : vector<1x8x32xbf16> to vector<8x32xbf16>
    %cst_15 = arith.constant dense<0.000000e+00> : vector<24x32xf32>
    %53 = tpu.matmul %50, %52, %cst_15 {dimension_numbers = #tpu.dot_dimension_numbers<[1], [0], [0], [1], [0, 0, 1, 1], [], []>} : vector<24x8xbf16>, vector<8x32xbf16>, vector<24x32xf32> -> vector<24x32xf32>
    %54 = arith.addf %49, %53 : vector<24x32xf32>
    %c0_16 = arith.constant 0 : index
    %c0_17 = arith.constant 0 : index
    %55 = vector.load %arg3[%c0_16, %c0_17] : memref<1x32xf32, #tpu.memory_space<vmem>>, vector<1x32xf32>
    %56 = vector.broadcast %55 : vector<1x32xf32> to vector<24x32xf32>
    %57 = arith.addf %54, %56 : vector<24x32xf32>
    %cst_18 = arith.constant 0.000000e+00 : f32
    %58 = vector.broadcast %cst_18 : f32 to vector<24x32xf32>
    %59 = arith.cmpf ogt, %57, %58 : vector<24x32xf32>
    %cst_19 = arith.constant 0.00999999977 : f32
    %60 = vector.broadcast %cst_19 : f32 to vector<24x32xf32>
    %61 = arith.mulf %60, %57 : vector<24x32xf32>
    %62 = arith.select %59, %57, %61 : vector<24x32xi1>, vector<24x32xf32>
    %63 = arith.truncf %62 : vector<24x32xf32> to vector<24x32xbf16>
    %c0_20 = arith.constant 0 : index
    %c0_21 = arith.constant 0 : index
    %64 = vector.load %arg4[%c0_20, %c0_21] : memref<32x8xbf16, #tpu.memory_space<vmem>>, vector<32x8xbf16>
    %cst_22 = arith.constant dense<0.000000e+00> : vector<24x8xf32>
    %65 = tpu.matmul %63, %64, %cst_22 {dimension_numbers = #tpu.dot_dimension_numbers<[1], [0], [0], [1], [0, 0, 1, 1], [], []>} : vector<24x32xbf16>, vector<32x8xbf16>, vector<24x8xf32> -> vector<24x8xf32>
    %c0_23 = arith.constant 0 : index
    %c0_24 = arith.constant 0 : index
    %66 = vector.load %arg5[%c0_23, %c0_24] : memref<1x8xf32, #tpu.memory_space<vmem>>, vector<1x8xf32>
    %67 = vector.broadcast %66 : vector<1x8xf32> to vector<24x8xf32>
    %68 = arith.addf %65, %67 : vector<24x8xf32>
    %69 = vector.extract_strided_slice %1 {offsets = [7, 0], sizes = [24, 8], strides = [1, 1]} : vector<44x8xf32> to vector<24x8xf32>
    %70 = arith.addf %68, %69 : vector<24x8xf32>
    %c0_25 = arith.constant 0 : index
    %c0_26 = arith.constant 0 : index
    %c0_27 = arith.constant 0 : index
    %71 = vector.load %arg6[%c0_25, %c0_26, %c0_27] : memref<1x24x8xf32, #tpu.memory_space<vmem>>, vector<1x24x8xf32>
    %72 = vector.shape_cast %71 : vector<1x24x8xf32> to vector<24x8xf32>
    %73 = vector.shape_cast %70 : vector<24x8xf32> to vector<1x24x8xf32>
    tpu.vector_store %arg6[%c0_25, %c0_26, %c0_27], %73 {strides = array<i32>} : memref<1x24x8xf32, #tpu.memory_space<vmem>>, vector<1x24x8xf32>,
    return
  }
  func.func @transform_0(%arg0: i32) -> (i32, i32, i32) {
    %c0_i32 = arith.constant 0 : i32
    %c0_i32_0 = arith.constant 0 : i32
    %c0_i32_1 = arith.constant 0 : i32
    return %arg0, %c0_i32, %c0_i32_0 : i32, i32, i32
  }
  func.func @transform_1(%arg0: i32) -> (i32, i32, i32) {
    %c0_i32 = arith.constant 0 : i32
    %c0_i32_0 = arith.constant 0 : i32
    %c0_i32_1 = arith.constant 0 : i32
    %c0_i32_2 = arith.constant 0 : i32
    return %c0_i32, %c0_i32_0, %c0_i32_1 : i32, i32, i32
  }
  func.func @transform_2(%arg0: i32) -> (i32, i32) {
    %c0_i32 = arith.constant 0 : i32
    %c0_i32_0 = arith.constant 0 : i32
    %c0_i32_1 = arith.constant 0 : i32
    return %c0_i32, %c0_i32_0 : i32, i32
  }
  func.func @transform_3(%arg0: i32) -> (i32, i32) {
    %c0_i32 = arith.constant 0 : i32
    %c0_i32_0 = arith.constant 0 : i32
    %c0_i32_1 = arith.constant 0 : i32
    return %c0_i32, %c0_i32_0 : i32, i32
  }
  func.func @transform_4(%arg0: i32) -> (i32, i32) {
    %c0_i32 = arith.constant 0 : i32
    %c0_i32_0 = arith.constant 0 : i32
    %c0_i32_1 = arith.constant 0 : i32
    return %c0_i32, %c0_i32_0 : i32, i32
  }
  func.func @transform_5(%arg0: i32) -> (i32, i32, i32) {
    %c0_i32 = arith.constant 0 : i32
    %c0_i32_0 = arith.constant 0 : i32
    %c0_i32_1 = arith.constant 0 : i32
    return %arg0, %c0_i32, %c0_i32_0 : i32, i32, i32
  }
}

module attributes {stable_mosaic.version = 11 : i64} {
  func.func @_conv3x3_kernel(%arg0: i32, %arg1: memref<1x44x8xf32, #tpu.memory_space<vmem>>, %arg2: memref<9x8x8xbf16, #tpu.memory_space<vmem>>, %arg3: memref<1x8xf32, #tpu.memory_space<vmem>>, %arg4: memref<1x24x8xf32, #tpu.memory_space<vmem>>) attributes {dimension_semantics = [#tpu.dimension_semantics<parallel>], iteration_bounds = array<i64: 2>, scalar_prefetch = 0 : i64, scratch_operands = 0 : i64, tpu.core_type = #tpu.core_type<tc>, window_params = [{transform_indices = @transform_0, window_bounds = array<i64: 1, 44, 8>}, {pipeline_mode = #tpu.pipeline_mode<synchronous>, transform_indices = @transform_1, window_bounds = array<i64: 9, 8, 8>}, {pipeline_mode = #tpu.pipeline_mode<synchronous>, transform_indices = @transform_2, window_bounds = array<i64: 1, 8>}, {transform_indices = @transform_3, window_bounds = array<i64: 1, 24, 8>}]} {
    %c0 = arith.constant 0 : index
    %c0_0 = arith.constant 0 : index
    %c0_1 = arith.constant 0 : index
    %0 = vector.load %arg1[%c0, %c0_0, %c0_1] : memref<1x44x8xf32, #tpu.memory_space<vmem>>, vector<1x44x8xf32>
    %1 = vector.shape_cast %0 : vector<1x44x8xf32> to vector<44x8xf32>
    %2 = arith.truncf %1 : vector<44x8xf32> to vector<44x8xbf16>
    %c0_2 = arith.constant 0 : index
    %c0_3 = arith.constant 0 : index
    %c0_4 = arith.constant 0 : index
    %3 = vector.load %arg2[%c0_2, %c0_3, %c0_4] : memref<9x8x8xbf16, #tpu.memory_space<vmem>>, vector<9x8x8xbf16>
    %cst = arith.constant 0.000000e+00 : f32
    %4 = vector.broadcast %cst : f32 to vector<24x8xf32>
    %5 = vector.extract_strided_slice %2 {offsets = [0, 0], sizes = [24, 8], strides = [1, 1]} : vector<44x8xbf16> to vector<24x8xbf16>
    %6 = vector.extract_strided_slice %3 {offsets = [0, 0, 0], sizes = [1, 8, 8], strides = [1, 1, 1]} : vector<9x8x8xbf16> to vector<1x8x8xbf16>
    %7 = vector.shape_cast %6 : vector<1x8x8xbf16> to vector<8x8xbf16>
    %cst_5 = arith.constant dense<0.000000e+00> : vector<24x8xf32>
    %8 = tpu.matmul %5, %7, %cst_5 {dimension_numbers = #tpu.dot_dimension_numbers<[1], [0], [0], [1], [0, 0, 1, 1], [], []>} : vector<24x8xbf16>, vector<8x8xbf16>, vector<24x8xf32> -> vector<24x8xf32>
    %9 = arith.addf %4, %8 : vector<24x8xf32>
    %10 = vector.extract_strided_slice %2 {offsets = [1, 0], sizes = [24, 8], strides = [1, 1]} : vector<44x8xbf16> to vector<24x8xbf16>
    %11 = vector.extract_strided_slice %3 {offsets = [1, 0, 0], sizes = [1, 8, 8], strides = [1, 1, 1]} : vector<9x8x8xbf16> to vector<1x8x8xbf16>
    %12 = vector.shape_cast %11 : vector<1x8x8xbf16> to vector<8x8xbf16>
    %cst_6 = arith.constant dense<0.000000e+00> : vector<24x8xf32>
    %13 = tpu.matmul %10, %12, %cst_6 {dimension_numbers = #tpu.dot_dimension_numbers<[1], [0], [0], [1], [0, 0, 1, 1], [], []>} : vector<24x8xbf16>, vector<8x8xbf16>, vector<24x8xf32> -> vector<24x8xf32>
    %14 = arith.addf %9, %13 : vector<24x8xf32>
    %15 = vector.extract_strided_slice %2 {offsets = [2, 0], sizes = [24, 8], strides = [1, 1]} : vector<44x8xbf16> to vector<24x8xbf16>
    %16 = vector.extract_strided_slice %3 {offsets = [2, 0, 0], sizes = [1, 8, 8], strides = [1, 1, 1]} : vector<9x8x8xbf16> to vector<1x8x8xbf16>
    %17 = vector.shape_cast %16 : vector<1x8x8xbf16> to vector<8x8xbf16>
    %cst_7 = arith.constant dense<0.000000e+00> : vector<24x8xf32>
    %18 = tpu.matmul %15, %17, %cst_7 {dimension_numbers = #tpu.dot_dimension_numbers<[1], [0], [0], [1], [0, 0, 1, 1], [], []>} : vector<24x8xbf16>, vector<8x8xbf16>, vector<24x8xf32> -> vector<24x8xf32>
    %19 = arith.addf %14, %18 : vector<24x8xf32>
    %20 = vector.extract_strided_slice %2 {offsets = [6, 0], sizes = [24, 8], strides = [1, 1]} : vector<44x8xbf16> to vector<24x8xbf16>
    %21 = vector.extract_strided_slice %3 {offsets = [3, 0, 0], sizes = [1, 8, 8], strides = [1, 1, 1]} : vector<9x8x8xbf16> to vector<1x8x8xbf16>
    %22 = vector.shape_cast %21 : vector<1x8x8xbf16> to vector<8x8xbf16>
    %cst_8 = arith.constant dense<0.000000e+00> : vector<24x8xf32>
    %23 = tpu.matmul %20, %22, %cst_8 {dimension_numbers = #tpu.dot_dimension_numbers<[1], [0], [0], [1], [0, 0, 1, 1], [], []>} : vector<24x8xbf16>, vector<8x8xbf16>, vector<24x8xf32> -> vector<24x8xf32>
    %24 = arith.addf %19, %23 : vector<24x8xf32>
    %25 = vector.extract_strided_slice %2 {offsets = [7, 0], sizes = [24, 8], strides = [1, 1]} : vector<44x8xbf16> to vector<24x8xbf16>
    %26 = vector.extract_strided_slice %3 {offsets = [4, 0, 0], sizes = [1, 8, 8], strides = [1, 1, 1]} : vector<9x8x8xbf16> to vector<1x8x8xbf16>
    %27 = vector.shape_cast %26 : vector<1x8x8xbf16> to vector<8x8xbf16>
    %cst_9 = arith.constant dense<0.000000e+00> : vector<24x8xf32>
    %28 = tpu.matmul %25, %27, %cst_9 {dimension_numbers = #tpu.dot_dimension_numbers<[1], [0], [0], [1], [0, 0, 1, 1], [], []>} : vector<24x8xbf16>, vector<8x8xbf16>, vector<24x8xf32> -> vector<24x8xf32>
    %29 = arith.addf %24, %28 : vector<24x8xf32>
    %30 = vector.extract_strided_slice %2 {offsets = [8, 0], sizes = [24, 8], strides = [1, 1]} : vector<44x8xbf16> to vector<24x8xbf16>
    %31 = vector.extract_strided_slice %3 {offsets = [5, 0, 0], sizes = [1, 8, 8], strides = [1, 1, 1]} : vector<9x8x8xbf16> to vector<1x8x8xbf16>
    %32 = vector.shape_cast %31 : vector<1x8x8xbf16> to vector<8x8xbf16>
    %cst_10 = arith.constant dense<0.000000e+00> : vector<24x8xf32>
    %33 = tpu.matmul %30, %32, %cst_10 {dimension_numbers = #tpu.dot_dimension_numbers<[1], [0], [0], [1], [0, 0, 1, 1], [], []>} : vector<24x8xbf16>, vector<8x8xbf16>, vector<24x8xf32> -> vector<24x8xf32>
    %34 = arith.addf %29, %33 : vector<24x8xf32>
    %35 = vector.extract_strided_slice %2 {offsets = [12, 0], sizes = [24, 8], strides = [1, 1]} : vector<44x8xbf16> to vector<24x8xbf16>
    %36 = vector.extract_strided_slice %3 {offsets = [6, 0, 0], sizes = [1, 8, 8], strides = [1, 1, 1]} : vector<9x8x8xbf16> to vector<1x8x8xbf16>
    %37 = vector.shape_cast %36 : vector<1x8x8xbf16> to vector<8x8xbf16>
    %cst_11 = arith.constant dense<0.000000e+00> : vector<24x8xf32>
    %38 = tpu.matmul %35, %37, %cst_11 {dimension_numbers = #tpu.dot_dimension_numbers<[1], [0], [0], [1], [0, 0, 1, 1], [], []>} : vector<24x8xbf16>, vector<8x8xbf16>, vector<24x8xf32> -> vector<24x8xf32>
    %39 = arith.addf %34, %38 : vector<24x8xf32>
    %40 = vector.extract_strided_slice %2 {offsets = [13, 0], sizes = [24, 8], strides = [1, 1]} : vector<44x8xbf16> to vector<24x8xbf16>
    %41 = vector.extract_strided_slice %3 {offsets = [7, 0, 0], sizes = [1, 8, 8], strides = [1, 1, 1]} : vector<9x8x8xbf16> to vector<1x8x8xbf16>
    %42 = vector.shape_cast %41 : vector<1x8x8xbf16> to vector<8x8xbf16>
    %cst_12 = arith.constant dense<0.000000e+00> : vector<24x8xf32>
    %43 = tpu.matmul %40, %42, %cst_12 {dimension_numbers = #tpu.dot_dimension_numbers<[1], [0], [0], [1], [0, 0, 1, 1], [], []>} : vector<24x8xbf16>, vector<8x8xbf16>, vector<24x8xf32> -> vector<24x8xf32>
    %44 = arith.addf %39, %43 : vector<24x8xf32>
    %45 = vector.extract_strided_slice %2 {offsets = [14, 0], sizes = [24, 8], strides = [1, 1]} : vector<44x8xbf16> to vector<24x8xbf16>
    %46 = vector.extract_strided_slice %3 {offsets = [8, 0, 0], sizes = [1, 8, 8], strides = [1, 1, 1]} : vector<9x8x8xbf16> to vector<1x8x8xbf16>
    %47 = vector.shape_cast %46 : vector<1x8x8xbf16> to vector<8x8xbf16>
    %cst_13 = arith.constant dense<0.000000e+00> : vector<24x8xf32>
    %48 = tpu.matmul %45, %47, %cst_13 {dimension_numbers = #tpu.dot_dimension_numbers<[1], [0], [0], [1], [0, 0, 1, 1], [], []>} : vector<24x8xbf16>, vector<8x8xbf16>, vector<24x8xf32> -> vector<24x8xf32>
    %49 = arith.addf %44, %48 : vector<24x8xf32>
    %c0_14 = arith.constant 0 : index
    %c0_15 = arith.constant 0 : index
    %50 = vector.load %arg3[%c0_14, %c0_15] : memref<1x8xf32, #tpu.memory_space<vmem>>, vector<1x8xf32>
    %51 = vector.broadcast %50 : vector<1x8xf32> to vector<24x8xf32>
    %52 = arith.addf %49, %51 : vector<24x8xf32>
    %c0_16 = arith.constant 0 : index
    %c0_17 = arith.constant 0 : index
    %c0_18 = arith.constant 0 : index
    %53 = vector.load %arg4[%c0_16, %c0_17, %c0_18] : memref<1x24x8xf32, #tpu.memory_space<vmem>>, vector<1x24x8xf32>
    %54 = vector.shape_cast %53 : vector<1x24x8xf32> to vector<24x8xf32>
    %55 = vector.shape_cast %52 : vector<24x8xf32> to vector<1x24x8xf32>
    tpu.vector_store %arg4[%c0_16, %c0_17, %c0_18], %55 {strides = array<i32>} : memref<1x24x8xf32, #tpu.memory_space<vmem>>, vector<1x24x8xf32>,
    return
  }
  func.func @transform_0(%arg0: i32) -> (i32, i32, i32) {
    %c0_i32 = arith.constant 0 : i32
    %c0_i32_0 = arith.constant 0 : i32
    %c0_i32_1 = arith.constant 0 : i32
    return %arg0, %c0_i32, %c0_i32_0 : i32, i32, i32
  }
  func.func @transform_1(%arg0: i32) -> (i32, i32, i32) {
    %c0_i32 = arith.constant 0 : i32
    %c0_i32_0 = arith.constant 0 : i32
    %c0_i32_1 = arith.constant 0 : i32
    %c0_i32_2 = arith.constant 0 : i32
    return %c0_i32, %c0_i32_0, %c0_i32_1 : i32, i32, i32
  }
  func.func @transform_2(%arg0: i32) -> (i32, i32) {
    %c0_i32 = arith.constant 0 : i32
    %c0_i32_0 = arith.constant 0 : i32
    %c0_i32_1 = arith.constant 0 : i32
    return %c0_i32, %c0_i32_0 : i32, i32
  }
  func.func @transform_3(%arg0: i32) -> (i32, i32, i32) {
    %c0_i32 = arith.constant 0 : i32
    %c0_i32_0 = arith.constant 0 : i32
    %c0_i32_1 = arith.constant 0 : i32
    return %arg0, %c0_i32, %c0_i32_0 : i32, i32, i32
  }
}

module attributes {stable_mosaic.version = 11 : i64} {
  func.func @_conv3x3_kernel(%arg0: i32, %arg1: memref<1x44x8xf32, #tpu.memory_space<vmem>>, %arg2: memref<9x8x8xbf16, #tpu.memory_space<vmem>>, %arg3: memref<1x8xf32, #tpu.memory_space<vmem>>, %arg4: memref<1x24x8xf32, #tpu.memory_space<vmem>>) attributes {dimension_semantics = [#tpu.dimension_semantics<parallel>], iteration_bounds = array<i64: 2>, scalar_prefetch = 0 : i64, scratch_operands = 0 : i64, tpu.core_type = #tpu.core_type<tc>, window_params = [{transform_indices = @transform_0, window_bounds = array<i64: 1, 44, 8>}, {pipeline_mode = #tpu.pipeline_mode<synchronous>, transform_indices = @transform_1, window_bounds = array<i64: 9, 8, 8>}, {pipeline_mode = #tpu.pipeline_mode<synchronous>, transform_indices = @transform_2, window_bounds = array<i64: 1, 8>}, {transform_indices = @transform_3, window_bounds = array<i64: 1, 24, 8>}]} {
    %c0 = arith.constant 0 : index
    %c0_0 = arith.constant 0 : index
    %c0_1 = arith.constant 0 : index
    %0 = vector.load %arg1[%c0, %c0_0, %c0_1] : memref<1x44x8xf32, #tpu.memory_space<vmem>>, vector<1x44x8xf32>
    %1 = vector.shape_cast %0 : vector<1x44x8xf32> to vector<44x8xf32>
    %2 = arith.truncf %1 : vector<44x8xf32> to vector<44x8xbf16>
    %c0_2 = arith.constant 0 : index
    %c0_3 = arith.constant 0 : index
    %c0_4 = arith.constant 0 : index
    %3 = vector.load %arg2[%c0_2, %c0_3, %c0_4] : memref<9x8x8xbf16, #tpu.memory_space<vmem>>, vector<9x8x8xbf16>
    %cst = arith.constant 0.000000e+00 : f32
    %4 = vector.broadcast %cst : f32 to vector<24x8xf32>
    %5 = vector.extract_strided_slice %2 {offsets = [0, 0], sizes = [24, 8], strides = [1, 1]} : vector<44x8xbf16> to vector<24x8xbf16>
    %6 = vector.extract_strided_slice %3 {offsets = [0, 0, 0], sizes = [1, 8, 8], strides = [1, 1, 1]} : vector<9x8x8xbf16> to vector<1x8x8xbf16>
    %7 = vector.shape_cast %6 : vector<1x8x8xbf16> to vector<8x8xbf16>
    %cst_5 = arith.constant dense<0.000000e+00> : vector<24x8xf32>
    %8 = tpu.matmul %5, %7, %cst_5 {dimension_numbers = #tpu.dot_dimension_numbers<[1], [0], [0], [1], [0, 0, 1, 1], [], []>} : vector<24x8xbf16>, vector<8x8xbf16>, vector<24x8xf32> -> vector<24x8xf32>
    %9 = arith.addf %4, %8 : vector<24x8xf32>
    %10 = vector.extract_strided_slice %2 {offsets = [1, 0], sizes = [24, 8], strides = [1, 1]} : vector<44x8xbf16> to vector<24x8xbf16>
    %11 = vector.extract_strided_slice %3 {offsets = [1, 0, 0], sizes = [1, 8, 8], strides = [1, 1, 1]} : vector<9x8x8xbf16> to vector<1x8x8xbf16>
    %12 = vector.shape_cast %11 : vector<1x8x8xbf16> to vector<8x8xbf16>
    %cst_6 = arith.constant dense<0.000000e+00> : vector<24x8xf32>
    %13 = tpu.matmul %10, %12, %cst_6 {dimension_numbers = #tpu.dot_dimension_numbers<[1], [0], [0], [1], [0, 0, 1, 1], [], []>} : vector<24x8xbf16>, vector<8x8xbf16>, vector<24x8xf32> -> vector<24x8xf32>
    %14 = arith.addf %9, %13 : vector<24x8xf32>
    %15 = vector.extract_strided_slice %2 {offsets = [2, 0], sizes = [24, 8], strides = [1, 1]} : vector<44x8xbf16> to vector<24x8xbf16>
    %16 = vector.extract_strided_slice %3 {offsets = [2, 0, 0], sizes = [1, 8, 8], strides = [1, 1, 1]} : vector<9x8x8xbf16> to vector<1x8x8xbf16>
    %17 = vector.shape_cast %16 : vector<1x8x8xbf16> to vector<8x8xbf16>
    %cst_7 = arith.constant dense<0.000000e+00> : vector<24x8xf32>
    %18 = tpu.matmul %15, %17, %cst_7 {dimension_numbers = #tpu.dot_dimension_numbers<[1], [0], [0], [1], [0, 0, 1, 1], [], []>} : vector<24x8xbf16>, vector<8x8xbf16>, vector<24x8xf32> -> vector<24x8xf32>
    %19 = arith.addf %14, %18 : vector<24x8xf32>
    %20 = vector.extract_strided_slice %2 {offsets = [6, 0], sizes = [24, 8], strides = [1, 1]} : vector<44x8xbf16> to vector<24x8xbf16>
    %21 = vector.extract_strided_slice %3 {offsets = [3, 0, 0], sizes = [1, 8, 8], strides = [1, 1, 1]} : vector<9x8x8xbf16> to vector<1x8x8xbf16>
    %22 = vector.shape_cast %21 : vector<1x8x8xbf16> to vector<8x8xbf16>
    %cst_8 = arith.constant dense<0.000000e+00> : vector<24x8xf32>
    %23 = tpu.matmul %20, %22, %cst_8 {dimension_numbers = #tpu.dot_dimension_numbers<[1], [0], [0], [1], [0, 0, 1, 1], [], []>} : vector<24x8xbf16>, vector<8x8xbf16>, vector<24x8xf32> -> vector<24x8xf32>
    %24 = arith.addf %19, %23 : vector<24x8xf32>
    %25 = vector.extract_strided_slice %2 {offsets = [7, 0], sizes = [24, 8], strides = [1, 1]} : vector<44x8xbf16> to vector<24x8xbf16>
    %26 = vector.extract_strided_slice %3 {offsets = [4, 0, 0], sizes = [1, 8, 8], strides = [1, 1, 1]} : vector<9x8x8xbf16> to vector<1x8x8xbf16>
    %27 = vector.shape_cast %26 : vector<1x8x8xbf16> to vector<8x8xbf16>
    %cst_9 = arith.constant dense<0.000000e+00> : vector<24x8xf32>
    %28 = tpu.matmul %25, %27, %cst_9 {dimension_numbers = #tpu.dot_dimension_numbers<[1], [0], [0], [1], [0, 0, 1, 1], [], []>} : vector<24x8xbf16>, vector<8x8xbf16>, vector<24x8xf32> -> vector<24x8xf32>
    %29 = arith.addf %24, %28 : vector<24x8xf32>
    %30 = vector.extract_strided_slice %2 {offsets = [8, 0], sizes = [24, 8], strides = [1, 1]} : vector<44x8xbf16> to vector<24x8xbf16>
    %31 = vector.extract_strided_slice %3 {offsets = [5, 0, 0], sizes = [1, 8, 8], strides = [1, 1, 1]} : vector<9x8x8xbf16> to vector<1x8x8xbf16>
    %32 = vector.shape_cast %31 : vector<1x8x8xbf16> to vector<8x8xbf16>
    %cst_10 = arith.constant dense<0.000000e+00> : vector<24x8xf32>
    %33 = tpu.matmul %30, %32, %cst_10 {dimension_numbers = #tpu.dot_dimension_numbers<[1], [0], [0], [1], [0, 0, 1, 1], [], []>} : vector<24x8xbf16>, vector<8x8xbf16>, vector<24x8xf32> -> vector<24x8xf32>
    %34 = arith.addf %29, %33 : vector<24x8xf32>
    %35 = vector.extract_strided_slice %2 {offsets = [12, 0], sizes = [24, 8], strides = [1, 1]} : vector<44x8xbf16> to vector<24x8xbf16>
    %36 = vector.extract_strided_slice %3 {offsets = [6, 0, 0], sizes = [1, 8, 8], strides = [1, 1, 1]} : vector<9x8x8xbf16> to vector<1x8x8xbf16>
    %37 = vector.shape_cast %36 : vector<1x8x8xbf16> to vector<8x8xbf16>
    %cst_11 = arith.constant dense<0.000000e+00> : vector<24x8xf32>
    %38 = tpu.matmul %35, %37, %cst_11 {dimension_numbers = #tpu.dot_dimension_numbers<[1], [0], [0], [1], [0, 0, 1, 1], [], []>} : vector<24x8xbf16>, vector<8x8xbf16>, vector<24x8xf32> -> vector<24x8xf32>
    %39 = arith.addf %34, %38 : vector<24x8xf32>
    %40 = vector.extract_strided_slice %2 {offsets = [13, 0], sizes = [24, 8], strides = [1, 1]} : vector<44x8xbf16> to vector<24x8xbf16>
    %41 = vector.extract_strided_slice %3 {offsets = [7, 0, 0], sizes = [1, 8, 8], strides = [1, 1, 1]} : vector<9x8x8xbf16> to vector<1x8x8xbf16>
    %42 = vector.shape_cast %41 : vector<1x8x8xbf16> to vector<8x8xbf16>
    %cst_12 = arith.constant dense<0.000000e+00> : vector<24x8xf32>
    %43 = tpu.matmul %40, %42, %cst_12 {dimension_numbers = #tpu.dot_dimension_numbers<[1], [0], [0], [1], [0, 0, 1, 1], [], []>} : vector<24x8xbf16>, vector<8x8xbf16>, vector<24x8xf32> -> vector<24x8xf32>
    %44 = arith.addf %39, %43 : vector<24x8xf32>
    %45 = vector.extract_strided_slice %2 {offsets = [14, 0], sizes = [24, 8], strides = [1, 1]} : vector<44x8xbf16> to vector<24x8xbf16>
    %46 = vector.extract_strided_slice %3 {offsets = [8, 0, 0], sizes = [1, 8, 8], strides = [1, 1, 1]} : vector<9x8x8xbf16> to vector<1x8x8xbf16>
    %47 = vector.shape_cast %46 : vector<1x8x8xbf16> to vector<8x8xbf16>
    %cst_13 = arith.constant dense<0.000000e+00> : vector<24x8xf32>
    %48 = tpu.matmul %45, %47, %cst_13 {dimension_numbers = #tpu.dot_dimension_numbers<[1], [0], [0], [1], [0, 0, 1, 1], [], []>} : vector<24x8xbf16>, vector<8x8xbf16>, vector<24x8xf32> -> vector<24x8xf32>
    %49 = arith.addf %44, %48 : vector<24x8xf32>
    %c0_14 = arith.constant 0 : index
    %c0_15 = arith.constant 0 : index
    %50 = vector.load %arg3[%c0_14, %c0_15] : memref<1x8xf32, #tpu.memory_space<vmem>>, vector<1x8xf32>
    %51 = vector.broadcast %50 : vector<1x8xf32> to vector<24x8xf32>
    %52 = arith.addf %49, %51 : vector<24x8xf32>
    %cst_16 = arith.constant 0.000000e+00 : f32
    %53 = vector.broadcast %cst_16 : f32 to vector<24x8xf32>
    %54 = arith.cmpf ogt, %52, %53 : vector<24x8xf32>
    %cst_17 = arith.constant 0.00999999977 : f32
    %55 = vector.broadcast %cst_17 : f32 to vector<24x8xf32>
    %56 = arith.mulf %55, %52 : vector<24x8xf32>
    %57 = arith.select %54, %52, %56 : vector<24x8xi1>, vector<24x8xf32>
    %c0_18 = arith.constant 0 : index
    %c0_19 = arith.constant 0 : index
    %c0_20 = arith.constant 0 : index
    %58 = vector.load %arg4[%c0_18, %c0_19, %c0_20] : memref<1x24x8xf32, #tpu.memory_space<vmem>>, vector<1x24x8xf32>
    %59 = vector.shape_cast %58 : vector<1x24x8xf32> to vector<24x8xf32>
    %60 = vector.shape_cast %57 : vector<24x8xf32> to vector<1x24x8xf32>
    tpu.vector_store %arg4[%c0_18, %c0_19, %c0_20], %60 {strides = array<i32>} : memref<1x24x8xf32, #tpu.memory_space<vmem>>, vector<1x24x8xf32>,
    return
  }
  func.func @transform_0(%arg0: i32) -> (i32, i32, i32) {
    %c0_i32 = arith.constant 0 : i32
    %c0_i32_0 = arith.constant 0 : i32
    %c0_i32_1 = arith.constant 0 : i32
    return %arg0, %c0_i32, %c0_i32_0 : i32, i32, i32
  }
  func.func @transform_1(%arg0: i32) -> (i32, i32, i32) {
    %c0_i32 = arith.constant 0 : i32
    %c0_i32_0 = arith.constant 0 : i32
    %c0_i32_1 = arith.constant 0 : i32
    %c0_i32_2 = arith.constant 0 : i32
    return %c0_i32, %c0_i32_0, %c0_i32_1 : i32, i32, i32
  }
  func.func @transform_2(%arg0: i32) -> (i32, i32) {
    %c0_i32 = arith.constant 0 : i32
    %c0_i32_0 = arith.constant 0 : i32
    %c0_i32_1 = arith.constant 0 : i32
    return %c0_i32, %c0_i32_0 : i32, i32
  }
  func.func @transform_3(%arg0: i32) -> (i32, i32, i32) {
    %c0_i32 = arith.constant 0 : i32
    %c0_i32_0 = arith.constant 0 : i32
    %c0_i32_1 = arith.constant 0 : i32
    return %arg0, %c0_i32, %c0_i32_0 : i32, i32, i32
  }
}

module attributes {stable_mosaic.version = 11 : i64} {
  func.func @_conv3x3_kernel(%arg0: i32, %arg1: memref<1x24x8xf32, #tpu.memory_space<vmem>>, %arg2: memref<9x8x8xbf16, #tpu.memory_space<vmem>>, %arg3: memref<1x8xf32, #tpu.memory_space<vmem>>, %arg4: memref<1x8x8xf32, #tpu.memory_space<vmem>>) attributes {dimension_semantics = [#tpu.dimension_semantics<parallel>], iteration_bounds = array<i64: 2>, scalar_prefetch = 0 : i64, scratch_operands = 0 : i64, tpu.core_type = #tpu.core_type<tc>, window_params = [{transform_indices = @transform_0, window_bounds = array<i64: 1, 24, 8>}, {pipeline_mode = #tpu.pipeline_mode<synchronous>, transform_indices = @transform_1, window_bounds = array<i64: 9, 8, 8>}, {pipeline_mode = #tpu.pipeline_mode<synchronous>, transform_indices = @transform_2, window_bounds = array<i64: 1, 8>}, {transform_indices = @transform_3, window_bounds = array<i64: 1, 8, 8>}]} {
    %c0 = arith.constant 0 : index
    %c0_0 = arith.constant 0 : index
    %c0_1 = arith.constant 0 : index
    %0 = vector.load %arg1[%c0, %c0_0, %c0_1] : memref<1x24x8xf32, #tpu.memory_space<vmem>>, vector<1x24x8xf32>
    %1 = vector.shape_cast %0 : vector<1x24x8xf32> to vector<24x8xf32>
    %2 = arith.truncf %1 : vector<24x8xf32> to vector<24x8xbf16>
    %c0_2 = arith.constant 0 : index
    %c0_3 = arith.constant 0 : index
    %c0_4 = arith.constant 0 : index
    %3 = vector.load %arg2[%c0_2, %c0_3, %c0_4] : memref<9x8x8xbf16, #tpu.memory_space<vmem>>, vector<9x8x8xbf16>
    %cst = arith.constant 0.000000e+00 : f32
    %4 = vector.broadcast %cst : f32 to vector<8x8xf32>
    %5 = vector.extract_strided_slice %2 {offsets = [0, 0], sizes = [8, 8], strides = [1, 1]} : vector<24x8xbf16> to vector<8x8xbf16>
    %6 = vector.extract_strided_slice %3 {offsets = [0, 0, 0], sizes = [1, 8, 8], strides = [1, 1, 1]} : vector<9x8x8xbf16> to vector<1x8x8xbf16>
    %7 = vector.shape_cast %6 : vector<1x8x8xbf16> to vector<8x8xbf16>
    %cst_5 = arith.constant dense<0.000000e+00> : vector<8x8xf32>
    %8 = tpu.matmul %5, %7, %cst_5 {dimension_numbers = #tpu.dot_dimension_numbers<[1], [0], [0], [1], [0, 0, 1, 1], [], []>} : vector<8x8xbf16>, vector<8x8xbf16>, vector<8x8xf32> -> vector<8x8xf32>
    %9 = arith.addf %4, %8 : vector<8x8xf32>
    %10 = vector.extract_strided_slice %2 {offsets = [1, 0], sizes = [8, 8], strides = [1, 1]} : vector<24x8xbf16> to vector<8x8xbf16>
    %11 = vector.extract_strided_slice %3 {offsets = [1, 0, 0], sizes = [1, 8, 8], strides = [1, 1, 1]} : vector<9x8x8xbf16> to vector<1x8x8xbf16>
    %12 = vector.shape_cast %11 : vector<1x8x8xbf16> to vector<8x8xbf16>
    %cst_6 = arith.constant dense<0.000000e+00> : vector<8x8xf32>
    %13 = tpu.matmul %10, %12, %cst_6 {dimension_numbers = #tpu.dot_dimension_numbers<[1], [0], [0], [1], [0, 0, 1, 1], [], []>} : vector<8x8xbf16>, vector<8x8xbf16>, vector<8x8xf32> -> vector<8x8xf32>
    %14 = arith.addf %9, %13 : vector<8x8xf32>
    %15 = vector.extract_strided_slice %2 {offsets = [2, 0], sizes = [8, 8], strides = [1, 1]} : vector<24x8xbf16> to vector<8x8xbf16>
    %16 = vector.extract_strided_slice %3 {offsets = [2, 0, 0], sizes = [1, 8, 8], strides = [1, 1, 1]} : vector<9x8x8xbf16> to vector<1x8x8xbf16>
    %17 = vector.shape_cast %16 : vector<1x8x8xbf16> to vector<8x8xbf16>
    %cst_7 = arith.constant dense<0.000000e+00> : vector<8x8xf32>
    %18 = tpu.matmul %15, %17, %cst_7 {dimension_numbers = #tpu.dot_dimension_numbers<[1], [0], [0], [1], [0, 0, 1, 1], [], []>} : vector<8x8xbf16>, vector<8x8xbf16>, vector<8x8xf32> -> vector<8x8xf32>
    %19 = arith.addf %14, %18 : vector<8x8xf32>
    %20 = vector.extract_strided_slice %2 {offsets = [4, 0], sizes = [8, 8], strides = [1, 1]} : vector<24x8xbf16> to vector<8x8xbf16>
    %21 = vector.extract_strided_slice %3 {offsets = [3, 0, 0], sizes = [1, 8, 8], strides = [1, 1, 1]} : vector<9x8x8xbf16> to vector<1x8x8xbf16>
    %22 = vector.shape_cast %21 : vector<1x8x8xbf16> to vector<8x8xbf16>
    %cst_8 = arith.constant dense<0.000000e+00> : vector<8x8xf32>
    %23 = tpu.matmul %20, %22, %cst_8 {dimension_numbers = #tpu.dot_dimension_numbers<[1], [0], [0], [1], [0, 0, 1, 1], [], []>} : vector<8x8xbf16>, vector<8x8xbf16>, vector<8x8xf32> -> vector<8x8xf32>
    %24 = arith.addf %19, %23 : vector<8x8xf32>
    %25 = vector.extract_strided_slice %2 {offsets = [5, 0], sizes = [8, 8], strides = [1, 1]} : vector<24x8xbf16> to vector<8x8xbf16>
    %26 = vector.extract_strided_slice %3 {offsets = [4, 0, 0], sizes = [1, 8, 8], strides = [1, 1, 1]} : vector<9x8x8xbf16> to vector<1x8x8xbf16>
    %27 = vector.shape_cast %26 : vector<1x8x8xbf16> to vector<8x8xbf16>
    %cst_9 = arith.constant dense<0.000000e+00> : vector<8x8xf32>
    %28 = tpu.matmul %25, %27, %cst_9 {dimension_numbers = #tpu.dot_dimension_numbers<[1], [0], [0], [1], [0, 0, 1, 1], [], []>} : vector<8x8xbf16>, vector<8x8xbf16>, vector<8x8xf32> -> vector<8x8xf32>
    %29 = arith.addf %24, %28 : vector<8x8xf32>
    %30 = vector.extract_strided_slice %2 {offsets = [6, 0], sizes = [8, 8], strides = [1, 1]} : vector<24x8xbf16> to vector<8x8xbf16>
    %31 = vector.extract_strided_slice %3 {offsets = [5, 0, 0], sizes = [1, 8, 8], strides = [1, 1, 1]} : vector<9x8x8xbf16> to vector<1x8x8xbf16>
    %32 = vector.shape_cast %31 : vector<1x8x8xbf16> to vector<8x8xbf16>
    %cst_10 = arith.constant dense<0.000000e+00> : vector<8x8xf32>
    %33 = tpu.matmul %30, %32, %cst_10 {dimension_numbers = #tpu.dot_dimension_numbers<[1], [0], [0], [1], [0, 0, 1, 1], [], []>} : vector<8x8xbf16>, vector<8x8xbf16>, vector<8x8xf32> -> vector<8x8xf32>
    %34 = arith.addf %29, %33 : vector<8x8xf32>
    %35 = vector.extract_strided_slice %2 {offsets = [8, 0], sizes = [8, 8], strides = [1, 1]} : vector<24x8xbf16> to vector<8x8xbf16>
    %36 = vector.extract_strided_slice %3 {offsets = [6, 0, 0], sizes = [1, 8, 8], strides = [1, 1, 1]} : vector<9x8x8xbf16> to vector<1x8x8xbf16>
    %37 = vector.shape_cast %36 : vector<1x8x8xbf16> to vector<8x8xbf16>
    %cst_11 = arith.constant dense<0.000000e+00> : vector<8x8xf32>
    %38 = tpu.matmul %35, %37, %cst_11 {dimension_numbers = #tpu.dot_dimension_numbers<[1], [0], [0], [1], [0, 0, 1, 1], [], []>} : vector<8x8xbf16>, vector<8x8xbf16>, vector<8x8xf32> -> vector<8x8xf32>
    %39 = arith.addf %34, %38 : vector<8x8xf32>
    %40 = vector.extract_strided_slice %2 {offsets = [9, 0], sizes = [8, 8], strides = [1, 1]} : vector<24x8xbf16> to vector<8x8xbf16>
    %41 = vector.extract_strided_slice %3 {offsets = [7, 0, 0], sizes = [1, 8, 8], strides = [1, 1, 1]} : vector<9x8x8xbf16> to vector<1x8x8xbf16>
    %42 = vector.shape_cast %41 : vector<1x8x8xbf16> to vector<8x8xbf16>
    %cst_12 = arith.constant dense<0.000000e+00> : vector<8x8xf32>
    %43 = tpu.matmul %40, %42, %cst_12 {dimension_numbers = #tpu.dot_dimension_numbers<[1], [0], [0], [1], [0, 0, 1, 1], [], []>} : vector<8x8xbf16>, vector<8x8xbf16>, vector<8x8xf32> -> vector<8x8xf32>
    %44 = arith.addf %39, %43 : vector<8x8xf32>
    %45 = vector.extract_strided_slice %2 {offsets = [10, 0], sizes = [8, 8], strides = [1, 1]} : vector<24x8xbf16> to vector<8x8xbf16>
    %46 = vector.extract_strided_slice %3 {offsets = [8, 0, 0], sizes = [1, 8, 8], strides = [1, 1, 1]} : vector<9x8x8xbf16> to vector<1x8x8xbf16>
    %47 = vector.shape_cast %46 : vector<1x8x8xbf16> to vector<8x8xbf16>
    %cst_13 = arith.constant dense<0.000000e+00> : vector<8x8xf32>
    %48 = tpu.matmul %45, %47, %cst_13 {dimension_numbers = #tpu.dot_dimension_numbers<[1], [0], [0], [1], [0, 0, 1, 1], [], []>} : vector<8x8xbf16>, vector<8x8xbf16>, vector<8x8xf32> -> vector<8x8xf32>
    %49 = arith.addf %44, %48 : vector<8x8xf32>
    %c0_14 = arith.constant 0 : index
    %c0_15 = arith.constant 0 : index
    %50 = vector.load %arg3[%c0_14, %c0_15] : memref<1x8xf32, #tpu.memory_space<vmem>>, vector<1x8xf32>
    %51 = vector.broadcast %50 : vector<1x8xf32> to vector<8x8xf32>
    %52 = arith.addf %49, %51 : vector<8x8xf32>
    %c0_16 = arith.constant 0 : index
    %c0_17 = arith.constant 0 : index
    %c0_18 = arith.constant 0 : index
    %53 = vector.load %arg4[%c0_16, %c0_17, %c0_18] : memref<1x8x8xf32, #tpu.memory_space<vmem>>, vector<1x8x8xf32>
    %54 = vector.shape_cast %53 : vector<1x8x8xf32> to vector<8x8xf32>
    %55 = vector.shape_cast %52 : vector<8x8xf32> to vector<1x8x8xf32>
    tpu.vector_store %arg4[%c0_16, %c0_17, %c0_18], %55 {strides = array<i32>} : memref<1x8x8xf32, #tpu.memory_space<vmem>>, vector<1x8x8xf32>,
    return
  }
  func.func @transform_0(%arg0: i32) -> (i32, i32, i32) {
    %c0_i32 = arith.constant 0 : i32
    %c0_i32_0 = arith.constant 0 : i32
    %c0_i32_1 = arith.constant 0 : i32
    return %arg0, %c0_i32, %c0_i32_0 : i32, i32, i32
  }
  func.func @transform_1(%arg0: i32) -> (i32, i32, i32) {
    %c0_i32 = arith.constant 0 : i32
    %c0_i32_0 = arith.constant 0 : i32
    %c0_i32_1 = arith.constant 0 : i32
    %c0_i32_2 = arith.constant 0 : i32
    return %c0_i32, %c0_i32_0, %c0_i32_1 : i32, i32, i32
  }
  func.func @transform_2(%arg0: i32) -> (i32, i32) {
    %c0_i32 = arith.constant 0 : i32
    %c0_i32_0 = arith.constant 0 : i32
    %c0_i32_1 = arith.constant 0 : i32
    return %c0_i32, %c0_i32_0 : i32, i32
  }
  func.func @transform_3(%arg0: i32) -> (i32, i32, i32) {
    %c0_i32 = arith.constant 0 : i32
    %c0_i32_0 = arith.constant 0 : i32
    %c0_i32_1 = arith.constant 0 : i32
    return %arg0, %c0_i32, %c0_i32_0 : i32, i32, i32
  }
}

module attributes {stable_mosaic.version = 11 : i64} {
  func.func @_matmul_kernel(%arg0: i32, %arg1: memref<8x128xbf16, #tpu.memory_space<vmem>>, %arg2: memref<128x8xbf16, #tpu.memory_space<vmem>>, %arg3: memref<1x8xf32, #tpu.memory_space<vmem>>, %arg4: memref<8x8xf32, #tpu.memory_space<vmem>>) attributes {dimension_semantics = [#tpu.dimension_semantics<parallel>], iteration_bounds = array<i64: 1>, scalar_prefetch = 0 : i64, scratch_operands = 0 : i64, tpu.core_type = #tpu.core_type<tc>, window_params = [{transform_indices = @transform_0, window_bounds = array<i64: 8, 128>}, {pipeline_mode = #tpu.pipeline_mode<synchronous>, transform_indices = @transform_1, window_bounds = array<i64: 128, 8>}, {pipeline_mode = #tpu.pipeline_mode<synchronous>, transform_indices = @transform_2, window_bounds = array<i64: 1, 8>}, {transform_indices = @transform_3, window_bounds = array<i64: 8, 8>}]} {
    %c0 = arith.constant 0 : index
    %c0_0 = arith.constant 0 : index
    %0 = vector.load %arg1[%c0, %c0_0] : memref<8x128xbf16, #tpu.memory_space<vmem>>, vector<8x128xbf16>
    %c0_1 = arith.constant 0 : index
    %c0_2 = arith.constant 0 : index
    %1 = vector.load %arg2[%c0_1, %c0_2] : memref<128x8xbf16, #tpu.memory_space<vmem>>, vector<128x8xbf16>
    %cst = arith.constant dense<0.000000e+00> : vector<8x8xf32>
    %2 = tpu.matmul %0, %1, %cst {dimension_numbers = #tpu.dot_dimension_numbers<[1], [0], [0], [1], [0, 0, 1, 1], [], []>} : vector<8x128xbf16>, vector<128x8xbf16>, vector<8x8xf32> -> vector<8x8xf32>
    %c0_3 = arith.constant 0 : index
    %c0_4 = arith.constant 0 : index
    %3 = vector.load %arg3[%c0_3, %c0_4] : memref<1x8xf32, #tpu.memory_space<vmem>>, vector<1x8xf32>
    %4 = vector.broadcast %3 : vector<1x8xf32> to vector<8x8xf32>
    %5 = arith.addf %2, %4 : vector<8x8xf32>
    %cst_5 = arith.constant 0.000000e+00 : f32
    %6 = vector.broadcast %cst_5 : f32 to vector<8x8xf32>
    %7 = arith.cmpf ogt, %5, %6 : vector<8x8xf32>
    %cst_6 = arith.constant 0.00999999977 : f32
    %8 = vector.broadcast %cst_6 : f32 to vector<8x8xf32>
    %9 = arith.mulf %8, %5 : vector<8x8xf32>
    %10 = arith.select %7, %5, %9 : vector<8x8xi1>, vector<8x8xf32>
    %c0_7 = arith.constant 0 : index
    %c0_8 = arith.constant 0 : index
    %11 = vector.load %arg4[%c0_7, %c0_8] : memref<8x8xf32, #tpu.memory_space<vmem>>, vector<8x8xf32>
    tpu.vector_store %arg4[%c0_7, %c0_8], %10 {strides = array<i32>} : memref<8x8xf32, #tpu.memory_space<vmem>>, vector<8x8xf32>,
    return
  }
  func.func @transform_0(%arg0: i32) -> (i32, i32) {
    %c0_i32 = arith.constant 0 : i32
    %c0_i32_0 = arith.constant 0 : i32
    return %arg0, %c0_i32 : i32, i32
  }
  func.func @transform_1(%arg0: i32) -> (i32, i32) {
    %c0_i32 = arith.constant 0 : i32
    %c0_i32_0 = arith.constant 0 : i32
    %c0_i32_1 = arith.constant 0 : i32
    return %c0_i32, %c0_i32_0 : i32, i32
  }
  func.func @transform_2(%arg0: i32) -> (i32, i32) {
    %c0_i32 = arith.constant 0 : i32
    %c0_i32_0 = arith.constant 0 : i32
    %c0_i32_1 = arith.constant 0 : i32
    return %c0_i32, %c0_i32_0 : i32, i32
  }
  func.func @transform_3(%arg0: i32) -> (i32, i32) {
    %c0_i32 = arith.constant 0 : i32
    %c0_i32_0 = arith.constant 0 : i32
    return %arg0, %c0_i32 : i32, i32
  }
}

module attributes {stable_mosaic.version = 11 : i64} {
  func.func @_matmul_kernel(%arg0: i32, %arg1: memref<2x32xbf16, #tpu.memory_space<vmem>>, %arg2: memref<32x32xbf16, #tpu.memory_space<vmem>>, %arg3: memref<1x32xf32, #tpu.memory_space<vmem>>, %arg4: memref<2x32xf32, #tpu.memory_space<vmem>>) attributes {dimension_semantics = [#tpu.dimension_semantics<parallel>], iteration_bounds = array<i64: 1>, scalar_prefetch = 0 : i64, scratch_operands = 0 : i64, tpu.core_type = #tpu.core_type<tc>, window_params = [{transform_indices = @transform_0, window_bounds = array<i64: 2, 32>}, {pipeline_mode = #tpu.pipeline_mode<synchronous>, transform_indices = @transform_1, window_bounds = array<i64: 32, 32>}, {pipeline_mode = #tpu.pipeline_mode<synchronous>, transform_indices = @transform_2, window_bounds = array<i64: 1, 32>}, {transform_indices = @transform_3, window_bounds = array<i64: 2, 32>}]} {
    %c0 = arith.constant 0 : index
    %c0_0 = arith.constant 0 : index
    %0 = vector.load %arg1[%c0, %c0_0] : memref<2x32xbf16, #tpu.memory_space<vmem>>, vector<2x32xbf16>
    %c0_1 = arith.constant 0 : index
    %c0_2 = arith.constant 0 : index
    %1 = vector.load %arg2[%c0_1, %c0_2] : memref<32x32xbf16, #tpu.memory_space<vmem>>, vector<32x32xbf16>
    %cst = arith.constant dense<0.000000e+00> : vector<2x32xf32>
    %2 = tpu.matmul %0, %1, %cst {dimension_numbers = #tpu.dot_dimension_numbers<[1], [0], [0], [1], [0, 0, 1, 1], [], []>} : vector<2x32xbf16>, vector<32x32xbf16>, vector<2x32xf32> -> vector<2x32xf32>
    %c0_3 = arith.constant 0 : index
    %c0_4 = arith.constant 0 : index
    %3 = vector.load %arg3[%c0_3, %c0_4] : memref<1x32xf32, #tpu.memory_space<vmem>>, vector<1x32xf32>
    %4 = vector.broadcast %3 : vector<1x32xf32> to vector<2x32xf32>
    %5 = arith.addf %2, %4 : vector<2x32xf32>
    %cst_5 = arith.constant 0.000000e+00 : f32
    %6 = vector.broadcast %cst_5 : f32 to vector<2x32xf32>
    %7 = arith.cmpf ogt, %5, %6 : vector<2x32xf32>
    %cst_6 = arith.constant 0.00999999977 : f32
    %8 = vector.broadcast %cst_6 : f32 to vector<2x32xf32>
    %9 = arith.mulf %8, %5 : vector<2x32xf32>
    %10 = arith.select %7, %5, %9 : vector<2x32xi1>, vector<2x32xf32>
    %c0_7 = arith.constant 0 : index
    %c0_8 = arith.constant 0 : index
    %11 = vector.load %arg4[%c0_7, %c0_8] : memref<2x32xf32, #tpu.memory_space<vmem>>, vector<2x32xf32>
    tpu.vector_store %arg4[%c0_7, %c0_8], %10 {strides = array<i32>} : memref<2x32xf32, #tpu.memory_space<vmem>>, vector<2x32xf32>,
    return
  }
  func.func @transform_0(%arg0: i32) -> (i32, i32) {
    %c0_i32 = arith.constant 0 : i32
    %c0_i32_0 = arith.constant 0 : i32
    return %arg0, %c0_i32 : i32, i32
  }
  func.func @transform_1(%arg0: i32) -> (i32, i32) {
    %c0_i32 = arith.constant 0 : i32
    %c0_i32_0 = arith.constant 0 : i32
    %c0_i32_1 = arith.constant 0 : i32
    return %c0_i32, %c0_i32_0 : i32, i32
  }
  func.func @transform_2(%arg0: i32) -> (i32, i32) {
    %c0_i32 = arith.constant 0 : i32
    %c0_i32_0 = arith.constant 0 : i32
    %c0_i32_1 = arith.constant 0 : i32
    return %c0_i32, %c0_i32_0 : i32, i32
  }
  func.func @transform_3(%arg0: i32) -> (i32, i32) {
    %c0_i32 = arith.constant 0 : i32
    %c0_i32_0 = arith.constant 0 : i32
    return %arg0, %c0_i32 : i32, i32
  }
}

</mosaic_0001>

<bundles_post_ra>
// kernel: encoder_forward.12
= control target key start
LH: loop header
LB: loop body
LE: loop exit
PB: predicated region body
PF: predicated region fallthrough
CT: control target
= control target key end

     0   :  { %s4202_s12 = smov 0   ;;  %s5292_s0 = inlined_call_operand.vmem [shape: f32[2,332,4], index: 0, kind: input, shape index: {}]   ;;  %s5293_s1 = inlined_call_operand.vmem [shape: bf16[9,4,2], index: 1, kind: input, shape index: {}]   ;;  %s5294_s2 = inlined_call_operand.vmem [shape: f32[1,2], index: 2, kind: input, shape index: {}]   ;;  %s5295_s3 = inlined_call_operand.vmem [shape: f32[2,288,2], index: 3, kind: output, shape index: {}]  }
   0x1 LB: > { %s3179_s13 = sadd.s32 4294967295, %s4180_s12   ;;  %p3183_p0 = scmp.ge.s32.totalorder %s4180_s12, 1  ;;  %s4180_s12 = sphi %s4202_s12, %s13_s12  }
   0x2   : > { %p137_p1 = scmp.lt.s32.totalorder %s4180_s12, 3 }
   0x4   : > { %p138_p2 = pnand %p3183_p0, %p137_p1 }
   0x6   : > { %141 = sbr.rel (%p138_p2) target bundleno = 575 (0x23f), region = 32 }
   0xd   : > { %v4213_v0 = vld [vmem:[%s5293_s1 + $0x8] sm:$0x3]  ;;  %vm448_vm0 = vcmask 1041408   ;;  %v236_v1 = vld [vmem:[%s5293_s1 + $0x2] sm:$0x3]  ;;  %p161_p3 = scmp.lt.s32.totalorder %s3179_s13, 1 }
   0xe   : > { %5326 = vst [vmem:[#allocation2_spill] sm:$0xff] %v4213_v0  ;;  %4158 = vmatprep.subr.msk.bf16.mxu0 %vm448_vm0, %v4213_v0  ;;  %4154 = vmatprep.subr.msk.bf16.mxu1 %vm448_vm0, %v236_v1  ;;  %v4223_v2 = vsel %vm448_vm0, %v4213_v0, 0  ;;  %v450_v3 = vsel %vm448_vm0, %v236_v1, 0  ;;  %v240_v4 = vld [vmem:[%s5293_s1 + $0xa] sm:$0x3]  ;;  %vm393_vm2 = vcmask 31744  }
   0xf   : > { %5327 = vst [vmem:[#allocation3_spill] sm:$0xff] %v4223_v2  ;;  %3675 = vmatpush3.bf16.msra.mxu0 %v4223_v2  ;;  %3523 = vmatpush3.bf16.msra.mxu1 %v450_v3  ;;  %s5362_s13 = smov (!%p161_p3, %s3179_s13), 1  ;;  %v235_v5 = vld [vmem:[%s5293_s1] sm:$0x3]  ;;  %vm244_vm1 = vsmask.f32 7424 }
  0x10   : > { %4160 = vmatprep.subr.msk.bf16.mxu0 %vm448_vm0, %v240_v4  ;;  %s4164_s22 = smul.u32 336, %s5362_s13  ;;  %4155 = vmatprep.subr.msk.bf16.mxu1 %vm448_vm0, %v235_v5  ;;  %vm1394_vm3 = vsmask.f32 6400  ;;  %v1840_v17 = vsel %vm448_vm0, %v240_v4, 0  ;;  %v666_v23 = vsel %vm448_vm0, %v235_v5, 0  ;;  %vm1747_vm4 = vcmask 1045504  }
  0x11   : > { %v4312_v62 = vld [vmem:[%s5293_s1 + $0x4] sm:$0x3]  ;;  %vm2277_vm5 = vsmask.f32 5376  ;;  %vm864_vm6 = vcmask 1046528   ;;  %vm2628_vm7 = vcmask 1044480  }
  0x12   : > { %s4241_s25 = scalar_lea.vmem %s5292_s0, %s4164_s22  ;;  %s4165_s11 = smul.u32 288, %s5362_s13  ;;  %vm3087_vm9 = vcmask 15360  }
  0x13   : > { %v172_v6 = vld [vmem:[%s4241_s25] sm:$0xff]  ;;  %v173_v7 = vld [vmem:[%s4241_s25 + $0x8] sm:$0xff]  ;;  %v174_v8 = vld [vmem:[%s4241_s25 + $0x10] sm:$0xff] }
  0x14   : > { %v175_v9 = vld [vmem:[%s4241_s25 + $0x18] sm:$0xff]  ;;  %v4247_v10 = vpack.c.bf16 %v173_v7, %v172_v6  ;;  %v176_v11 = vld [vmem:[%s4241_s25 + $0x20] sm:$0xff]  ;;  %v177_v12 = vld [vmem:[%s4241_s25 + $0x28] sm:$0xff]  ;;  %s5169_s16 = scalar_lea.vmem %s5295_s3, %s4165_s11 }
  0x15   : > { %v4251_v13 = vpack.c.bf16 %v175_v9, %v174_v8  ;;  %v4253_v14 = vpack.c.bf16 %v177_v12, %v176_v11  ;;  %v178_v15 = vld [vmem:[%s4241_s25 + $0x30] sm:$0xff]  ;;  %v179_v16 = vld [vmem:[%s4241_s25 + $0x38] sm:$0xff]  ;;  %v180_v18 = vld [vmem:[%s4241_s25 + $0x40] sm:$0xff] }
  0x16   : > { %v246_v19 = vshrl.u32 %v4247_v10, 16  ;;  %v248_v20 = vshll.u32 %v4247_v10, 16  ;;  %v4261_v21 = vpack.c.bf16 %v179_v16, %v178_v15  ;;  %v181_v22 = vld [vmem:[%s4241_s25 + $0x48] sm:$0xff]  ;;  %v182_v44 = vld [vmem:[%s4241_s25 + $0x50] sm:$0xff]  ;;  %v183_v49 = vld [vmem:[%s4241_s25 + $0x58] sm:$0xff] }
  0x17   : > { %v253_v24 = vshll.u32 %v4251_v13, 16  ;;  %v257_v25 = vshrl.u32 %v4251_v13, 16  ;;  %v4268_v26 = vshll.u32 %v4253_v14, 16  ;;  %v4271_v27 = vshrl.u32 %v4253_v14, 16  ;;  %v184_v50 = vld [vmem:[%s4241_s25 + $0x60] sm:$0xff]  ;;  %v185_v51 = vld [vmem:[%s4241_s25 + $0x68] sm:$0xff] }
  0x18   : > { %v250_v28 = vrot.slane %v248_v20, 1  ;;  %v4274_v29 = vshll.u32 %v4261_v21, 16  ;;  %v4277_v30 = vshrl.u32 %v4261_v21, 16  ;;  %v4279_v31 = vpack.c.bf16 %v181_v22, %v180_v18  ;;  %v186_v56 = vld [vmem:[%s4241_s25 + $0x70] sm:$0xff]  ;;  %v187_v57 = vld [vmem:[%s4241_s25 + $0x78] sm:$0xff]  ;;  %v188_v5 = vld [vmem:[%s4241_s25 + $0x80] sm:$0xff] }
  0x19   : > { %v255_v32 = vrot.slane %v253_v24, 1  ;;  %v1395_v33 = vrot.slane %v257_v25, 1  ;;  %v1396_v34 = vrot.slane %v253_v24, 2  ;;  %v1398_v35 = vrot.slane %v4271_v27, 1  ;;  %v189_v6 = vld [vmem:[%s4241_s25 + $0x88] sm:$0xff] }
  0x1a   : > { %v251_v36 = vor.u32 %v250_v28, %v246_v19  ;;  %v1399_v37 = vrot.slane %v4268_v26, 2  ;;  %v263_v38 = vrot.slane %v4268_v26, 1  ;;  %v1402_v39 = vrot.slane %v4277_v30, 1  ;;  %v4327_v7 = vld [vmem:[%s5293_s1 + $0xc] sm:$0x3] }
  0x1b   : > { %v259_v40 = vor.u32 %v257_v25, %v255_v32  ;;  %v1397_v41 = vor.u32 %v1396_v34, %v1395_v33  ;;  %v1403_v42 = vrot.slane %v4274_v29, 2  ;;  %v271_v43 = vrot.slane %v4274_v29, 1 }
  0x1c   : > { %v256_v45 = vsel %vm244_vm1, %v251_v36, %v255_v32  ;;  %v1400_v46 = vor.u32 %v1399_v37, %v1398_v35  ;;  %v267_v47 = vor.u32 %v4271_v27, %v263_v38  ;;  %v4291_v48 = vshll.u32 %v4279_v31, 16 }
  0x1d   : > { %3524 = vmatprep.mubr.msk.bf16.mxu1 %vm393_vm2, %v256_v45  ;;  %v264_v52 = vsel %vm244_vm1, %v259_v40, %v263_v38  ;;  %v1404_v53 = vor.u32 %v1403_v42, %v1402_v39  ;;  %v4299_v54 = vshrl.u32 %v4279_v31, 16  ;;  %v275_v55 = vor.u32 %v4277_v30, %v271_v43  ;;  %v191_v42 = vld [vmem:[%s4241_s25 + $0x98] sm:$0xff] }
  0x1e   : > { %v1401_v58 = vsel %vm1394_vm3, %v1397_v41, %v1400_v46  ;;  %3525 = vmatmul.mubr.msk.bf16.vlgmr.msra.gmra.mrb[0].mxu1 %vm393_vm2, %v264_v52  ;;  %v272_v59 = vsel %vm244_vm1, %v267_v47, %v271_v43  ;;  %v1407_v60 = vrot.slane %v4291_v48, 2  ;;  %v279_v61 = vrot.slane %v4291_v48, 1  ;;  %v190_v41 = vld [vmem:[%s4241_s25 + $0x90] sm:$0xff]  ;;  %v193_v47 = vld [vmem:[%s4241_s25 + $0xa8] sm:$0xff] }
  0x1f   : > { %3676 = vmatprep.mubr.msk.bf16.mxu0 %vm393_vm2, %v1401_v58  ;;  %v1405_v63 = vsel %vm1394_vm3, %v1400_v46, %v1404_v53  ;;  %3528 = vmatprep.mubr.msk.bf16.mxu1 %vm393_vm2, %v272_v59  ;;  %v1406_v1 = vrot.slane %v4299_v54, 1  ;;  %v4318_v3 = vpack.c.bf16 %v183_v49, %v182_v44  ;;  %v4320_v4 = vpack.c.bf16 %v185_v51, %v184_v50  ;;  %v192_v46 = vld [vmem:[%s4241_s25 + $0xa0] sm:$0xff]  ;;  %v194_v58 = vld [vmem:[%s4241_s25 + $0xb0] sm:$0xff]  ;;  %v195_v59 = vld [vmem:[%s4241_s25 + $0xb8] sm:$0xff] }
  0x20   : > { %3677 = vmatmul.mubr.msk.bf16.vlgmr.msra.gmra.mrb[0].mxu0 %vm393_vm2, %v1405_v63  ;;  %v280_v8 = vsel %vm244_vm1, %v275_v55, %v279_v61  ;;  %3561 = vmatpush3.bf16.msra.mxu1 %v666_v23  ;;  %v283_v9 = vor.u32 %v4299_v54, %v279_v61  ;;  %v4332_v11 = vpack.c.bf16 %v187_v57, %v186_v56 }
  0x21   : > { %3713 = vmatpush3.bf16.msra.mxu0 %v1840_v17  ;;  %v1408_v12 = vor.u32 %v1407_v60, %v1406_v1  ;;  %v4335_v15 = vshll.u32 %v4318_v3, 16  ;;  %v4338_v16 = vshrl.u32 %v4318_v3, 16  ;;  %v4341_v18 = vshll.u32 %v4320_v4, 16  ;;  %4156 = vmatprep.subr.msk.bf16.mxu1 %vm448_vm0, %v4312_v62 }
  0x22   : > { %v4346_v19 = vshrl.u32 %v4320_v4, 16  ;;  %v4349_v20 = vshll.u32 %v4332_v11, 16  ;;  %v4352_v17 = vshrl.u32 %v4332_v11, 16  ;;  %v4354_v22 = vpack.c.bf16 %v189_v6, %v188_v5  ;;  %4161 = vmatprep.subr.msk.bf16.mxu0 %vm448_vm0, %v4327_v7 }
  0x23   : > { %v1409_v23 = vsel %vm1394_vm3, %v1404_v53, %v1408_v12  ;;  %v1410_v24 = vrot.slane %v4338_v16, 1  ;;  %v1411_v25 = vrot.slane %v4335_v15, 2  ;;  %v287_v28 = vrot.slane %v4335_v15, 1 }
  0x24   : > { %3680 = vmatprep.mubr.msk.bf16.mxu0 %vm393_vm2, %v1409_v23  ;;  %v1414_v32 = vrot.slane %v4346_v19, 1  ;;  %v1415_v33 = vrot.slane %v4341_v18, 2  ;;  %v1418_v36 = vrot.slane %v4352_v17, 1  ;;  %v1419_v37 = vrot.slane %v4349_v20, 2 }
  0x25   : > { %v1412_v34 = vor.u32 %v1411_v25, %v1410_v24  ;;  %v288_v35 = vsel %vm244_vm1, %v283_v9, %v287_v28  ;;  %v295_v39 = vrot.slane %v4341_v18, 1  ;;  %v4371_v40 = vshll.u32 %v4354_v22, 16 }
  0x26   : > { %3529 = vmatmul.mubr.msk.bf16.gmra.mrb[4].mxu1 %vm393_vm2, %v280_v8  ;;  %v1416_v38 = vor.u32 %v1415_v33, %v1414_v32  ;;  %v291_v44 = vor.u32 %v4338_v16, %v287_v28  ;;  %v4379_v45 = vshrl.u32 %v4354_v22, 16  ;;  %v303_v51 = vrot.slane %v4349_v20, 1 }
  0x27   : > { %v1413_v43 = vsel %vm1394_vm3, %v1408_v12, %v1412_v34  ;;  %3532 = vmatprep.mubr.msk.bf16.mxu1 %vm393_vm2, %v288_v35  ;;  %v299_v50 = vor.u32 %v4346_v19, %v295_v39  ;;  %v1423_v52 = vrot.slane %v4371_v40, 2  ;;  %v1420_v53 = vor.u32 %v1419_v37, %v1418_v36 }
  0x28   : > { %3681 = vmatmul.mubr.msk.bf16.gmra.mrb[4].mxu0 %vm393_vm2, %v1413_v43  ;;  %v1417_v49 = vsel %vm1394_vm3, %v1412_v34, %v1416_v38  ;;  %v1422_v55 = vrot.slane %v4379_v45, 1  ;;  %v4390_v56 = vpack.c.bf16 %v191_v42, %v190_v41  ;;  %v4392_v57 = vpack.c.bf16 %v193_v47, %v192_v46  ;;  %v196_v43 = vld [vmem:[%s4241_s25 + $0xc0] sm:$0xff] }
  0x29   : > { %3684 = vmatprep.mubr.msk.bf16.mxu0 %vm393_vm2, %v1417_v49  ;;  %v296_v60 = vsel %vm244_vm1, %v291_v44, %v295_v39  ;;  %v304_v5 = vsel %vm244_vm1, %v299_v50, %v303_v51  ;;  %v1421_v9 = vsel %vm1394_vm3, %v1416_v38, %v1420_v53  ;;  %v4413_v24 = vpack.c.bf16 %v195_v59, %v194_v58  ;;  %v197_v44 = vld [vmem:[%s4241_s25 + $0xc8] sm:$0xff] }
  0x2a   : > { %v1424_v61 = vor.u32 %v1423_v52, %v1422_v55  ;;  %v4398_v63 = vshll.u32 %v4390_v56, 16  ;;  %v4401_v1 = vshrl.u32 %v4390_v56, 16  ;;  %v4405_v6 = vshll.u32 %v4392_v57, 16  ;;  %v199_v52 = vld [vmem:[%s4241_s25 + $0xd8] sm:$0xff] }
  0x2b   : > { %v4408_v8 = vshrl.u32 %v4392_v57, 16  ;;  %v311_v28 = vrot.slane %v4371_v40, 1  ;;  %v307_v34 = vor.u32 %v4352_v17, %v303_v51  ;;  %v4427_v38 = vshll.u32 %v4413_v24, 16  ;;  %v198_v51 = vld [vmem:[%s4241_s25 + $0xd0] sm:$0xff] }
  0x2c   : > { %v1426_v12 = vrot.slane %v4401_v1, 1  ;;  %v1427_v23 = vrot.slane %v4398_v63, 2  ;;  %v1425_v25 = vsel %vm1394_vm3, %v1420_v53, %v1424_v61  ;;  %v1431_v33 = vrot.slane %v4405_v6, 2 }
  0x2d   : > { %v1430_v32 = vrot.slane %v4408_v8, 1  ;;  %v315_v35 = vor.u32 %v4379_v45, %v311_v28  ;;  %v319_v36 = vrot.slane %v4398_v63, 1  ;;  %v4430_v39 = vshrl.u32 %v4413_v24, 16 }
  0x2e   : > { %3533 = vmatmul.mubr.msk.bf16.gmra.mrb[8].mxu1 %vm393_vm2, %v296_v60  ;;  %v1428_v37 = vor.u32 %v1427_v23, %v1426_v12  ;;  %v312_v42 = vsel %vm244_vm1, %v307_v34, %v311_v28  ;;  %v1435_v50 = vrot.slane %v4427_v38, 2  ;;  %v327_v55 = vrot.slane %v4405_v6, 1 }
  0x2f   : > { %3536 = vmatprep.mubr.msk.bf16.mxu1 %vm393_vm2, %v304_v5  ;;  %v1432_v41 = vor.u32 %v1431_v33, %v1430_v32  ;;  %v320_v46 = vsel %vm244_vm1, %v315_v35, %v319_v36  ;;  %v1434_v49 = vrot.slane %v4430_v39, 1  ;;  %v4444_v58 = vpack.c.bf16 %v197_v44, %v196_v43  ;;  %v200_v32 = vld [vmem:[%s4241_s25 + $0xe0] sm:$0xff]  ;;  %v201_v33 = vld [vmem:[%s4241_s25 + $0xe8] sm:$0xff]  ;;  %v203_v43 = vld [vmem:[%s4241_s25 + $0xf8] sm:$0xff] }
  0x30   : > { %3685 = vmatmul.mubr.msk.bf16.gmra.mrb[8].mxu0 %vm393_vm2, %v1421_v9  ;;  %v1429_v47 = vsel %vm1394_vm3, %v1424_v61, %v1428_v37  ;;  %v323_v59 = vor.u32 %v4401_v1, %v319_v36  ;;  %v331_v60 = vor.u32 %v4408_v8, %v327_v55  ;;  %v335_v61 = vrot.slane %v4427_v38, 1 }
  0x31   : > { %3688 = vmatprep.mubr.msk.bf16.mxu0 %vm393_vm2, %v1425_v25  ;;  %v1433_v53 = vsel %vm1394_vm3, %v1428_v37, %v1432_v41  ;;  %v4451_v5 = vpack.c.bf16 %v199_v52, %v198_v51  ;;  %v4454_v9 = vor.u32 %v1435_v50, %v1434_v49  ;;  %v1748_v12 = vrot.slane %v4251_v13, 2 }
  0x32   : > { %v1749_v23 = vrot.slane %v4253_v14, 2  ;;  %v4459_v25 = vshll.u32 %v4444_v58, 16  ;;  %v328_v28 = vsel %vm244_vm1, %v323_v59, %v327_v55  ;;  %v336_v34 = vsel %vm244_vm1, %v331_v60, %v335_v61 }
  0x33   : > { %5328 = vst [vmem:[#allocation4_spill] sm:$0xff] %v4454_v9  ;;  %v4466_v35 = vshrl.u32 %v4444_v58, 16  ;;  %v4469_v36 = vshll.u32 %v4451_v5, 16  ;;  %v1437_v37 = vsel %vm1394_vm3, %v1432_v41, %v4454_v9  ;;  %v339_v49 = vor.u32 %v4430_v39, %v335_v61  ;;  %v204_v61 = vld [vmem:[%s4241_s25 + $0x100] sm:$0xff]  ;;  %v211_v9 = vld [vmem:[%s4241_s25 + $0x138] sm:$0xff] }
  0x34   : > { %5329 = vst [vmem:[#allocation5_spill] sm:$0xff] %v4459_v25  ;;  %v1750_v44 = vsel %vm1747_vm4, %v1748_v12, %v1749_v23  ;;  %v1751_v52 = vrot.slane %v4261_v21, 2  ;;  %v4495_v60 = vshrl.u32 %v4451_v5, 16  ;;  %v205_v12 = vld [vmem:[%s4241_s25 + $0x108] sm:$0xff] }
  0x35   : > { %5330 = vst [vmem:[#allocation6_spill] sm:$0xff] %v4466_v35  ;;  %5331 = vst [vmem:[#allocation7_spill] sm:$0xff] %v4469_v36  ;;  %v351_v50 = vrot.slane %v4469_v36, 1 }
  0x36   : > { %3537 = vmatmul.mubr.msk.bf16.gmra.mrb[12].mxu1 %vm393_vm2, %v312_v42  ;;  %v202_v42 = vld [vmem:[%s4241_s25 + $0xf0] sm:$0xff]  ;;  %5333 = vst [vmem:[#allocation9_spill] sm:$0xff] %v4495_v60 }
  0x37   : > { %3540 = vmatprep.mubr.msk.bf16.mxu1 %vm393_vm2, %v320_v46  ;;  %v343_v46 = vrot.slane %v4459_v25, 1  ;;  %v4485_v51 = vpack.c.bf16 %v203_v43, %v202_v42  ;;  %v207_v42 = vld [vmem:[%s4241_s25 + $0x118] sm:$0xff]  ;;  %v2062_v43 = vsel %vm448_vm0, %v4327_v7, 0 }
  0x38   : > { %3689 = vmatmul.mubr.msk.bf16.gmra.mrb[12].mxu0 %vm393_vm2, %v1429_v47  ;;  %v4478_v47 = vpack.c.bf16 %v201_v33, %v200_v32 }
  0x39   : > { %3692 = vmatprep.mubr.msk.bf16.mxu0 %vm393_vm2, %v1433_v53  ;;  %v347_v41 = vor.u32 %v4466_v35, %v343_v46  ;;  %v1753_v53 = vrot.slane %v4279_v31, 2  ;;  %v344_v59 = vsel %vm244_vm1, %v339_v49, %v343_v46  ;;  %v4504_v33 = vshll.u32 %v4485_v51, 16 }
  0x3a   : > { %v4491_v55 = vshll.u32 %v4478_v47, 16  ;;  %v4501_v32 = vshrl.u32 %v4478_v47, 16  ;;  %v4518_v49 = vpack.c.bf16 %v205_v12, %v204_v61 }
  0x3b   : > { %5335 = vst [vmem:[#allocation11_spill] sm:$0xff] %v4504_v33 }
  0x3c   : > { %5332 = vst [vmem:[#allocation8_spill] sm:$0xff] %v4491_v55  ;;  %5334 = vst [vmem:[#allocation10_spill] sm:$0xff] %v4501_v32  ;;  %v359_v46 = vrot.slane %v4491_v55, 1  ;;  %v4542_v2 = vshll.u32 %v4518_v49, 16  ;;  %v212_v55 = vld [vmem:[%s4241_s25 + $0x140] sm:$0xff] }
  0x3e   : > { %3541 = vmatmul.mubr.msk.bf16.gmra.mrb[16].mxu1 %vm393_vm2, %v328_v28  ;;  %v352_v28 = vsel %vm244_vm1, %v347_v41, %v351_v50  ;;  %v210_v41 = vld [vmem:[%s4241_s25 + $0x130] sm:$0xff]  ;;  %v363_v7 = vor.u32 %v4501_v32, %v359_v46  ;;  %5336 = vst [vmem:[#allocation12_spill] sm:$0xff] %v4542_v2  ;;  %v209_v32 = vld [vmem:[%s4241_s25 + $0x128] sm:$0xff] }
  0x3f   : > { %3544 = vmatprep.mubr.msk.bf16.mxu1 %vm393_vm2, %v336_v34  ;;  %v4507_v34 = vsel %vm1747_vm4, %v1749_v23, %v1751_v52  ;;  %v355_v23 = vor.u32 %v4495_v60, %v351_v50  ;;  %v1755_v50 = vrot.slane %v4318_v3, 2  ;;  %v4538_v12 = vpack.c.bf16 %v211_v9, %v210_v41 }
  0x40   : > { %3693 = vmatmul.mubr.msk.bf16.gmra.mrb[16].mxu0 %vm393_vm2, %v1437_v37  ;;  %v206_v37 = vld [vmem:[%s4241_s25 + $0x110] sm:$0xff]  ;;  %v4558_v41 = vshrl.u32 %v4518_v49, 16 }
  0x41   : > { %3714 = vmatprep.mubr.msk.bf16.mxu0 %vm393_vm2, %v1750_v44  ;;  %v4515_v44 = vsel %vm1747_vm4, %v1751_v52, %v1753_v53  ;;  %v367_v52 = vrot.slane %v4504_v33, 1  ;;  %v4533_v61 = vpack.c.bf16 %v207_v42, %v206_v37  ;;  %v213_v33 = vld [vmem:[%s4241_s25 + $0x148] sm:$0xf]  ;;  %v360_v37 = vsel %vm244_vm1, %v355_v23, %v359_v46 }
  0x42   : > { %v4550_v42 = vshrl.u32 %v4485_v51, 16  ;;  %v4554_v36 = vpack.c.bf16 %v213_v33, %v212_v55  ;;  %5339 = vst [vmem:[#allocation15_spill] sm:$0xff] %v4558_v41  ;;  %v4564_v25 = vsel %vm1747_vm4, %v1753_v53, %v1755_v50  ;;  %v5314_v46 = vrot.slane %v4538_v12, 2 }
  0x43   : > { %v368_v9 = vsel %vm244_vm1, %v363_v7, %v367_v52  ;;  %v4561_v60 = vshll.u32 %v4533_v61, 16  ;;  %v375_v33 = vrot.slane %v4542_v2, 1 }
  0x44   : > { %5337 = vst [vmem:[#allocation13_spill] sm:$0xff] %v4550_v42  ;;  %5338 = vst [vmem:[#allocation14_spill] sm:$0xff] %v4554_v36  ;;  %v2056_v23 = vrot.slane %v4554_v36, 2  ;;  %v371_v35 = vor.u32 %v4550_v42, %v367_v52  ;;  %v2278_v36 = vrot.slane %v4271_v27, 2  ;;  %v1759_v52 = vrot.slane %v4332_v11, 2 }
  0x45   : > { %5340 = vst [vmem:[#allocation16_spill] sm:$0xff] %v4561_v60  ;;  %v2286_v42 = vrot.slane %v4291_v48, 3 }
  0x46   : > { %3545 = vmatmul.mubr.msk.bf16.gmra.mrb[20].mxu1 %vm393_vm2, %v344_v59  ;;  %v4527_v59 = vld [vmem:[%s5293_s1 + $0xe] sm:$0x3]  ;;  %v4580_v53 = vsel %vm1747_vm4, %v5314_v46, %v2056_v23  ;;  %v2282_v23 = vrot.slane %v4274_v29, 3  ;;  %v4595_v46 = vshrl.u32 %v4533_v61, 16 }
  0x47   : > { %3548 = vmatprep.mubr.msk.bf16.mxu1 %vm393_vm2, %v352_v28  ;;  %v1757_v28 = vrot.slane %v4320_v4, 2  ;;  %5341 = vst [vmem:[#allocation17_spill] sm:$0xff] %v4580_v53 }
  0x48   : > { %3715 = vmatmul.mubr.msk.bf16.vlgmr.msra.gmra.mrb[0].mxu0 %vm393_vm2, %v4507_v34 }
  0x49   : > { %3751 = vmatpush3.bf16.msra.mxu0 %v2062_v43  ;;  %3718 = vmatprep.mubr.msk.bf16.mxu0 %vm393_vm2, %v4515_v44  ;;  %v208_v43 = vld [vmem:[%s4241_s25 + $0x120] sm:$0xff]  ;;  %v4570_v55 = vsel %vm1747_vm4, %v1755_v50, %v1757_v28  ;;  %v383_v50 = vrot.slane %v4561_v60, 1 }
  0x4a   : > { %4162 = vmatprep.subr.msk.bf16.mxu0 %vm448_vm0, %v4527_v59  ;;  %v4573_v7 = vpack.c.bf16 %v209_v32, %v208_v43  ;;  %v2279_v32 = vrot.slane %v4268_v26, 3  ;;  %v1761_v43 = vrot.slane %v4354_v22, 2  ;;  %v376_v26 = vsel %vm244_vm1, %v371_v35, %v375_v33 }
  0x4c   : > { %v4598_v60 = vshll.u32 %v4573_v7, 16  ;;  %v2280_v27 = vor.u32 %v2279_v32, %v2278_v36  ;;  %v4612_v36 = vsel %vm1747_vm4, %v1759_v52, %v1761_v43 }
  0x4e   : > { %3549 = vmatmul.mubr.msk.bf16.gmra.mrb[24].mxu1 %vm393_vm2, %v360_v37  ;;  %v379_v37 = vor.u32 %v4558_v41, %v375_v33  ;;  %v2285_v41 = vrot.slane %v4299_v54, 2  ;;  %v387_v54 = vor.u32 %v4595_v46, %v383_v50  ;;  %v391_v48 = vrot.slane %v4598_v60, 1 }
  0x4f   : > { %3552 = vmatprep.mubr.msk.bf16.mxu1 %vm393_vm2, %v368_v9  ;;  %v2281_v9 = vrot.slane %v4277_v30, 2  ;;  %v4605_v30 = vsel %vm1747_vm4, %v1757_v28, %v1759_v52  ;;  %v1763_v28 = vrot.slane %v4390_v56, 2  ;;  %v1765_v33 = vrot.slane %v4392_v57, 2 }
  0x50   : > { %3719 = vmatmul.mubr.msk.bf16.gmra.mrb[4].mxu0 %vm393_vm2, %v4564_v25  ;;  %v384_v53 = vsel %vm244_vm1, %v379_v37, %v383_v50  ;;  %v2287_v0 = vor.u32 %v2286_v42, %v2285_v41  ;;  %v2289_v42 = vrot.slane %v4338_v16, 2  ;;  %v2290_v41 = vrot.slane %v4335_v15, 3 }
  0x51   : > { %3722 = vmatprep.mubr.msk.bf16.mxu0 %vm393_vm2, %v4570_v55  ;;  %v2283_v2 = vor.u32 %v2282_v23, %v2281_v9  ;;  %v2294_v50 = vrot.slane %v4341_v18, 3  ;;  %v4632_v32 = vsel %vm1747_vm4, %v1761_v43, %v1763_v28  ;;  %v4639_v16 = vsel %vm1747_vm4, %v1763_v28, %v1765_v33 }
  0x52   : > { %v2291_v37 = vor.u32 %v2290_v41, %v2289_v42  ;;  %v1767_v43 = vrot.slane %v4413_v24, 2  ;;  %v1769_v9 = vrot.slane %v4444_v58, 2  ;;  %v2306_v42 = vrot.slane %v4398_v63, 3 }
  0x53   : > { %v4608_v29 = vsel %vm2277_vm5, %v2280_v27, %v2283_v2  ;;  %v4618_v35 = vsel %vm2277_vm5, %v2283_v2, %v2287_v0  ;;  %v2293_v2 = vrot.slane %v4346_v19, 2  ;;  %v2297_v19 = vrot.slane %v4352_v17, 2  ;;  %v4667_v17 = vld [vmem:[%s5293_s1 + $0x6] sm:$0x3] }
  0x54   : > { %v4635_v52 = vsel %vm2277_vm5, %v2287_v0, %v2291_v37  ;;  %v2298_v0 = vrot.slane %v4349_v20, 3  ;;  %v2301_v27 = vrot.slane %v4379_v45, 2  ;;  %v4662_v20 = vsel %vm1747_vm4, %v1765_v33, %v1767_v43 }
  0x55   : > { %v2295_v15 = vor.u32 %v2294_v50, %v2293_v2  ;;  %v2305_v45 = vrot.slane %v4401_v1, 2  ;;  %v1771_v41 = vrot.slane %v4451_v5, 2  ;;  %v1773_v33 = vrot.slane %v4478_v47, 2 }
  0x56   : > { %3553 = vmatmul.mubr.msk.bf16.gmra.mrb[28].mxu1 %vm393_vm2, %v376_v26  ;;  %v2299_v23 = vor.u32 %v2298_v0, %v2297_v19  ;;  %v2302_v26 = vrot.slane %v4371_v40, 3  ;;  %v4672_v40 = vsel %vm1747_vm4, %v1767_v43, %v1769_v9  ;;  %v2310_v2 = vrot.slane %v4405_v6, 3 }
  0x57   : > { %3556 = vmatprep.mubr.msk.bf16.mxu1 %vm393_vm2, %v384_v53  ;;  %v392_v53 = vsel %vm244_vm1, %v387_v54, %v391_v48  ;;  %v4646_v18 = vsel %vm2277_vm5, %v2291_v37, %v2295_v15  ;;  %v957_v54 = vsel %vm448_vm0, %v4312_v62, 0  ;;  %v2309_v37 = vrot.slane %v4408_v8, 2 }
  0x58   : > { %3723 = vmatmul.mubr.msk.bf16.gmra.mrb[8].mxu0 %vm393_vm2, %v4605_v30  ;;  %v4659_v48 = vsel %vm2277_vm5, %v2295_v15, %v2299_v23  ;;  %v2303_v28 = vor.u32 %v2302_v26, %v2301_v27  ;;  %v4695_v15 = vsel %vm1747_vm4, %v1769_v9, %v1771_v41  ;;  %v4700_v63 = vsel %vm1747_vm4, %v1771_v41, %v1773_v33 }
  0x59   : > { %3726 = vmatprep.mubr.msk.bf16.mxu0 %vm393_vm2, %v4612_v36  ;;  %v2311_v1 = vor.u32 %v2310_v2, %v2309_v37  ;;  %v2313_v6 = vrot.slane %v4430_v39, 2  ;;  %v2314_v19 = vrot.slane %v4427_v38, 3  ;;  %v1775_v0 = vrot.slane %v4485_v51, 2 }
  0x5a   : > { %v4677_v62 = vsel %vm2277_vm5, %v2299_v23, %v2303_v28  ;;  %v1777_v43 = vrot.slane %v4518_v49, 2  ;;  %v1779_v39 = vrot.slane %v4533_v61, 2  ;;  %v1781_v26 = vrot.slane %v4573_v7, 2 }
  0x5b   : > { %v4715_v9 = vor.u32 %v2314_v19, %v2313_v6  ;;  %v4722_v27 = vsel %vm1747_vm4, %v1773_v33, %v1775_v0  ;;  %v2413_v41 = vsel %vm448_vm0, %v4527_v59, 0  ;;  %v4773_v33 = vld [vmem:[%s5293_s1 + $0x10] sm:$0x3]  ;;  %v868_v59 = vrot.slane %v4253_v14, 1 }
  0x5c   : > { %v4727_v38 = vsel %vm1747_vm4, %v1775_v0, %v1777_v43  ;;  %v884_v19 = vrot.slane %v4392_v57, 1  ;;  %v886_v0 = vrot.slane %v4413_v24, 1 }
  0x5d   : > { %v4719_v23 = vsel %vm2277_vm5, %v2311_v1, %v4715_v9 }
  0x5e   : > { %3557 = vmatmul.mubr.msk.bf16.gmra.mrb[32].mxu1 %vm393_vm2, %v392_v53  ;;  %v2307_v53 = vor.u32 %v2306_v42, %v2305_v45  ;;  %v5342_v45 = vrot.slane %v4538_v12, 2 }
  0x5f   : > { %3562 = vmatprep.mubr.msk.bf16.mxu1 %vm393_vm2, %v4247_v10 }
  0x60   : > { %3727 = vmatmul.mubr.msk.bf16.gmra.mrb[12].mxu0 %vm393_vm2, %v4632_v32  ;;  %v4692_v50 = vsel %vm2277_vm5, %v2303_v28, %v2307_v53  ;;  %v4705_v8 = vsel %vm2277_vm5, %v2307_v53, %v2311_v1  ;;  %v4743_v28 = vsel %vm1747_vm4, %v1779_v39, %v1781_v26  ;;  %v4754_v42 = vsel %vm1747_vm4, %v1781_v26, %v5342_v45 }
  0x61   : > { %3730 = vmatprep.mubr.msk.bf16.mxu0 %vm393_vm2, %v4639_v16  ;;  %v878_v53 = vrot.slane %v4332_v11, 1  ;;  %v882_v1 = vrot.slane %v4390_v56, 1  ;;  %v1469_v26 = vshrl.u32 %v4538_v12, 16  ;;  %v890_v45 = vrot.slane %v4451_v5, 1 }
  0x66   : > { %3563 = vmatmul.mubr.msk.bf16.vlgmr.msra.gmra.mrb[0].mxu1 %vm393_vm2, %v4251_v13 }
  0x67   : > { %3566 = vmatprep.mubr.msk.bf16.mxu1 %vm393_vm2, %v4253_v14  ;;  %3599 = vmatpush3.bf16.msra.mxu1 %v957_v54  ;;  %v4738_v54 = vsel %vm1747_vm4, %v1777_v43, %v1779_v39  ;;  %v4878_v43 = vsel %vm864_vm6, %v882_v1, %v884_v19  ;;  %v888_v39 = vrot.slane %v4444_v58, 1 }
  0x68   : > { %3731 = vmatmul.mubr.msk.bf16.gmra.mrb[16].mxu0 %vm393_vm2, %v4662_v20  ;;  %4157 = vmatprep.subr.msk.bf16.mxu1 %vm448_vm0, %v4667_v17 }
  0x69   : > { %3734 = vmatprep.mubr.msk.bf16.mxu0 %vm393_vm2, %v4672_v40 }
  0x6e   : > { %3567 = vmatmul.mubr.msk.bf16.gmra.mrb[4].mxu1 %vm393_vm2, %v4261_v21 }
  0x6f   : > { %3570 = vmatprep.mubr.msk.bf16.mxu1 %vm393_vm2, %v4279_v31 }
  0x70   : > { %3735 = vmatmul.mubr.msk.bf16.gmra.mrb[20].mxu0 %vm393_vm2, %v4695_v15 }
  0x71   : > { %3738 = vmatprep.mubr.msk.bf16.mxu0 %vm393_vm2, %v4700_v63 }
  0x76   : > { %3571 = vmatmul.mubr.msk.bf16.gmra.mrb[8].mxu1 %vm393_vm2, %v4318_v3 }
  0x77   : > { %3574 = vmatprep.mubr.msk.bf16.mxu1 %vm393_vm2, %v4320_v4 }
  0x78   : > { %3739 = vmatmul.mubr.msk.bf16.gmra.mrb[24].mxu0 %vm393_vm2, %v4722_v27 }
  0x79   : > { %3742 = vmatprep.mubr.msk.bf16.mxu0 %vm393_vm2, %v4727_v38 }
  0x7e   : > { %3575 = vmatmul.mubr.msk.bf16.gmra.mrb[12].mxu1 %vm393_vm2, %v4332_v11 }
  0x7f   : > { %3578 = vmatprep.mubr.msk.bf16.mxu1 %vm393_vm2, %v4354_v22 }
  0x80   : > { %3743 = vmatmul.mubr.msk.bf16.gmra.mrb[28].mxu0 %vm393_vm2, %v4738_v54 }
  0x81   : > { %3746 = vmatprep.mubr.msk.bf16.mxu0 %vm393_vm2, %v4743_v28 }
  0x86   : > { %3579 = vmatmul.mubr.msk.bf16.gmra.mrb[16].mxu1 %vm393_vm2, %v4390_v56 }
  0x87   : > { %3582 = vmatprep.mubr.msk.bf16.mxu1 %vm393_vm2, %v4392_v57 }
  0x88   : > { %3747 = vmatmul.mubr.msk.bf16.gmra.mrb[32].mxu0 %vm393_vm2, %v4754_v42 }
  0x89   : > { %3752 = vmatprep.mubr.msk.bf16.mxu0 %vm393_vm2, %v4507_v34  ;;  %v866_v34 = vrot.slane %v4251_v13, 1 }
  0x8b   : > { %v4810_v13 = vsel %vm864_vm6, %v866_v34, %v868_v59 }
  0x8e   : > { %3583 = vmatmul.mubr.msk.bf16.gmra.mrb[20].mxu1 %vm393_vm2, %v4413_v24 }
  0x8f   : > { %3586 = vmatprep.mubr.msk.bf16.mxu1 %vm393_vm2, %v4444_v58 }
  0x90   : > { %3753 = vmatmul.mubr.msk.bf16.vlgmr.msra.gmra.mrb[0].mxu0 %vm393_vm2, %v4515_v44 }
  0x91   : > { %3789 = vmatpush3.bf16.msra.mxu0 %v2413_v41  ;;  %3756 = vmatprep.mubr.msk.bf16.mxu0 %vm393_vm2, %v4564_v25  ;;  %v865_v25 = vrot.slane %v4247_v10, 1  ;;  %v870_v10 = vrot.slane %v4261_v21, 1  ;;  %v1465_v41 = vrot.slane %v4598_v60, 2 }
  0x92   : > { %4163 = vmatprep.subr.msk.bf16.mxu0 %vm448_vm0, %v4773_v33 }
  0x93   : > { %v867_v44 = vsel %vm864_vm6, %v865_v25, %v866_v34  ;;  %v1471_v25 = vrot.slane %v1469_v26, 1 }
  0x96   : > { %3587 = vmatmul.mubr.msk.bf16.gmra.mrb[24].mxu1 %vm393_vm2, %v4451_v5 }
  0x97   : > { %3590 = vmatprep.mubr.msk.bf16.mxu1 %vm393_vm2, %v4478_v47 }
  0x98   : > { %3757 = vmatmul.mubr.msk.bf16.gmra.mrb[4].mxu0 %vm393_vm2, %v4570_v55  ;;  %v4813_v55 = vsel %vm864_vm6, %v868_v59, %v870_v10  ;;  %v4906_v59 = vsel %vm864_vm6, %v886_v0, %v888_v39 }
  0x99   : > { %3760 = vmatprep.mubr.msk.bf16.mxu0 %vm393_vm2, %v4605_v30  ;;  %v1179_v30 = vsel %vm448_vm0, %v4667_v17, 0 }
  0x9e   : > { %3591 = vmatmul.mubr.msk.bf16.gmra.mrb[28].mxu1 %vm393_vm2, %v4485_v51 }
  0x9f   : > { %3594 = vmatprep.mubr.msk.bf16.mxu1 %vm393_vm2, %v4518_v49 }
  0xa0   : > { %3761 = vmatmul.mubr.msk.bf16.gmra.mrb[8].mxu0 %vm393_vm2, %v4612_v36  ;;  %v872_v36 = vrot.slane %v4279_v31, 1 }
  0xa1   : > { %3764 = vmatprep.mubr.msk.bf16.mxu0 %vm393_vm2, %v4632_v32  ;;  %v874_v32 = vrot.slane %v4318_v3, 1 }
  0xa3   : > { %v4833_v17 = vsel %vm864_vm6, %v872_v36, %v874_v32 }
  0xa6   : > { %3595 = vmatmul.mubr.msk.bf16.gmra.mrb[32].mxu1 %vm393_vm2, %v4533_v61 }
  0xa7   : > { %3600 = vmatprep.mubr.msk.bf16.mxu1 %vm393_vm2, %v867_v44 }
  0xa8   : > { %3765 = vmatmul.mubr.msk.bf16.gmra.mrb[12].mxu0 %vm393_vm2, %v4639_v16  ;;  %v5343_v16 = vld [vmem:[#allocation2_spill] sm:$0xff] }
  0xa9   : > { %3768 = vmatprep.mubr.msk.bf16.mxu0 %vm393_vm2, %v4662_v20  ;;  %v4830_v20 = vsel %vm864_vm6, %v870_v10, %v872_v36 }
  0xae   : > { %3601 = vmatmul.mubr.msk.bf16.vlgmr.msra.gmra.mrb[0].mxu1 %vm393_vm2, %v4810_v13 }
  0xaf   : > { %3604 = vmatprep.mubr.msk.bf16.mxu1 %vm393_vm2, %v4813_v55  ;;  %3637 = vmatpush3.bf16.msra.mxu1 %v1179_v30  ;;  %v4909_v30 = vsel %vm864_vm6, %v888_v39, %v890_v45 }
  0xb0   : > { %3769 = vmatmul.mubr.msk.bf16.gmra.mrb[16].mxu0 %vm393_vm2, %v4672_v40  ;;  %4159 = vmatprep.subr.msk.bf16.mxu1 %vm448_vm0, %v5343_v16  ;;  %v876_v40 = vrot.slane %v4320_v4, 1  ;;  %v894_v16 = vrot.slane %v4485_v51, 1 }
  0xb1   : > { %3772 = vmatprep.mubr.msk.bf16.mxu0 %vm393_vm2, %v4695_v15  ;;  %v880_v15 = vrot.slane %v4354_v22, 1 }
  0xb2   : > { %v4846_v37 = vsel %vm864_vm6, %v874_v32, %v876_v40  ;;  %v4849_v2 = vsel %vm864_vm6, %v876_v40, %v878_v53  ;;  %v892_v32 = vrot.slane %v4478_v47, 1 }
  0xb3   : > { %v4865_v6 = vsel %vm864_vm6, %v880_v15, %v882_v1  ;;  %v5324_v1 = vrot.slane %v4573_v7, 1 }
  0xb4   : > { %v4928_v40 = vsel %vm864_vm6, %v890_v45, %v892_v32 }
  0xb6   : > { %3605 = vmatmul.mubr.msk.bf16.gmra.mrb[4].mxu1 %vm393_vm2, %v4830_v20 }
  0xb7   : > { %3608 = vmatprep.mubr.msk.bf16.mxu1 %vm393_vm2, %v4833_v17 }
  0xb8   : > { %3773 = vmatmul.mubr.msk.bf16.gmra.mrb[20].mxu0 %vm393_vm2, %v4700_v63  ;;  %v4862_v63 = vsel %vm864_vm6, %v878_v53, %v880_v15  ;;  %v4931_v53 = vsel %vm864_vm6, %v892_v32, %v894_v16 }
  0xb9   : > { %3776 = vmatprep.mubr.msk.bf16.mxu0 %vm393_vm2, %v4722_v27  ;;  %v4881_v27 = vsel %vm864_vm6, %v884_v19, %v886_v0  ;;  %v5346_v0 = vld [vmem:[#allocation5_spill] sm:$0xff] }
  0xba   : > { %v2318_v39 = vrot.slane %v5346_v0, 3 }
  0xbe   : > { %3609 = vmatmul.mubr.msk.bf16.gmra.mrb[8].mxu1 %vm393_vm2, %v4846_v37 }
  0xbf   : > { %3612 = vmatprep.mubr.msk.bf16.mxu1 %vm393_vm2, %v4849_v2 }
  0xc0   : > { %3777 = vmatmul.mubr.msk.bf16.gmra.mrb[24].mxu0 %vm393_vm2, %v4727_v38  ;;  %v1462_v38 = vshrl.u32 %v4573_v7, 16 }
  0xc1   : > { %3780 = vmatprep.mubr.msk.bf16.mxu0 %vm393_vm2, %v4738_v54  ;;  %v5325_v54 = vshll.u32 %v4538_v12, 16 }
  0xc3   : > { %v1474_v34 = vrot.slane %v5325_v54, 2 }
  0xc5   : > { %v1475_v10 = vor.u32 %v1474_v34, %v1471_v25  ;;  %v5349_v34 = vld [vmem:[#allocation10_spill] sm:$0xff] }
  0xc6   : > { %3613 = vmatmul.mubr.msk.bf16.gmra.mrb[12].mxu1 %vm393_vm2, %v4862_v63 }
  0xc7   : > { %3616 = vmatprep.mubr.msk.bf16.mxu1 %vm393_vm2, %v4865_v6 }
  0xc8   : > { %3781 = vmatmul.mubr.msk.bf16.gmra.mrb[28].mxu0 %vm393_vm2, %v4743_v28  ;;  %v5344_v28 = vld [vmem:[#allocation17_spill] sm:$0xff] }
  0xc9   : > { %3784 = vmatprep.mubr.msk.bf16.mxu0 %vm393_vm2, %v4754_v42  ;;  %v1464_v42 = vrot.slane %v1462_v38, 1 }
  0xcb   : > { %v4903_v44 = vor.u32 %v1465_v41, %v1464_v42  ;;  %v5348_v42 = vld [vmem:[#allocation7_spill] sm:$0xff] }
  0xcc   : > { %v2322_v41 = vrot.slane %v5348_v42, 3 }
  0xcd   : > { %v4913_v36 = vsel %vm1394_vm3, %v4903_v44, %v1475_v10  ;;  %v2325_v10 = vrot.slane %v5349_v34, 2 }
  0xce   : > { %3617 = vmatmul.mubr.msk.bf16.gmra.mrb[16].mxu1 %vm393_vm2, %v4878_v43 }
  0xcf   : > { %3620 = vmatprep.mubr.msk.bf16.mxu1 %vm393_vm2, %v4881_v27 }
  0xd0   : > { %3785 = vmatmul.mubr.msk.bf16.gmra.mrb[32].mxu0 %vm393_vm2, %v5344_v28  ;;  %v5347_v28 = vld [vmem:[#allocation9_spill] sm:$0xff] }
  0xd1   : > { %3790 = vmatprep.mubr.msk.bf16.mxu0 %vm393_vm2, %v4608_v29  ;;  %v2721_v29 = vsel %vm448_vm0, %v4773_v33, 0  ;;  %v898_v33 = vrot.slane %v4533_v61, 1  ;;  %v2321_v45 = vrot.slane %v5347_v28, 2 }
  0xd6   : > { %3621 = vmatmul.mubr.msk.bf16.gmra.mrb[20].mxu1 %vm393_vm2, %v4906_v59 }
  0xd7   : > { %3624 = vmatprep.mubr.msk.bf16.mxu1 %vm393_vm2, %v4909_v30 }
  0xd8   : > { %3791 = vmatmul.mubr.msk.bf16.vlgmr.msra.gmra.mrb[0].mxu0 %vm393_vm2, %v4618_v35  ;;  %v896_v35 = vrot.slane %v4518_v49, 1 }
  0xd9   : > { %3827 = vmatpush3.bf16.msra.mxu0 %v2721_v29  ;;  %3794 = vmatprep.mubr.msk.bf16.mxu0 %vm393_vm2, %v4635_v52  ;;  %v5350_v29 = vld [vmem:[#allocation8_spill] sm:$0xff] }
  0xda   : > { %v4944_v52 = vsel %vm864_vm6, %v894_v16, %v896_v35  ;;  %v4947_v15 = vsel %vm864_vm6, %v896_v35, %v898_v33  ;;  %v2326_v32 = vrot.slane %v5350_v29, 3  ;;  %v5351_v16 = vld [vmem:[#allocation13_spill] sm:$0xff] }
  0xdb   : > { %v2329_v35 = vrot.slane %v5351_v16, 2 }
  0xde   : > { %3625 = vmatmul.mubr.msk.bf16.gmra.mrb[24].mxu1 %vm393_vm2, %v4928_v40 }
  0xdf   : > { %3628 = vmatprep.mubr.msk.bf16.mxu1 %vm393_vm2, %v4931_v53 }
  0xe0   : > { %3795 = vmatmul.mubr.msk.bf16.gmra.mrb[4].mxu0 %vm393_vm2, %v4646_v18  ;;  %v4961_v18 = vsel %vm864_vm6, %v898_v33, %v5324_v1 }
  0xe1   : > { %3798 = vmatprep.mubr.msk.bf16.mxu0 %vm393_vm2, %v4659_v48  ;;  %v5345_v48 = vld [vmem:[#allocation6_spill] sm:$0xff] }
  0xe2   : > { %v2317_v19 = vrot.slane %v5345_v48, 2 }
  0xe6   : > { %3629 = vmatmul.mubr.msk.bf16.gmra.mrb[28].mxu1 %vm393_vm2, %v4944_v52 }
  0xe7   : > { %3632 = vmatprep.mubr.msk.bf16.mxu1 %vm393_vm2, %v4947_v15 }
  0xe8   : > { %3799 = vmatmul.mubr.msk.bf16.gmra.mrb[8].mxu0 %vm393_vm2, %v4677_v62  ;;  %v2319_v62 = vor.u32 %v2318_v39, %v2317_v19 }
  0xe9   : > { %3802 = vmatprep.mubr.msk.bf16.mxu0 %vm393_vm2, %v4692_v50  ;;  %v2323_v50 = vor.u32 %v2322_v41, %v2321_v45  ;;  %v5355_v41 = vld [vmem:[#allocation12_spill] sm:$0xff] }
  0xea   : > { %v2320_v25 = vsel %vm2277_vm5, %v4715_v9, %v2319_v62  ;;  %v2327_v9 = vor.u32 %v2326_v32, %v2325_v10  ;;  %v2342_v32 = vrot.slane %v4598_v60, 3  ;;  %v5358_v60 = vld [vmem:[#allocation14_spill] sm:$0xff] }
  0xec   : > { %v2328_v39 = vsel %vm2277_vm5, %v2323_v50, %v2327_v9 }
  0xee   : > { %3633 = vmatmul.mubr.msk.bf16.gmra.mrb[32].mxu1 %vm393_vm2, %v4961_v18 }
  0xef   : > { %3638 = vmatprep.mubr.msk.bf16.mxu1 %vm393_vm2, %v4810_v13  ;;  %v2324_v13 = vsel %vm2277_vm5, %v2319_v62, %v2323_v50  ;;  %v2334_v62 = vrot.slane %v5355_v41, 3 }
  0xf0   : > { %3803 = vmatmul.mubr.msk.bf16.gmra.mrb[12].mxu0 %vm393_vm2, %v4705_v8  ;;  %v5352_v8 = vld [vmem:[#allocation11_spill] sm:$0xff] }
  0xf1   : > { %3806 = vmatprep.mubr.msk.bf16.mxu0 %vm393_vm2, %v4719_v23  ;;  %v2330_v33 = vrot.slane %v5352_v8, 3  ;;  %v5353_v23 = vld [vmem:[#allocation3_spill] sm:$0xff] }
  0xf3   : > { %v2331_v19 = vor.u32 %v2330_v33, %v2329_v35  ;;  %v5357_v35 = vshll.u32 %v4538_v12, 16 }
  0xf5   : > { %v2332_v1 = vsel %vm2277_vm5, %v2327_v9, %v2331_v19 }
  0xf6   : > { %3639 = vmatmul.mubr.msk.bf16.vlgmr.msra.gmra.mrb[0].mxu1 %vm393_vm2, %v4813_v55  ;;  %v5354_v55 = vld [vmem:[#allocation15_spill] sm:$0xff] }
  0xf7   : > { %3642 = vmatprep.mubr.msk.bf16.mxu1 %vm393_vm2, %v4830_v20  ;;  %3865 = vmatpush3.bf16.msra.mxu1 %v5353_v23  ;;  %v2333_v45 = vrot.slane %v5354_v55, 2  ;;  %v2337_v20 = vrot.slane %v4595_v46, 2  ;;  %v5356_v23 = vld [vmem:[#allocation16_spill] sm:$0xff] }
  0xf8   : > { %3807 = vmatmul.mubr.msk.bf16.gmra.mrb[16].mxu0 %vm393_vm2, %v2320_v25  ;;  %v2338_v54 = vrot.slane %v5356_v23, 3 }
  0xf9   : > { %3810 = vmatprep.mubr.msk.bf16.mxu0 %vm393_vm2, %v2324_v13  ;;  %v2335_v50 = vor.u32 %v2334_v62, %v2333_v45  ;;  %v2629_v45 = vrot.slane %v4253_v14, 3  ;;  %v2630_v62 = vrot.slane %v4261_v21, 3  ;;  %v2634_v14 = vrot.slane %v4318_v3, 3 }
  0xfa   : > { %v2339_v25 = vor.u32 %v2338_v54, %v2337_v20  ;;  %v2350_v54 = vshrl.u32 %v5358_v60, 16 }
  0xfb   : > { %v2336_v10 = vsel %vm2277_vm5, %v2331_v19, %v2335_v50 }
  0xfc   : > { %v2340_v13 = vsel %vm2277_vm5, %v2335_v50, %v2339_v25  ;;  %v2352_v19 = vrot.slane %v2350_v54, 2  ;;  %v1439_v50 = vrot.slane %v5346_v0, 2  ;;  %v5359_v0 = vrot.slane %v4573_v7, 1 }
  0xfe   : > { %3643 = vmatmul.mubr.msk.bf16.gmra.mrb[4].mxu1 %vm393_vm2, %v4833_v17  ;;  %v2341_v17 = vrot.slane %v1462_v38, 2 }
  0xff   : > { %3646 = vmatprep.mubr.msk.bf16.mxu1 %vm393_vm2, %v4846_v37  ;;  %v2345_v37 = vrot.slane %v1469_v26, 2 }
 0x100   : > { %3811 = vmatmul.mubr.msk.bf16.gmra.mrb[20].mxu0 %vm393_vm2, %v2328_v39  ;;  %v2343_v38 = vor.u32 %v2342_v32, %v2341_v17  ;;  %v1443_v17 = vrot.slane %v5348_v42, 2  ;;  %v2648_v42 = vrot.slane %v4444_v58, 3 }
 0x101   : > { %3814 = vmatprep.mubr.msk.bf16.mxu0 %vm393_vm2, %v2332_v1  ;;  %v2346_v1 = vrot.slane %v5357_v35, 3 }
 0x102   : > { %v2344_v9 = vsel %vm2277_vm5, %v2339_v25, %v2343_v38 }
 0x103   : > { %v2347_v33 = vor.u32 %v2346_v1, %v2345_v37  ;;  %v1447_v37 = vrot.slane %v5350_v29, 2  ;;  %v1450_v1 = vrot.slane %v5351_v16, 1 }
 0x105   : > { %v2348_v39 = vsel %vm2277_vm5, %v2343_v38, %v2347_v33  ;;  %v1451_v38 = vrot.slane %v5352_v8, 2  ;;  %v2652_v8 = vrot.slane %v4478_v47, 3  ;;  %v2656_v47 = vrot.slane %v4518_v49, 3 }
 0x106   : > { %3647 = vmatmul.mubr.msk.bf16.gmra.mrb[8].mxu1 %vm393_vm2, %v4849_v2  ;;  %v2353_v2 = vshll.u32 %v5358_v60, 16  ;;  %v2660_v49 = vrot.slane %v4573_v7, 3 }
 0x107   : > { %3650 = vmatprep.mubr.msk.bf16.mxu1 %vm393_vm2, %v4862_v63 }
 0x108   : > { %3815 = vmatmul.mubr.msk.bf16.gmra.mrb[24].mxu0 %vm393_vm2, %v2336_v10  ;;  %v2355_v26 = vrot.slane %v2353_v2, 3  ;;  %v1442_v10 = vrot.slane %v5347_v28, 1  ;;  %v1454_v2 = vrot.slane %v5354_v55, 1  ;;  %v2654_v55 = vrot.slane %v4485_v51, 3 }
 0x109   : > { %3818 = vmatprep.mubr.msk.bf16.mxu0 %vm393_vm2, %v2340_v13  ;;  %v1446_v13 = vrot.slane %v5349_v34, 1  ;;  %v2650_v34 = vrot.slane %v4451_v5, 3  ;;  %v1452_v5 = vor.u32 %v1451_v38, %v1450_v1  ;;  %v2658_v51 = vrot.slane %v4533_v61, 3 }
 0x10a   : > { %v2356_v63 = vor.u32 %v2355_v26, %v2352_v19  ;;  %v1458_v19 = vrot.slane %v4595_v46, 1  ;;  %v1459_v26 = vrot.slane %v5356_v23, 2  ;;  %v2662_v61 = vrot.slane %v4538_v12, 3 }
 0x10b   : > { %v1448_v28 = vor.u32 %v1447_v37, %v1446_v13  ;;  %v2651_v58 = vsel %vm2628_vm7, %v2648_v42, %v2650_v34 }
 0x10c   : > { %v2357_v20 = vsel %vm2277_vm5, %v2347_v33, %v2356_v63  ;;  %v1455_v33 = vrot.slane %v5355_v41, 2  ;;  %v2653_v63 = vsel %vm2628_vm7, %v2650_v34, %v2652_v8 }
 0x10d   : > { %v1453_v41 = vsel %vm1394_vm3, %v1448_v28, %v1452_v5 }
 0x10e   : > { %3651 = vmatmul.mubr.msk.bf16.gmra.mrb[12].mxu1 %vm393_vm2, %v4865_v6  ;;  %v2631_v6 = vsel %vm2628_vm7, %v2629_v45, %v2630_v62  ;;  %v1456_v16 = vor.u32 %v1455_v33, %v1454_v2  ;;  %v2655_v45 = vsel %vm2628_vm7, %v2652_v8, %v2654_v55 }
 0x10f   : > { %3654 = vmatprep.mubr.msk.bf16.mxu1 %vm393_vm2, %v4878_v43  ;;  %v2632_v43 = vrot.slane %v4279_v31, 3  ;;  %v2638_v31 = vrot.slane %v4332_v11, 3  ;;  %v1438_v11 = vrot.slane %v5345_v48, 1  ;;  %v2646_v48 = vrot.slane %v4413_v24, 3 }
 0x110   : > { %3819 = vmatmul.mubr.msk.bf16.gmra.mrb[28].mxu0 %vm393_vm2, %v2344_v9  ;;  %v1444_v24 = vor.u32 %v1443_v17, %v1442_v10  ;;  %v5161_v10 = vld [vmem:[%s5294_s2] ss:$0 sm:$0xff] }
 0x111   : > { %3822 = vmatprep.mubr.msk.bf16.mxu0 %vm393_vm2, %v2348_v39  ;;  %v2633_v21 = vsel %vm2628_vm7, %v2630_v62, %v2632_v43  ;;  %v2649_v9 = vsel %vm2628_vm7, %v2646_v48, %v2648_v42  ;;  %v1457_v39 = vsel %vm1394_vm3, %v1452_v5, %v1456_v16  ;;  %v1460_v62 = vor.u32 %v1459_v26, %v1458_v19 }
 0x112   : > { %v1449_v54 = vsel %vm1394_vm3, %v1444_v24, %v1448_v28 }
 0x113   : > { %v1461_v46 = vsel %vm1394_vm3, %v1456_v16, %v1460_v62  ;;  %v1467_v23 = vsel %vm1394_vm3, %v1460_v62, %v4903_v44  ;;  %v2663_v44 = vsel %vm2628_vm7, %v2660_v49, %v2662_v61 }
 0x116   : > { %3655 = vmatmul.mubr.msk.bf16.gmra.mrb[16].mxu1 %vm393_vm2, %v4881_v27  ;;  %v2635_v27 = vsel %vm2628_vm7, %v2632_v43, %v2634_v14  ;;  %v2661_v43 = vsel %vm2628_vm7, %v2658_v51, %v2660_v49 }
 0x117   : > { %3658 = vmatprep.mubr.msk.bf16.mxu1 %vm393_vm2, %v4906_v59  ;;  %v2636_v59 = vrot.slane %v4320_v4, 3  ;;  %v2642_v4 = vrot.slane %v4390_v56, 3  ;;  %v2644_v56 = vrot.slane %v4392_v57, 3 }
 0x118   : > { %3823 = vmatmul.mubr.msk.bf16.gmra.mrb[32].mxu0 %vm393_vm2, %v2357_v20  ;;  %v2657_v20 = vsel %vm2628_vm7, %v2654_v55, %v2656_v47 }
 0x119   : > { %3828 = vmatprep.mubr.msk.bf16.mxu0 %vm393_vm2, %v2631_v6  ;;  %v2637_v3 = vsel %vm2628_vm7, %v2634_v14, %v2636_v59  ;;  %v2645_v35 = vsel %vm2628_vm7, %v2642_v4, %v2644_v56  ;;  %v2647_v57 = vsel %vm2628_vm7, %v2644_v56, %v2646_v48  ;;  %v2659_v6 = vsel %vm2628_vm7, %v2656_v47, %v2658_v51 }
 0x11a   : > { %v2664_v14 = vrot.slane %v5358_v60, 3 }
 0x11e   : > { %3659 = vmatmul.mubr.msk.bf16.gmra.mrb[20].mxu1 %vm393_vm2, %v4909_v30  ;;  %v2639_v30 = vsel %vm2628_vm7, %v2636_v59, %v2638_v31 }
 0x11f   : > { %3662 = vmatprep.mubr.msk.bf16.mxu1 %vm393_vm2, %v4928_v40  ;;  %v2640_v40 = vrot.slane %v4354_v22, 3  ;;  %v1440_v22 = vor.u32 %v1439_v50, %v1438_v11 }
 0x120   : > { %3829 = vmatmul.mubr.msk.bf16.vlgmr.msra.gmra.mrb[0].mxu0 %vm393_vm2, %v2633_v21  ;;  %v2665_v21 = vsel %vm2628_vm7, %v2662_v61, %v2664_v14 }
 0x121   : > { %3832 = vmatprep.mubr.msk.bf16.mxu0 %vm393_vm2, %v2635_v27  ;;  %v2641_v25 = vsel %vm2628_vm7, %v2638_v31, %v2640_v40  ;;  %v1445_v29 = vsel %vm1394_vm3, %v1440_v22, %v1444_v24 }
 0x126   : > { %3663 = vmatmul.mubr.msk.bf16.gmra.mrb[24].mxu1 %vm393_vm2, %v4931_v53  ;;  %v2643_v53 = vsel %vm2628_vm7, %v2640_v40, %v2642_v4 }
 0x127   : > { %3666 = vmatprep.mubr.msk.bf16.mxu1 %vm393_vm2, %v4944_v52  ;;  %v1173_v52 = vrot.slane %v4538_v12, 1 }
 0x128   : > { %3833 = vmatmul.mubr.msk.bf16.gmra.mrb[4].mxu0 %vm393_vm2, %v2637_v3 }
 0x129   : > { %3836 = vmatprep.mubr.msk.bf16.mxu0 %vm393_vm2, %v2639_v30 }
 0x12e   : > { %3667 = vmatmul.mubr.msk.bf16.gmra.mrb[28].mxu1 %vm393_vm2, %v4947_v15  ;;  %v1174_v15 = vsel %vm864_vm6, %v5359_v0, %v1173_v52 }
 0x12f   : > { %3670 = vmatprep.mubr.msk.bf16.mxu1 %vm393_vm2, %v4961_v18  ;;  %v5360_v18 = vld [vmem:[#allocation4_spill] sm:$0xff] }
 0x130   : > { %3837 = vmatmul.mubr.msk.bf16.gmra.mrb[8].mxu0 %vm393_vm2, %v2641_v25  ;;  %v1441_v32 = vsel %vm1394_vm3, %v5360_v18, %v1440_v22 }
 0x131   : > { %3840 = vmatprep.mubr.msk.bf16.mxu0 %vm393_vm2, %v2643_v53 }
 0x136   : > { %3671 = vmatmul.mubr.msk.bf16.gmra.mrb[32].mxu1 %vm393_vm2, %v1174_v15 }
 0x137   : > { %3696 = vmatprep.mubr.msk.bf16.mxu1 %vm393_vm2, %v1441_v32 }
 0x138   : > { %3841 = vmatmul.mubr.msk.bf16.gmra.mrb[12].mxu0 %vm393_vm2, %v2645_v35 }
 0x139   : > { %3844 = vmatprep.mubr.msk.bf16.mxu0 %vm393_vm2, %v2647_v57 }
 0x13e   : > { %3697 = vmatmul.mubr.msk.bf16.vlgmr.msra.gmra.mrb[20].mxu1 %vm393_vm2, %v1445_v29 }
 0x13f   : > { %3700 = vmatprep.mubr.msk.bf16.mxu1 %vm393_vm2, %v1449_v54 }
 0x140   : > { %3845 = vmatmul.mubr.msk.bf16.gmra.mrb[16].mxu0 %vm393_vm2, %v2649_v9 }
 0x141   : > { %3848 = vmatprep.mubr.msk.bf16.mxu0 %vm393_vm2, %v2651_v58 }
 0x146   : > { %3701 = vmatmul.mubr.msk.bf16.gmra.mrb[24].mxu1 %vm393_vm2, %v1453_v41 }
 0x147   : > { %3704 = vmatprep.mubr.msk.bf16.mxu1 %vm393_vm2, %v1457_v39 }
 0x148   : > { %3849 = vmatmul.mubr.msk.bf16.gmra.mrb[20].mxu0 %vm393_vm2, %v2653_v63 }
 0x149   : > { %3852 = vmatprep.mubr.msk.bf16.mxu0 %vm393_vm2, %v2655_v45 }
 0x14e   : > { %3705 = vmatmul.mubr.msk.bf16.gmra.mrb[28].mxu1 %vm393_vm2, %v1461_v46 }
 0x14f   : > { %3708 = vmatprep.mubr.msk.bf16.mxu1 %vm393_vm2, %v1467_v23 }
 0x150   : > { %3853 = vmatmul.mubr.msk.bf16.gmra.mrb[24].mxu0 %vm393_vm2, %v2657_v20 }
 0x151   : > { %3856 = vmatprep.mubr.msk.bf16.mxu0 %vm393_vm2, %v2659_v6 }
 0x156   : > { %3709 = vmatmul.mubr.msk.bf16.gmra.mrb[32].mxu1 %vm393_vm2, %v4913_v36 }
 0x158   : > { %3857 = vmatmul.mubr.msk.bf16.gmra.mrb[28].mxu0 %vm393_vm2, %v2661_v43 }
 0x159   : > { %3860 = vmatprep.mubr.msk.bf16.mxu0 %vm393_vm2, %v2663_v44 }
 0x160   : > { %3861 = vmatmul.mubr.msk.bf16.gmra.mrb[32].mxu0 %vm393_vm2, %v2665_v21 }
 0x1c9   : > { %v3640_v7 = vpop.f32.mrb[0].mxu1 }
 0x1ca   : > { %v1215_v27 = vpop.f32.mrb[1].mxu1 }
 0x1cb   : > { %v3641_v12 = vpop.f32.mrb[2].mxu1 }
 0x1cc   : > { %v1218_v59 = vpop.f32.mrb[3].mxu1 }
 0x1d1   : > { %v3644_v31 = vpop.f32.mrb[4].mxu1 }
 0x1d2   : > { %v1231_v3 = vpop.f32.mrb[5].mxu1 }
 0x1d3   : > { %v3645_v30 = vpop.f32.mrb[6].mxu1 }
 0x1d4   : > { %v1234_v36 = vpop.f32.mrb[7].mxu1 }
 0x1d9   : > { %v5134_v40 = vpop.f32.mrb[8].mxu1 }
 0x1da   : > { %v5136_v4 = vpop.f32.mrb[9].mxu1 }
 0x1db   : > { %v5138_v11 = vpop.f32.mrb[10].mxu1 }
 0x1dc   : > { %v5140_v60 = vpop.f32.mrb[11].mxu1 }
 0x1e1   : > { %v5142_v50 = vpop.f32.mrb[12].mxu1 }
 0x1e2   : > { %v5144_v25 = vpop.f32.mrb[13].mxu1 }
 0x1e3   : > { %v5146_v53 = vpop.f32.mrb[14].mxu1 }
 0x1e4   : > { %v5148_v52 = vpop.f32.mrb[15].mxu1 }
 0x1e9   : > { %v5150_v22 = vpop.f32.mrb[16].mxu1 }
 0x1ea   : > { %v5152_v56 = vpop.f32.mrb[17].mxu1 }
 0x1eb   : > { %v5154_v48 = vpop.f32.mrb[18].mxu1 }
 0x1ec   : > { %v5156_v0 = vpop.f32.mrb[19].mxu1 }
 0x1f3   : > { %v3830_v15 = vpop.f32.mrb[0].mxu0 }
 0x1f4   : > { %v3866_v17 = vadd.f32 %v3830_v15, %v3640_v7  ;;  %v2757_v18 = vpop.f32.mrb[1].mxu0 }
 0x1f5   : > { %v3867_v32 = vadd.f32 %v2757_v18, %v1215_v27  ;;  %v3831_v13 = vpop.f32.mrb[2].mxu0 }
 0x1f6   : > { %v2945_v37 = vadd.f32 %v3866_v17, %v5161_v10  ;;  %v3868_v35 = vadd.f32 %v3831_v13, %v3641_v12  ;;  %v2760_v57 = vpop.f32.mrb[3].mxu0 }
 0x1f7   : > { %v2943_v24 = vadd.f32 %v3867_v32, %v5161_v10  ;;  %v3869_v28 = vadd.f32 %v2760_v57, %v1218_v59 }
 0x1f8   : > { %vm2981_vm8 = vcmp.gt.f32.partialorder %v2945_v37, 0.0  ;;  %v3017_v42 = vmul.f32 0.01, %v2945_v37  ;;  %v2946_v34 = vadd.f32 %v3868_v35, %v5161_v10 }
 0x1f9   : > { %vm2979_vm10 = vcmp.gt.f32.partialorder %v2943_v24, 0.0  ;;  %v3015_v29 = vmul.f32 0.01, %v2943_v24  ;;  %v2944_v1 = vadd.f32 %v3869_v28, %v5161_v10 }
 0x1fa   : > { %v3053_v38 = vsel %vm2981_vm8, %v2945_v37, %v3017_v42  ;;  %vm2982_vm11 = vcmp.gt.f32.partialorder %v2946_v34, 0.0  ;;  %v3018_v54 = vmul.f32 0.01, %v2946_v34 }
 0x1fb   : > { %3090 = vst.msk [vmem:[%s5169_s16 + $0x10] sm:$0xff] %vm3087_vm9, %v3053_v38  ;;  %v3051_v2 = vsel %vm2979_vm10, %v2943_v24, %v3015_v29  ;;  %vm2980_vm12 = vcmp.gt.f32.partialorder %v2944_v1, 0.0  ;;  %v3016_v33 = vmul.f32 0.01, %v2944_v1  ;;  %v3834_v9 = vpop.f32.mrb[4].mxu0 }
 0x1fc   : > { %3088 = vst.msk [vmem:[%s5169_s16] sm:$0xff] %vm3087_vm9, %v3051_v2  ;;  %v3054_v58 = vsel %vm2982_vm11, %v2946_v34, %v3018_v54  ;;  %v3870_v5 = vadd.f32 %v3834_v9, %v3644_v31  ;;  %v2773_v16 = vpop.f32.mrb[5].mxu0 }
 0x1fd   : > { %3091 = vst.msk [vmem:[%s5169_s16 + $0x18] sm:$0xff] %vm3087_vm9, %v3054_v58  ;;  %v3052_v8 = vsel %vm2980_vm12, %v2944_v1, %v3016_v33  ;;  %v3871_v55 = vadd.f32 %v2773_v16, %v1231_v3  ;;  %v3835_v41 = vpop.f32.mrb[6].mxu0 }
 0x1fe   : > { %3089 = vst.msk [vmem:[%s5169_s16 + $0x8] sm:$0xff] %vm3087_vm9, %v3052_v8  ;;  %v2949_v19 = vadd.f32 %v3870_v5, %v5161_v10  ;;  %v3872_v26 = vadd.f32 %v3835_v41, %v3645_v30  ;;  %v2776_v39 = vpop.f32.mrb[7].mxu0 }
 0x1ff   : > { %v2947_v63 = vadd.f32 %v3871_v55, %v5161_v10  ;;  %v3873_v45 = vadd.f32 %v2776_v39, %v1234_v36 }
 0x200   : > { %vm2985_vm13 = vcmp.gt.f32.partialorder %v2949_v19, 0.0  ;;  %v3021_v62 = vmul.f32 0.01, %v2949_v19  ;;  %v2950_v47 = vadd.f32 %v3872_v26, %v5161_v10 }
 0x201   : > { %vm2983_vm14 = vcmp.gt.f32.partialorder %v2947_v63, 0.0  ;;  %v3019_v51 = vmul.f32 0.01, %v2947_v63  ;;  %v2948_v46 = vadd.f32 %v3873_v45, %v5161_v10 }
 0x202   : > { %v3057_v23 = vsel %vm2985_vm13, %v2949_v19, %v3021_v62  ;;  %vm2986_vm15 = vcmp.gt.f32.partialorder %v2950_v47, 0.0  ;;  %v3022_v20 = vmul.f32 0.01, %v2950_v47 }
 0x203   : > { %3094 = vst.msk [vmem:[%s5169_s16 + $0x30] sm:$0xff] %vm3087_vm9, %v3057_v23  ;;  %v3055_v6 = vsel %vm2983_vm14, %v2947_v63, %v3019_v51  ;;  %vm2984_vm0 = vcmp.gt.f32.partialorder %v2948_v46, 0.0  ;;  %v3020_v49 = vmul.f32 0.01, %v2948_v46  ;;  %v3838_v61 = vpop.f32.mrb[8].mxu0 }
 0x204   : > { %3092 = vst.msk [vmem:[%s5169_s16 + $0x20] sm:$0xff] %vm3087_vm9, %v3055_v6  ;;  %v3058_v43 = vsel %vm2986_vm15, %v2950_v47, %v3022_v20  ;;  %v3874_v44 = vadd.f32 %v3838_v61, %v5134_v40  ;;  %v2789_v14 = vpop.f32.mrb[9].mxu0 }
 0x205   : > { %3095 = vst.msk [vmem:[%s5169_s16 + $0x38] sm:$0xff] %vm3087_vm9, %v3058_v43  ;;  %v3056_v21 = vsel %vm2984_vm0, %v2948_v46, %v3020_v49  ;;  %v3875_v7 = vadd.f32 %v2789_v14, %v5136_v4  ;;  %v3839_v27 = vpop.f32.mrb[10].mxu0 }
 0x206   : > { %3093 = vst.msk [vmem:[%s5169_s16 + $0x28] sm:$0xff] %vm3087_vm9, %v3056_v21  ;;  %v2953_v12 = vadd.f32 %v3874_v44, %v5161_v10  ;;  %v3876_v59 = vadd.f32 %v3839_v27, %v5138_v11  ;;  %v2792_v31 = vpop.f32.mrb[11].mxu0 }
 0x207   : > { %v2951_v3 = vadd.f32 %v3875_v7, %v5161_v10  ;;  %v3877_v30 = vadd.f32 %v2792_v31, %v5140_v60 }
 0x208   : > { %vm2989_vm1 = vcmp.gt.f32.partialorder %v2953_v12, 0.0  ;;  %v3025_v36 = vmul.f32 0.01, %v2953_v12  ;;  %v2954_v40 = vadd.f32 %v3876_v59, %v5161_v10 }
 0x209   : > { %vm2987_vm2 = vcmp.gt.f32.partialorder %v2951_v3, 0.0  ;;  %v3023_v4 = vmul.f32 0.01, %v2951_v3  ;;  %v2952_v15 = vadd.f32 %v3877_v30, %v5161_v10 }
 0x20a   : > { %v3061_v17 = vsel %vm2989_vm1, %v2953_v12, %v3025_v36  ;;  %vm2990_vm3 = vcmp.gt.f32.partialorder %v2954_v40, 0.0  ;;  %v3026_v18 = vmul.f32 0.01, %v2954_v40 }
 0x20b   : > { %3098 = vst.msk [vmem:[%s5169_s16 + $0x50] sm:$0xff] %vm3087_vm9, %v3061_v17  ;;  %v3059_v11 = vsel %vm2987_vm2, %v2951_v3, %v3023_v4  ;;  %vm2988_vm4 = vcmp.gt.f32.partialorder %v2952_v15, 0.0  ;;  %v3024_v32 = vmul.f32 0.01, %v2952_v15  ;;  %v3842_v13 = vpop.f32.mrb[12].mxu0 }
 0x20c   : > { %3096 = vst.msk [vmem:[%s5169_s16 + $0x40] sm:$0xff] %vm3087_vm9, %v3059_v11  ;;  %v3062_v60 = vsel %vm2990_vm3, %v2954_v40, %v3026_v18  ;;  %v3878_v37 = vadd.f32 %v3842_v13, %v5142_v50  ;;  %v2805_v35 = vpop.f32.mrb[13].mxu0 }
 0x20d   : > { %3099 = vst.msk [vmem:[%s5169_s16 + $0x58] sm:$0xff] %vm3087_vm9, %v3062_v60  ;;  %v3060_v57 = vsel %vm2988_vm4, %v2952_v15, %v3024_v32  ;;  %v3879_v24 = vadd.f32 %v2805_v35, %v5144_v25  ;;  %v3843_v28 = vpop.f32.mrb[14].mxu0 }
 0x20e   : > { %3097 = vst.msk [vmem:[%s5169_s16 + $0x48] sm:$0xff] %vm3087_vm9, %v3060_v57  ;;  %v2957_v42 = vadd.f32 %v3878_v37, %v5161_v10  ;;  %v3880_v34 = vadd.f32 %v3843_v28, %v5146_v53  ;;  %v2808_v29 = vpop.f32.mrb[15].mxu0 }
 0x20f   : > { %v2955_v1 = vadd.f32 %v3879_v24, %v5161_v10  ;;  %v3881_v38 = vadd.f32 %v2808_v29, %v5148_v52 }
 0x210   : > { %vm2993_vm5 = vcmp.gt.f32.partialorder %v2957_v42, 0.0  ;;  %v3029_v50 = vmul.f32 0.01, %v2957_v42  ;;  %v2958_v54 = vadd.f32 %v3880_v34, %v5161_v10 }
 0x211   : > { %vm2991_vm6 = vcmp.gt.f32.partialorder %v2955_v1, 0.0  ;;  %v3027_v25 = vmul.f32 0.01, %v2955_v1  ;;  %v2956_v2 = vadd.f32 %v3881_v38, %v5161_v10  ;;  %v3698_v33 = vpop.f32.mrb[20].mxu1 }
 0x212   : > { %v3065_v9 = vsel %vm2993_vm5, %v2957_v42, %v3029_v50  ;;  %vm2994_vm7 = vcmp.gt.f32.partialorder %v2958_v54, 0.0  ;;  %v3030_v58 = vmul.f32 0.01, %v2958_v54  ;;  %v1648_v53 = vpop.f32.mrb[21].mxu1 }
 0x213   : > { %3102 = vst.msk [vmem:[%s5169_s16 + $0x70] sm:$0xff] %vm3087_vm9, %v3065_v9  ;;  %v3063_v5 = vsel %vm2991_vm6, %v2955_v1, %v3027_v25  ;;  %vm2992_vm8 = vcmp.gt.f32.partialorder %v2956_v2, 0.0  ;;  %v3028_v52 = vmul.f32 0.01, %v2956_v2  ;;  %v3846_v16 = vpop.f32.mrb[16].mxu0  ;;  %v3699_v8 = vpop.f32.mrb[22].mxu1 }
 0x214   : > { %3100 = vst.msk [vmem:[%s5169_s16 + $0x60] sm:$0xff] %vm3087_vm9, %v3063_v5  ;;  %v3066_v55 = vsel %vm2994_vm7, %v2958_v54, %v3030_v58  ;;  %v3882_v41 = vadd.f32 %v3846_v16, %v5150_v22  ;;  %v2821_v19 = vpop.f32.mrb[17].mxu0  ;;  %v1651_v26 = vpop.f32.mrb[23].mxu1 }
 0x215   : > { %3103 = vst.msk [vmem:[%s5169_s16 + $0x78] sm:$0xff] %vm3087_vm9, %v3066_v55  ;;  %v3064_v39 = vsel %vm2992_vm8, %v2956_v2, %v3028_v52  ;;  %v3883_v63 = vadd.f32 %v2821_v19, %v5152_v56  ;;  %v3847_v45 = vpop.f32.mrb[18].mxu0 }
 0x216   : > { %3101 = vst.msk [vmem:[%s5169_s16 + $0x68] sm:$0xff] %vm3087_vm9, %v3064_v39  ;;  %v2961_v62 = vadd.f32 %v3882_v41, %v5161_v10  ;;  %v3884_v47 = vadd.f32 %v3847_v45, %v5154_v48  ;;  %v2824_v51 = vpop.f32.mrb[19].mxu0 }
 0x217   : > { %v2959_v46 = vadd.f32 %v3883_v63, %v5161_v10  ;;  %v3885_v22 = vadd.f32 %v2824_v51, %v5156_v0 }
 0x218   : > { %vm2997_vm10 = vcmp.gt.f32.partialorder %v2961_v62, 0.0  ;;  %v3033_v23 = vmul.f32 0.01, %v2961_v62  ;;  %v2962_v20 = vadd.f32 %v3884_v47, %v5161_v10 }
 0x219   : > { %vm2995_vm11 = vcmp.gt.f32.partialorder %v2959_v46, 0.0  ;;  %v3031_v56 = vmul.f32 0.01, %v2959_v46  ;;  %v2960_v6 = vadd.f32 %v3885_v22, %v5161_v10  ;;  %v3702_v49 = vpop.f32.mrb[24].mxu1 }
 0x21a   : > { %v3069_v61 = vsel %vm2997_vm10, %v2961_v62, %v3033_v23  ;;  %vm2998_vm12 = vcmp.gt.f32.partialorder %v2962_v20, 0.0  ;;  %v3034_v43 = vmul.f32 0.01, %v2962_v20  ;;  %v1664_v48 = vpop.f32.mrb[25].mxu1 }
 0x21b   : > { %3106 = vst.msk [vmem:[%s5169_s16 + $0x90] sm:$0xff] %vm3087_vm9, %v3069_v61  ;;  %v3067_v44 = vsel %vm2995_vm11, %v2959_v46, %v3031_v56  ;;  %vm2996_vm13 = vcmp.gt.f32.partialorder %v2960_v6, 0.0  ;;  %v3032_v0 = vmul.f32 0.01, %v2960_v6  ;;  %v3850_v14 = vpop.f32.mrb[20].mxu0  ;;  %v3703_v21 = vpop.f32.mrb[26].mxu1 }
 0x21c   : > { %3104 = vst.msk [vmem:[%s5169_s16 + $0x80] sm:$0xff] %vm3087_vm9, %v3067_v44  ;;  %v3070_v7 = vsel %vm2998_vm12, %v2962_v20, %v3034_v43  ;;  %v3886_v27 = vadd.f32 %v3850_v14, %v3698_v33  ;;  %v2837_v12 = vpop.f32.mrb[21].mxu0  ;;  %v1667_v59 = vpop.f32.mrb[27].mxu1 }
 0x21d   : > { %3107 = vst.msk [vmem:[%s5169_s16 + $0x98] sm:$0xff] %vm3087_vm9, %v3070_v7  ;;  %v3068_v31 = vsel %vm2996_vm13, %v2960_v6, %v3032_v0  ;;  %v3887_v3 = vadd.f32 %v2837_v12, %v1648_v53  ;;  %v3851_v30 = vpop.f32.mrb[22].mxu0 }
 0x21e   : > { %3105 = vst.msk [vmem:[%s5169_s16 + $0x88] sm:$0xff] %vm3087_vm9, %v3068_v31  ;;  %v2965_v36 = vadd.f32 %v3886_v27, %v5161_v10  ;;  %v3888_v40 = vadd.f32 %v3851_v30, %v3699_v8  ;;  %v2840_v4 = vpop.f32.mrb[23].mxu0 }
 0x21f   : > { %v2963_v15 = vadd.f32 %v3887_v3, %v5161_v10  ;;  %v3889_v17 = vadd.f32 %v2840_v4, %v1651_v26 }
 0x220   : > { %vm3001_vm14 = vcmp.gt.f32.partialorder %v2965_v36, 0.0  ;;  %v3037_v18 = vmul.f32 0.01, %v2965_v36  ;;  %v2966_v11 = vadd.f32 %v3888_v40, %v5161_v10 }
 0x221   : > { %vm2999_vm15 = vcmp.gt.f32.partialorder %v2963_v15, 0.0  ;;  %v3035_v32 = vmul.f32 0.01, %v2963_v15  ;;  %v2964_v13 = vadd.f32 %v3889_v17, %v5161_v10  ;;  %v3706_v60 = vpop.f32.mrb[28].mxu1 }
 0x222   : > { %v3073_v37 = vsel %vm3001_vm14, %v2965_v36, %v3037_v18  ;;  %vm3002_vm0 = vcmp.gt.f32.partialorder %v2966_v11, 0.0  ;;  %v3038_v35 = vmul.f32 0.01, %v2966_v11  ;;  %v1680_v57 = vpop.f32.mrb[29].mxu1 }
 0x223   : > { %3110 = vst.msk [vmem:[%s5169_s16 + $0xb0] sm:$0xff] %vm3087_vm9, %v3073_v37  ;;  %v3071_v24 = vsel %vm2999_vm15, %v2963_v15, %v3035_v32  ;;  %vm3000_vm1 = vcmp.gt.f32.partialorder %v2964_v13, 0.0  ;;  %v3036_v28 = vmul.f32 0.01, %v2964_v13  ;;  %v3854_v42 = vpop.f32.mrb[24].mxu0  ;;  %v3707_v34 = vpop.f32.mrb[30].mxu1 }
 0x224   : > { %3108 = vst.msk [vmem:[%s5169_s16 + $0xa0] sm:$0xff] %vm3087_vm9, %v3071_v24  ;;  %v3074_v29 = vsel %vm3002_vm0, %v2966_v11, %v3038_v35  ;;  %v3890_v1 = vadd.f32 %v3854_v42, %v3702_v49  ;;  %v2853_v38 = vpop.f32.mrb[25].mxu0  ;;  %v1683_v50 = vpop.f32.mrb[31].mxu1 }
 0x225   : > { %3111 = vst.msk [vmem:[%s5169_s16 + $0xb8] sm:$0xff] %vm3087_vm9, %v3074_v29  ;;  %v3072_v54 = vsel %vm3000_vm1, %v2964_v13, %v3036_v28  ;;  %v3891_v25 = vadd.f32 %v2853_v38, %v1664_v48  ;;  %v3855_v2 = vpop.f32.mrb[26].mxu0 }
 0x226   : > { %3109 = vst.msk [vmem:[%s5169_s16 + $0xa8] sm:$0xff] %vm3087_vm9, %v3072_v54  ;;  %v2969_v33 = vadd.f32 %v3890_v1, %v5161_v10  ;;  %v3892_v9 = vadd.f32 %v3855_v2, %v3703_v21  ;;  %v2856_v58 = vpop.f32.mrb[27].mxu0 }
 0x227   : > { %v2967_v53 = vadd.f32 %v3891_v25, %v5161_v10  ;;  %v3893_v5 = vadd.f32 %v2856_v58, %v1667_v59 }
 0x228   : > { %vm3005_vm2 = vcmp.gt.f32.partialorder %v2969_v33, 0.0  ;;  %v3041_v52 = vmul.f32 0.01, %v2969_v33  ;;  %v2970_v16 = vadd.f32 %v3892_v9, %v5161_v10 }
 0x229   : > { %vm3003_vm3 = vcmp.gt.f32.partialorder %v2967_v53, 0.0  ;;  %v3039_v8 = vmul.f32 0.01, %v2967_v53  ;;  %v2968_v55 = vadd.f32 %v3893_v5, %v5161_v10  ;;  %v3710_v41 = vpop.f32.mrb[32].mxu1 }
 0x22a   : > { %v3077_v19 = vsel %vm3005_vm2, %v2969_v33, %v3041_v52  ;;  %vm3006_vm4 = vcmp.gt.f32.partialorder %v2970_v16, 0.0  ;;  %v3042_v26 = vmul.f32 0.01, %v2970_v16  ;;  %v1696_v39 = vpop.f32.mrb[33].mxu1 }
 0x22b   : > { %3114 = vst.msk [vmem:[%s5169_s16 + $0xd0] sm:$0xff] %vm3087_vm9, %v3077_v19  ;;  %v3075_v63 = vsel %vm3003_vm3, %v2967_v53, %v3039_v8  ;;  %vm3004_vm5 = vcmp.gt.f32.partialorder %v2968_v55, 0.0  ;;  %v3040_v45 = vmul.f32 0.01, %v2968_v55  ;;  %v3858_v62 = vpop.f32.mrb[28].mxu0  ;;  %v3711_v47 = vpop.f32.mrb[34].mxu1 }
 0x22c   : > { %3112 = vst.msk [vmem:[%s5169_s16 + $0xc0] sm:$0xff] %vm3087_vm9, %v3075_v63  ;;  %v3078_v51 = vsel %vm3006_vm4, %v2970_v16, %v3042_v26  ;;  %v3894_v46 = vadd.f32 %v3858_v62, %v3706_v60  ;;  %v2869_v22 = vpop.f32.mrb[29].mxu0  ;;  %v1699_v23 = vpop.f32.mrb[35].mxu1 }
 0x22d   : > { %3115 = vst.msk [vmem:[%s5169_s16 + $0xd8] sm:$0xff] %vm3087_vm9, %v3078_v51  ;;  %v3076_v20 = vsel %vm3004_vm5, %v2968_v55, %v3040_v45  ;;  %v3895_v56 = vadd.f32 %v2869_v22, %v1680_v57  ;;  %v3859_v6 = vpop.f32.mrb[30].mxu0 }
 0x22e   : > { %3113 = vst.msk [vmem:[%s5169_s16 + $0xc8] sm:$0xff] %vm3087_vm9, %v3076_v20  ;;  %v2973_v49 = vadd.f32 %v3894_v46, %v5161_v10  ;;  %v3896_v61 = vadd.f32 %v3859_v6, %v3707_v34  ;;  %v2872_v43 = vpop.f32.mrb[31].mxu0 }
 0x22f   : > { %v2971_v48 = vadd.f32 %v3895_v56, %v5161_v10  ;;  %v3897_v44 = vadd.f32 %v2872_v43, %v1683_v50 }
 0x230   : > { %vm3009_vm6 = vcmp.gt.f32.partialorder %v2973_v49, 0.0  ;;  %v3045_v0 = vmul.f32 0.01, %v2973_v49  ;;  %v2974_v14 = vadd.f32 %v3896_v61, %v5161_v10 }
 0x231   : > { %vm3007_vm7 = vcmp.gt.f32.partialorder %v2971_v48, 0.0  ;;  %v3043_v21 = vmul.f32 0.01, %v2971_v48  ;;  %v2972_v7 = vadd.f32 %v3897_v44, %v5161_v10 }
 0x232   : > { %v3081_v27 = vsel %vm3009_vm6, %v2973_v49, %v3045_v0  ;;  %vm3010_vm8 = vcmp.gt.f32.partialorder %v2974_v14, 0.0  ;;  %v3046_v12 = vmul.f32 0.01, %v2974_v14 }
 0x233   : > { %3118 = vst.msk [vmem:[%s5169_s16 + $0xf0] sm:$0xff] %vm3087_vm9, %v3081_v27  ;;  %v3079_v59 = vsel %vm3007_vm7, %v2971_v48, %v3043_v21  ;;  %vm3008_vm10 = vcmp.gt.f32.partialorder %v2972_v7, 0.0  ;;  %v3044_v31 = vmul.f32 0.01, %v2972_v7  ;;  %v3862_v3 = vpop.f32.mrb[32].mxu0 }
 0x234   : > { %3116 = vst.msk [vmem:[%s5169_s16 + $0xe0] sm:$0xff] %vm3087_vm9, %v3079_v59  ;;  %v3082_v30 = vsel %vm3010_vm8, %v2974_v14, %v3046_v12  ;;  %v3898_v36 = vadd.f32 %v3862_v3, %v3710_v41  ;;  %v2885_v40 = vpop.f32.mrb[33].mxu0 }
 0x235   : > { %3119 = vst.msk [vmem:[%s5169_s16 + $0xf8] sm:$0xff] %vm3087_vm9, %v3082_v30  ;;  %v3080_v4 = vsel %vm3008_vm10, %v2972_v7, %v3044_v31  ;;  %v3899_v15 = vadd.f32 %v2885_v40, %v1696_v39  ;;  %v3863_v17 = vpop.f32.mrb[34].mxu0 }
 0x236   : > { %3117 = vst.msk [vmem:[%s5169_s16 + $0xe8] sm:$0xff] %vm3087_vm9, %v3080_v4  ;;  %v2977_v18 = vadd.f32 %v3898_v36, %v5161_v10  ;;  %v3900_v11 = vadd.f32 %v3863_v17, %v3711_v47  ;;  %v2888_v32 = vpop.f32.mrb[35].mxu0 }
 0x237   : > { %v2975_v13 = vadd.f32 %v3899_v15, %v5161_v10  ;;  %v3901_v60 = vadd.f32 %v2888_v32, %v1699_v23 }
 0x238   : > { %vm3013_vm11 = vcmp.gt.f32.partialorder %v2977_v18, 0.0  ;;  %v3049_v37 = vmul.f32 0.01, %v2977_v18  ;;  %v2978_v35 = vadd.f32 %v3900_v11, %v5161_v10 }
 0x239   : > { %vm3011_vm12 = vcmp.gt.f32.partialorder %v2975_v13, 0.0  ;;  %v3047_v57 = vmul.f32 0.01, %v2975_v13  ;;  %v2976_v24 = vadd.f32 %v3901_v60, %v5161_v10 }
 0x23a   : > { %v3085_v28 = vsel %vm3013_vm11, %v2977_v18, %v3049_v37  ;;  %vm3014_vm13 = vcmp.gt.f32.partialorder %v2978_v35, 0.0  ;;  %v3050_v42 = vmul.f32 0.01, %v2978_v35 }
 0x23b   : > { %3122 = vst.msk [vmem:[%s5169_s16 + $0x110] sm:$0xff] %vm3087_vm9, %v3085_v28  ;;  %v3083_v34 = vsel %vm3011_vm12, %v2975_v13, %v3047_v57  ;;  %vm3012_vm14 = vcmp.gt.f32.partialorder %v2976_v24, 0.0  ;;  %v3048_v29 = vmul.f32 0.01, %v2976_v24 }
 0x23c   : > { %3120 = vst.msk [vmem:[%s5169_s16 + $0x100] sm:$0xff] %vm3087_vm9, %v3083_v34  ;;  %v3086_v1 = vsel %vm3014_vm13, %v2978_v35, %v3050_v42 }
 0x23d   : > { %3123 = vst.msk [vmem:[%s5169_s16 + $0x118] sm:$0xff] %vm3087_vm9, %v3086_v1  ;;  %v3084_v38 = vsel %vm3012_vm14, %v2976_v24, %v3048_v29 }
 0x23e   : > { %3121 = vst.msk [vmem:[%s5169_s16 + $0x108] sm:$0xff] %vm3087_vm9, %v3084_v38 }
 0x23f PF: > { %s13_s12 = sadd.s32 1, %s4180_s12  }
 0x240   : > { %p10_p4 = scmp.ge.s32.totalorder %s13_s12, 4  }
 0x242   :  { %12 = sbr.rel (!%p10_p4) target bundleno = 1 (0x1), region = 62 }

// kernel: encoder_forward.13
= control target key start
LH: loop header
LB: loop body
LE: loop exit
PB: predicated region body
PF: predicated region fallthrough
CT: control target
= control target key end

     0   :  { %vm94_vm0 = vcmask 261120   ;;  %vm264_vm1 = vcmask 31744   ;;  %s491_s1 = inlined_call_operand.vmem [shape: bf16[32,4], index: 1, kind: input, shape index: {}]   ;;  %s492_s0 = inlined_call_operand.vmem [shape: bf16[128,32], index: 0, kind: input, shape index: {}]   ;;  %s493_s2 = inlined_call_operand.vmem [shape: f32[1,4], index: 2, kind: input, shape index: {}]   ;;  %s494_s3 = inlined_call_operand.vmem [shape: f32[128,4], index: 3, kind: output, shape index: {}]  }
   0x1   :  { %v338_v0 = vld [vmem:[%s491_s1] sm:$0xff]   ;;  %v339_v1 = vld [vmem:[%s491_s1 + $0x8] sm:$0xff]   ;;  %v344_v6 = vld [vmem:[%s492_s0 + $0x10] sm:$0xff]  }
   0x2   :  { %314 = vmatprep.subr.bf16.mxu0 %v338_v0  ;;  %334 = vmatprep.subr.bf16.mxu1 %v338_v0  ;;  %v340_v2 = vld [vmem:[%s492_s0] sm:$0xff]   ;;  %v342_v4 = vld [vmem:[%s492_s0 + $0x8] sm:$0xff]   ;;  %v345_v7 = vld [vmem:[%s492_s0 + $0x30] sm:$0xff]  }
   0x3   :  { %315 = vmatpush3.bf16.msra.mxu0 %v338_v0  ;;  %336 = vmatpush3.bf16.msra.mxu1 %v338_v0  ;;  %v341_v3 = vld [vmem:[%s492_s0 + $0x20] sm:$0xff]   ;;  %v343_v5 = vld [vmem:[%s492_s0 + $0x28] sm:$0xff]   ;;  %v346_v8 = vld [vmem:[%s492_s0 + $0x18] sm:$0xff]  }
   0x4   :  { %316 = vmatprep.subr.bf16.mxu0 %v339_v1  ;;  %335 = vmatprep.subr.bf16.mxu1 %v339_v1  ;;  %v347_v9 = vld [vmem:[%s492_s0 + $0x38] sm:$0xff]   ;;  %v409_v10 = vld [vmem:[%s493_s2] ss:$0 sm:$0xff] }
   0x5   :  { %318 = vmatprep.mubr.msk.bf16.mxu0 %vm94_vm0, %v340_v2  ;;  %326 = vmatprep.mubr.msk.bf16.mxu1 %vm94_vm0, %v341_v3 }
   0x7   :  { %317 = vmatpush3.bf16.msra.mxu0 %v339_v1  ;;  %337 = vmatpush3.bf16.msra.mxu1 %v339_v1 }
   0xa   :  { %319 = vmatmul.mubr.msk.bf16.vlgmr.msra.gmra.mrb[0].mxu0 %vm94_vm0, %v342_v4  ;;  %327 = vmatmul.mubr.msk.bf16.vlgmr.msra.gmra.mrb[0].mxu1 %vm94_vm0, %v343_v5 }
   0xb   :  { %322 = vmatprep.mubr.msk.bf16.mxu0 %vm94_vm0, %v344_v6  ;;  %330 = vmatprep.mubr.msk.bf16.mxu1 %vm94_vm0, %v345_v7 }
  0x12   :  { %323 = vmatmul.mubr.msk.bf16.gmra.mrb[4].mxu0 %vm94_vm0, %v346_v8  ;;  %331 = vmatmul.mubr.msk.bf16.gmra.mrb[4].mxu1 %vm94_vm0, %v347_v9 }
  0xdd   :  { %v320_v11 = vpop.f32.mrb[0].mxu0  ;;  %v328_v12 = vpop.f32.mrb[0].mxu1 }
  0xde   :  { %v162_v13 = vadd.f32 %v320_v11, %v409_v10  ;;  %v194_v14 = vadd.f32 %v328_v12, %v409_v10  ;;  %v153_v15 = vpop.f32.mrb[1].mxu0  ;;  %v185_v16 = vpop.f32.mrb[1].mxu1 }
  0xdf   :  { %v154_v17 = vadd.f32 %v409_v10, %v153_v15  ;;  %v186_v18 = vadd.f32 %v409_v10, %v185_v16  ;;  %v321_v19 = vpop.f32.mrb[2].mxu0  ;;  %v329_v20 = vpop.f32.mrb[2].mxu1 }
  0xe0   :  { %vm218_vm2 = vcmp.gt.f32.partialorder %v162_v13, 0.0  ;;  %v234_v21 = vmul.f32 0.01, %v162_v13  ;;  %vm226_vm3 = vcmp.gt.f32.partialorder %v194_v14, 0.0  ;;  %v242_v22 = vmul.f32 0.01, %v194_v14 }
  0xe1   :  { %vm216_vm4 = vcmp.gt.f32.partialorder %v154_v17, 0.0  ;;  %v232_v23 = vmul.f32 0.01, %v154_v17  ;;  %vm224_vm5 = vcmp.gt.f32.partialorder %v186_v18, 0.0  ;;  %v240_v24 = vmul.f32 0.01, %v186_v18 }
  0xe2   :  { %v250_v25 = vsel %vm218_vm2, %v162_v13, %v234_v21  ;;  %v258_v26 = vsel %vm226_vm3, %v194_v14, %v242_v22  ;;  %v165_v27 = vadd.f32 %v321_v19, %v409_v10  ;;  %v197_v28 = vadd.f32 %v329_v20, %v409_v10  ;;  %v156_v29 = vpop.f32.mrb[3].mxu0  ;;  %v188_v30 = vpop.f32.mrb[3].mxu1 }
  0xe3   :  { %267 = vst.msk [vmem:[%s494_s3 + $0x10] sm:$0xff] %vm264_vm1, %v250_v25  ;;  %275 = vst.msk [vmem:[%s494_s3 + $0x50] sm:$0xff] %vm264_vm1, %v258_v26  ;;  %v248_v31 = vsel %vm216_vm4, %v154_v17, %v232_v23  ;;  %v256_v32 = vsel %vm224_vm5, %v186_v18, %v240_v24  ;;  %v157_v33 = vadd.f32 %v409_v10, %v156_v29 }
  0xe4   :  { %v189_v34 = vadd.f32 %v409_v10, %v188_v30  ;;  %265 = vst.msk [vmem:[%s494_s3] sm:$0xff] %vm264_vm1, %v248_v31  ;;  %273 = vst.msk [vmem:[%s494_s3 + $0x40] sm:$0xff] %vm264_vm1, %v256_v32  ;;  %vm219_vm6 = vcmp.gt.f32.partialorder %v165_v27, 0.0  ;;  %v235_v35 = vmul.f32 0.01, %v165_v27  ;;  %vm227_vm7 = vcmp.gt.f32.partialorder %v197_v28, 0.0 }
  0xe5   :  { %v243_v36 = vmul.f32 0.01, %v197_v28  ;;  %vm217_vm8 = vcmp.gt.f32.partialorder %v157_v33, 0.0  ;;  %v233_v37 = vmul.f32 0.01, %v157_v33  ;;  %v324_v41 = vpop.f32.mrb[4].mxu0 }
  0xe6   :  { %vm225_vm9 = vcmp.gt.f32.partialorder %v189_v34, 0.0  ;;  %v241_v38 = vmul.f32 0.01, %v189_v34  ;;  %v251_v39 = vsel %vm219_vm6, %v165_v27, %v235_v35  ;;  %v332_v42 = vpop.f32.mrb[4].mxu1  ;;  %v178_v45 = vadd.f32 %v324_v41, %v409_v10  ;;  %v169_v47 = vpop.f32.mrb[5].mxu0 }
  0xe7   :  { %v259_v40 = vsel %vm227_vm7, %v197_v28, %v243_v36  ;;  %268 = vst.msk [vmem:[%s494_s3 + $0x18] sm:$0xff] %vm264_vm1, %v251_v39  ;;  %v249_v43 = vsel %vm217_vm8, %v157_v33, %v233_v37  ;;  %v210_v46 = vadd.f32 %v332_v42, %v409_v10  ;;  %v201_v48 = vpop.f32.mrb[5].mxu1  ;;  %v170_v49 = vadd.f32 %v409_v10, %v169_v47  ;;  %v325_v51 = vpop.f32.mrb[6].mxu0 }
  0xe8   :  { %276 = vst.msk [vmem:[%s494_s3 + $0x58] sm:$0xff] %vm264_vm1, %v259_v40  ;;  %v257_v44 = vsel %vm225_vm9, %v189_v34, %v241_v38  ;;  %266 = vst.msk [vmem:[%s494_s3 + $0x8] sm:$0xff] %vm264_vm1, %v249_v43  ;;  %v202_v50 = vadd.f32 %v409_v10, %v201_v48  ;;  %v333_v52 = vpop.f32.mrb[6].mxu1  ;;  %vm222_vm10 = vcmp.gt.f32.partialorder %v178_v45, 0.0  ;;  %v238_v53 = vmul.f32 0.01, %v178_v45 }
  0xe9   :  { %274 = vst.msk [vmem:[%s494_s3 + $0x48] sm:$0xff] %vm264_vm1, %v257_v44  ;;  %vm230_vm11 = vcmp.gt.f32.partialorder %v210_v46, 0.0  ;;  %v246_v54 = vmul.f32 0.01, %v210_v46  ;;  %vm220_vm12 = vcmp.gt.f32.partialorder %v170_v49, 0.0  ;;  %v181_v59 = vadd.f32 %v325_v51, %v409_v10  ;;  %v172_v61 = vpop.f32.mrb[7].mxu0 }
  0xea   :  { %v236_v55 = vmul.f32 0.01, %v170_v49  ;;  %vm228_vm13 = vcmp.gt.f32.partialorder %v202_v50, 0.0  ;;  %v244_v56 = vmul.f32 0.01, %v202_v50  ;;  %v254_v57 = vsel %vm222_vm10, %v178_v45, %v238_v53  ;;  %v204_v62 = vpop.f32.mrb[7].mxu1 }
  0xeb   :  { %v262_v58 = vsel %vm230_vm11, %v210_v46, %v246_v54  ;;  %v213_v60 = vadd.f32 %v333_v52, %v409_v10  ;;  %271 = vst.msk [vmem:[%s494_s3 + $0x30] sm:$0xff] %vm264_vm1, %v254_v57  ;;  %v173_v1 = vadd.f32 %v409_v10, %v172_v61  ;;  %v205_v2 = vadd.f32 %v409_v10, %v204_v62 }
  0xec   :  { %279 = vst.msk [vmem:[%s494_s3 + $0x70] sm:$0xff] %vm264_vm1, %v262_v58  ;;  %v252_v63 = vsel %vm220_vm12, %v170_v49, %v236_v55  ;;  %v260_v0 = vsel %vm228_vm13, %v202_v50, %v244_v56  ;;  %vm223_vm14 = vcmp.gt.f32.partialorder %v181_v59, 0.0  ;;  %v239_v3 = vmul.f32 0.01, %v181_v59 }
  0xed   :  { %269 = vst.msk [vmem:[%s494_s3 + $0x20] sm:$0xff] %vm264_vm1, %v252_v63  ;;  %277 = vst.msk [vmem:[%s494_s3 + $0x60] sm:$0xff] %vm264_vm1, %v260_v0  ;;  %vm231_vm15 = vcmp.gt.f32.partialorder %v213_v60, 0.0  ;;  %v247_v4 = vmul.f32 0.01, %v213_v60  ;;  %vm221_vm0 = vcmp.gt.f32.partialorder %v173_v1, 0.0 }
  0xee   :  { %v237_v5 = vmul.f32 0.01, %v173_v1  ;;  %vm229_vm2 = vcmp.gt.f32.partialorder %v205_v2, 0.0  ;;  %v245_v6 = vmul.f32 0.01, %v205_v2  ;;  %v255_v7 = vsel %vm223_vm14, %v181_v59, %v239_v3 }
  0xef   :  { %v263_v8 = vsel %vm231_vm15, %v213_v60, %v247_v4  ;;  %272 = vst.msk [vmem:[%s494_s3 + $0x38] sm:$0xff] %vm264_vm1, %v255_v7 }
  0xf0   :  { %280 = vst.msk [vmem:[%s494_s3 + $0x78] sm:$0xff] %vm264_vm1, %v263_v8  ;;  %v253_v9 = vsel %vm221_vm0, %v173_v1, %v237_v5  ;;  %v261_v10 = vsel %vm229_vm2, %v205_v2, %v245_v6 }
  0xf1   :  { %270 = vst.msk [vmem:[%s494_s3 + $0x28] sm:$0xff] %vm264_vm1, %v253_v9  ;;  %278 = vst.msk [vmem:[%s494_s3 + $0x68] sm:$0xff] %vm264_vm1, %v261_v10 }

// kernel: encoder_forward.14
= control target key start
LH: loop header
LB: loop body
LE: loop exit
PB: predicated region body
PF: predicated region fallthrough
CT: control target
= control target key end

     0   :  { %s1688_s12 = smov 0   ;;  %s2193_s0 = inlined_call_operand.vmem [shape: f32[2,108,4], index: 0, kind: input, shape index: {}]   ;;  %s2194_s1 = inlined_call_operand.vmem [shape: bf16[9,4,4], index: 1, kind: input, shape index: {}]   ;;  %s2195_s2 = inlined_call_operand.vmem [shape: f32[1,4], index: 2, kind: input, shape index: {}]   ;;  %s2196_s3 = inlined_call_operand.vmem [shape: f32[2,80,4], index: 3, kind: output, shape index: {}]  }
   0x1 LB: > { %s1337_s13 = sadd.s32 4294967295, %s1664_s12   ;;  %p1341_p0 = scmp.ge.s32.totalorder %s1664_s12, 1  ;;  %s1664_s12 = sphi %s1688_s12, %s13_s12  }
   0x2   : > { %p137_p1 = scmp.lt.s32.totalorder %s1664_s12, 3 }
   0x4   : > { %p138_p2 = pnand %p1341_p0, %p137_p1 }
   0x5   : > { %v194_v0 = vld [vmem:[%s2194_s1 + $0x2] sm:$0x3] (!%p138_p2)  ;;  %vm263_vm0 = vcmask (!%p138_p2), 1041408   ;;  %p161_p3 = scmp.lt.s32.totalorder (!%p138_p2), %s1337_s13, 1  ;;  %v1666_v1 = vmov (!%p138_p2), 0.0   ;;  %vm1667_vm1 = vmmov (!%p138_p2), 0  }
   0x6   : > { %141 = sbr.rel (%p138_p2) target bundleno = 422 (0x1a6), region = 32  ;;  %1446 = vmatprep.subr.bf16.mxu0 (!%p138_p2), %v1666_v1  ;;  %1644 = vmatprep.subr.bf16.mxu1 (!%p138_p2), %v1666_v1  ;;  %v265_v2 = vsel (!%p138_p2), %vm263_vm0, %v194_v0, 0  ;;  %vm202_vm2 = vsmask.f32 (!%p138_p2), 7424  ;;  %v195_v27 = vld [vmem:[%s2194_s1 + $0x4] sm:$0x3] (!%p138_p2) }
   0x7   : > { %1447 = vmatpush3.bf16.msra.mxu0 (!%p138_p2), %v265_v2  ;;  %1645 = vmatpush3.bf16.msra.mxu1 (!%p138_p2), %v265_v2  ;;  %vm247_vm3 = vcmask (!%p138_p2), 31744   ;;  %v193_v30 = vld [vmem:[%s2194_s1] sm:$0x3] (!%p138_p2)  ;;  %v460_v37 = vsel (!%p138_p2), %vm263_vm0, %v195_v27, 0  ;;  %v196_v47 = vld [vmem:[%s2194_s1 + $0x6] sm:$0x3] (!%p138_p2) }
   0x8   : > { %1448 = vmatprep.mubr.msk.bf16.mxu0 (!%p138_p2), %vm1667_vm1, %v1666_v1  ;;  %1460 = vmatprep.mubr.msk.bf16.mxu1 (!%p138_p2), %vm1667_vm1, %v1666_v1  ;;  %v351_v40 = vsel (!%p138_p2), %vm263_vm0, %v193_v30, 0  ;;  %v573_v50 = vsel (!%p138_p2), %vm263_vm0, %v196_v47, 0  ;;  %vm545_vm4 = vcmask (!%p138_p2), 1042432   ;;  %vm658_vm5 = vsmask.f32 (!%p138_p2), 2304 }
   0x9   : > { %1490 = vmatprep.subr.bf16.mxu0 (!%p138_p2), %v1666_v1  ;;  %1468 = vmatprep.subr.bf16.mxu1 (!%p138_p2), %v1666_v1  ;;  %vm899_vm6 = vcmask (!%p138_p2), 1045504   ;;  %vm432_vm7 = vcmask (!%p138_p2), 1046528   ;;  %vm1012_vm8 = vsmask.f32 (!%p138_p2), 5376  ;;  %vm1142_vm9 = vcmask (!%p138_p2), 1044480  }
   0xd   : > { %s2198_s13 = smov (!%p161_p3, %s1337_s13), 1 }
   0xe   : > { %s1646_s16 = smul.u32 112, %s2198_s13 }
   0xf   : > { %s1647_s9 = smul.u32 80, %s2198_s13 }
  0x10   : > { %s1714_s19 = scalar_lea.vmem %s2193_s0, %s1646_s16 }
  0x11   : > { %v172_v3 = vld [vmem:[%s1714_s19] sm:$0xff]  ;;  %v173_v4 = vld [vmem:[%s1714_s19 + $0x8] sm:$0xff]  ;;  %v174_v5 = vld [vmem:[%s1714_s19 + $0x10] sm:$0xff]  ;;  %s2156_s16 = scalar_lea.vmem %s2196_s3, %s1647_s9 }
  0x12   : > { %v175_v6 = vld [vmem:[%s1714_s19 + $0x18] sm:$0xff]  ;;  %v1720_v7 = vpack.c.bf16 %v173_v4, %v172_v3  ;;  %v178_v8 = vld [vmem:[%s1714_s19 + $0x30] sm:$0xff]  ;;  %v180_v11 = vld [vmem:[%s1714_s19 + $0x40] sm:$0xff] }
  0x13   : > { %v179_v9 = vld [vmem:[%s1714_s19 + $0x38] sm:$0xff]  ;;  %v1724_v10 = vpack.c.bf16 %v175_v6, %v174_v5  ;;  %v181_v12 = vld [vmem:[%s1714_s19 + $0x48] sm:$0xff]  ;;  %v176_v14 = vld [vmem:[%s1714_s19 + $0x20] sm:$0xff] }
  0x14   : > { %v1728_v13 = vpack.c.bf16 %v179_v9, %v178_v8  ;;  %v204_v15 = vshrl.u32 %v1720_v7, 16  ;;  %v206_v16 = vshll.u32 %v1720_v7, 16  ;;  %v1733_v17 = vpack.c.bf16 %v181_v12, %v180_v11  ;;  %v177_v18 = vld [vmem:[%s1714_s19 + $0x28] sm:$0xff]  ;;  %v182_v23 = vld [vmem:[%s1714_s19 + $0x50] sm:$0xff]  ;;  %v183_v24 = vld [vmem:[%s1714_s19 + $0x58] sm:$0xff] }
  0x15   : > { %v1737_v19 = vshll.u32 %v1724_v10, 16  ;;  %v1745_v22 = vpack.c.bf16 %v177_v18, %v176_v14  ;;  %v1763_v31 = vshrl.u32 %v1724_v10, 16  ;;  %v1771_v35 = vpack.c.bf16 %v183_v24, %v182_v23  ;;  %v185_v30 = vld [vmem:[%s1714_s19 + $0x68] sm:$0xf] }
  0x16   : > { %v1740_v20 = vshll.u32 %v1728_v13, 16  ;;  %v1743_v21 = vshrl.u32 %v1728_v13, 16  ;;  %v208_v25 = vrot.slane %v206_v16, 1  ;;  %v1752_v26 = vshll.u32 %v1733_v17, 16 }
  0x17   : > { %v213_v28 = vrot.slane %v1737_v19, 1  ;;  %v1769_v34 = vshll.u32 %v1745_v22, 16  ;;  %v1776_v38 = vshrl.u32 %v1733_v17, 16  ;;  %v1781_v41 = vshll.u32 %v1771_v35, 16 }
  0x18   : > { %v229_v29 = vrot.slane %v1740_v20, 1  ;;  %v209_v32 = vor.u32 %v208_v25, %v204_v15  ;;  %v237_v33 = vrot.slane %v1752_v26, 1  ;;  %v1798_v48 = vshrl.u32 %v1745_v22, 16 }
  0x19   : > { %v217_v43 = vor.u32 %v1763_v31, %v213_v28  ;;  %v221_v44 = vrot.slane %v1769_v34, 1  ;;  %v245_v46 = vrot.slane %v1781_v41, 1  ;;  %v551_v52 = vrot.slane %v1728_v13, 5 }
  0x1a   : > { %v233_v36 = vor.u32 %v1743_v21, %v229_v29  ;;  %v214_v39 = vsel %vm202_vm2, %v209_v32, %v213_v28  ;;  %v241_v45 = vor.u32 %v1776_v38, %v237_v33  ;;  %v553_v53 = vrot.slane %v1733_v17, 5 }
  0x1b   : > { %1449 = vmatmul.mubr.msk.bf16.vlgmr.msra.gmra.mrb[0].mxu0 %vm247_vm3, %v214_v39  ;;  %v222_v49 = vsel %vm202_vm2, %v217_v43, %v221_v44  ;;  %v670_v54 = vrot.slane %v1743_v21, 5  ;;  %v225_v55 = vor.u32 %v1798_v48, %v221_v44  ;;  %v671_v56 = vrot.slane %v1740_v20, 6 }
  0x1c   : > { %v238_v42 = vsel %vm202_vm2, %v233_v36, %v237_v33  ;;  %1491 = vmatpush3.bf16.msra.mxu0 %v460_v37  ;;  %1452 = vmatprep.mubr.msk.bf16.mxu0 %vm1667_vm1, %v1666_v1  ;;  %v246_v51 = vsel %vm202_vm2, %v241_v45, %v245_v46  ;;  %v555_v57 = vrot.slane %v1771_v35, 5  ;;  %v1815_v58 = vsel %vm545_vm4, %v551_v52, %v553_v53 }
  0x1d   : > { %1461 = vmatmul.mubr.msk.bf16.vlgmr.msra.gmra.mrb[0].mxu1 %vm247_vm3, %v238_v42  ;;  %1534 = vmatprep.subr.bf16.mxu0 %v1666_v1  ;;  %v674_v59 = vrot.slane %v1776_v38, 5  ;;  %v675_v60 = vrot.slane %v1752_v26, 6  ;;  %v433_v61 = vrot.slane %v1720_v7, 1  ;;  %v1823_v62 = vor.u32 %v671_v56, %v670_v54 }
  0x1e   : > { %1469 = vmatpush3.bf16.msra.mxu1 %v351_v40  ;;  %1464 = vmatprep.mubr.msk.bf16.mxu1 %vm1667_vm1, %v1666_v1  ;;  %v1826_v63 = vsel %vm545_vm4, %v553_v53, %v555_v57  ;;  %v678_v0 = vshrl.u32 %v1771_v35, 16  ;;  %v434_v2 = vrot.slane %v1724_v10, 1  ;;  %v681_v4 = vrot.slane %v1781_v41, 6 }
  0x1f   : > { %1512 = vmatprep.subr.bf16.mxu1 %v1666_v1  ;;  %v676_v3 = vor.u32 %v675_v60, %v674_v59  ;;  %v786_v5 = vrot.slane %v1720_v7, 6  ;;  %v230_v6 = vsel %vm202_vm2, %v225_v55, %v229_v29  ;;  %v787_v9 = vrot.slane %v1724_v10, 6  ;;  %v184_v29 = vld [vmem:[%s1714_s19 + $0x60] sm:$0xff]  ;;  %v197_v59 = vld [vmem:[%s2194_s1 + $0x8] sm:$0x3] }
  0x20   : > { %v680_v8 = vrot.slane %v678_v0, 5  ;;  %v789_v11 = vrot.slane %v1745_v22, 6  ;;  %v900_v14 = vrot.slane %v1724_v10, 2  ;;  %v901_v18 = vrot.slane %v1745_v22, 2 }
  0x21   : > { %v1841_v12 = vsel %vm658_vm5, %v1823_v62, %v676_v3  ;;  %v791_v23 = vrot.slane %v1728_v13, 6  ;;  %v1847_v25 = vsel %vm263_vm0, %v786_v5, %v787_v9  ;;  %v903_v28 = vrot.slane %v1728_v13, 2 }
  0x22   : > { %v682_v24 = vor.u32 %v681_v4, %v680_v8  ;;  %v1850_v27 = vsel %vm263_vm0, %v787_v9, %v789_v11  ;;  %v1856_v32 = vsel %vm899_vm6, %v900_v14, %v901_v18  ;;  %v793_v36 = vrot.slane %v1733_v17, 6 }
  0x23   : > { %1453 = vmatmul.mubr.msk.bf16.gmra.mrb[4].mxu0 %vm247_vm3, %v222_v49  ;;  %v1859_v33 = vsel %vm263_vm0, %v789_v11, %v791_v23  ;;  %v905_v37 = vrot.slane %v1733_v17, 2  ;;  %v1867_v40 = vsel %vm899_vm6, %v901_v18, %v903_v28  ;;  %v795_v42 = vrot.slane %v1771_v35, 6 }
  0x24   : > { %1456 = vmatprep.mubr.msk.bf16.mxu0 %vm1667_vm1, %v1666_v1  ;;  %v1864_v39 = vsel %vm658_vm5, %v676_v3, %v682_v24  ;;  %v907_v43 = vrot.slane %v1771_v35, 2  ;;  %v1873_v44 = vsel %vm263_vm0, %v791_v23, %v793_v36  ;;  %v1878_v46 = vpack.c.bf16 %v185_v30, %v184_v29 }
  0x25   : > { %1465 = vmatmul.mubr.msk.bf16.gmra.mrb[4].mxu1 %vm247_vm3, %v246_v51  ;;  %v1876_v45 = vsel %vm899_vm6, %v903_v28, %v905_v37  ;;  %v1885_v47 = vsel %vm263_vm0, %v793_v36, %v795_v42  ;;  %v1013_v51 = vrot.slane %v1763_v31, 2  ;;  %v1014_v53 = vrot.slane %v1737_v19, 3 }
  0x26   : > { %1470 = vmatprep.mubr.msk.bf16.mxu1 %vm1667_vm1, %v1666_v1  ;;  %v1888_v49 = vsel %vm899_vm6, %v905_v37, %v907_v43  ;;  %v909_v54 = vrot.slane %v1878_v46, 2  ;;  %v1016_v55 = vrot.slane %v1798_v48, 2  ;;  %v1017_v56 = vrot.slane %v1769_v34, 3 }
  0x27   : > { %v1020_v57 = vrot.slane %v1743_v21, 2  ;;  %v1015_v60 = vor.u32 %v1014_v53, %v1013_v51  ;;  %v1143_v3 = vrot.slane %v1724_v10, 3  ;;  %v1024_v21 = vrot.slane %v1776_v38, 2 }
  0x28   : > { %v1905_v4 = vsel %vm899_vm6, %v907_v43, %v909_v54  ;;  %v1018_v5 = vor.u32 %v1017_v56, %v1016_v55  ;;  %v435_v8 = vsel %vm432_vm7, %v433_v61, %v434_v2  ;;  %v1025_v11 = vrot.slane %v1752_v26, 3 }
  0x29   : > { %v1146_v23 = vrot.slane %v1728_v13, 3  ;;  %v436_v26 = vrot.slane %v1745_v22, 1  ;;  %v1028_v29 = vrot.slane %v678_v0, 2  ;;  %v1029_v30 = vrot.slane %v1781_v41, 3 }
  0x2a   : > { %v1915_v14 = vsel %vm1012_vm8, %v1015_v60, %v1018_v5  ;;  %v1026_v38 = vor.u32 %v1025_v11, %v1024_v21  ;;  %v1148_v43 = vrot.slane %v1733_v17, 3  ;;  %v438_v41 = vrot.slane %v1728_v13, 1  ;;  %v198_v11 = vld [vmem:[%s2194_s1 + $0xa] sm:$0x3] }
  0x2b   : > { %1457 = vmatmul.mubr.msk.bf16.gmra.mrb[8].mxu0 %vm247_vm3, %v230_v6  ;;  %v1144_v6 = vrot.slane %v1745_v22, 3  ;;  %v1030_v36 = vor.u32 %v1029_v30, %v1028_v29  ;;  %v437_v37 = vsel %vm432_vm7, %v434_v2, %v436_v26  ;;  %v1033_v0 = vshrl.u32 %v1878_v46, 16 }
  0x2c   : > { %1492 = vmatprep.mubr.msk.bf16.mxu0 %vm1667_vm1, %v1666_v1  ;;  %v1951_v51 = vsel %vm1142_vm9, %v1146_v23, %v1148_v43  ;;  %v1036_v2 = vshll.u32 %v1878_v46, 16  ;;  %v439_v55 = vsel %vm432_vm7, %v436_v26, %v438_v41  ;;  %v442_v21 = vrot.slane %v1771_v35, 1 }
  0x2d   : > { %1471 = vmatmul.mubr.msk.bf16.vlgmr.msra.gmra.mrb[8].mxu1 %vm247_vm3, %v1720_v7  ;;  %v1918_v18 = vsel %vm1142_vm9, %v1143_v3, %v1144_v6  ;;  %v1926_v61 = vsel %vm1142_vm9, %v1144_v6, %v1146_v23  ;;  %v1946_v42 = vsel %vm1012_vm8, %v1026_v38, %v1030_v36  ;;  %v1035_v53 = vrot.slane %v1033_v0, 2 }
  0x2e   : > { %1513 = vmatpush3.bf16.msra.mxu1 %v573_v50  ;;  %1474 = vmatprep.mubr.msk.bf16.mxu1 %vm1667_vm1, %v1666_v1  ;;  %v1021_v50 = vrot.slane %v1740_v20, 3  ;;  %v700_v20 = vsel %vm263_vm0, %v197_v59, 0  ;;  %v1038_v54 = vrot.slane %v1036_v2, 3  ;;  %v1152_v3 = vrot.slane %v1878_v46, 3 }
  0x2f   : > { %1556 = vmatprep.subr.bf16.mxu1 %v1666_v1  ;;  %v546_v46 = vrot.slane %v1720_v7, 5  ;;  %v663_v23 = vrot.slane %v1737_v19, 6  ;;  %v199_v19 = vld [vmem:[%s2194_s1 + $0xc] sm:$0x3]  ;;  %v666_v26 = vrot.slane %v1798_v48, 5  ;;  %v667_v29 = vrot.slane %v1769_v34, 6 }
  0x30   : > { %v1022_v9 = vor.u32 %v1021_v50, %v1020_v57  ;;  %v1039_v56 = vor.u32 %v1038_v54, %v1035_v53  ;;  %v1150_v57 = vrot.slane %v1771_v35, 3  ;;  %v440_v50 = vrot.slane %v1733_v17, 1 }
  0x31   : > { %v662_v35 = vrot.slane %v1763_v31, 5 }
  0x32   : > { %v1922_v24 = vsel %vm1012_vm8, %v1018_v5, %v1022_v9  ;;  %v1932_v28 = vsel %vm1012_vm8, %v1022_v9, %v1026_v38  ;;  %v1966_v59 = vsel %vm1012_vm8, %v1030_v36, %v1039_v56  ;;  %v1969_v60 = vsel %vm1142_vm9, %v1148_v43, %v1150_v57 }
  0x33   : > { %1493 = vmatmul.mubr.msk.bf16.vlgmr.msra.gmra.mrb[12].mxu0 %vm247_vm3, %v435_v8  ;;  %v1980_v5 = vsel %vm1142_vm9, %v1150_v57, %v1152_v3  ;;  %v441_v6 = vsel %vm432_vm7, %v438_v41, %v440_v50  ;;  %v547_v8 = vrot.slane %v1724_v10, 5  ;;  %v659_v9 = vrot.slane %v204_v15, 5 }
  0x34   : > { %1535 = vmatpush3.bf16.msra.mxu0 %v700_v20  ;;  %1496 = vmatprep.mubr.msk.bf16.mxu0 %vm1667_vm1, %v1666_v1  ;;  %v443_v20 = vsel %vm432_vm7, %v440_v50, %v442_v21  ;;  %v664_v7 = vor.u32 %v663_v23, %v662_v35  ;;  %v927_v36 = vsel %vm263_vm0, %v199_v19, 0 }
  0x35   : > { %1475 = vmatmul.mubr.msk.bf16.gmra.mrb[12].mxu1 %vm247_vm3, %v1724_v10  ;;  %1578 = vmatprep.subr.bf16.mxu0 %v1666_v1  ;;  %v548_v38 = vsel %vm545_vm4, %v546_v46, %v547_v8  ;;  %v813_v10 = vsel %vm263_vm0, %v198_v11, 0 }
  0x36   : > { %1478 = vmatprep.mubr.msk.bf16.mxu1 %vm1667_vm1, %v1666_v1 }
  0x3b   : > { %1497 = vmatmul.mubr.msk.bf16.gmra.mrb[16].mxu0 %vm247_vm3, %v437_v37 }
  0x3c   : > { %1500 = vmatprep.mubr.msk.bf16.mxu0 %vm1667_vm1, %v1666_v1 }
  0x3d   : > { %1479 = vmatmul.mubr.msk.bf16.gmra.mrb[16].mxu1 %vm247_vm3, %v1745_v22 }
  0x3e   : > { %1482 = vmatprep.mubr.msk.bf16.mxu1 %vm1667_vm1, %v1666_v1 }
  0x43   : > { %1501 = vmatmul.mubr.msk.bf16.gmra.mrb[20].mxu0 %vm247_vm3, %v439_v55 }
  0x44   : > { %1504 = vmatprep.mubr.msk.bf16.mxu0 %vm1667_vm1, %v1666_v1 }
  0x45   : > { %1483 = vmatmul.mubr.msk.bf16.gmra.mrb[20].mxu1 %vm247_vm3, %v1728_v13  ;;  %v200_v13 = vld [vmem:[%s2194_s1 + $0xe] sm:$0x3] }
  0x46   : > { %1486 = vmatprep.mubr.msk.bf16.mxu1 %vm1667_vm1, %v1666_v1 }
  0x4b   : > { %1505 = vmatmul.mubr.msk.bf16.gmra.mrb[24].mxu0 %vm247_vm3, %v441_v6 }
  0x4c   : > { %1508 = vmatprep.mubr.msk.bf16.mxu0 %vm1667_vm1, %v1666_v1 }
  0x4d   : > { %1487 = vmatmul.mubr.msk.bf16.gmra.mrb[24].mxu1 %vm247_vm3, %v1733_v17  ;;  %v660_v17 = vrot.slane %v206_v16, 6  ;;  %v549_v16 = vrot.slane %v1745_v22, 5  ;;  %v668_v22 = vor.u32 %v667_v29, %v666_v26 }
  0x4e   : > { %1514 = vmatprep.mubr.msk.bf16.mxu1 %vm1667_vm1, %v1666_v1 }
  0x4f   : > { %v661_v15 = vor.u32 %v660_v17, %v659_v9  ;;  %v550_v30 = vsel %vm545_vm4, %v547_v8, %v549_v16  ;;  %v669_v34 = vsel %vm658_vm5, %v664_v7, %v668_v22  ;;  %v552_v48 = vsel %vm545_vm4, %v549_v16, %v551_v52 }
  0x50   : > { %v673_v37 = vsel %vm658_vm5, %v668_v22, %v1823_v62  ;;  %v1057_v52 = vsel %vm263_vm0, %v200_v13, 0 }
  0x51   : > { %v665_v31 = vsel %vm658_vm5, %v661_v15, %v664_v7 }
  0x53   : > { %1509 = vmatmul.mubr.msk.bf16.gmra.mrb[28].mxu0 %vm247_vm3, %v443_v20 }
  0x54   : > { %1536 = vmatprep.mubr.msk.bf16.mxu0 %vm1667_vm1, %v1666_v1 }
  0x55   : > { %1515 = vmatmul.mubr.msk.bf16.vlgmr.msra.gmra.mrb[28].mxu1 %vm247_vm3, %v548_v38 }
  0x56   : > { %1557 = vmatpush3.bf16.msra.mxu1 %v813_v10  ;;  %1518 = vmatprep.mubr.msk.bf16.mxu1 %vm1667_vm1, %v1666_v1 }
  0x57   : > { %1600 = vmatprep.subr.bf16.mxu1 %v1666_v1 }
  0x5b   : > { %1537 = vmatmul.mubr.msk.bf16.vlgmr.msra.gmra.mrb[32].mxu0 %vm247_vm3, %v665_v31 }
  0x5c   : > { %1579 = vmatpush3.bf16.msra.mxu0 %v927_v36  ;;  %1540 = vmatprep.mubr.msk.bf16.mxu0 %vm1667_vm1, %v1666_v1 }
  0x5d   : > { %1519 = vmatmul.mubr.msk.bf16.gmra.mrb[32].mxu1 %vm247_vm3, %v550_v30  ;;  %1622 = vmatprep.subr.bf16.mxu0 %v1666_v1 }
  0x5e   : > { %1522 = vmatprep.mubr.msk.bf16.mxu1 %vm1667_vm1, %v1666_v1 }
  0x63   : > { %1541 = vmatmul.mubr.msk.bf16.gmra.mrb[36].mxu0 %vm247_vm3, %v669_v34 }
  0x64   : > { %1544 = vmatprep.mubr.msk.bf16.mxu0 %vm1667_vm1, %v1666_v1 }
  0x65   : > { %1523 = vmatmul.mubr.msk.bf16.gmra.mrb[36].mxu1 %vm247_vm3, %v552_v48 }
  0x66   : > { %1526 = vmatprep.mubr.msk.bf16.mxu1 %vm1667_vm1, %v1666_v1 }
  0x6b   : > { %1545 = vmatmul.mubr.msk.bf16.gmra.mrb[40].mxu0 %vm247_vm3, %v673_v37 }
  0x6c   : > { %1548 = vmatprep.mubr.msk.bf16.mxu0 %vm1667_vm1, %v1666_v1 }
  0x6d   : > { %1527 = vmatmul.mubr.msk.bf16.gmra.mrb[40].mxu1 %vm247_vm3, %v1815_v58  ;;  %v201_v58 = vld [vmem:[%s2194_s1 + $0x10] sm:$0x3] }
  0x6e   : > { %1530 = vmatprep.mubr.msk.bf16.mxu1 %vm1667_vm1, %v1666_v1  ;;  %v1170_v62 = vsel %vm263_vm0, %v201_v58, 0 }
  0x73   : > { %1549 = vmatmul.mubr.msk.bf16.gmra.mrb[44].mxu0 %vm247_vm3, %v1841_v12 }
  0x74   : > { %1552 = vmatprep.mubr.msk.bf16.mxu0 %vm1667_vm1, %v1666_v1 }
  0x75   : > { %1531 = vmatmul.mubr.msk.bf16.gmra.mrb[44].mxu1 %vm247_vm3, %v1826_v63 }
  0x76   : > { %1558 = vmatprep.mubr.msk.bf16.mxu1 %vm1667_vm1, %v1666_v1 }
  0x7b   : > { %1553 = vmatmul.mubr.msk.bf16.gmra.mrb[48].mxu0 %vm247_vm3, %v1864_v39 }
  0x7c   : > { %1580 = vmatprep.mubr.msk.bf16.mxu0 %vm1667_vm1, %v1666_v1 }
  0x7d   : > { %1559 = vmatmul.mubr.msk.bf16.vlgmr.msra.gmra.mrb[48].mxu1 %vm247_vm3, %v1847_v25 }
  0x7e   : > { %1601 = vmatpush3.bf16.msra.mxu1 %v1057_v52  ;;  %1562 = vmatprep.mubr.msk.bf16.mxu1 %vm1667_vm1, %v1666_v1 }
  0x83   : > { %1581 = vmatmul.mubr.msk.bf16.vlgmr.msra.gmra.mrb[52].mxu0 %vm247_vm3, %v1856_v32 }
  0x84   : > { %1623 = vmatpush3.bf16.msra.mxu0 %v1170_v62  ;;  %1584 = vmatprep.mubr.msk.bf16.mxu0 %vm1667_vm1, %v1666_v1 }
  0x85   : > { %1563 = vmatmul.mubr.msk.bf16.gmra.mrb[52].mxu1 %vm247_vm3, %v1850_v27 }
  0x86   : > { %1566 = vmatprep.mubr.msk.bf16.mxu1 %vm1667_vm1, %v1666_v1 }
  0x8b   : > { %1585 = vmatmul.mubr.msk.bf16.gmra.mrb[56].mxu0 %vm247_vm3, %v1867_v40 }
  0x8c   : > { %1588 = vmatprep.mubr.msk.bf16.mxu0 %vm1667_vm1, %v1666_v1 }
  0x8d   : > { %1567 = vmatmul.mubr.msk.bf16.gmra.mrb[56].mxu1 %vm247_vm3, %v1859_v33 }
  0x8e   : > { %1570 = vmatprep.mubr.msk.bf16.mxu1 %vm1667_vm1, %v1666_v1 }
  0x93   : > { %1589 = vmatmul.mubr.msk.bf16.gmra.mrb[60].mxu0 %vm247_vm3, %v1876_v45 }
  0x94   : > { %1592 = vmatprep.mubr.msk.bf16.mxu0 %vm1667_vm1, %v1666_v1 }
  0x95   : > { %1571 = vmatmul.mubr.msk.bf16.gmra.mrb[60].mxu1 %vm247_vm3, %v1873_v44 }
  0x96   : > { %1574 = vmatprep.mubr.msk.bf16.mxu1 %vm1667_vm1, %v1666_v1 }
  0x9b   : > { %1593 = vmatmul.mubr.msk.bf16.gmra.mrb[64].mxu0 %vm247_vm3, %v1888_v49 }
  0x9c   : > { %1596 = vmatprep.mubr.msk.bf16.mxu0 %vm1667_vm1, %v1666_v1 }
  0x9d   : > { %1575 = vmatmul.mubr.msk.bf16.gmra.mrb[64].mxu1 %vm247_vm3, %v1885_v47 }
  0x9e   : > { %1602 = vmatprep.mubr.msk.bf16.mxu1 %vm1667_vm1, %v1666_v1 }
  0xa3   : > { %1597 = vmatmul.mubr.msk.bf16.gmra.mrb[68].mxu0 %vm247_vm3, %v1905_v4 }
  0xa4   : > { %1624 = vmatprep.mubr.msk.bf16.mxu0 %vm1667_vm1, %v1666_v1 }
  0xa5   : > { %1603 = vmatmul.mubr.msk.bf16.vlgmr.msra.gmra.mrb[68].mxu1 %vm247_vm3, %v1915_v14 }
  0xa6   : > { %1606 = vmatprep.mubr.msk.bf16.mxu1 %vm1667_vm1, %v1666_v1 }
  0xab   : > { %1625 = vmatmul.mubr.msk.bf16.vlgmr.msra.gmra.mrb[72].mxu0 %vm247_vm3, %v1918_v18 }
  0xac   : > { %1628 = vmatprep.mubr.msk.bf16.mxu0 %vm1667_vm1, %v1666_v1 }
  0xad   : > { %1607 = vmatmul.mubr.msk.bf16.gmra.mrb[72].mxu1 %vm247_vm3, %v1922_v24 }
  0xae   : > { %1610 = vmatprep.mubr.msk.bf16.mxu1 %vm1667_vm1, %v1666_v1 }
  0xb3   : > { %1629 = vmatmul.mubr.msk.bf16.gmra.mrb[76].mxu0 %vm247_vm3, %v1926_v61 }
  0xb4   : > { %1632 = vmatprep.mubr.msk.bf16.mxu0 %vm1667_vm1, %v1666_v1 }
  0xb5   : > { %1611 = vmatmul.mubr.msk.bf16.gmra.mrb[76].mxu1 %vm247_vm3, %v1932_v28 }
  0xb6   : > { %1614 = vmatprep.mubr.msk.bf16.mxu1 %vm1667_vm1, %v1666_v1 }
  0xbb   : > { %1633 = vmatmul.mubr.msk.bf16.gmra.mrb[80].mxu0 %vm247_vm3, %v1951_v51 }
  0xbc   : > { %1636 = vmatprep.mubr.msk.bf16.mxu0 %vm1667_vm1, %v1666_v1 }
  0xbd   : > { %1615 = vmatmul.mubr.msk.bf16.gmra.mrb[80].mxu1 %vm247_vm3, %v1946_v42 }
  0xbe   : > { %1618 = vmatprep.mubr.msk.bf16.mxu1 %vm1667_vm1, %v1666_v1 }
  0xc3   : > { %1637 = vmatmul.mubr.msk.bf16.gmra.mrb[84].mxu0 %vm247_vm3, %v1969_v60 }
  0xc4   : > { %1640 = vmatprep.mubr.msk.bf16.mxu0 %vm1667_vm1, %v1666_v1 }
  0xc5   : > { %1619 = vmatmul.mubr.msk.bf16.gmra.mrb[84].mxu1 %vm247_vm3, %v1966_v59 }
  0xcb   : > { %1641 = vmatmul.mubr.msk.bf16.gmra.mrb[88].mxu0 %vm247_vm3, %v1980_v5 }
  0xee   : > { %v301_v63 = vpop.f32.mrb[0].mxu0 }
  0xef   : > { %v1450_v12 = vpop.f32.mrb[1].mxu0 }
  0xf0   : > { %v325_v25 = vpop.f32.mrb[0].mxu1  ;;  %v304_v27 = vpop.f32.mrb[2].mxu0 }
  0xf1   : > { %v1462_v32 = vpop.f32.mrb[1].mxu1  ;;  %v1451_v33 = vpop.f32.mrb[3].mxu0 }
  0xf2   : > { %v328_v39 = vpop.f32.mrb[2].mxu1 }
  0xf3   : > { %v1463_v40 = vpop.f32.mrb[3].mxu1 }
  0xf6   : > { %v309_v44 = vpop.f32.mrb[4].mxu0 }
  0xf7   : > { %v1454_v45 = vpop.f32.mrb[5].mxu0 }
  0xf8   : > { %v333_v47 = vpop.f32.mrb[4].mxu1  ;;  %v312_v49 = vpop.f32.mrb[6].mxu0 }
  0xf9   : > { %v1466_v4 = vpop.f32.mrb[5].mxu1  ;;  %v1455_v14 = vpop.f32.mrb[7].mxu0 }
  0xfa   : > { %v336_v18 = vpop.f32.mrb[6].mxu1 }
  0xfb   : > { %v1467_v24 = vpop.f32.mrb[7].mxu1 }
  0xfe   : > { %v317_v1 = vpop.f32.mrb[8].mxu0 }
  0xff   : > { %v1458_v28 = vpop.f32.mrb[9].mxu0 }
 0x100   : > { %v387_v61 = vpop.f32.mrb[8].mxu1  ;;  %v320_v51 = vpop.f32.mrb[10].mxu0 }
 0x101   : > { %v388_v42 = vadd.f32 %v387_v61, %v301_v63  ;;  %v1472_v43 = vpop.f32.mrb[9].mxu1  ;;  %v1459_v0 = vpop.f32.mrb[11].mxu0 }
 0x102   : > { %v390_v41 = vpop.f32.mrb[10].mxu1 }
 0x103   : > { %v391_v2 = vadd.f32 %v390_v41, %v304_v27  ;;  %v1473_v53 = vpop.f32.mrb[11].mxu1 }
 0x106   : > { %v496_v54 = vpop.f32.mrb[12].mxu0 }
 0x107   : > { %v535_v56 = vadd.f32 %v496_v54, %v388_v42  ;;  %v1494_v57 = vpop.f32.mrb[13].mxu0 }
 0x108   : > { %v395_v55 = vpop.f32.mrb[12].mxu1  ;;  %v499_v50 = vpop.f32.mrb[14].mxu0 }
 0x109   : > { %v396_v59 = vadd.f32 %v395_v55, %v309_v44  ;;  %v1476_v60 = vpop.f32.mrb[13].mxu1  ;;  %v536_v5 = vadd.f32 %v499_v50, %v391_v2  ;;  %v1495_v6 = vpop.f32.mrb[15].mxu0 }
 0x10a   : > { %v398_v3 = vpop.f32.mrb[14].mxu1 }
 0x10b   : > { %v399_v21 = vadd.f32 %v398_v3, %v312_v49  ;;  %v1477_v46 = vpop.f32.mrb[15].mxu1 }
 0x10e   : > { %v504_v8 = vpop.f32.mrb[16].mxu0 }
 0x10f   : > { %v537_v11 = vadd.f32 %v504_v8, %v396_v59  ;;  %v1498_v17 = vpop.f32.mrb[17].mxu0 }
 0x110   : > { %v403_v9 = vpop.f32.mrb[16].mxu1  ;;  %v507_v23 = vpop.f32.mrb[18].mxu0 }
 0x111   : > { %v404_v20 = vadd.f32 %v403_v9, %v317_v1  ;;  %v1480_v35 = vpop.f32.mrb[17].mxu1  ;;  %v538_v10 = vadd.f32 %v507_v23, %v399_v21  ;;  %v1499_v15 = vpop.f32.mrb[19].mxu0 }
 0x112   : > { %v406_v38 = vpop.f32.mrb[18].mxu1 }
 0x113   : > { %v407_v7 = vadd.f32 %v406_v38, %v320_v51  ;;  %v1481_v16 = vpop.f32.mrb[19].mxu1 }
 0x116   : > { %v512_v19 = vpop.f32.mrb[20].mxu0 }
 0x117   : > { %v539_v26 = vadd.f32 %v512_v19, %v404_v20  ;;  %v1502_v29 = vpop.f32.mrb[21].mxu0 }
 0x118   : > { %v411_v31 = vpop.f32.mrb[20].mxu1  ;;  %v515_v22 = vpop.f32.mrb[22].mxu0 }
 0x119   : > { %v412_v30 = vadd.f32 %v411_v31, %v325_v25  ;;  %v1484_v36 = vpop.f32.mrb[21].mxu1  ;;  %v540_v48 = vadd.f32 %v515_v22, %v407_v7  ;;  %v1503_v37 = vpop.f32.mrb[23].mxu0 }
 0x11a   : > { %v414_v34 = vpop.f32.mrb[22].mxu1 }
 0x11b   : > { %v415_v13 = vadd.f32 %v414_v34, %v328_v39  ;;  %v1485_v52 = vpop.f32.mrb[23].mxu1 }
 0x11e   : > { %v520_v58 = vpop.f32.mrb[24].mxu0 }
 0x11f   : > { %v541_v63 = vadd.f32 %v520_v58, %v412_v30  ;;  %v1506_v12 = vpop.f32.mrb[25].mxu0 }
 0x120   : > { %v419_v62 = vpop.f32.mrb[24].mxu1  ;;  %v523_v33 = vpop.f32.mrb[26].mxu0 }
 0x121   : > { %v420_v27 = vadd.f32 %v419_v62, %v333_v47  ;;  %v1488_v32 = vpop.f32.mrb[25].mxu1  ;;  %v542_v44 = vadd.f32 %v523_v33, %v415_v13  ;;  %v1507_v45 = vpop.f32.mrb[27].mxu0 }
 0x122   : > { %v422_v40 = vpop.f32.mrb[26].mxu1 }
 0x123   : > { %v423_v49 = vadd.f32 %v422_v40, %v336_v18  ;;  %v1489_v4 = vpop.f32.mrb[27].mxu1 }
 0x126   : > { %v528_v25 = vpop.f32.mrb[28].mxu0 }
 0x127   : > { %v543_v14 = vadd.f32 %v528_v25, %v420_v27  ;;  %v1510_v1 = vpop.f32.mrb[29].mxu0 }
 0x128   : > { %v609_v24 = vpop.f32.mrb[28].mxu1  ;;  %v531_v39 = vpop.f32.mrb[30].mxu0 }
 0x129   : > { %v648_v61 = vadd.f32 %v609_v24, %v535_v56  ;;  %v1516_v28 = vpop.f32.mrb[29].mxu1  ;;  %v544_v42 = vadd.f32 %v531_v39, %v423_v49  ;;  %v1511_v51 = vpop.f32.mrb[31].mxu0 }
 0x12a   : > { %v612_v43 = vpop.f32.mrb[30].mxu1 }
 0x12b   : > { %v649_v41 = vadd.f32 %v612_v43, %v536_v5  ;;  %v1517_v0 = vpop.f32.mrb[31].mxu1 }
 0x12e   : > { %v736_v47 = vpop.f32.mrb[32].mxu0 }
 0x12f   : > { %v775_v53 = vadd.f32 %v736_v47, %v648_v61  ;;  %v1538_v54 = vpop.f32.mrb[33].mxu0 }
 0x130   : > { %v617_v2 = vpop.f32.mrb[32].mxu1  ;;  %v739_v18 = vpop.f32.mrb[34].mxu0 }
 0x131   : > { %v650_v55 = vadd.f32 %v617_v2, %v537_v11  ;;  %v1520_v57 = vpop.f32.mrb[33].mxu1  ;;  %v776_v60 = vadd.f32 %v739_v18, %v649_v41  ;;  %v1539_v50 = vpop.f32.mrb[35].mxu0 }
 0x132   : > { %v620_v59 = vpop.f32.mrb[34].mxu1 }
 0x133   : > { %v651_v3 = vadd.f32 %v620_v59, %v538_v10  ;;  %v1521_v6 = vpop.f32.mrb[35].mxu1 }
 0x136   : > { %v744_v56 = vpop.f32.mrb[36].mxu0 }
 0x137   : > { %v777_v46 = vadd.f32 %v744_v56, %v650_v55  ;;  %v1542_v8 = vpop.f32.mrb[37].mxu0 }
 0x138   : > { %v625_v21 = vpop.f32.mrb[36].mxu1  ;;  %v747_v5 = vpop.f32.mrb[38].mxu0 }
 0x139   : > { %v652_v9 = vadd.f32 %v625_v21, %v539_v26  ;;  %v1524_v17 = vpop.f32.mrb[37].mxu1  ;;  %v778_v35 = vadd.f32 %v747_v5, %v651_v3  ;;  %v1543_v23 = vpop.f32.mrb[39].mxu0 }
 0x13a   : > { %v628_v20 = vpop.f32.mrb[38].mxu1 }
 0x13b   : > { %v653_v38 = vadd.f32 %v628_v20, %v540_v48  ;;  %v1525_v15 = vpop.f32.mrb[39].mxu1 }
 0x13e   : > { %v752_v11 = vpop.f32.mrb[40].mxu0 }
 0x13f   : > { %v779_v16 = vadd.f32 %v752_v11, %v652_v9  ;;  %v1546_v19 = vpop.f32.mrb[41].mxu0 }
 0x140   : > { %v633_v7 = vpop.f32.mrb[40].mxu1  ;;  %v755_v10 = vpop.f32.mrb[42].mxu0 }
 0x141   : > { %v654_v31 = vadd.f32 %v633_v7, %v541_v63  ;;  %v1528_v29 = vpop.f32.mrb[41].mxu1  ;;  %v780_v36 = vadd.f32 %v755_v10, %v653_v38  ;;  %v1547_v22 = vpop.f32.mrb[43].mxu0 }
 0x142   : > { %v636_v30 = vpop.f32.mrb[42].mxu1 }
 0x143   : > { %v655_v34 = vadd.f32 %v636_v30, %v542_v44  ;;  %v1529_v37 = vpop.f32.mrb[43].mxu1 }
 0x146   : > { %v760_v26 = vpop.f32.mrb[44].mxu0 }
 0x147   : > { %v781_v52 = vadd.f32 %v760_v26, %v654_v31  ;;  %v1550_v58 = vpop.f32.mrb[45].mxu0 }
 0x148   : > { %v641_v13 = vpop.f32.mrb[44].mxu1  ;;  %v763_v48 = vpop.f32.mrb[46].mxu0 }
 0x149   : > { %v656_v62 = vadd.f32 %v641_v13, %v543_v14  ;;  %v1532_v12 = vpop.f32.mrb[45].mxu1  ;;  %v782_v32 = vadd.f32 %v763_v48, %v655_v34  ;;  %v1551_v33 = vpop.f32.mrb[47].mxu0 }
 0x14a   : > { %v644_v27 = vpop.f32.mrb[46].mxu1 }
 0x14b   : > { %v657_v40 = vadd.f32 %v644_v27, %v544_v42  ;;  %v1533_v45 = vpop.f32.mrb[47].mxu1 }
 0x14e   : > { %v768_v63 = vpop.f32.mrb[48].mxu0 }
 0x14f   : > { %v783_v49 = vadd.f32 %v768_v63, %v656_v62  ;;  %v1554_v25 = vpop.f32.mrb[49].mxu0 }
 0x150   : > { %v849_v4 = vpop.f32.mrb[48].mxu1  ;;  %v771_v44 = vpop.f32.mrb[50].mxu0 }
 0x151   : > { %v888_v24 = vadd.f32 %v849_v4, %v775_v53  ;;  %v1560_v1 = vpop.f32.mrb[49].mxu1  ;;  %v784_v61 = vadd.f32 %v771_v44, %v657_v40  ;;  %v1555_v39 = vpop.f32.mrb[51].mxu0 }
 0x152   : > { %v852_v28 = vpop.f32.mrb[50].mxu1 }
 0x153   : > { %v889_v43 = vadd.f32 %v852_v28, %v776_v60  ;;  %v1561_v51 = vpop.f32.mrb[51].mxu1 }
 0x156   : > { %v963_v14 = vpop.f32.mrb[52].mxu0 }
 0x157   : > { %v1002_v0 = vadd.f32 %v963_v14, %v888_v24  ;;  %v1582_v47 = vpop.f32.mrb[53].mxu0 }
 0x158   : > { %v857_v41 = vpop.f32.mrb[52].mxu1  ;;  %v966_v42 = vpop.f32.mrb[54].mxu0 }
 0x159   : > { %v890_v2 = vadd.f32 %v857_v41, %v777_v46  ;;  %v1564_v54 = vpop.f32.mrb[53].mxu1  ;;  %v1003_v57 = vadd.f32 %v966_v42, %v889_v43  ;;  %v1583_v18 = vpop.f32.mrb[55].mxu0 }
 0x15a   : > { %v860_v55 = vpop.f32.mrb[54].mxu1 }
 0x15b   : > { %v891_v59 = vadd.f32 %v860_v55, %v778_v35  ;;  %v1565_v50 = vpop.f32.mrb[55].mxu1 }
 0x15e   : > { %v971_v53 = vpop.f32.mrb[56].mxu0 }
 0x15f   : > { %v1004_v6 = vadd.f32 %v971_v53, %v890_v2  ;;  %v1586_v56 = vpop.f32.mrb[57].mxu0 }
 0x160   : > { %v865_v3 = vpop.f32.mrb[56].mxu1  ;;  %v974_v60 = vpop.f32.mrb[58].mxu0 }
 0x161   : > { %v892_v21 = vadd.f32 %v865_v3, %v779_v16  ;;  %v1568_v8 = vpop.f32.mrb[57].mxu1  ;;  %v1005_v17 = vadd.f32 %v974_v60, %v891_v59  ;;  %v1587_v5 = vpop.f32.mrb[59].mxu0 }
 0x162   : > { %v868_v9 = vpop.f32.mrb[58].mxu1 }
 0x163   : > { %v893_v20 = vadd.f32 %v868_v9, %v780_v36  ;;  %v1569_v23 = vpop.f32.mrb[59].mxu1 }
 0x166   : > { %v979_v46 = vpop.f32.mrb[60].mxu0 }
 0x167   : > { %v1006_v15 = vadd.f32 %v979_v46, %v892_v21  ;;  %v1590_v11 = vpop.f32.mrb[61].mxu0 }
 0x168   : > { %v873_v38 = vpop.f32.mrb[60].mxu1  ;;  %v982_v35 = vpop.f32.mrb[62].mxu0 }
 0x169   : > { %v894_v7 = vadd.f32 %v873_v38, %v781_v52  ;;  %v1572_v19 = vpop.f32.mrb[61].mxu1  ;;  %v1007_v29 = vadd.f32 %v982_v35, %v893_v20  ;;  %v1591_v10 = vpop.f32.mrb[63].mxu0 }
 0x16a   : > { %v876_v31 = vpop.f32.mrb[62].mxu1 }
 0x16b   : > { %v895_v30 = vadd.f32 %v876_v31, %v782_v32  ;;  %v1573_v22 = vpop.f32.mrb[63].mxu1 }
 0x16e   : > { %v987_v16 = vpop.f32.mrb[64].mxu0 }
 0x16f   : > { %v1008_v37 = vadd.f32 %v987_v16, %v894_v7  ;;  %v1594_v26 = vpop.f32.mrb[65].mxu0 }
 0x170   : > { %v881_v34 = vpop.f32.mrb[64].mxu1  ;;  %v990_v36 = vpop.f32.mrb[66].mxu0 }
 0x171   : > { %v896_v13 = vadd.f32 %v881_v34, %v783_v49  ;;  %v1576_v58 = vpop.f32.mrb[65].mxu1  ;;  %v1009_v12 = vadd.f32 %v990_v36, %v895_v30  ;;  %v1595_v48 = vpop.f32.mrb[67].mxu0 }
 0x172   : > { %v884_v62 = vpop.f32.mrb[66].mxu1 }
 0x173   : > { %v897_v27 = vadd.f32 %v884_v62, %v784_v61  ;;  %v1577_v52 = vpop.f32.mrb[67].mxu1  ;;  %v2151_v61 = vld [vmem:[%s2195_s2] ss:$0 sm:$0xff] }
 0x176   : > { %v995_v33 = vpop.f32.mrb[68].mxu0 }
 0x177   : > { %v2143_v40 = vadd.f32 %v995_v33, %v896_v13  ;;  %v1598_v63 = vpop.f32.mrb[69].mxu0 }
 0x178   : > { %v1093_v45 = vpop.f32.mrb[68].mxu1  ;;  %v998_v25 = vpop.f32.mrb[70].mxu0 }
 0x179   : > { %v1132_v32 = vadd.f32 %v1093_v45, %v1002_v0  ;;  %v1604_v4 = vpop.f32.mrb[69].mxu1  ;;  %v2145_v24 = vadd.f32 %v998_v25, %v897_v27  ;;  %v1599_v49 = vpop.f32.mrb[71].mxu0 }
 0x17a   : > { %v1096_v1 = vpop.f32.mrb[70].mxu1 }
 0x17b   : > { %v1133_v44 = vadd.f32 %v1096_v1, %v1003_v57  ;;  %v1605_v28 = vpop.f32.mrb[71].mxu1 }
 0x17e   : > { %v1206_v39 = vpop.f32.mrb[72].mxu0 }
 0x17f   : > { %v1245_v51 = vadd.f32 %v1206_v39, %v1132_v32  ;;  %v1626_v14 = vpop.f32.mrb[73].mxu0 }
 0x180   : > { %v1101_v43 = vpop.f32.mrb[72].mxu1  ;;  %v1209_v47 = vpop.f32.mrb[74].mxu0 }
 0x181   : > { %v1134_v41 = vadd.f32 %v1101_v43, %v1004_v6  ;;  %v1608_v0 = vpop.f32.mrb[73].mxu1  ;;  %v1262_v2 = vadd.f32 %v2151_v61, %v1245_v51  ;;  %v1246_v42 = vadd.f32 %v1209_v47, %v1133_v44  ;;  %v1627_v55 = vpop.f32.mrb[75].mxu0 }
 0x182   : > { %v1104_v54 = vpop.f32.mrb[74].mxu1 }
 0x183   : > { %v1135_v57 = vadd.f32 %v1104_v54, %v1005_v17  ;;  %v1609_v18 = vpop.f32.mrb[75].mxu1  ;;  %1272 = vst.msk [vmem:[%s2156_s16] sm:$0xff] %vm247_vm3, %v1262_v2  ;;  %v1263_v59 = vadd.f32 %v2151_v61, %v1246_v42 }
 0x185   : > { %1273 = vst.msk [vmem:[%s2156_s16 + $0x8] sm:$0xff] %vm247_vm3, %v1263_v59 }
 0x186   : > { %v1214_v50 = vpop.f32.mrb[76].mxu0 }
 0x187   : > { %v1247_v3 = vadd.f32 %v1214_v50, %v1134_v41  ;;  %v1630_v6 = vpop.f32.mrb[77].mxu0 }
 0x188   : > { %v1109_v53 = vpop.f32.mrb[76].mxu1  ;;  %v1217_v8 = vpop.f32.mrb[78].mxu0 }
 0x189   : > { %v1136_v56 = vadd.f32 %v1109_v53, %v1006_v15  ;;  %v1612_v21 = vpop.f32.mrb[77].mxu1  ;;  %v1264_v60 = vadd.f32 %v2151_v61, %v1247_v3  ;;  %v1248_v17 = vadd.f32 %v1217_v8, %v1135_v57  ;;  %v1631_v5 = vpop.f32.mrb[79].mxu0 }
 0x18a   : > { %v1112_v9 = vpop.f32.mrb[78].mxu1 }
 0x18b   : > { %v1137_v20 = vadd.f32 %v1112_v9, %v1007_v29  ;;  %v1613_v23 = vpop.f32.mrb[79].mxu1  ;;  %1274 = vst.msk [vmem:[%s2156_s16 + $0x10] sm:$0xff] %vm247_vm3, %v1264_v60  ;;  %v1265_v46 = vadd.f32 %v2151_v61, %v1248_v17 }
 0x18d   : > { %1275 = vst.msk [vmem:[%s2156_s16 + $0x18] sm:$0xff] %vm247_vm3, %v1265_v46 }
 0x18e   : > { %v1222_v38 = vpop.f32.mrb[80].mxu0 }
 0x18f   : > { %v1249_v15 = vadd.f32 %v1222_v38, %v1136_v56  ;;  %v1634_v7 = vpop.f32.mrb[81].mxu0 }
 0x190   : > { %v1117_v11 = vpop.f32.mrb[80].mxu1  ;;  %v1225_v31 = vpop.f32.mrb[82].mxu0 }
 0x191   : > { %v1138_v19 = vadd.f32 %v1117_v11, %v1008_v37  ;;  %v1616_v35 = vpop.f32.mrb[81].mxu1  ;;  %v1266_v10 = vadd.f32 %v2151_v61, %v1249_v15  ;;  %v1250_v29 = vadd.f32 %v1225_v31, %v1137_v20  ;;  %v1635_v22 = vpop.f32.mrb[83].mxu0 }
 0x192   : > { %v1120_v30 = vpop.f32.mrb[82].mxu1 }
 0x193   : > { %v1139_v16 = vadd.f32 %v1120_v30, %v1009_v12  ;;  %v1617_v34 = vpop.f32.mrb[83].mxu1  ;;  %1276 = vst.msk [vmem:[%s2156_s16 + $0x20] sm:$0xff] %vm247_vm3, %v1266_v10  ;;  %v1267_v26 = vadd.f32 %v2151_v61, %v1250_v29 }
 0x195   : > { %1277 = vst.msk [vmem:[%s2156_s16 + $0x28] sm:$0xff] %vm247_vm3, %v1267_v26 }
 0x196   : > { %v1230_v13 = vpop.f32.mrb[84].mxu0 }
 0x197   : > { %v1251_v37 = vadd.f32 %v1230_v13, %v1138_v19  ;;  %v1638_v36 = vpop.f32.mrb[85].mxu0 }
 0x198   : > { %v1125_v58 = vpop.f32.mrb[84].mxu1  ;;  %v1233_v27 = vpop.f32.mrb[86].mxu0 }
 0x199   : > { %v1140_v62 = vadd.f32 %v1125_v58, %v2143_v40  ;;  %v1620_v48 = vpop.f32.mrb[85].mxu1  ;;  %v1268_v52 = vadd.f32 %v2151_v61, %v1251_v37  ;;  %v1252_v33 = vadd.f32 %v1233_v27, %v1139_v16  ;;  %v1639_v45 = vpop.f32.mrb[87].mxu0 }
 0x19a   : > { %v1128_v12 = vpop.f32.mrb[86].mxu1 }
 0x19b   : > { %v1141_v63 = vadd.f32 %v1128_v12, %v2145_v24  ;;  %v1621_v32 = vpop.f32.mrb[87].mxu1  ;;  %1278 = vst.msk [vmem:[%s2156_s16 + $0x30] sm:$0xff] %vm247_vm3, %v1268_v52  ;;  %v1269_v4 = vadd.f32 %v2151_v61, %v1252_v33 }
 0x19d   : > { %1279 = vst.msk [vmem:[%s2156_s16 + $0x38] sm:$0xff] %vm247_vm3, %v1269_v4 }
 0x19e   : > { %v1238_v25 = vpop.f32.mrb[88].mxu0 }
 0x19f   : > { %v1253_v40 = vadd.f32 %v1238_v25, %v1140_v62  ;;  %v1642_v1 = vpop.f32.mrb[89].mxu0 }
 0x1a0   : > { %v1241_v49 = vpop.f32.mrb[90].mxu0 }
 0x1a1   : > { %v1270_v44 = vadd.f32 %v2151_v61, %v1253_v40  ;;  %v1254_v28 = vadd.f32 %v1241_v49, %v1141_v63  ;;  %v1643_v39 = vpop.f32.mrb[91].mxu0 }
 0x1a3   : > { %1280 = vst.msk [vmem:[%s2156_s16 + $0x40] sm:$0xff] %vm247_vm3, %v1270_v44  ;;  %v1271_v43 = vadd.f32 %v2151_v61, %v1254_v28 }
 0x1a5   : > { %1281 = vst.msk [vmem:[%s2156_s16 + $0x48] sm:$0xff] %vm247_vm3, %v1271_v43 }
 0x1a6 PF: > { %s13_s12 = sadd.s32 1, %s1664_s12  }
 0x1a7   : > { %p10_p4 = scmp.ge.s32.totalorder %s13_s12, 4  }
 0x1a9   :  { %12 = sbr.rel (!%p10_p4) target bundleno = 1 (0x1), region = 62 }

// kernel: encoder_forward.16
= control target key start
LH: loop header
LB: loop body
LE: loop exit
PB: predicated region body
PF: predicated region fallthrough
CT: control target
= control target key end

     0   :  { %s1718_s12 = smov 0   ;;  %s2235_s0 = inlined_call_operand.vmem [shape: f32[2,108,4], index: 0, kind: input, shape index: {}]   ;;  %s2236_s1 = inlined_call_operand.vmem [shape: bf16[9,4,4], index: 1, kind: input, shape index: {}]   ;;  %s2237_s2 = inlined_call_operand.vmem [shape: f32[1,4], index: 2, kind: input, shape index: {}]   ;;  %s2238_s3 = inlined_call_operand.vmem [shape: f32[2,80,4], index: 3, kind: output, shape index: {}]  }
   0x1 LB: > { %s1367_s13 = sadd.s32 4294967295, %s1694_s12   ;;  %p1371_p0 = scmp.ge.s32.totalorder %s1694_s12, 1  ;;  %s1694_s12 = sphi %s1718_s12, %s13_s12  }
   0x2   : > { %p137_p1 = scmp.lt.s32.totalorder %s1694_s12, 3 }
   0x4   : > { %p138_p2 = pnand %p1371_p0, %p137_p1 }
   0x5   : > { %v194_v0 = vld [vmem:[%s2236_s1 + $0x2] sm:$0x3] (!%p138_p2)  ;;  %vm263_vm0 = vcmask (!%p138_p2), 1041408   ;;  %p161_p3 = scmp.lt.s32.totalorder (!%p138_p2), %s1367_s13, 1  ;;  %v1696_v1 = vmov (!%p138_p2), 0.0   ;;  %vm1697_vm1 = vmmov (!%p138_p2), 0  }
   0x6   : > { %141 = sbr.rel (%p138_p2) target bundleno = 425 (0x1a9), region = 32  ;;  %1476 = vmatprep.subr.bf16.mxu0 (!%p138_p2), %v1696_v1  ;;  %1674 = vmatprep.subr.bf16.mxu1 (!%p138_p2), %v1696_v1  ;;  %v265_v2 = vsel (!%p138_p2), %vm263_vm0, %v194_v0, 0  ;;  %vm202_vm2 = vsmask.f32 (!%p138_p2), 7424  ;;  %v195_v27 = vld [vmem:[%s2236_s1 + $0x4] sm:$0x3] (!%p138_p2) }
   0x7   : > { %1477 = vmatpush3.bf16.msra.mxu0 (!%p138_p2), %v265_v2  ;;  %1675 = vmatpush3.bf16.msra.mxu1 (!%p138_p2), %v265_v2  ;;  %vm247_vm3 = vcmask (!%p138_p2), 31744   ;;  %v193_v30 = vld [vmem:[%s2236_s1] sm:$0x3] (!%p138_p2)  ;;  %v460_v37 = vsel (!%p138_p2), %vm263_vm0, %v195_v27, 0  ;;  %v196_v47 = vld [vmem:[%s2236_s1 + $0x6] sm:$0x3] (!%p138_p2) }
   0x8   : > { %1478 = vmatprep.mubr.msk.bf16.mxu0 (!%p138_p2), %vm1697_vm1, %v1696_v1  ;;  %1490 = vmatprep.mubr.msk.bf16.mxu1 (!%p138_p2), %vm1697_vm1, %v1696_v1  ;;  %v351_v40 = vsel (!%p138_p2), %vm263_vm0, %v193_v30, 0  ;;  %v573_v50 = vsel (!%p138_p2), %vm263_vm0, %v196_v47, 0  ;;  %vm545_vm4 = vcmask (!%p138_p2), 1042432   ;;  %vm658_vm5 = vsmask.f32 (!%p138_p2), 2304 }
   0x9   : > { %1520 = vmatprep.subr.bf16.mxu0 (!%p138_p2), %v1696_v1  ;;  %1498 = vmatprep.subr.bf16.mxu1 (!%p138_p2), %v1696_v1  ;;  %vm899_vm6 = vcmask (!%p138_p2), 1045504   ;;  %vm432_vm7 = vcmask (!%p138_p2), 1046528   ;;  %vm1012_vm8 = vsmask.f32 (!%p138_p2), 5376  ;;  %vm1142_vm9 = vcmask (!%p138_p2), 1044480  }
   0xd   : > { %s2240_s13 = smov (!%p161_p3, %s1367_s13), 1 }
   0xe   : > { %s1676_s16 = smul.u32 112, %s2240_s13 }
   0xf   : > { %s1677_s11 = smul.u32 80, %s2240_s13 }
  0x10   : > { %s1744_s19 = scalar_lea.vmem %s2235_s0, %s1676_s16 }
  0x11   : > { %v172_v3 = vld [vmem:[%s1744_s19] sm:$0xff]  ;;  %v173_v4 = vld [vmem:[%s1744_s19 + $0x8] sm:$0xff]  ;;  %v174_v5 = vld [vmem:[%s1744_s19 + $0x10] sm:$0xff]  ;;  %s2195_s16 = scalar_lea.vmem %s2238_s3, %s1677_s11 }
  0x12   : > { %v175_v6 = vld [vmem:[%s1744_s19 + $0x18] sm:$0xff]  ;;  %v1750_v7 = vpack.c.bf16 %v173_v4, %v172_v3  ;;  %v178_v8 = vld [vmem:[%s1744_s19 + $0x30] sm:$0xff]  ;;  %v180_v11 = vld [vmem:[%s1744_s19 + $0x40] sm:$0xff] }
  0x13   : > { %v179_v9 = vld [vmem:[%s1744_s19 + $0x38] sm:$0xff]  ;;  %v1754_v10 = vpack.c.bf16 %v175_v6, %v174_v5  ;;  %v181_v12 = vld [vmem:[%s1744_s19 + $0x48] sm:$0xff]  ;;  %v176_v14 = vld [vmem:[%s1744_s19 + $0x20] sm:$0xff] }
  0x14   : > { %v1758_v13 = vpack.c.bf16 %v179_v9, %v178_v8  ;;  %v204_v15 = vshrl.u32 %v1750_v7, 16  ;;  %v206_v16 = vshll.u32 %v1750_v7, 16  ;;  %v1763_v17 = vpack.c.bf16 %v181_v12, %v180_v11  ;;  %v177_v18 = vld [vmem:[%s1744_s19 + $0x28] sm:$0xff]  ;;  %v182_v23 = vld [vmem:[%s1744_s19 + $0x50] sm:$0xff]  ;;  %v183_v24 = vld [vmem:[%s1744_s19 + $0x58] sm:$0xff] }
  0x15   : > { %v1767_v19 = vshll.u32 %v1754_v10, 16  ;;  %v1775_v22 = vpack.c.bf16 %v177_v18, %v176_v14  ;;  %v1793_v31 = vshrl.u32 %v1754_v10, 16  ;;  %v1801_v35 = vpack.c.bf16 %v183_v24, %v182_v23  ;;  %v185_v30 = vld [vmem:[%s1744_s19 + $0x68] sm:$0xf] }
  0x16   : > { %v1770_v20 = vshll.u32 %v1758_v13, 16  ;;  %v1773_v21 = vshrl.u32 %v1758_v13, 16  ;;  %v208_v25 = vrot.slane %v206_v16, 1  ;;  %v1782_v26 = vshll.u32 %v1763_v17, 16 }
  0x17   : > { %v213_v28 = vrot.slane %v1767_v19, 1  ;;  %v1799_v34 = vshll.u32 %v1775_v22, 16  ;;  %v1806_v38 = vshrl.u32 %v1763_v17, 16  ;;  %v1811_v41 = vshll.u32 %v1801_v35, 16 }
  0x18   : > { %v229_v29 = vrot.slane %v1770_v20, 1  ;;  %v209_v32 = vor.u32 %v208_v25, %v204_v15  ;;  %v237_v33 = vrot.slane %v1782_v26, 1  ;;  %v1828_v48 = vshrl.u32 %v1775_v22, 16 }
  0x19   : > { %v217_v43 = vor.u32 %v1793_v31, %v213_v28  ;;  %v221_v44 = vrot.slane %v1799_v34, 1  ;;  %v245_v46 = vrot.slane %v1811_v41, 1  ;;  %v551_v52 = vrot.slane %v1758_v13, 5 }
  0x1a   : > { %v233_v36 = vor.u32 %v1773_v21, %v229_v29  ;;  %v214_v39 = vsel %vm202_vm2, %v209_v32, %v213_v28  ;;  %v241_v45 = vor.u32 %v1806_v38, %v237_v33  ;;  %v553_v53 = vrot.slane %v1763_v17, 5 }
  0x1b   : > { %1479 = vmatmul.mubr.msk.bf16.vlgmr.msra.gmra.mrb[0].mxu0 %vm247_vm3, %v214_v39  ;;  %v222_v49 = vsel %vm202_vm2, %v217_v43, %v221_v44  ;;  %v670_v54 = vrot.slane %v1773_v21, 5  ;;  %v225_v55 = vor.u32 %v1828_v48, %v221_v44  ;;  %v671_v56 = vrot.slane %v1770_v20, 6 }
  0x1c   : > { %v238_v42 = vsel %vm202_vm2, %v233_v36, %v237_v33  ;;  %1521 = vmatpush3.bf16.msra.mxu0 %v460_v37  ;;  %1482 = vmatprep.mubr.msk.bf16.mxu0 %vm1697_vm1, %v1696_v1  ;;  %v246_v51 = vsel %vm202_vm2, %v241_v45, %v245_v46  ;;  %v555_v57 = vrot.slane %v1801_v35, 5  ;;  %v1845_v58 = vsel %vm545_vm4, %v551_v52, %v553_v53 }
  0x1d   : > { %1491 = vmatmul.mubr.msk.bf16.vlgmr.msra.gmra.mrb[0].mxu1 %vm247_vm3, %v238_v42  ;;  %1564 = vmatprep.subr.bf16.mxu0 %v1696_v1  ;;  %v674_v59 = vrot.slane %v1806_v38, 5  ;;  %v675_v60 = vrot.slane %v1782_v26, 6  ;;  %v433_v61 = vrot.slane %v1750_v7, 1  ;;  %v1853_v62 = vor.u32 %v671_v56, %v670_v54 }
  0x1e   : > { %1499 = vmatpush3.bf16.msra.mxu1 %v351_v40  ;;  %1494 = vmatprep.mubr.msk.bf16.mxu1 %vm1697_vm1, %v1696_v1  ;;  %v1856_v63 = vsel %vm545_vm4, %v553_v53, %v555_v57  ;;  %v678_v0 = vshrl.u32 %v1801_v35, 16  ;;  %v434_v2 = vrot.slane %v1754_v10, 1  ;;  %v681_v4 = vrot.slane %v1811_v41, 6 }
  0x1f   : > { %1542 = vmatprep.subr.bf16.mxu1 %v1696_v1  ;;  %v676_v3 = vor.u32 %v675_v60, %v674_v59  ;;  %v786_v5 = vrot.slane %v1750_v7, 6  ;;  %v230_v6 = vsel %vm202_vm2, %v225_v55, %v229_v29  ;;  %v787_v9 = vrot.slane %v1754_v10, 6  ;;  %v184_v29 = vld [vmem:[%s1744_s19 + $0x60] sm:$0xff]  ;;  %v197_v59 = vld [vmem:[%s2236_s1 + $0x8] sm:$0x3] }
  0x20   : > { %v680_v8 = vrot.slane %v678_v0, 5  ;;  %v789_v11 = vrot.slane %v1775_v22, 6  ;;  %v900_v14 = vrot.slane %v1754_v10, 2  ;;  %v901_v18 = vrot.slane %v1775_v22, 2 }
  0x21   : > { %v1871_v12 = vsel %vm658_vm5, %v1853_v62, %v676_v3  ;;  %v791_v23 = vrot.slane %v1758_v13, 6  ;;  %v1877_v25 = vsel %vm263_vm0, %v786_v5, %v787_v9  ;;  %v903_v28 = vrot.slane %v1758_v13, 2 }
  0x22   : > { %v682_v24 = vor.u32 %v681_v4, %v680_v8  ;;  %v1880_v27 = vsel %vm263_vm0, %v787_v9, %v789_v11  ;;  %v1886_v32 = vsel %vm899_vm6, %v900_v14, %v901_v18  ;;  %v793_v36 = vrot.slane %v1763_v17, 6 }
  0x23   : > { %1483 = vmatmul.mubr.msk.bf16.gmra.mrb[4].mxu0 %vm247_vm3, %v222_v49  ;;  %v1889_v33 = vsel %vm263_vm0, %v789_v11, %v791_v23  ;;  %v905_v37 = vrot.slane %v1763_v17, 2  ;;  %v1897_v40 = vsel %vm899_vm6, %v901_v18, %v903_v28  ;;  %v795_v42 = vrot.slane %v1801_v35, 6 }
  0x24   : > { %1486 = vmatprep.mubr.msk.bf16.mxu0 %vm1697_vm1, %v1696_v1  ;;  %v1894_v39 = vsel %vm658_vm5, %v676_v3, %v682_v24  ;;  %v907_v43 = vrot.slane %v1801_v35, 2  ;;  %v1903_v44 = vsel %vm263_vm0, %v791_v23, %v793_v36  ;;  %v1908_v46 = vpack.c.bf16 %v185_v30, %v184_v29 }
  0x25   : > { %1495 = vmatmul.mubr.msk.bf16.gmra.mrb[4].mxu1 %vm247_vm3, %v246_v51  ;;  %v1906_v45 = vsel %vm899_vm6, %v903_v28, %v905_v37  ;;  %v1915_v47 = vsel %vm263_vm0, %v793_v36, %v795_v42  ;;  %v1013_v51 = vrot.slane %v1793_v31, 2  ;;  %v1014_v53 = vrot.slane %v1767_v19, 3 }
  0x26   : > { %1500 = vmatprep.mubr.msk.bf16.mxu1 %vm1697_vm1, %v1696_v1  ;;  %v1918_v49 = vsel %vm899_vm6, %v905_v37, %v907_v43  ;;  %v909_v54 = vrot.slane %v1908_v46, 2  ;;  %v1016_v55 = vrot.slane %v1828_v48, 2  ;;  %v1017_v56 = vrot.slane %v1799_v34, 3 }
  0x27   : > { %v1020_v57 = vrot.slane %v1773_v21, 2  ;;  %v1015_v60 = vor.u32 %v1014_v53, %v1013_v51  ;;  %v1143_v3 = vrot.slane %v1754_v10, 3  ;;  %v1024_v21 = vrot.slane %v1806_v38, 2 }
  0x28   : > { %v1935_v4 = vsel %vm899_vm6, %v907_v43, %v909_v54  ;;  %v1018_v5 = vor.u32 %v1017_v56, %v1016_v55  ;;  %v435_v8 = vsel %vm432_vm7, %v433_v61, %v434_v2  ;;  %v1025_v11 = vrot.slane %v1782_v26, 3 }
  0x29   : > { %v1146_v23 = vrot.slane %v1758_v13, 3  ;;  %v436_v26 = vrot.slane %v1775_v22, 1  ;;  %v1028_v29 = vrot.slane %v678_v0, 2  ;;  %v1029_v30 = vrot.slane %v1811_v41, 3 }
  0x2a   : > { %v1945_v14 = vsel %vm1012_vm8, %v1015_v60, %v1018_v5  ;;  %v1026_v38 = vor.u32 %v1025_v11, %v1024_v21  ;;  %v1148_v43 = vrot.slane %v1763_v17, 3  ;;  %v438_v41 = vrot.slane %v1758_v13, 1  ;;  %v198_v11 = vld [vmem:[%s2236_s1 + $0xa] sm:$0x3] }
  0x2b   : > { %1487 = vmatmul.mubr.msk.bf16.gmra.mrb[8].mxu0 %vm247_vm3, %v230_v6  ;;  %v1144_v6 = vrot.slane %v1775_v22, 3  ;;  %v1030_v36 = vor.u32 %v1029_v30, %v1028_v29  ;;  %v437_v37 = vsel %vm432_vm7, %v434_v2, %v436_v26  ;;  %v1033_v0 = vshrl.u32 %v1908_v46, 16 }
  0x2c   : > { %1522 = vmatprep.mubr.msk.bf16.mxu0 %vm1697_vm1, %v1696_v1  ;;  %v1981_v51 = vsel %vm1142_vm9, %v1146_v23, %v1148_v43  ;;  %v1036_v2 = vshll.u32 %v1908_v46, 16  ;;  %v439_v55 = vsel %vm432_vm7, %v436_v26, %v438_v41  ;;  %v442_v21 = vrot.slane %v1801_v35, 1 }
  0x2d   : > { %1501 = vmatmul.mubr.msk.bf16.vlgmr.msra.gmra.mrb[8].mxu1 %vm247_vm3, %v1750_v7  ;;  %v1948_v18 = vsel %vm1142_vm9, %v1143_v3, %v1144_v6  ;;  %v1956_v61 = vsel %vm1142_vm9, %v1144_v6, %v1146_v23  ;;  %v1976_v42 = vsel %vm1012_vm8, %v1026_v38, %v1030_v36  ;;  %v1035_v53 = vrot.slane %v1033_v0, 2 }
  0x2e   : > { %1543 = vmatpush3.bf16.msra.mxu1 %v573_v50  ;;  %1504 = vmatprep.mubr.msk.bf16.mxu1 %vm1697_vm1, %v1696_v1  ;;  %v1021_v50 = vrot.slane %v1770_v20, 3  ;;  %v700_v20 = vsel %vm263_vm0, %v197_v59, 0  ;;  %v1038_v54 = vrot.slane %v1036_v2, 3  ;;  %v1152_v3 = vrot.slane %v1908_v46, 3 }
  0x2f   : > { %1586 = vmatprep.subr.bf16.mxu1 %v1696_v1  ;;  %v546_v46 = vrot.slane %v1750_v7, 5  ;;  %v663_v23 = vrot.slane %v1767_v19, 6  ;;  %v199_v19 = vld [vmem:[%s2236_s1 + $0xc] sm:$0x3]  ;;  %v666_v26 = vrot.slane %v1828_v48, 5  ;;  %v667_v29 = vrot.slane %v1799_v34, 6 }
  0x30   : > { %v1022_v9 = vor.u32 %v1021_v50, %v1020_v57  ;;  %v1039_v56 = vor.u32 %v1038_v54, %v1035_v53  ;;  %v1150_v57 = vrot.slane %v1801_v35, 3  ;;  %v440_v50 = vrot.slane %v1763_v17, 1 }
  0x31   : > { %v662_v35 = vrot.slane %v1793_v31, 5 }
  0x32   : > { %v1952_v24 = vsel %vm1012_vm8, %v1018_v5, %v1022_v9  ;;  %v1962_v28 = vsel %vm1012_vm8, %v1022_v9, %v1026_v38  ;;  %v1996_v59 = vsel %vm1012_vm8, %v1030_v36, %v1039_v56  ;;  %v1999_v60 = vsel %vm1142_vm9, %v1148_v43, %v1150_v57 }
  0x33   : > { %1523 = vmatmul.mubr.msk.bf16.vlgmr.msra.gmra.mrb[12].mxu0 %vm247_vm3, %v435_v8  ;;  %v2010_v5 = vsel %vm1142_vm9, %v1150_v57, %v1152_v3  ;;  %v441_v6 = vsel %vm432_vm7, %v438_v41, %v440_v50  ;;  %v547_v8 = vrot.slane %v1754_v10, 5  ;;  %v659_v9 = vrot.slane %v204_v15, 5 }
  0x34   : > { %1565 = vmatpush3.bf16.msra.mxu0 %v700_v20  ;;  %1526 = vmatprep.mubr.msk.bf16.mxu0 %vm1697_vm1, %v1696_v1  ;;  %v443_v20 = vsel %vm432_vm7, %v440_v50, %v442_v21  ;;  %v664_v7 = vor.u32 %v663_v23, %v662_v35  ;;  %v927_v36 = vsel %vm263_vm0, %v199_v19, 0 }
  0x35   : > { %1505 = vmatmul.mubr.msk.bf16.gmra.mrb[12].mxu1 %vm247_vm3, %v1754_v10  ;;  %1608 = vmatprep.subr.bf16.mxu0 %v1696_v1  ;;  %v548_v38 = vsel %vm545_vm4, %v546_v46, %v547_v8  ;;  %v813_v10 = vsel %vm263_vm0, %v198_v11, 0 }
  0x36   : > { %1508 = vmatprep.mubr.msk.bf16.mxu1 %vm1697_vm1, %v1696_v1 }
  0x3b   : > { %1527 = vmatmul.mubr.msk.bf16.gmra.mrb[16].mxu0 %vm247_vm3, %v437_v37 }
  0x3c   : > { %1530 = vmatprep.mubr.msk.bf16.mxu0 %vm1697_vm1, %v1696_v1 }
  0x3d   : > { %1509 = vmatmul.mubr.msk.bf16.gmra.mrb[16].mxu1 %vm247_vm3, %v1775_v22 }
  0x3e   : > { %1512 = vmatprep.mubr.msk.bf16.mxu1 %vm1697_vm1, %v1696_v1 }
  0x43   : > { %1531 = vmatmul.mubr.msk.bf16.gmra.mrb[20].mxu0 %vm247_vm3, %v439_v55 }
  0x44   : > { %1534 = vmatprep.mubr.msk.bf16.mxu0 %vm1697_vm1, %v1696_v1 }
  0x45   : > { %1513 = vmatmul.mubr.msk.bf16.gmra.mrb[20].mxu1 %vm247_vm3, %v1758_v13  ;;  %v200_v13 = vld [vmem:[%s2236_s1 + $0xe] sm:$0x3] }
  0x46   : > { %1516 = vmatprep.mubr.msk.bf16.mxu1 %vm1697_vm1, %v1696_v1 }
  0x4b   : > { %1535 = vmatmul.mubr.msk.bf16.gmra.mrb[24].mxu0 %vm247_vm3, %v441_v6 }
  0x4c   : > { %1538 = vmatprep.mubr.msk.bf16.mxu0 %vm1697_vm1, %v1696_v1 }
  0x4d   : > { %1517 = vmatmul.mubr.msk.bf16.gmra.mrb[24].mxu1 %vm247_vm3, %v1763_v17  ;;  %v660_v17 = vrot.slane %v206_v16, 6  ;;  %v549_v16 = vrot.slane %v1775_v22, 5  ;;  %v668_v22 = vor.u32 %v667_v29, %v666_v26 }
  0x4e   : > { %1544 = vmatprep.mubr.msk.bf16.mxu1 %vm1697_vm1, %v1696_v1 }
  0x4f   : > { %v661_v15 = vor.u32 %v660_v17, %v659_v9  ;;  %v550_v30 = vsel %vm545_vm4, %v547_v8, %v549_v16  ;;  %v669_v34 = vsel %vm658_vm5, %v664_v7, %v668_v22  ;;  %v552_v48 = vsel %vm545_vm4, %v549_v16, %v551_v52 }
  0x50   : > { %v673_v37 = vsel %vm658_vm5, %v668_v22, %v1853_v62  ;;  %v1057_v52 = vsel %vm263_vm0, %v200_v13, 0 }
  0x51   : > { %v665_v31 = vsel %vm658_vm5, %v661_v15, %v664_v7 }
  0x53   : > { %1539 = vmatmul.mubr.msk.bf16.gmra.mrb[28].mxu0 %vm247_vm3, %v443_v20 }
  0x54   : > { %1566 = vmatprep.mubr.msk.bf16.mxu0 %vm1697_vm1, %v1696_v1 }
  0x55   : > { %1545 = vmatmul.mubr.msk.bf16.vlgmr.msra.gmra.mrb[28].mxu1 %vm247_vm3, %v548_v38 }
  0x56   : > { %1587 = vmatpush3.bf16.msra.mxu1 %v813_v10  ;;  %1548 = vmatprep.mubr.msk.bf16.mxu1 %vm1697_vm1, %v1696_v1 }
  0x57   : > { %1630 = vmatprep.subr.bf16.mxu1 %v1696_v1 }
  0x5b   : > { %1567 = vmatmul.mubr.msk.bf16.vlgmr.msra.gmra.mrb[32].mxu0 %vm247_vm3, %v665_v31 }
  0x5c   : > { %1609 = vmatpush3.bf16.msra.mxu0 %v927_v36  ;;  %1570 = vmatprep.mubr.msk.bf16.mxu0 %vm1697_vm1, %v1696_v1 }
  0x5d   : > { %1549 = vmatmul.mubr.msk.bf16.gmra.mrb[32].mxu1 %vm247_vm3, %v550_v30  ;;  %1652 = vmatprep.subr.bf16.mxu0 %v1696_v1 }
  0x5e   : > { %1552 = vmatprep.mubr.msk.bf16.mxu1 %vm1697_vm1, %v1696_v1 }
  0x63   : > { %1571 = vmatmul.mubr.msk.bf16.gmra.mrb[36].mxu0 %vm247_vm3, %v669_v34 }
  0x64   : > { %1574 = vmatprep.mubr.msk.bf16.mxu0 %vm1697_vm1, %v1696_v1 }
  0x65   : > { %1553 = vmatmul.mubr.msk.bf16.gmra.mrb[36].mxu1 %vm247_vm3, %v552_v48 }
  0x66   : > { %1556 = vmatprep.mubr.msk.bf16.mxu1 %vm1697_vm1, %v1696_v1 }
  0x6b   : > { %1575 = vmatmul.mubr.msk.bf16.gmra.mrb[40].mxu0 %vm247_vm3, %v673_v37 }
  0x6c   : > { %1578 = vmatprep.mubr.msk.bf16.mxu0 %vm1697_vm1, %v1696_v1 }
  0x6d   : > { %1557 = vmatmul.mubr.msk.bf16.gmra.mrb[40].mxu1 %vm247_vm3, %v1845_v58  ;;  %v201_v58 = vld [vmem:[%s2236_s1 + $0x10] sm:$0x3] }
  0x6e   : > { %1560 = vmatprep.mubr.msk.bf16.mxu1 %vm1697_vm1, %v1696_v1  ;;  %v1170_v62 = vsel %vm263_vm0, %v201_v58, 0 }
  0x73   : > { %1579 = vmatmul.mubr.msk.bf16.gmra.mrb[44].mxu0 %vm247_vm3, %v1871_v12 }
  0x74   : > { %1582 = vmatprep.mubr.msk.bf16.mxu0 %vm1697_vm1, %v1696_v1 }
  0x75   : > { %1561 = vmatmul.mubr.msk.bf16.gmra.mrb[44].mxu1 %vm247_vm3, %v1856_v63 }
  0x76   : > { %1588 = vmatprep.mubr.msk.bf16.mxu1 %vm1697_vm1, %v1696_v1 }
  0x7b   : > { %1583 = vmatmul.mubr.msk.bf16.gmra.mrb[48].mxu0 %vm247_vm3, %v1894_v39 }
  0x7c   : > { %1610 = vmatprep.mubr.msk.bf16.mxu0 %vm1697_vm1, %v1696_v1 }
  0x7d   : > { %1589 = vmatmul.mubr.msk.bf16.vlgmr.msra.gmra.mrb[48].mxu1 %vm247_vm3, %v1877_v25 }
  0x7e   : > { %1631 = vmatpush3.bf16.msra.mxu1 %v1057_v52  ;;  %1592 = vmatprep.mubr.msk.bf16.mxu1 %vm1697_vm1, %v1696_v1 }
  0x83   : > { %1611 = vmatmul.mubr.msk.bf16.vlgmr.msra.gmra.mrb[52].mxu0 %vm247_vm3, %v1886_v32 }
  0x84   : > { %1653 = vmatpush3.bf16.msra.mxu0 %v1170_v62  ;;  %1614 = vmatprep.mubr.msk.bf16.mxu0 %vm1697_vm1, %v1696_v1 }
  0x85   : > { %1593 = vmatmul.mubr.msk.bf16.gmra.mrb[52].mxu1 %vm247_vm3, %v1880_v27 }
  0x86   : > { %1596 = vmatprep.mubr.msk.bf16.mxu1 %vm1697_vm1, %v1696_v1 }
  0x8b   : > { %1615 = vmatmul.mubr.msk.bf16.gmra.mrb[56].mxu0 %vm247_vm3, %v1897_v40 }
  0x8c   : > { %1618 = vmatprep.mubr.msk.bf16.mxu0 %vm1697_vm1, %v1696_v1 }
  0x8d   : > { %1597 = vmatmul.mubr.msk.bf16.gmra.mrb[56].mxu1 %vm247_vm3, %v1889_v33 }
  0x8e   : > { %1600 = vmatprep.mubr.msk.bf16.mxu1 %vm1697_vm1, %v1696_v1 }
  0x93   : > { %1619 = vmatmul.mubr.msk.bf16.gmra.mrb[60].mxu0 %vm247_vm3, %v1906_v45 }
  0x94   : > { %1622 = vmatprep.mubr.msk.bf16.mxu0 %vm1697_vm1, %v1696_v1 }
  0x95   : > { %1601 = vmatmul.mubr.msk.bf16.gmra.mrb[60].mxu1 %vm247_vm3, %v1903_v44 }
  0x96   : > { %1604 = vmatprep.mubr.msk.bf16.mxu1 %vm1697_vm1, %v1696_v1 }
  0x9b   : > { %1623 = vmatmul.mubr.msk.bf16.gmra.mrb[64].mxu0 %vm247_vm3, %v1918_v49 }
  0x9c   : > { %1626 = vmatprep.mubr.msk.bf16.mxu0 %vm1697_vm1, %v1696_v1 }
  0x9d   : > { %1605 = vmatmul.mubr.msk.bf16.gmra.mrb[64].mxu1 %vm247_vm3, %v1915_v47 }
  0x9e   : > { %1632 = vmatprep.mubr.msk.bf16.mxu1 %vm1697_vm1, %v1696_v1 }
  0xa3   : > { %1627 = vmatmul.mubr.msk.bf16.gmra.mrb[68].mxu0 %vm247_vm3, %v1935_v4 }
  0xa4   : > { %1654 = vmatprep.mubr.msk.bf16.mxu0 %vm1697_vm1, %v1696_v1 }
  0xa5   : > { %1633 = vmatmul.mubr.msk.bf16.vlgmr.msra.gmra.mrb[68].mxu1 %vm247_vm3, %v1945_v14 }
  0xa6   : > { %1636 = vmatprep.mubr.msk.bf16.mxu1 %vm1697_vm1, %v1696_v1 }
  0xab   : > { %1655 = vmatmul.mubr.msk.bf16.vlgmr.msra.gmra.mrb[72].mxu0 %vm247_vm3, %v1948_v18 }
  0xac   : > { %1658 = vmatprep.mubr.msk.bf16.mxu0 %vm1697_vm1, %v1696_v1 }
  0xad   : > { %1637 = vmatmul.mubr.msk.bf16.gmra.mrb[72].mxu1 %vm247_vm3, %v1952_v24 }
  0xae   : > { %1640 = vmatprep.mubr.msk.bf16.mxu1 %vm1697_vm1, %v1696_v1 }
  0xb3   : > { %1659 = vmatmul.mubr.msk.bf16.gmra.mrb[76].mxu0 %vm247_vm3, %v1956_v61 }
  0xb4   : > { %1662 = vmatprep.mubr.msk.bf16.mxu0 %vm1697_vm1, %v1696_v1 }
  0xb5   : > { %1641 = vmatmul.mubr.msk.bf16.gmra.mrb[76].mxu1 %vm247_vm3, %v1962_v28 }
  0xb6   : > { %1644 = vmatprep.mubr.msk.bf16.mxu1 %vm1697_vm1, %v1696_v1 }
  0xbb   : > { %1663 = vmatmul.mubr.msk.bf16.gmra.mrb[80].mxu0 %vm247_vm3, %v1981_v51 }
  0xbc   : > { %1666 = vmatprep.mubr.msk.bf16.mxu0 %vm1697_vm1, %v1696_v1 }
  0xbd   : > { %1645 = vmatmul.mubr.msk.bf16.gmra.mrb[80].mxu1 %vm247_vm3, %v1976_v42 }
  0xbe   : > { %1648 = vmatprep.mubr.msk.bf16.mxu1 %vm1697_vm1, %v1696_v1 }
  0xc3   : > { %1667 = vmatmul.mubr.msk.bf16.gmra.mrb[84].mxu0 %vm247_vm3, %v1999_v60 }
  0xc4   : > { %1670 = vmatprep.mubr.msk.bf16.mxu0 %vm1697_vm1, %v1696_v1 }
  0xc5   : > { %1649 = vmatmul.mubr.msk.bf16.gmra.mrb[84].mxu1 %vm247_vm3, %v1996_v59 }
  0xcb   : > { %1671 = vmatmul.mubr.msk.bf16.gmra.mrb[88].mxu0 %vm247_vm3, %v2010_v5 }
  0xee   : > { %v301_v63 = vpop.f32.mrb[0].mxu0 }
  0xef   : > { %v1480_v12 = vpop.f32.mrb[1].mxu0 }
  0xf0   : > { %v325_v25 = vpop.f32.mrb[0].mxu1  ;;  %v304_v27 = vpop.f32.mrb[2].mxu0 }
  0xf1   : > { %v1492_v32 = vpop.f32.mrb[1].mxu1  ;;  %v1481_v33 = vpop.f32.mrb[3].mxu0 }
  0xf2   : > { %v328_v39 = vpop.f32.mrb[2].mxu1 }
  0xf3   : > { %v1493_v40 = vpop.f32.mrb[3].mxu1 }
  0xf6   : > { %v309_v44 = vpop.f32.mrb[4].mxu0 }
  0xf7   : > { %v1484_v45 = vpop.f32.mrb[5].mxu0 }
  0xf8   : > { %v333_v47 = vpop.f32.mrb[4].mxu1  ;;  %v312_v49 = vpop.f32.mrb[6].mxu0 }
  0xf9   : > { %v1496_v4 = vpop.f32.mrb[5].mxu1  ;;  %v1485_v14 = vpop.f32.mrb[7].mxu0 }
  0xfa   : > { %v336_v18 = vpop.f32.mrb[6].mxu1 }
  0xfb   : > { %v1497_v24 = vpop.f32.mrb[7].mxu1 }
  0xfe   : > { %v317_v1 = vpop.f32.mrb[8].mxu0 }
  0xff   : > { %v1488_v28 = vpop.f32.mrb[9].mxu0 }
 0x100   : > { %v387_v61 = vpop.f32.mrb[8].mxu1  ;;  %v320_v51 = vpop.f32.mrb[10].mxu0 }
 0x101   : > { %v388_v42 = vadd.f32 %v387_v61, %v301_v63  ;;  %v1502_v43 = vpop.f32.mrb[9].mxu1  ;;  %v1489_v0 = vpop.f32.mrb[11].mxu0 }
 0x102   : > { %v390_v41 = vpop.f32.mrb[10].mxu1 }
 0x103   : > { %v391_v2 = vadd.f32 %v390_v41, %v304_v27  ;;  %v1503_v53 = vpop.f32.mrb[11].mxu1 }
 0x106   : > { %v496_v54 = vpop.f32.mrb[12].mxu0 }
 0x107   : > { %v535_v56 = vadd.f32 %v496_v54, %v388_v42  ;;  %v1524_v57 = vpop.f32.mrb[13].mxu0 }
 0x108   : > { %v395_v55 = vpop.f32.mrb[12].mxu1  ;;  %v499_v50 = vpop.f32.mrb[14].mxu0 }
 0x109   : > { %v396_v59 = vadd.f32 %v395_v55, %v309_v44  ;;  %v1506_v60 = vpop.f32.mrb[13].mxu1  ;;  %v536_v5 = vadd.f32 %v499_v50, %v391_v2  ;;  %v1525_v6 = vpop.f32.mrb[15].mxu0 }
 0x10a   : > { %v398_v3 = vpop.f32.mrb[14].mxu1 }
 0x10b   : > { %v399_v21 = vadd.f32 %v398_v3, %v312_v49  ;;  %v1507_v46 = vpop.f32.mrb[15].mxu1 }
 0x10e   : > { %v504_v8 = vpop.f32.mrb[16].mxu0 }
 0x10f   : > { %v537_v11 = vadd.f32 %v504_v8, %v396_v59  ;;  %v1528_v17 = vpop.f32.mrb[17].mxu0 }
 0x110   : > { %v403_v9 = vpop.f32.mrb[16].mxu1  ;;  %v507_v23 = vpop.f32.mrb[18].mxu0 }
 0x111   : > { %v404_v20 = vadd.f32 %v403_v9, %v317_v1  ;;  %v1510_v35 = vpop.f32.mrb[17].mxu1  ;;  %v538_v10 = vadd.f32 %v507_v23, %v399_v21  ;;  %v1529_v15 = vpop.f32.mrb[19].mxu0 }
 0x112   : > { %v406_v38 = vpop.f32.mrb[18].mxu1 }
 0x113   : > { %v407_v7 = vadd.f32 %v406_v38, %v320_v51  ;;  %v1511_v16 = vpop.f32.mrb[19].mxu1 }
 0x116   : > { %v512_v19 = vpop.f32.mrb[20].mxu0 }
 0x117   : > { %v539_v26 = vadd.f32 %v512_v19, %v404_v20  ;;  %v1532_v29 = vpop.f32.mrb[21].mxu0 }
 0x118   : > { %v411_v31 = vpop.f32.mrb[20].mxu1  ;;  %v515_v22 = vpop.f32.mrb[22].mxu0 }
 0x119   : > { %v412_v30 = vadd.f32 %v411_v31, %v325_v25  ;;  %v1514_v36 = vpop.f32.mrb[21].mxu1  ;;  %v540_v48 = vadd.f32 %v515_v22, %v407_v7  ;;  %v1533_v37 = vpop.f32.mrb[23].mxu0 }
 0x11a   : > { %v414_v34 = vpop.f32.mrb[22].mxu1 }
 0x11b   : > { %v415_v13 = vadd.f32 %v414_v34, %v328_v39  ;;  %v1515_v52 = vpop.f32.mrb[23].mxu1 }
 0x11e   : > { %v520_v58 = vpop.f32.mrb[24].mxu0 }
 0x11f   : > { %v541_v63 = vadd.f32 %v520_v58, %v412_v30  ;;  %v1536_v12 = vpop.f32.mrb[25].mxu0 }
 0x120   : > { %v419_v62 = vpop.f32.mrb[24].mxu1  ;;  %v523_v33 = vpop.f32.mrb[26].mxu0 }
 0x121   : > { %v420_v27 = vadd.f32 %v419_v62, %v333_v47  ;;  %v1518_v32 = vpop.f32.mrb[25].mxu1  ;;  %v542_v44 = vadd.f32 %v523_v33, %v415_v13  ;;  %v1537_v45 = vpop.f32.mrb[27].mxu0 }
 0x122   : > { %v422_v40 = vpop.f32.mrb[26].mxu1 }
 0x123   : > { %v423_v49 = vadd.f32 %v422_v40, %v336_v18  ;;  %v1519_v4 = vpop.f32.mrb[27].mxu1 }
 0x126   : > { %v528_v25 = vpop.f32.mrb[28].mxu0 }
 0x127   : > { %v543_v14 = vadd.f32 %v528_v25, %v420_v27  ;;  %v1540_v1 = vpop.f32.mrb[29].mxu0 }
 0x128   : > { %v609_v24 = vpop.f32.mrb[28].mxu1  ;;  %v531_v39 = vpop.f32.mrb[30].mxu0 }
 0x129   : > { %v648_v61 = vadd.f32 %v609_v24, %v535_v56  ;;  %v1546_v28 = vpop.f32.mrb[29].mxu1  ;;  %v544_v42 = vadd.f32 %v531_v39, %v423_v49  ;;  %v1541_v51 = vpop.f32.mrb[31].mxu0 }
 0x12a   : > { %v612_v43 = vpop.f32.mrb[30].mxu1 }
 0x12b   : > { %v649_v41 = vadd.f32 %v612_v43, %v536_v5  ;;  %v1547_v0 = vpop.f32.mrb[31].mxu1 }
 0x12e   : > { %v736_v47 = vpop.f32.mrb[32].mxu0 }
 0x12f   : > { %v775_v53 = vadd.f32 %v736_v47, %v648_v61  ;;  %v1568_v54 = vpop.f32.mrb[33].mxu0 }
 0x130   : > { %v617_v2 = vpop.f32.mrb[32].mxu1  ;;  %v739_v18 = vpop.f32.mrb[34].mxu0 }
 0x131   : > { %v650_v55 = vadd.f32 %v617_v2, %v537_v11  ;;  %v1550_v57 = vpop.f32.mrb[33].mxu1  ;;  %v776_v60 = vadd.f32 %v739_v18, %v649_v41  ;;  %v1569_v50 = vpop.f32.mrb[35].mxu0 }
 0x132   : > { %v620_v59 = vpop.f32.mrb[34].mxu1 }
 0x133   : > { %v651_v3 = vadd.f32 %v620_v59, %v538_v10  ;;  %v1551_v6 = vpop.f32.mrb[35].mxu1 }
 0x136   : > { %v744_v56 = vpop.f32.mrb[36].mxu0 }
 0x137   : > { %v777_v46 = vadd.f32 %v744_v56, %v650_v55  ;;  %v1572_v8 = vpop.f32.mrb[37].mxu0 }
 0x138   : > { %v625_v21 = vpop.f32.mrb[36].mxu1  ;;  %v747_v5 = vpop.f32.mrb[38].mxu0 }
 0x139   : > { %v652_v9 = vadd.f32 %v625_v21, %v539_v26  ;;  %v1554_v17 = vpop.f32.mrb[37].mxu1  ;;  %v778_v35 = vadd.f32 %v747_v5, %v651_v3  ;;  %v1573_v23 = vpop.f32.mrb[39].mxu0 }
 0x13a   : > { %v628_v20 = vpop.f32.mrb[38].mxu1 }
 0x13b   : > { %v653_v38 = vadd.f32 %v628_v20, %v540_v48  ;;  %v1555_v15 = vpop.f32.mrb[39].mxu1 }
 0x13e   : > { %v752_v11 = vpop.f32.mrb[40].mxu0 }
 0x13f   : > { %v779_v16 = vadd.f32 %v752_v11, %v652_v9  ;;  %v1576_v19 = vpop.f32.mrb[41].mxu0 }
 0x140   : > { %v633_v7 = vpop.f32.mrb[40].mxu1  ;;  %v755_v10 = vpop.f32.mrb[42].mxu0 }
 0x141   : > { %v654_v31 = vadd.f32 %v633_v7, %v541_v63  ;;  %v1558_v29 = vpop.f32.mrb[41].mxu1  ;;  %v780_v36 = vadd.f32 %v755_v10, %v653_v38  ;;  %v1577_v22 = vpop.f32.mrb[43].mxu0 }
 0x142   : > { %v636_v30 = vpop.f32.mrb[42].mxu1 }
 0x143   : > { %v655_v34 = vadd.f32 %v636_v30, %v542_v44  ;;  %v1559_v37 = vpop.f32.mrb[43].mxu1 }
 0x146   : > { %v760_v26 = vpop.f32.mrb[44].mxu0 }
 0x147   : > { %v781_v52 = vadd.f32 %v760_v26, %v654_v31  ;;  %v1580_v58 = vpop.f32.mrb[45].mxu0 }
 0x148   : > { %v641_v13 = vpop.f32.mrb[44].mxu1  ;;  %v763_v48 = vpop.f32.mrb[46].mxu0 }
 0x149   : > { %v656_v62 = vadd.f32 %v641_v13, %v543_v14  ;;  %v1562_v12 = vpop.f32.mrb[45].mxu1  ;;  %v782_v32 = vadd.f32 %v763_v48, %v655_v34  ;;  %v1581_v33 = vpop.f32.mrb[47].mxu0 }
 0x14a   : > { %v644_v27 = vpop.f32.mrb[46].mxu1 }
 0x14b   : > { %v657_v40 = vadd.f32 %v644_v27, %v544_v42  ;;  %v1563_v45 = vpop.f32.mrb[47].mxu1 }
 0x14e   : > { %v768_v63 = vpop.f32.mrb[48].mxu0 }
 0x14f   : > { %v783_v49 = vadd.f32 %v768_v63, %v656_v62  ;;  %v1584_v25 = vpop.f32.mrb[49].mxu0 }
 0x150   : > { %v849_v4 = vpop.f32.mrb[48].mxu1  ;;  %v771_v44 = vpop.f32.mrb[50].mxu0 }
 0x151   : > { %v888_v24 = vadd.f32 %v849_v4, %v775_v53  ;;  %v1590_v1 = vpop.f32.mrb[49].mxu1  ;;  %v784_v61 = vadd.f32 %v771_v44, %v657_v40  ;;  %v1585_v39 = vpop.f32.mrb[51].mxu0 }
 0x152   : > { %v852_v28 = vpop.f32.mrb[50].mxu1 }
 0x153   : > { %v889_v43 = vadd.f32 %v852_v28, %v776_v60  ;;  %v1591_v51 = vpop.f32.mrb[51].mxu1 }
 0x156   : > { %v963_v14 = vpop.f32.mrb[52].mxu0 }
 0x157   : > { %v1002_v0 = vadd.f32 %v963_v14, %v888_v24  ;;  %v1612_v47 = vpop.f32.mrb[53].mxu0 }
 0x158   : > { %v857_v41 = vpop.f32.mrb[52].mxu1  ;;  %v966_v42 = vpop.f32.mrb[54].mxu0 }
 0x159   : > { %v890_v2 = vadd.f32 %v857_v41, %v777_v46  ;;  %v1594_v54 = vpop.f32.mrb[53].mxu1  ;;  %v1003_v57 = vadd.f32 %v966_v42, %v889_v43  ;;  %v1613_v18 = vpop.f32.mrb[55].mxu0 }
 0x15a   : > { %v860_v55 = vpop.f32.mrb[54].mxu1 }
 0x15b   : > { %v891_v59 = vadd.f32 %v860_v55, %v778_v35  ;;  %v1595_v50 = vpop.f32.mrb[55].mxu1 }
 0x15e   : > { %v971_v53 = vpop.f32.mrb[56].mxu0 }
 0x15f   : > { %v1004_v6 = vadd.f32 %v971_v53, %v890_v2  ;;  %v1616_v56 = vpop.f32.mrb[57].mxu0 }
 0x160   : > { %v865_v3 = vpop.f32.mrb[56].mxu1  ;;  %v974_v60 = vpop.f32.mrb[58].mxu0 }
 0x161   : > { %v892_v21 = vadd.f32 %v865_v3, %v779_v16  ;;  %v1598_v8 = vpop.f32.mrb[57].mxu1  ;;  %v1005_v17 = vadd.f32 %v974_v60, %v891_v59  ;;  %v1617_v5 = vpop.f32.mrb[59].mxu0 }
 0x162   : > { %v868_v9 = vpop.f32.mrb[58].mxu1 }
 0x163   : > { %v893_v20 = vadd.f32 %v868_v9, %v780_v36  ;;  %v1599_v23 = vpop.f32.mrb[59].mxu1 }
 0x166   : > { %v979_v46 = vpop.f32.mrb[60].mxu0 }
 0x167   : > { %v2173_v15 = vadd.f32 %v979_v46, %v892_v21  ;;  %v1620_v11 = vpop.f32.mrb[61].mxu0 }
 0x168   : > { %v873_v38 = vpop.f32.mrb[60].mxu1  ;;  %v982_v19 = vpop.f32.mrb[62].mxu0 }
 0x169   : > { %v894_v7 = vadd.f32 %v873_v38, %v781_v52  ;;  %v1602_v35 = vpop.f32.mrb[61].mxu1  ;;  %v2175_v29 = vadd.f32 %v982_v19, %v893_v20  ;;  %v1621_v10 = vpop.f32.mrb[63].mxu0 }
 0x16a   : > { %v876_v31 = vpop.f32.mrb[62].mxu1 }
 0x16b   : > { %v895_v16 = vadd.f32 %v876_v31, %v782_v32  ;;  %v1603_v30 = vpop.f32.mrb[63].mxu1 }
 0x16e   : > { %v987_v22 = vpop.f32.mrb[64].mxu0 }
 0x16f   : > { %v2177_v37 = vadd.f32 %v987_v22, %v894_v7  ;;  %v1624_v36 = vpop.f32.mrb[65].mxu0 }
 0x170   : > { %v881_v34 = vpop.f32.mrb[64].mxu1  ;;  %v990_v58 = vpop.f32.mrb[66].mxu0 }
 0x171   : > { %v896_v26 = vadd.f32 %v881_v34, %v783_v49  ;;  %v1606_v13 = vpop.f32.mrb[65].mxu1  ;;  %v2179_v12 = vadd.f32 %v990_v58, %v895_v16  ;;  %v1625_v52 = vpop.f32.mrb[67].mxu0 }
 0x172   : > { %v884_v62 = vpop.f32.mrb[66].mxu1 }
 0x173   : > { %v897_v48 = vadd.f32 %v884_v62, %v784_v61  ;;  %v1607_v27 = vpop.f32.mrb[67].mxu1  ;;  %v2188_v61 = vld [vmem:[%s2237_s2] ss:$0 sm:$0xff] }
 0x176   : > { %v995_v33 = vpop.f32.mrb[68].mxu0 }
 0x177   : > { %v2181_v40 = vadd.f32 %v995_v33, %v896_v26  ;;  %v1628_v45 = vpop.f32.mrb[69].mxu0 }
 0x178   : > { %v1093_v32 = vpop.f32.mrb[68].mxu1  ;;  %v998_v25 = vpop.f32.mrb[70].mxu0 }
 0x179   : > { %v1132_v63 = vadd.f32 %v1093_v32, %v1002_v0  ;;  %v1634_v4 = vpop.f32.mrb[69].mxu1  ;;  %v2183_v24 = vadd.f32 %v998_v25, %v897_v48  ;;  %v1629_v1 = vpop.f32.mrb[71].mxu0 }
 0x17a   : > { %v1096_v49 = vpop.f32.mrb[70].mxu1 }
 0x17b   : > { %v1133_v44 = vadd.f32 %v1096_v49, %v1003_v57  ;;  %v1635_v28 = vpop.f32.mrb[71].mxu1 }
 0x17e   : > { %v1206_v39 = vpop.f32.mrb[72].mxu0 }
 0x17f   : > { %v1245_v51 = vadd.f32 %v1206_v39, %v1132_v63  ;;  %v1656_v14 = vpop.f32.mrb[73].mxu0 }
 0x180   : > { %v1101_v43 = vpop.f32.mrb[72].mxu1  ;;  %v1209_v47 = vpop.f32.mrb[74].mxu0 }
 0x181   : > { %v1134_v41 = vadd.f32 %v1101_v43, %v1004_v6  ;;  %v1638_v0 = vpop.f32.mrb[73].mxu1  ;;  %v1262_v2 = vadd.f32 %v2188_v61, %v1245_v51  ;;  %v1246_v42 = vadd.f32 %v1209_v47, %v1133_v44  ;;  %v1657_v55 = vpop.f32.mrb[75].mxu0 }
 0x182   : > { %v1104_v54 = vpop.f32.mrb[74].mxu1 }
 0x183   : > { %v1135_v57 = vadd.f32 %v1104_v54, %v1005_v17  ;;  %v1639_v18 = vpop.f32.mrb[75].mxu1  ;;  %vm1272_vm10 = vcmp.gt.f32.partialorder %v1262_v2, 0.0  ;;  %v1282_v59 = vmul.f32 0.01, %v1262_v2  ;;  %v1263_v50 = vadd.f32 %v2188_v61, %v1246_v42 }
 0x185   : > { %v1292_v53 = vsel %vm1272_vm10, %v1262_v2, %v1282_v59  ;;  %vm1273_vm11 = vcmp.gt.f32.partialorder %v1263_v50, 0.0  ;;  %v1283_v3 = vmul.f32 0.01, %v1263_v50 }
 0x186   : > { %1302 = vst.msk [vmem:[%s2195_s16] sm:$0xff] %vm247_vm3, %v1292_v53  ;;  %v1214_v6 = vpop.f32.mrb[76].mxu0 }
 0x187   : > { %v1293_v56 = vsel %vm1273_vm11, %v1263_v50, %v1283_v3  ;;  %v1247_v8 = vadd.f32 %v1214_v6, %v1134_v41  ;;  %v1660_v60 = vpop.f32.mrb[77].mxu0 }
 0x188   : > { %v1109_v21 = vpop.f32.mrb[76].mxu1  ;;  %1303 = vst.msk [vmem:[%s2195_s16 + $0x8] sm:$0xff] %vm247_vm3, %v1293_v56  ;;  %v1217_v5 = vpop.f32.mrb[78].mxu0 }
 0x189   : > { %v1136_v9 = vadd.f32 %v1109_v21, %v2173_v15  ;;  %v1642_v17 = vpop.f32.mrb[77].mxu1  ;;  %v1264_v20 = vadd.f32 %v2188_v61, %v1247_v8  ;;  %v1248_v46 = vadd.f32 %v1217_v5, %v1135_v57  ;;  %v1661_v38 = vpop.f32.mrb[79].mxu0 }
 0x18a   : > { %v1112_v23 = vpop.f32.mrb[78].mxu1 }
 0x18b   : > { %v1137_v11 = vadd.f32 %v1112_v23, %v2175_v29  ;;  %v1643_v7 = vpop.f32.mrb[79].mxu1  ;;  %vm1274_vm12 = vcmp.gt.f32.partialorder %v1264_v20, 0.0  ;;  %v1284_v35 = vmul.f32 0.01, %v1264_v20  ;;  %v1265_v19 = vadd.f32 %v2188_v61, %v1248_v46 }
 0x18d   : > { %v1294_v31 = vsel %vm1274_vm12, %v1264_v20, %v1284_v35  ;;  %vm1275_vm13 = vcmp.gt.f32.partialorder %v1265_v19, 0.0  ;;  %v1285_v10 = vmul.f32 0.01, %v1265_v19 }
 0x18e   : > { %1304 = vst.msk [vmem:[%s2195_s16 + $0x10] sm:$0xff] %vm247_vm3, %v1294_v31  ;;  %v1222_v15 = vpop.f32.mrb[80].mxu0 }
 0x18f   : > { %v1295_v16 = vsel %vm1275_vm13, %v1265_v19, %v1285_v10  ;;  %v1249_v22 = vadd.f32 %v1222_v15, %v1136_v9  ;;  %v1664_v34 = vpop.f32.mrb[81].mxu0 }
 0x190   : > { %v1117_v30 = vpop.f32.mrb[80].mxu1  ;;  %1305 = vst.msk [vmem:[%s2195_s16 + $0x18] sm:$0xff] %vm247_vm3, %v1295_v16  ;;  %v1225_v26 = vpop.f32.mrb[82].mxu0 }
 0x191   : > { %v1138_v29 = vadd.f32 %v1117_v30, %v2177_v37  ;;  %v1646_v36 = vpop.f32.mrb[81].mxu1  ;;  %v1266_v13 = vadd.f32 %v2188_v61, %v1249_v22  ;;  %v1250_v62 = vadd.f32 %v1225_v26, %v1137_v11  ;;  %v1665_v52 = vpop.f32.mrb[83].mxu0 }
 0x192   : > { %v1120_v58 = vpop.f32.mrb[82].mxu1 }
 0x193   : > { %v1139_v48 = vadd.f32 %v1120_v58, %v2179_v12  ;;  %v1647_v27 = vpop.f32.mrb[83].mxu1  ;;  %vm1276_vm14 = vcmp.gt.f32.partialorder %v1266_v13, 0.0  ;;  %v1286_v33 = vmul.f32 0.01, %v1266_v13  ;;  %v1267_v32 = vadd.f32 %v2188_v61, %v1250_v62 }
 0x195   : > { %v1296_v45 = vsel %vm1276_vm14, %v1266_v13, %v1286_v33  ;;  %vm1277_vm15 = vcmp.gt.f32.partialorder %v1267_v32, 0.0  ;;  %v1287_v63 = vmul.f32 0.01, %v1267_v32 }
 0x196   : > { %1306 = vst.msk [vmem:[%s2195_s16 + $0x20] sm:$0xff] %vm247_vm3, %v1296_v45  ;;  %v1230_v37 = vpop.f32.mrb[84].mxu0 }
 0x197   : > { %v1297_v4 = vsel %vm1277_vm15, %v1267_v32, %v1287_v63  ;;  %v1251_v49 = vadd.f32 %v1230_v37, %v1138_v29  ;;  %v1668_v1 = vpop.f32.mrb[85].mxu0 }
 0x198   : > { %v1125_v25 = vpop.f32.mrb[84].mxu1  ;;  %1307 = vst.msk [vmem:[%s2195_s16 + $0x28] sm:$0xff] %vm247_vm3, %v1297_v4  ;;  %v1233_v28 = vpop.f32.mrb[86].mxu0 }
 0x199   : > { %v1140_v12 = vadd.f32 %v1125_v25, %v2181_v40  ;;  %v1650_v44 = vpop.f32.mrb[85].mxu1  ;;  %v1268_v39 = vadd.f32 %v2188_v61, %v1251_v49  ;;  %v1252_v51 = vadd.f32 %v1233_v28, %v1139_v48  ;;  %v1669_v14 = vpop.f32.mrb[87].mxu0 }
 0x19a   : > { %v1128_v43 = vpop.f32.mrb[86].mxu1 }
 0x19b   : > { %v1141_v41 = vadd.f32 %v1128_v43, %v2183_v24  ;;  %v1651_v0 = vpop.f32.mrb[87].mxu1  ;;  %vm1278_vm0 = vcmp.gt.f32.partialorder %v1268_v39, 0.0  ;;  %v1288_v47 = vmul.f32 0.01, %v1268_v39  ;;  %v1269_v2 = vadd.f32 %v2188_v61, %v1252_v51 }
 0x19d   : > { %v1298_v54 = vsel %vm1278_vm0, %v1268_v39, %v1288_v47  ;;  %vm1279_vm1 = vcmp.gt.f32.partialorder %v1269_v2, 0.0  ;;  %v1289_v42 = vmul.f32 0.01, %v1269_v2 }
 0x19e   : > { %1308 = vst.msk [vmem:[%s2195_s16 + $0x30] sm:$0xff] %vm247_vm3, %v1298_v54  ;;  %v1238_v40 = vpop.f32.mrb[88].mxu0 }
 0x19f   : > { %v1299_v55 = vsel %vm1279_vm1, %v1269_v2, %v1289_v42  ;;  %v1253_v57 = vadd.f32 %v1238_v40, %v1140_v12  ;;  %v1672_v18 = vpop.f32.mrb[89].mxu0 }
 0x1a0   : > { %1309 = vst.msk [vmem:[%s2195_s16 + $0x38] sm:$0xff] %vm247_vm3, %v1299_v55  ;;  %v1241_v59 = vpop.f32.mrb[90].mxu0 }
 0x1a1   : > { %v1270_v24 = vadd.f32 %v2188_v61, %v1253_v57  ;;  %v1254_v50 = vadd.f32 %v1241_v59, %v1141_v41  ;;  %v1673_v53 = vpop.f32.mrb[91].mxu0 }
 0x1a3   : > { %vm1280_vm2 = vcmp.gt.f32.partialorder %v1270_v24, 0.0  ;;  %v1290_v3 = vmul.f32 0.01, %v1270_v24  ;;  %v1271_v6 = vadd.f32 %v2188_v61, %v1254_v50 }
 0x1a5   : > { %v1300_v56 = vsel %vm1280_vm2, %v1270_v24, %v1290_v3  ;;  %vm1281_vm4 = vcmp.gt.f32.partialorder %v1271_v6, 0.0  ;;  %v1291_v21 = vmul.f32 0.01, %v1271_v6 }
 0x1a6   : > { %1310 = vst.msk [vmem:[%s2195_s16 + $0x40] sm:$0xff] %vm247_vm3, %v1300_v56 }
 0x1a7   : > { %v1301_v8 = vsel %vm1281_vm4, %v1271_v6, %v1291_v21 }
 0x1a8   : > { %1311 = vst.msk [vmem:[%s2195_s16 + $0x48] sm:$0xff] %vm247_vm3, %v1301_v8 }
 0x1a9 PF: > { %s13_s12 = sadd.s32 1, %s1694_s12  }
 0x1aa   : > { %p10_p4 = scmp.ge.s32.totalorder %s13_s12, 4  }
 0x1ac   :  { %12 = sbr.rel (!%p10_p4) target bundleno = 1 (0x1), region = 62 }

// kernel: encoder_forward.15
= control target key start
LH: loop header
LB: loop body
LE: loop exit
PB: predicated region body
PF: predicated region fallthrough
CT: control target
= control target key end

     0   :  { %s2044_s18 = smov 0   ;;  %s2593_s0 = inlined_call_operand.vmem [shape: f32[2,108,4], index: 0, kind: input, shape index: {}]   ;;  %s2594_s1 = inlined_call_operand.vmem [shape: bf16[9,4,32], index: 1, kind: input, shape index: {}]   ;;  %s2595_s2 = inlined_call_operand.vmem [shape: f32[1,32], index: 2, kind: input, shape index: {}]   ;;  %s2596_s3 = inlined_call_operand.vmem [shape: bf16[32,4], index: 3, kind: input, shape index: {}]   ;;  %s2597_s4 = inlined_call_operand.vmem [shape: f32[1,4], index: 4, kind: input, shape index: {}]   ;;  %s2598_s5 = inlined_call_operand.vmem [shape: f32[2,80,4], index: 5, kind: output, shape index: {}]  }
   0x1 LB: > { %s1633_s19 = sadd.s32 4294967295, %s2010_s18   ;;  %p1637_p0 = scmp.ge.s32.totalorder %s2010_s18, 1  ;;  %s2010_s18 = sphi %s2044_s18, %s15_s18  }
   0x2   : > { %p187_p1 = scmp.lt.s32.totalorder %s2010_s18, 3 }
   0x4   : > { %p188_p2 = pnand %p1637_p0, %p187_p1 }
   0x5   : > { %v290_v0 = vld [vmem:[%s2594_s1 + $0x2] sm:$0x3] (!%p188_p2)  ;;  %vm359_vm0 = vcmask (!%p188_p2), 1041408   ;;  %v289_v1 = vld [vmem:[%s2594_s1] sm:$0x3] (!%p188_p2)  ;;  %v2012_v2 = vmov (!%p188_p2), 0.0  }
   0x6   : > { %191 = sbr.rel (%p188_p2) target bundleno = 665 (0x299), region = 40  ;;  %1757 = vmatprep.subr.bf16.mxu0 (!%p188_p2), %v2012_v2  ;;  %v361_v3 = vsel (!%p188_p2), %vm359_vm0, %v290_v0, 0  ;;  %1779 = vmatprep.subr.bf16.mxu1 (!%p188_p2), %v2012_v2  ;;  %v447_v4 = vsel (!%p188_p2), %vm359_vm0, %v289_v1, 0  ;;  %p215_p3 = scmp.lt.s32.totalorder (!%p188_p2), %s1633_s19, 1  ;;  %vm2013_vm1 = vmmov (!%p188_p2), 0   ;;  %vm343_vm2 = vcmask (!%p188_p2), 31744  }
   0x7   : > { %1758 = vmatpush3.bf16.msra.mxu0 (!%p188_p2), %v361_v3  ;;  %1780 = vmatpush3.bf16.msra.mxu1 (!%p188_p2), %v447_v4  ;;  %v292_v5 = vld [vmem:[%s2594_s1 + $0x6] sm:$0x3] (!%p188_p2)  ;;  %vm298_vm11 = vsmask.f32 (!%p188_p2), 7424  ;;  %v291_v39 = vld [vmem:[%s2594_s1 + $0x4] sm:$0x3] (!%p188_p2) }
   0x8   : > { %1759 = vmatprep.mubr.msk.bf16.mxu0 (!%p188_p2), %vm2013_vm1, %v2012_v2  ;;  %1781 = vmatprep.mubr.msk.bf16.mxu1 (!%p188_p2), %vm2013_vm1, %v2012_v2  ;;  %v669_v9 = vsel (!%p188_p2), %vm359_vm0, %v292_v5, 0  ;;  %v556_v49 = vsel (!%p188_p2), %vm359_vm0, %v291_v39, 0 }
   0x9   : > { %1801 = vmatprep.subr.bf16.mxu0 (!%p188_p2), %v2012_v2  ;;  %1823 = vmatprep.subr.bf16.mxu1 (!%p188_p2), %v2012_v2 }
   0xd   : > { %s2600_s19 = smov (!%p215_p3, %s1633_s19), 1 }
   0xe   : > { %s1979_s24 = smul.u32 112, %s2600_s19 }
   0xf   : > { %s1980_s25 = smul.u32 80, %s2600_s19 }
  0x10   : > { %s2077_s29 = scalar_lea.vmem %s2593_s0, %s1979_s24 }
  0x11   : > { %v226_v6 = vld [vmem:[%s2077_s29] sm:$0xff]  ;;  %v227_v7 = vld [vmem:[%s2077_s29 + $0x8] sm:$0xff]  ;;  %v228_v8 = vld [vmem:[%s2077_s29 + $0x10] sm:$0xff]  ;;  %s2542_s6 = scalar_lea.vmem %s2598_s5, %s1980_s25 }
  0x12   : > { %v229_v10 = vld [vmem:[%s2077_s29 + $0x18] sm:$0xff]  ;;  %vm240_vm3 = vcmp.gt.f32.partialorder %v226_v6, 0.0  ;;  %vm241_vm4 = vcmp.gt.f32.partialorder %v227_v7, 0.0  ;;  %vm242_vm5 = vcmp.gt.f32.partialorder %v228_v8, 0.0  ;;  %v254_v11 = vmul.f32 0.01, %v226_v6 }
  0x13   : > { %vm243_vm6 = vcmp.gt.f32.partialorder %v229_v10, 0.0  ;;  %v255_v12 = vmul.f32 0.01, %v227_v7  ;;  %v256_v13 = vmul.f32 0.01, %v228_v8  ;;  %v230_v14 = vld [vmem:[%s2077_s29 + $0x20] sm:$0xff] }
  0x14   : > { %v257_v15 = vmul.f32 0.01, %v229_v10  ;;  %v268_v16 = vsel %vm240_vm3, %v226_v6, %v254_v11  ;;  %v231_v17 = vld [vmem:[%s2077_s29 + $0x28] sm:$0xff]  ;;  %vm244_vm7 = vcmp.gt.f32.partialorder %v230_v14, 0.0  ;;  %v258_v18 = vmul.f32 0.01, %v230_v14 }
  0x15   : > { %v269_v19 = vsel %vm241_vm4, %v227_v7, %v255_v12  ;;  %v270_v20 = vsel %vm242_vm5, %v228_v8, %v256_v13  ;;  %vm245_vm8 = vcmp.gt.f32.partialorder %v231_v17, 0.0  ;;  %v259_v21 = vmul.f32 0.01, %v231_v17  ;;  %v232_v22 = vld [vmem:[%s2077_s29 + $0x30] sm:$0xff]  ;;  %v233_v23 = vld [vmem:[%s2077_s29 + $0x38] sm:$0xff]  ;;  %v234_v34 = vld [vmem:[%s2077_s29 + $0x40] sm:$0xff] }
  0x16   : > { %v271_v24 = vsel %vm243_vm6, %v229_v10, %v257_v15  ;;  %v2088_v25 = vpack.c.bf16 %v269_v19, %v268_v16  ;;  %v272_v26 = vsel %vm244_vm7, %v230_v14, %v258_v18  ;;  %vm246_vm9 = vcmp.gt.f32.partialorder %v232_v22, 0.0  ;;  %v235_v37 = vld [vmem:[%s2077_s29 + $0x48] sm:$0xff]  ;;  %v236_v47 = vld [vmem:[%s2077_s29 + $0x50] sm:$0xff]  ;;  %v237_v48 = vld [vmem:[%s2077_s29 + $0x58] sm:$0xff] }
  0x17   : > { %v2090_v27 = vpack.c.bf16 %v271_v24, %v270_v20  ;;  %v273_v28 = vsel %vm245_vm8, %v231_v17, %v259_v21  ;;  %vm247_vm10 = vcmp.gt.f32.partialorder %v233_v23, 0.0  ;;  %v260_v29 = vmul.f32 0.01, %v232_v22 }
  0x18   : > { %v300_v30 = vshrl.u32 %v2088_v25, 16  ;;  %v302_v31 = vshll.u32 %v2088_v25, 16  ;;  %1782 = vmatmul.mubr.msk.bf16.vlgmr.msra.gmra.mrb[0].mxu1 %vm343_vm2, %v2088_v25  ;;  %v2096_v32 = vpack.c.bf16 %v273_v28, %v272_v26  ;;  %v261_v33 = vmul.f32 0.01, %v233_v23 }
  0x19   : > { %v2100_v35 = vshll.u32 %v2090_v27, 16  ;;  %1785 = vmatprep.mubr.msk.bf16.mxu1 %vm2013_vm1, %v2012_v2  ;;  %v274_v36 = vsel %vm246_vm9, %v232_v22, %v260_v29  ;;  %1824 = vmatpush3.bf16.msra.mxu1 %v669_v9  ;;  %v2114_v42 = vshrl.u32 %v2090_v27, 16  ;;  %vm248_vm12 = vcmp.gt.f32.partialorder %v234_v34, 0.0 }
  0x1a   : > { %v304_v38 = vrot.slane %v302_v31, 1  ;;  %v2109_v40 = vshll.u32 %v2096_v32, 16  ;;  %1867 = vmatprep.subr.bf16.mxu1 %v2012_v2  ;;  %v275_v43 = vsel %vm247_vm10, %v233_v23, %v261_v33  ;;  %vm249_vm13 = vcmp.gt.f32.partialorder %v235_v37, 0.0 }
  0x1b   : > { %v309_v41 = vrot.slane %v2100_v35, 1  ;;  %v2117_v45 = vpack.c.bf16 %v275_v43, %v274_v36  ;;  %v262_v46 = vmul.f32 0.01, %v234_v34  ;;  %v263_v50 = vmul.f32 0.01, %v235_v37 }
  0x1c   : > { %v305_v44 = vor.u32 %v304_v38, %v300_v30  ;;  %v317_v52 = vrot.slane %v2109_v40, 1  ;;  %v2125_v53 = vshrl.u32 %v2096_v32, 16  ;;  %vm250_vm14 = vcmp.gt.f32.partialorder %v236_v47, 0.0 }
  0x1d   : > { %v276_v54 = vsel %vm248_vm12, %v234_v34, %v262_v46  ;;  %v277_v55 = vsel %vm249_vm13, %v235_v37, %v263_v50  ;;  %vm251_vm15 = vcmp.gt.f32.partialorder %v237_v48, 0.0  ;;  %v264_v56 = vmul.f32 0.01, %v236_v47 }
  0x1e   : > { %v310_v51 = vsel %vm298_vm11, %v305_v44, %v309_v41  ;;  %v313_v57 = vor.u32 %v2114_v42, %v309_v41  ;;  %v2132_v58 = vshll.u32 %v2117_v45, 16  ;;  %v2134_v59 = vpack.c.bf16 %v277_v55, %v276_v54 }
  0x1f   : > { %1760 = vmatmul.mubr.msk.bf16.vlgmr.msra.gmra.mrb[0].mxu0 %vm343_vm2, %v310_v51  ;;  %v265_v60 = vmul.f32 0.01, %v237_v48  ;;  %v2142_v61 = vshrl.u32 %v2117_v45, 16  ;;  %v278_v63 = vsel %vm250_vm14, %v236_v47, %v264_v56  ;;  %v755_v1 = vrot.slane %v300_v30, 5 }
  0x20   : > { %1802 = vmatpush3.bf16.msra.mxu0 %v556_v49  ;;  %1763 = vmatprep.mubr.msk.bf16.mxu0 %vm2013_vm1, %v2012_v2  ;;  %v2145_v62 = vshll.u32 %v2134_v59, 16  ;;  %v756_v3 = vrot.slane %v302_v31, 6  ;;  %v318_v4 = vsel %vm298_vm11, %v313_v57, %v317_v52  ;;  %v321_v5 = vor.u32 %v2125_v53, %v317_v52 }
  0x21   : > { %1786 = vmatmul.mubr.msk.bf16.gmra.mrb[4].mxu1 %vm343_vm2, %v2090_v27  ;;  %1845 = vmatprep.subr.bf16.mxu0 %v2012_v2  ;;  %v279_v0 = vsel %vm251_vm15, %v237_v48, %v265_v60  ;;  %v325_v6 = vrot.slane %v2132_v58, 1  ;;  %v2155_v10 = vshrl.u32 %v2134_v59, 16  ;;  %vm754_vm3 = vsmask.f32 2304 }
  0x22   : > { %1789 = vmatprep.mubr.msk.bf16.mxu1 %vm2013_vm1, %v2012_v2  ;;  %v2150_v7 = vpack.c.bf16 %v279_v0, %v278_v63  ;;  %v333_v9 = vrot.slane %v2145_v62, 1  ;;  %v642_v12 = vrot.slane %v2088_v25, 5  ;;  %v757_v13 = vor.u32 %v756_v3, %v755_v1 }
  0x23   : > { %v329_v8 = vor.u32 %v2142_v61, %v325_v6  ;;  %v326_v11 = vsel %vm298_vm11, %v321_v5, %v325_v6  ;;  %vm995_vm4 = vcmask 1045504   ;;  %v758_v15 = vrot.slane %v2114_v42, 5 }
  0x24   : > { %v2165_v14 = vshll.u32 %v2150_v7, 16  ;;  %v759_v16 = vrot.slane %v2100_v35, 6  ;;  %v882_v17 = vrot.slane %v2088_v25, 6  ;;  %v2174_v19 = vor.u32 %v2155_v10, %v333_v9 }
  0x25   : > { %v334_v18 = vsel %vm298_vm11, %v329_v8, %v333_v9  ;;  %v883_v20 = vrot.slane %v2090_v27, 6  ;;  %v762_v21 = vrot.slane %v2125_v53, 5  ;;  %v763_v23 = vrot.slane %v2109_v40, 6 }
  0x26   : > { %v760_v22 = vor.u32 %v759_v16, %v758_v15  ;;  %v885_v24 = vrot.slane %v2096_v32, 6  ;;  %v766_v26 = vrot.slane %v2142_v61, 5  ;;  %v767_v29 = vrot.slane %v2132_v58, 6 }
  0x27   : > { %1764 = vmatmul.mubr.msk.bf16.gmra.mrb[4].mxu0 %vm343_vm2, %v318_v4  ;;  %v2182_v28 = vsel %vm359_vm0, %v882_v17, %v883_v20  ;;  %v887_v30 = vrot.slane %v2117_v45, 6  ;;  %v770_v31 = vrot.slane %v2155_v10, 5  ;;  %v764_v34 = vor.u32 %v763_v23, %v762_v21 }
  0x28   : > { %1767 = vmatprep.mubr.msk.bf16.mxu0 %vm2013_vm1, %v2012_v2  ;;  %v2188_v33 = vsel %vm754_vm3, %v757_v13, %v760_v22  ;;  %v2191_v36 = vsel %vm359_vm0, %v883_v20, %v885_v24  ;;  %v771_v37 = vrot.slane %v2145_v62, 6  ;;  %v768_v38 = vor.u32 %v767_v29, %v766_v26 }
  0x29   : > { %1790 = vmatmul.mubr.msk.bf16.gmra.mrb[8].mxu1 %vm343_vm2, %v2096_v32  ;;  %v2195_v39 = vsel %vm359_vm0, %v885_v24, %v887_v30  ;;  %v889_v41 = vrot.slane %v2134_v59, 6  ;;  %v774_v43 = vshrl.u32 %v2150_v7, 16  ;;  %v2201_v44 = vsel %vm754_vm3, %v760_v22, %v764_v34 }
  0x2a   : > { %1793 = vmatprep.mubr.msk.bf16.mxu1 %vm2013_vm1, %v2012_v2  ;;  %v772_v46 = vor.u32 %v771_v37, %v770_v31  ;;  %v777_v47 = vrot.slane %v2165_v14, 6  ;;  %v891_v48 = vrot.slane %v2150_v7, 6  ;;  %v2208_v49 = vsel %vm754_vm3, %v764_v34, %v768_v38 }
  0x2b   : > { %v2211_v50 = vsel %vm359_vm0, %v887_v30, %v889_v41  ;;  %v776_v51 = vrot.slane %v774_v43, 5  ;;  %v996_v52 = vrot.slane %v2090_v27, 2  ;;  %v341_v54 = vrot.slane %v2165_v14, 1 }
  0x2c   : > { %v2218_v55 = vsel %vm754_vm3, %v768_v38, %v772_v46  ;;  %v2221_v56 = vsel %vm359_vm0, %v889_v41, %v891_v48  ;;  %v997_v57 = vrot.slane %v2096_v32, 2  ;;  %vm1108_vm5 = vsmask.f32 5376 }
  0x2d   : > { %v778_v60 = vor.u32 %v777_v47, %v776_v51  ;;  %v1109_v63 = vrot.slane %v2114_v42, 2  ;;  %v1110_v0 = vrot.slane %v2100_v35, 3  ;;  %v1112_v3 = vrot.slane %v2125_v53, 2  ;;  %v238_v42 = vld [vmem:[%s2077_s29 + $0x60] sm:$0xff] }
  0x2e   : > { %v2229_v1 = vsel %vm995_vm4, %v996_v52, %v997_v57  ;;  %v1113_v4 = vrot.slane %v2109_v40, 3  ;;  %v999_v5 = vrot.slane %v2117_v45, 2  ;;  %v1116_v9 = vrot.slane %v2142_v61, 2  ;;  %v239_v40 = vld [vmem:[%s2077_s29 + $0x68] sm:$0xf] }
  0x2f   : > { %1768 = vmatmul.mubr.msk.bf16.gmra.mrb[8].mxu0 %vm343_vm2, %v326_v11  ;;  %v2235_v6 = vsel %vm754_vm3, %v772_v46, %v778_v60  ;;  %v1111_v8 = vor.u32 %v1110_v0, %v1109_v63  ;;  %v1117_v11 = vrot.slane %v2132_v58, 3  ;;  %v1001_v15 = vrot.slane %v2134_v59, 2 }
  0x30   : > { %1771 = vmatprep.mubr.msk.bf16.mxu0 %vm2013_vm1, %v2012_v2  ;;  %v1114_v13 = vor.u32 %v1113_v4, %v1112_v3  ;;  %v2241_v35 = vsel %vm995_vm4, %v997_v57, %v999_v5  ;;  %v1120_v53 = vrot.slane %v2155_v10, 2  ;;  %v1121_v17 = vrot.slane %v2145_v62, 3 }
  0x31   : > { %1794 = vmatmul.mubr.msk.bf16.gmra.mrb[12].mxu1 %vm343_vm2, %v2117_v45  ;;  %v1118_v16 = vor.u32 %v1117_v11, %v1116_v9  ;;  %v1003_v20 = vrot.slane %v2150_v7, 2  ;;  %v1124_v21 = vrot.slane %v774_v43, 2  ;;  %v2253_v61 = vsel %vm995_vm4, %v999_v5, %v1001_v15  ;;  %v294_v43 = vld [vmem:[%s2594_s1 + $0xa] sm:$0x3] }
  0x32   : > { %1797 = vmatprep.mubr.msk.bf16.mxu1 %vm2013_vm1, %v2012_v2  ;;  %v2250_v58 = vsel %vm1108_vm5, %v1111_v8, %v1114_v13  ;;  %v1125_v22 = vrot.slane %v2165_v14, 3  ;;  %vm252_vm6 = vcmp.gt.f32.partialorder %v238_v42, 0.0  ;;  %v1122_v62 = vor.u32 %v1121_v17, %v1120_v53 }
  0x33   : > { %v2259_v10 = vsel %vm1108_vm5, %v1114_v13, %v1118_v16  ;;  %v2262_v23 = vsel %vm995_vm4, %v1001_v15, %v1003_v20  ;;  %vm253_vm7 = vcmp.gt.f32.partialorder %v239_v40, 0.0  ;;  %v266_v24 = vmul.f32 0.01, %v238_v42 }
  0x34   : > { %v267_v26 = vmul.f32 0.01, %v239_v40  ;;  %vm1238_vm8 = vcmask 1044480   ;;  %v643_v14 = vrot.slane %v2090_v27, 5  ;;  %v2270_v29 = vsel %vm1108_vm5, %v1118_v16, %v1122_v62 }
  0x35   : > { %v1239_v30 = vrot.slane %v2090_v27, 3  ;;  %v1240_v31 = vrot.slane %v2096_v32, 3  ;;  %vm641_vm9 = vcmask 1042432   ;;  %v280_v37 = vsel %vm252_vm6, %v238_v42, %v266_v24 }
  0x36   : > { %v281_v38 = vsel %vm253_vm7, %v239_v40, %v267_v26  ;;  %v342_v41 = vsel %vm298_vm11, %v2174_v19, %v341_v54  ;;  %v644_v48 = vsel %vm641_vm9, %v642_v12, %v643_v14  ;;  %v529_v60 = vrot.slane %v2088_v25, 1  ;;  %v293_v25 = vld [vmem:[%s2594_s1 + $0x8] sm:$0x3] }
  0x37   : > { %1772 = vmatmul.mubr.msk.bf16.gmra.mrb[12].mxu0 %vm343_vm2, %v334_v18  ;;  %v1126_v18 = vor.u32 %v1125_v22, %v1124_v21  ;;  %v288_v46 = vpack.c.bf16 %v281_v38, %v280_v37  ;;  %v2284_v47 = vsel %vm1238_vm8, %v1239_v30, %v1240_v31  ;;  %v530_v19 = vrot.slane %v2090_v27, 1  ;;  %v296_v38 = vld [vmem:[%s2594_s1 + $0xe] sm:$0x3] }
  0x38   : > { %1775 = vmatprep.mubr.msk.bf16.mxu0 %vm2013_vm1, %v2012_v2  ;;  %v909_v54 = vsel %vm359_vm0, %v294_v43, 0  ;;  %v1242_v12 = vrot.slane %v2117_v45, 3  ;;  %vm528_vm10 = vcmask 1046528   ;;  %v645_v27 = vrot.slane %v2096_v32, 5 }
  0x39   : > { %1798 = vmatmul.mubr.msk.bf16.gmra.mrb[16].mxu1 %vm343_vm2, %v2134_v59  ;;  %v2275_v34 = vsel %vm1108_vm5, %v1122_v62, %v1126_v18  ;;  %v1005_v51 = vrot.slane %v288_v46, 2  ;;  %v1129_v52 = vshrl.u32 %v288_v46, 16  ;;  %v1132_v57 = vshll.u32 %v288_v46, 16 }
  0x3a   : > { %1825 = vmatprep.mubr.msk.bf16.mxu1 %vm2013_vm1, %v2012_v2  ;;  %v2307_v5 = vsel %vm1238_vm8, %v1240_v31, %v1242_v12  ;;  %v531_v8 = vsel %vm528_vm10, %v529_v60, %v530_v19  ;;  %v796_v11 = vsel %vm359_vm0, %v293_v25, 0  ;;  %v646_v42 = vsel %vm641_vm9, %v643_v14, %v645_v27 }
  0x3b   : > { %v2296_v63 = vsel %vm995_vm4, %v1003_v20, %v1005_v51  ;;  %v1131_v0 = vrot.slane %v1129_v52, 2  ;;  %v1134_v3 = vrot.slane %v1132_v57, 3  ;;  %v532_v13 = vrot.slane %v2096_v32, 1 }
  0x3c   : > { %v1244_v15 = vrot.slane %v2134_v59, 3  ;;  %v647_v53 = vrot.slane %v2117_v45, 5  ;;  %v534_v32 = vrot.slane %v2117_v45, 1  ;;  %v1246_v20 = vrot.slane %v2150_v7, 3 }
  0x3d   : > { %v1135_v4 = vor.u32 %v1134_v3, %v1131_v0  ;;  %v533_v16 = vsel %vm528_vm10, %v530_v19, %v532_v13  ;;  %v649_v21 = vrot.slane %v2134_v59, 5  ;;  %v536_v45 = vrot.slane %v2134_v59, 1 }
  0x3e   : > { %v2327_v40 = vsel %vm1238_vm8, %v1242_v12, %v1244_v15  ;;  %v648_v17 = vsel %vm641_vm9, %v645_v27, %v647_v53  ;;  %v2341_v22 = vsel %vm1238_vm8, %v1244_v15, %v1246_v20  ;;  %v535_v62 = vsel %vm528_vm10, %v532_v13, %v534_v32  ;;  %v1992_v15 = vld [vmem:[%s2596_s3 + $0x8] sm:$0xff]  }
  0x3f   : > { %1776 = vmatmul.mubr.msk.bf16.gmra.mrb[16].mxu0 %vm343_vm2, %v342_v41  ;;  %v2312_v9 = vsel %vm1108_vm5, %v1126_v18, %v1135_v4  ;;  %v650_v18 = vsel %vm641_vm9, %v647_v53, %v649_v21  ;;  %v1248_v24 = vrot.slane %v288_v46, 3  ;;  %v651_v26 = vrot.slane %v2150_v7, 5 }
  0x40   : > { %1803 = vmatprep.mubr.msk.bf16.mxu0 %vm2013_vm1, %v2012_v2  ;;  %v537_v30 = vsel %vm528_vm10, %v534_v32, %v536_v45  ;;  %v538_v59 = vrot.slane %v2150_v7, 1  ;;  %v1153_v41 = vsel %vm359_vm0, %v296_v38, 0  ;;  %v295_v7 = vld [vmem:[%s2594_s1 + $0xc] sm:$0x3]  ;;  %vm1426_vm12 = vcmask 261120  }
  0x41   : > { %1826 = vmatmul.mubr.msk.bf16.vlgmr.msra.gmra.mrb[20].mxu1 %vm343_vm2, %v644_v48  ;;  %v2354_v14 = vsel %vm1238_vm8, %v1246_v20, %v1248_v24  ;;  %v652_v31 = vsel %vm641_vm9, %v649_v21, %v651_v26  ;;  %v1023_v43 = vsel %vm359_vm0, %v295_v7, 0 }
  0x42   : > { %1829 = vmatprep.mubr.msk.bf16.mxu1 %vm2013_vm1, %v2012_v2  ;;  %1868 = vmatpush3.bf16.msra.mxu1 %v909_v54  ;;  %v539_v37 = vsel %vm528_vm10, %v536_v45, %v538_v59 }
  0x43   : > { %1911 = vmatprep.subr.bf16.mxu1 %v2012_v2 }
  0x47   : > { %1804 = vmatmul.mubr.msk.bf16.vlgmr.msra.gmra.mrb[20].mxu0 %vm343_vm2, %v531_v8 }
  0x48   : > { %1846 = vmatpush3.bf16.msra.mxu0 %v796_v11  ;;  %1807 = vmatprep.mubr.msk.bf16.mxu0 %vm2013_vm1, %v2012_v2 }
  0x49   : > { %1830 = vmatmul.mubr.msk.bf16.gmra.mrb[24].mxu1 %vm343_vm2, %v646_v42  ;;  %1889 = vmatprep.subr.bf16.mxu0 %v2012_v2 }
  0x4a   : > { %1833 = vmatprep.mubr.msk.bf16.mxu1 %vm2013_vm1, %v2012_v2 }
  0x4f   : > { %1808 = vmatmul.mubr.msk.bf16.gmra.mrb[24].mxu0 %vm343_vm2, %v533_v16 }
  0x50   : > { %1811 = vmatprep.mubr.msk.bf16.mxu0 %vm2013_vm1, %v2012_v2 }
  0x51   : > { %1834 = vmatmul.mubr.msk.bf16.gmra.mrb[28].mxu1 %vm343_vm2, %v648_v17 }
  0x52   : > { %1837 = vmatprep.mubr.msk.bf16.mxu1 %vm2013_vm1, %v2012_v2 }
  0x57   : > { %1812 = vmatmul.mubr.msk.bf16.gmra.mrb[28].mxu0 %vm343_vm2, %v535_v62 }
  0x58   : > { %1815 = vmatprep.mubr.msk.bf16.mxu0 %vm2013_vm1, %v2012_v2 }
  0x59   : > { %1838 = vmatmul.mubr.msk.bf16.gmra.mrb[32].mxu1 %vm343_vm2, %v650_v18 }
  0x5a   : > { %1841 = vmatprep.mubr.msk.bf16.mxu1 %vm2013_vm1, %v2012_v2 }
  0x5f   : > { %1816 = vmatmul.mubr.msk.bf16.gmra.mrb[32].mxu0 %vm343_vm2, %v537_v30 }
  0x60   : > { %1819 = vmatprep.mubr.msk.bf16.mxu0 %vm2013_vm1, %v2012_v2 }
  0x61   : > { %1842 = vmatmul.mubr.msk.bf16.gmra.mrb[36].mxu1 %vm343_vm2, %v652_v31 }
  0x62   : > { %1869 = vmatprep.mubr.msk.bf16.mxu1 %vm2013_vm1, %v2012_v2 }
  0x67   : > { %1820 = vmatmul.mubr.msk.bf16.gmra.mrb[36].mxu0 %vm343_vm2, %v539_v37 }
  0x68   : > { %1847 = vmatprep.mubr.msk.bf16.mxu0 %vm2013_vm1, %v2012_v2 }
  0x69   : > { %1870 = vmatmul.mubr.msk.bf16.vlgmr.msra.gmra.mrb[40].mxu1 %vm343_vm2, %v2182_v28  ;;  %v297_v28 = vld [vmem:[%s2594_s1 + $0x10] sm:$0x3] }
  0x6a   : > { %1873 = vmatprep.mubr.msk.bf16.mxu1 %vm2013_vm1, %v2012_v2  ;;  %1912 = vmatpush3.bf16.msra.mxu1 %v1153_v41 }
  0x6b   : > { %1955 = vmatprep.subr.bf16.mxu1 %v2012_v2 }
  0x6f   : > { %1848 = vmatmul.mubr.msk.bf16.vlgmr.msra.gmra.mrb[40].mxu0 %vm343_vm2, %v2188_v33  ;;  %v1266_v33 = vsel %vm359_vm0, %v297_v28, 0 }
  0x70   : > { %1890 = vmatpush3.bf16.msra.mxu0 %v1023_v43  ;;  %1851 = vmatprep.mubr.msk.bf16.mxu0 %vm2013_vm1, %v2012_v2 }
  0x71   : > { %1874 = vmatmul.mubr.msk.bf16.gmra.mrb[44].mxu1 %vm343_vm2, %v2191_v36  ;;  %1933 = vmatprep.subr.bf16.mxu0 %v2012_v2 }
  0x72   : > { %1877 = vmatprep.mubr.msk.bf16.mxu1 %vm2013_vm1, %v2012_v2 }
  0x77   : > { %1852 = vmatmul.mubr.msk.bf16.gmra.mrb[44].mxu0 %vm343_vm2, %v2201_v44 }
  0x78   : > { %1855 = vmatprep.mubr.msk.bf16.mxu0 %vm2013_vm1, %v2012_v2 }
  0x79   : > { %1878 = vmatmul.mubr.msk.bf16.gmra.mrb[48].mxu1 %vm343_vm2, %v2195_v39 }
  0x7a   : > { %1881 = vmatprep.mubr.msk.bf16.mxu1 %vm2013_vm1, %v2012_v2 }
  0x7f   : > { %1856 = vmatmul.mubr.msk.bf16.gmra.mrb[48].mxu0 %vm343_vm2, %v2208_v49 }
  0x80   : > { %1859 = vmatprep.mubr.msk.bf16.mxu0 %vm2013_vm1, %v2012_v2 }
  0x81   : > { %1882 = vmatmul.mubr.msk.bf16.gmra.mrb[52].mxu1 %vm343_vm2, %v2211_v50 }
  0x82   : > { %1885 = vmatprep.mubr.msk.bf16.mxu1 %vm2013_vm1, %v2012_v2 }
  0x87   : > { %1860 = vmatmul.mubr.msk.bf16.gmra.mrb[52].mxu0 %vm343_vm2, %v2218_v55 }
  0x88   : > { %1863 = vmatprep.mubr.msk.bf16.mxu0 %vm2013_vm1, %v2012_v2 }
  0x89   : > { %1886 = vmatmul.mubr.msk.bf16.gmra.mrb[56].mxu1 %vm343_vm2, %v2221_v56 }
  0x8a   : > { %1913 = vmatprep.mubr.msk.bf16.mxu1 %vm2013_vm1, %v2012_v2 }
  0x8f   : > { %1864 = vmatmul.mubr.msk.bf16.gmra.mrb[56].mxu0 %vm343_vm2, %v2235_v6 }
  0x90   : > { %1891 = vmatprep.mubr.msk.bf16.mxu0 %vm2013_vm1, %v2012_v2 }
  0x91   : > { %1914 = vmatmul.mubr.msk.bf16.vlgmr.msra.gmra.mrb[60].mxu1 %vm343_vm2, %v2250_v58 }
  0x92   : > { %1917 = vmatprep.mubr.msk.bf16.mxu1 %vm2013_vm1, %v2012_v2 }
  0x97   : > { %1892 = vmatmul.mubr.msk.bf16.vlgmr.msra.gmra.mrb[60].mxu0 %vm343_vm2, %v2229_v1 }
  0x98   : > { %1934 = vmatpush3.bf16.msra.mxu0 %v1266_v33  ;;  %1895 = vmatprep.mubr.msk.bf16.mxu0 %vm2013_vm1, %v2012_v2 }
  0x99   : > { %1918 = vmatmul.mubr.msk.bf16.gmra.mrb[64].mxu1 %vm343_vm2, %v2259_v10 }
  0x9a   : > { %1921 = vmatprep.mubr.msk.bf16.mxu1 %vm2013_vm1, %v2012_v2 }
  0x9f   : > { %1896 = vmatmul.mubr.msk.bf16.gmra.mrb[64].mxu0 %vm343_vm2, %v2241_v35 }
  0xa0   : > { %1899 = vmatprep.mubr.msk.bf16.mxu0 %vm2013_vm1, %v2012_v2 }
  0xa1   : > { %1922 = vmatmul.mubr.msk.bf16.gmra.mrb[68].mxu1 %vm343_vm2, %v2270_v29  ;;  %v1991_v29 = vld [vmem:[%s2596_s3] sm:$0xff]  }
  0xa2   : > { %1925 = vmatprep.mubr.msk.bf16.mxu1 %vm2013_vm1, %v2012_v2  ;;  %1956 = vmatpush3.bf16.msra.mxu1 %v1991_v29 }
  0xa3   : > { %1957 = vmatprep.subr.bf16.mxu1 %v2012_v2 }
  0xa6   : > { %1958 = vmatpush3.bf16.msra.mxu1 %v1992_v15 }
  0xa7   : > { %1900 = vmatmul.mubr.msk.bf16.gmra.mrb[68].mxu0 %vm343_vm2, %v2253_v61 }
  0xa8   : > { %1903 = vmatprep.mubr.msk.bf16.mxu0 %vm2013_vm1, %v2012_v2 }
  0xa9   : > { %1926 = vmatmul.mubr.msk.bf16.gmra.mrb[72].mxu1 %vm343_vm2, %v2275_v34 }
  0xaa   : > { %1929 = vmatprep.mubr.msk.bf16.mxu1 %vm2013_vm1, %v2012_v2 }
  0xaf   : > { %1904 = vmatmul.mubr.msk.bf16.gmra.mrb[72].mxu0 %vm343_vm2, %v2262_v23 }
  0xb0   : > { %1907 = vmatprep.mubr.msk.bf16.mxu0 %vm2013_vm1, %v2012_v2 }
  0xb1   : > { %1930 = vmatmul.mubr.msk.bf16.gmra.mrb[76].mxu1 %vm343_vm2, %v2312_v9 }
  0xb2   : > { %1959 = vmatprep.mubr.msk.bf16.mxu1 %vm2013_vm1, %v2012_v2 }
  0xb7   : > { %1908 = vmatmul.mubr.msk.bf16.gmra.mrb[76].mxu0 %vm343_vm2, %v2296_v63 }
  0xb8   : > { %1935 = vmatprep.mubr.msk.bf16.mxu0 %vm2013_vm1, %v2012_v2 }
  0xbf   : > { %1936 = vmatmul.mubr.msk.bf16.vlgmr.msra.gmra.mrb[80].mxu0 %vm343_vm2, %v2284_v47 }
  0xc0   : > { %1939 = vmatprep.mubr.msk.bf16.mxu0 %vm2013_vm1, %v2012_v2 }
  0xc7   : > { %1940 = vmatmul.mubr.msk.bf16.gmra.mrb[84].mxu0 %vm343_vm2, %v2307_v5 }
  0xc8   : > { %1943 = vmatprep.mubr.msk.bf16.mxu0 %vm2013_vm1, %v2012_v2 }
  0xcf   : > { %1944 = vmatmul.mubr.msk.bf16.gmra.mrb[88].mxu0 %vm343_vm2, %v2327_v40 }
  0xd0   : > { %1947 = vmatprep.mubr.msk.bf16.mxu0 %vm2013_vm1, %v2012_v2 }
  0xd7   : > { %1948 = vmatmul.mubr.msk.bf16.gmra.mrb[92].mxu0 %vm343_vm2, %v2341_v22 }
  0xd8   : > { %1951 = vmatprep.mubr.msk.bf16.mxu0 %vm2013_vm1, %v2012_v2 }
  0xdf   : > { %1952 = vmatmul.mubr.msk.bf16.gmra.mrb[96].mxu0 %vm343_vm2, %v2354_v14 }
  0xeb   : > { %v483_v36 = vpop.f32.mrb[0].mxu1 }
  0xec   : > { %v1783_v39 = vpop.f32.mrb[1].mxu1 }
  0xed   : > { %v486_v44 = vpop.f32.mrb[2].mxu1 }
  0xee   : > { %v1784_v49 = vpop.f32.mrb[3].mxu1 }
  0xf2   : > { %v397_v50 = vpop.f32.mrb[0].mxu0 }
  0xf3   : > { %v484_v55 = vadd.f32 %v483_v36, %v397_v50  ;;  %v1761_v56 = vpop.f32.mrb[1].mxu0 }
  0xf4   : > { %v400_v1 = vpop.f32.mrb[2].mxu0  ;;  %v491_v6 = vpop.f32.mrb[4].mxu1 }
  0xf5   : > { %v487_v35 = vadd.f32 %v486_v44, %v400_v1  ;;  %v1762_v58 = vpop.f32.mrb[3].mxu0  ;;  %v1787_v61 = vpop.f32.mrb[5].mxu1 }
  0xf6   : > { %v494_v10 = vpop.f32.mrb[6].mxu1 }
  0xf7   : > { %v1788_v23 = vpop.f32.mrb[7].mxu1 }
  0xfa   : > { %v405_v34 = vpop.f32.mrb[4].mxu0 }
  0xfb   : > { %v492_v46 = vadd.f32 %v491_v6, %v405_v34  ;;  %v1765_v47 = vpop.f32.mrb[5].mxu0 }
  0xfc   : > { %v408_v48 = vpop.f32.mrb[6].mxu0  ;;  %v499_v51 = vpop.f32.mrb[8].mxu1 }
  0xfd   : > { %v495_v52 = vadd.f32 %v494_v10, %v408_v48  ;;  %v1766_v57 = vpop.f32.mrb[7].mxu0  ;;  %v1791_v60 = vpop.f32.mrb[9].mxu1 }
  0xfe   : > { %v502_v19 = vpop.f32.mrb[10].mxu1 }
  0xff   : > { %v1792_v54 = vpop.f32.mrb[11].mxu1 }
 0x102   : > { %v413_v63 = vpop.f32.mrb[8].mxu0 }
 0x103   : > { %v500_v0 = vadd.f32 %v499_v51, %v413_v63  ;;  %v1769_v3 = vpop.f32.mrb[9].mxu0 }
 0x104   : > { %v416_v12 = vpop.f32.mrb[10].mxu0  ;;  %v507_v25 = vpop.f32.mrb[12].mxu1 }
 0x105   : > { %v503_v27 = vadd.f32 %v502_v19, %v416_v12  ;;  %v1770_v4 = vpop.f32.mrb[11].mxu0  ;;  %v1795_v5 = vpop.f32.mrb[13].mxu1 }
 0x106   : > { %v510_v8 = vpop.f32.mrb[14].mxu1 }
 0x107   : > { %v1796_v9 = vpop.f32.mrb[15].mxu1 }
 0x10a   : > { %v421_v11 = vpop.f32.mrb[12].mxu0 }
 0x10b   : > { %v508_v42 = vadd.f32 %v507_v25, %v421_v11  ;;  %v1773_v13 = vpop.f32.mrb[13].mxu0 }
 0x10c   : > { %v424_v53 = vpop.f32.mrb[14].mxu0  ;;  %v515_v40 = vpop.f32.mrb[16].mxu1 }
 0x10d   : > { %v511_v16 = vadd.f32 %v510_v8, %v424_v53  ;;  %v1774_v17 = vpop.f32.mrb[15].mxu0  ;;  %v1799_v32 = vpop.f32.mrb[17].mxu1 }
 0x10e   : > { %v518_v20 = vpop.f32.mrb[18].mxu1 }
 0x10f   : > { %v1800_v21 = vpop.f32.mrb[19].mxu1 }
 0x112   : > { %v429_v22 = vpop.f32.mrb[16].mxu0 }
 0x113   : > { %v516_v62 = vadd.f32 %v515_v40, %v429_v22  ;;  %v1777_v18 = vpop.f32.mrb[17].mxu0 }
 0x114   : > { %v432_v45 = vpop.f32.mrb[18].mxu0  ;;  %v705_v24 = vpop.f32.mrb[20].mxu1 }
 0x115   : > { %v519_v26 = vadd.f32 %v518_v20, %v432_v45  ;;  %v1778_v14 = vpop.f32.mrb[19].mxu0  ;;  %v1827_v30 = vpop.f32.mrb[21].mxu1 }
 0x116   : > { %v708_v31 = vpop.f32.mrb[22].mxu1 }
 0x117   : > { %v1828_v59 = vpop.f32.mrb[23].mxu1 }
 0x11a   : > { %v592_v37 = vpop.f32.mrb[20].mxu0 }
 0x11b   : > { %v631_v38 = vadd.f32 %v592_v37, %v484_v55  ;;  %v1805_v41 = vpop.f32.mrb[21].mxu0 }
 0x11c   : > { %v595_v7 = vpop.f32.mrb[22].mxu0  ;;  %v713_v43 = vpop.f32.mrb[24].mxu1 }
 0x11d   : > { %v632_v28 = vadd.f32 %v595_v7, %v487_v35  ;;  %v744_v33 = vadd.f32 %v705_v24, %v631_v38  ;;  %v1806_v36 = vpop.f32.mrb[23].mxu0  ;;  %v1831_v39 = vpop.f32.mrb[25].mxu1 }
 0x11e   : > { %v716_v44 = vpop.f32.mrb[26].mxu1 }
 0x11f   : > { %v745_v49 = vadd.f32 %v708_v31, %v632_v28  ;;  %v1832_v50 = vpop.f32.mrb[27].mxu1 }
 0x122   : > { %v600_v56 = vpop.f32.mrb[24].mxu0 }
 0x123   : > { %v633_v1 = vadd.f32 %v600_v56, %v492_v46  ;;  %v1809_v6 = vpop.f32.mrb[25].mxu0 }
 0x124   : > { %v603_v58 = vpop.f32.mrb[26].mxu0  ;;  %v721_v61 = vpop.f32.mrb[28].mxu1 }
 0x125   : > { %v634_v10 = vadd.f32 %v603_v58, %v495_v52  ;;  %v746_v23 = vadd.f32 %v713_v43, %v633_v1  ;;  %v1810_v29 = vpop.f32.mrb[27].mxu0  ;;  %v1835_v34 = vpop.f32.mrb[29].mxu1 }
 0x126   : > { %v724_v55 = vpop.f32.mrb[30].mxu1 }
 0x127   : > { %v747_v47 = vadd.f32 %v716_v44, %v634_v10  ;;  %v1836_v48 = vpop.f32.mrb[31].mxu1 }
 0x12a   : > { %v608_v51 = vpop.f32.mrb[28].mxu0 }
 0x12b   : > { %v635_v35 = vadd.f32 %v608_v51, %v500_v0  ;;  %v1813_v57 = vpop.f32.mrb[29].mxu0 }
 0x12c   : > { %v611_v60 = vpop.f32.mrb[30].mxu0  ;;  %v729_v19 = vpop.f32.mrb[32].mxu1 }
 0x12d   : > { %v636_v54 = vadd.f32 %v611_v60, %v503_v27  ;;  %v748_v63 = vadd.f32 %v721_v61, %v635_v35  ;;  %v1814_v3 = vpop.f32.mrb[31].mxu0  ;;  %v1839_v12 = vpop.f32.mrb[33].mxu1 }
 0x12e   : > { %v732_v46 = vpop.f32.mrb[34].mxu1 }
 0x12f   : > { %v749_v25 = vadd.f32 %v724_v55, %v636_v54  ;;  %v1840_v4 = vpop.f32.mrb[35].mxu1 }
 0x132   : > { %v616_v5 = vpop.f32.mrb[32].mxu0 }
 0x133   : > { %v637_v52 = vadd.f32 %v616_v5, %v508_v42  ;;  %v1817_v8 = vpop.f32.mrb[33].mxu0 }
 0x134   : > { %v619_v9 = vpop.f32.mrb[34].mxu0  ;;  %v737_v11 = vpop.f32.mrb[36].mxu1 }
 0x135   : > { %v638_v13 = vadd.f32 %v619_v9, %v511_v16  ;;  %v750_v15 = vadd.f32 %v729_v19, %v637_v52  ;;  %v1818_v53 = vpop.f32.mrb[35].mxu0  ;;  %v1843_v40 = vpop.f32.mrb[37].mxu1 }
 0x136   : > { %v740_v0 = vpop.f32.mrb[38].mxu1 }
 0x137   : > { %v751_v17 = vadd.f32 %v732_v46, %v638_v13  ;;  %v1844_v32 = vpop.f32.mrb[39].mxu1 }
 0x13a   : > { %v624_v20 = vpop.f32.mrb[36].mxu0 }
 0x13b   : > { %v639_v27 = vadd.f32 %v624_v20, %v516_v62  ;;  %v1821_v21 = vpop.f32.mrb[37].mxu0 }
 0x13c   : > { %v627_v22 = vpop.f32.mrb[38].mxu0  ;;  %v945_v18 = vpop.f32.mrb[40].mxu1 }
 0x13d   : > { %v640_v45 = vadd.f32 %v627_v22, %v519_v26  ;;  %v752_v24 = vadd.f32 %v737_v11, %v639_v27  ;;  %v1822_v14 = vpop.f32.mrb[39].mxu0  ;;  %v1871_v30 = vpop.f32.mrb[41].mxu1 }
 0x13e   : > { %v948_v42 = vpop.f32.mrb[42].mxu1 }
 0x13f   : > { %v753_v31 = vadd.f32 %v740_v0, %v640_v45  ;;  %v1872_v59 = vpop.f32.mrb[43].mxu1 }
 0x142   : > { %v832_v37 = vpop.f32.mrb[40].mxu0 }
 0x143   : > { %v871_v16 = vadd.f32 %v832_v37, %v744_v33  ;;  %v1849_v38 = vpop.f32.mrb[41].mxu0 }
 0x144   : > { %v835_v41 = vpop.f32.mrb[42].mxu0  ;;  %v953_v7 = vpop.f32.mrb[44].mxu1 }
 0x145   : > { %v872_v43 = vadd.f32 %v835_v41, %v745_v49  ;;  %v984_v28 = vadd.f32 %v945_v18, %v871_v16  ;;  %v1850_v36 = vpop.f32.mrb[43].mxu0  ;;  %v1875_v39 = vpop.f32.mrb[45].mxu1 }
 0x146   : > { %v956_v62 = vpop.f32.mrb[46].mxu1 }
 0x147   : > { %v985_v44 = vadd.f32 %v948_v42, %v872_v43  ;;  %v1876_v50 = vpop.f32.mrb[47].mxu1 }
 0x14a   : > { %v840_v56 = vpop.f32.mrb[44].mxu0 }
 0x14b   : > { %v873_v26 = vadd.f32 %v840_v56, %v746_v23  ;;  %v1853_v1 = vpop.f32.mrb[45].mxu0 }
 0x14c   : > { %v843_v6 = vpop.f32.mrb[46].mxu0  ;;  %v961_v58 = vpop.f32.mrb[48].mxu1 }
 0x14d   : > { %v874_v61 = vadd.f32 %v843_v6, %v747_v47  ;;  %v986_v10 = vadd.f32 %v953_v7, %v873_v26  ;;  %v1854_v29 = vpop.f32.mrb[47].mxu0  ;;  %v1879_v34 = vpop.f32.mrb[49].mxu1 }
 0x14e   : > { %v964_v33 = vpop.f32.mrb[50].mxu1 }
 0x14f   : > { %v987_v55 = vadd.f32 %v956_v62, %v874_v61  ;;  %v1880_v48 = vpop.f32.mrb[51].mxu1 }
 0x152   : > { %v848_v51 = vpop.f32.mrb[48].mxu0 }
 0x153   : > { %v875_v49 = vadd.f32 %v848_v51, %v748_v63  ;;  %v1857_v35 = vpop.f32.mrb[49].mxu0 }
 0x154   : > { %v851_v57 = vpop.f32.mrb[50].mxu0  ;;  %v969_v60 = vpop.f32.mrb[52].mxu1 }
 0x155   : > { %v876_v19 = vadd.f32 %v851_v57, %v749_v25  ;;  %v988_v54 = vadd.f32 %v961_v58, %v875_v49  ;;  %v1858_v3 = vpop.f32.mrb[51].mxu0  ;;  %v1883_v12 = vpop.f32.mrb[53].mxu1 }
 0x156   : > { %v972_v23 = vpop.f32.mrb[54].mxu1 }
 0x157   : > { %v989_v46 = vadd.f32 %v964_v33, %v876_v19  ;;  %v1884_v4 = vpop.f32.mrb[55].mxu1 }
 0x15a   : > { %v856_v5 = vpop.f32.mrb[52].mxu0 }
 0x15b   : > { %v877_v47 = vadd.f32 %v856_v5, %v750_v15  ;;  %v1861_v52 = vpop.f32.mrb[53].mxu0 }
 0x15c   : > { %v859_v8 = vpop.f32.mrb[54].mxu0  ;;  %v977_v9 = vpop.f32.mrb[56].mxu1 }
 0x15d   : > { %v878_v11 = vadd.f32 %v859_v8, %v751_v17  ;;  %v990_v13 = vadd.f32 %v969_v60, %v877_v47  ;;  %v1862_v53 = vpop.f32.mrb[55].mxu0  ;;  %v1887_v40 = vpop.f32.mrb[57].mxu1 }
 0x15e   : > { %v980_v63 = vpop.f32.mrb[58].mxu1 }
 0x15f   : > { %v991_v0 = vadd.f32 %v972_v23, %v878_v11  ;;  %v1888_v32 = vpop.f32.mrb[59].mxu1 }
 0x162   : > { %v864_v20 = vpop.f32.mrb[56].mxu0 }
 0x163   : > { %v879_v25 = vadd.f32 %v864_v20, %v752_v24  ;;  %v1865_v27 = vpop.f32.mrb[57].mxu0 }
 0x164   : > { %v867_v21 = vpop.f32.mrb[58].mxu0  ;;  %v1189_v22 = vpop.f32.mrb[60].mxu1 }
 0x165   : > { %v880_v18 = vadd.f32 %v867_v21, %v753_v31  ;;  %v992_v45 = vadd.f32 %v977_v9, %v879_v25  ;;  %v1866_v14 = vpop.f32.mrb[59].mxu0  ;;  %v1915_v30 = vpop.f32.mrb[61].mxu1 }
 0x166   : > { %v1192_v15 = vpop.f32.mrb[62].mxu1 }
 0x167   : > { %v993_v42 = vadd.f32 %v980_v63, %v880_v18  ;;  %v1916_v59 = vpop.f32.mrb[63].mxu1 }
 0x16a   : > { %v1059_v37 = vpop.f32.mrb[60].mxu0 }
 0x16b   : > { %v1098_v17 = vadd.f32 %v1059_v37, %v984_v28  ;;  %v1893_v16 = vpop.f32.mrb[61].mxu0 }
 0x16c   : > { %v1062_v38 = vpop.f32.mrb[62].mxu0  ;;  %v1197_v41 = vpop.f32.mrb[64].mxu1 }
 0x16d   : > { %v1099_v7 = vadd.f32 %v1062_v38, %v985_v44  ;;  %v1228_v43 = vadd.f32 %v1189_v22, %v1098_v17  ;;  %v1894_v36 = vpop.f32.mrb[63].mxu0  ;;  %v1919_v39 = vpop.f32.mrb[65].mxu1 }
 0x16e   : > { %v1200_v24 = vpop.f32.mrb[66].mxu1 }
 0x16f   : > { %v1229_v62 = vadd.f32 %v1192_v15, %v1099_v7  ;;  %v1920_v50 = vpop.f32.mrb[67].mxu1 }
 0x172   : > { %v1067_v56 = vpop.f32.mrb[64].mxu0 }
 0x173   : > { %v1100_v31 = vadd.f32 %v1067_v56, %v986_v10  ;;  %v1897_v26 = vpop.f32.mrb[65].mxu0 }
 0x174   : > { %v1070_v1 = vpop.f32.mrb[66].mxu0  ;;  %v1205_v6 = vpop.f32.mrb[68].mxu1 }
 0x175   : > { %v1101_v58 = vadd.f32 %v1070_v1, %v987_v55  ;;  %v1230_v61 = vadd.f32 %v1197_v41, %v1100_v31  ;;  %v1898_v29 = vpop.f32.mrb[67].mxu0  ;;  %v1923_v34 = vpop.f32.mrb[69].mxu1 }
 0x176   : > { %v1208_v28 = vpop.f32.mrb[70].mxu1 }
 0x177   : > { %v1231_v33 = vadd.f32 %v1200_v24, %v1101_v58  ;;  %v1924_v48 = vpop.f32.mrb[71].mxu1 }
 0x17a   : > { %v1075_v51 = vpop.f32.mrb[68].mxu0 }
 0x17b   : > { %v1102_v44 = vadd.f32 %v1075_v51, %v988_v54  ;;  %v1901_v49 = vpop.f32.mrb[69].mxu0 }
 0x17c   : > { %v1078_v35 = vpop.f32.mrb[70].mxu0  ;;  %v1213_v57 = vpop.f32.mrb[72].mxu1 }
 0x17d   : > { %v1103_v60 = vadd.f32 %v1078_v35, %v989_v46  ;;  %v1232_v19 = vadd.f32 %v1205_v6, %v1102_v44  ;;  %v1902_v3 = vpop.f32.mrb[71].mxu0  ;;  %v1927_v12 = vpop.f32.mrb[73].mxu1 }
 0x17e   : > { %v1216_v10 = vpop.f32.mrb[74].mxu1 }
 0x17f   : > { %v1233_v23 = vadd.f32 %v1208_v28, %v1103_v60  ;;  %v1928_v4 = vpop.f32.mrb[75].mxu1 }
 0x182   : > { %v1083_v5 = vpop.f32.mrb[72].mxu0 }
 0x183   : > { %v1104_v55 = vadd.f32 %v1083_v5, %v990_v13  ;;  %v1905_v47 = vpop.f32.mrb[73].mxu0 }
 0x184   : > { %v1086_v52 = vpop.f32.mrb[74].mxu0  ;;  %v1221_v8 = vpop.f32.mrb[76].mxu1 }
 0x185   : > { %v1105_v9 = vadd.f32 %v1086_v52, %v991_v0  ;;  %v2488_v11 = vadd.f32 %v1213_v57, %v1104_v55  ;;  %v1906_v53 = vpop.f32.mrb[75].mxu0  ;;  %v1931_v54 = vpop.f32.mrb[77].mxu1  ;;  %v2499_v0 = vld [vmem:[%s2595_s2] ss:$0 sm:$0xff] }
 0x186   : > { %v1224_v40 = vpop.f32.mrb[78].mxu1 }
 0x187   : > { %v2490_v63 = vadd.f32 %v1216_v10, %v1105_v9  ;;  %v1932_v46 = vpop.f32.mrb[79].mxu1 }
 0x18a   : > { %v1091_v32 = vpop.f32.mrb[76].mxu0 }
 0x18b   : > { %v1106_v20 = vadd.f32 %v1091_v32, %v992_v45  ;;  %v1909_v25 = vpop.f32.mrb[77].mxu0 }
 0x18c   : > { %v1094_v27 = vpop.f32.mrb[78].mxu0 }
 0x18d   : > { %v1107_v21 = vadd.f32 %v1094_v27, %v993_v42  ;;  %v2492_v22 = vadd.f32 %v1221_v8, %v1106_v20  ;;  %v1910_v13 = vpop.f32.mrb[79].mxu0 }
 0x18f   : > { %v2494_v18 = vadd.f32 %v1224_v40, %v1107_v21 }
 0x192   : > { %v1302_v14 = vpop.f32.mrb[80].mxu0 }
 0x193   : > { %v1341_v30 = vadd.f32 %v1302_v14, %v1228_v43  ;;  %v1937_v15 = vpop.f32.mrb[81].mxu0 }
 0x194   : > { %v1305_v59 = vpop.f32.mrb[82].mxu0 }
 0x195   : > { %v1358_v37 = vadd.f32 %v2499_v0, %v1341_v30  ;;  %v1342_v45 = vadd.f32 %v1305_v59, %v1229_v62  ;;  %v1938_v17 = vpop.f32.mrb[83].mxu0 }
 0x197   : > { %v1378_v16 = vmul.f32 0.01, %v1358_v37  ;;  %v1359_v42 = vadd.f32 %v2499_v0, %v1342_v45  ;;  %vm1368_vm0 = vcmp.gt.f32.partialorder %v1358_v37, 0.0  ;;  %v1994_v45 = vld [vmem:[%s2077_s29 + $0x10] sm:$0xff] }
 0x198   : > { %v1528_v17 = vrot.slane %v1994_v45, 3 }
 0x199   : > { %vm1369_vm11 = vcmp.gt.f32.partialorder %v1359_v42, 0.0  ;;  %v1379_v38 = vmul.f32 0.01, %v1359_v42  ;;  %v1388_v7 = vsel %vm1368_vm0, %v1358_v37, %v1378_v16 }
 0x19a   : > { %v1310_v41 = vpop.f32.mrb[84].mxu0 }
 0x19b   : > { %v1389_v36 = vsel %vm1369_vm11, %v1359_v42, %v1379_v38  ;;  %v1343_v39 = vadd.f32 %v1310_v41, %v1230_v61  ;;  %v1941_v24 = vpop.f32.mrb[85].mxu0 }
 0x19c   : > { %v1398_v50 = vpack.c.bf16 %v1389_v36, %v1388_v7  ;;  %v1313_v43 = vpop.f32.mrb[86].mxu0 }
 0x19d   : > { %v1360_v56 = vadd.f32 %v2499_v0, %v1343_v39  ;;  %v1344_v31 = vadd.f32 %v1313_v43, %v1231_v33  ;;  %v1942_v26 = vpop.f32.mrb[87].mxu0 }
 0x19e   : > { %1960 = vmatmul.mubr.msk.bf16.vlgmr.msra.gmra.mrb[80].mxu1 %vm1426_vm12, %v1398_v50 }
 0x19f   : > { %v1380_v62 = vmul.f32 0.01, %v1360_v56  ;;  %v1361_v1 = vadd.f32 %v2499_v0, %v1344_v31  ;;  %1963 = vmatprep.mubr.msk.bf16.mxu1 %vm2013_vm1, %v2012_v2  ;;  %vm1370_vm13 = vcmp.gt.f32.partialorder %v1360_v56, 0.0 }
 0x1a1   : > { %vm1371_vm14 = vcmp.gt.f32.partialorder %v1361_v1, 0.0  ;;  %v1381_v6 = vmul.f32 0.01, %v1361_v1  ;;  %v1390_v61 = vsel %vm1370_vm13, %v1360_v56, %v1380_v62  ;;  %v1996_v56 = vld [vmem:[%s2077_s29 + $0x20] sm:$0xff]  ;;  %v1997_v62 = vld [vmem:[%s2077_s29 + $0x28] sm:$0xff] }
 0x1a2   : > { %v1318_v58 = vpop.f32.mrb[88].mxu0  ;;  %v1532_v31 = vrot.slane %v1996_v56, 3 }
 0x1a3   : > { %v1391_v29 = vsel %vm1371_vm14, %v1361_v1, %v1381_v6  ;;  %v1345_v34 = vadd.f32 %v1318_v58, %v1232_v19  ;;  %v1945_v28 = vpop.f32.mrb[89].mxu0  ;;  %v1534_v1 = vrot.slane %v1997_v62, 3 }
 0x1a4   : > { %v1321_v48 = vpop.f32.mrb[90].mxu0  ;;  %v1399_v51 = vpack.c.bf16 %v1391_v29, %v1390_v61 }
 0x1a5   : > { %v1362_v33 = vadd.f32 %v2499_v0, %v1345_v34  ;;  %v1346_v44 = vadd.f32 %v1321_v48, %v1233_v23  ;;  %v1946_v49 = vpop.f32.mrb[91].mxu0  ;;  %v1535_v28 = vsel %vm1238_vm8, %v1532_v31, %v1534_v1 }
 0x1a6   : > { %1964 = vmatmul.mubr.msk.bf16.gmra.mrb[84].mxu1 %vm1426_vm12, %v1399_v51 }
 0x1a7   : > { %v1382_v35 = vmul.f32 0.01, %v1362_v33  ;;  %v1363_v57 = vadd.f32 %v2499_v0, %v1346_v44  ;;  %1967 = vmatprep.mubr.msk.bf16.mxu1 %vm2013_vm1, %v2012_v2  ;;  %vm1372_vm15 = vcmp.gt.f32.partialorder %v1362_v33, 0.0  ;;  %v1998_v44 = vld [vmem:[%s2077_s29 + $0x30] sm:$0xff] }
 0x1a8   : > { %v1536_v49 = vrot.slane %v1998_v44, 3 }
 0x1a9   : > { %vm1373_vm3 = vcmp.gt.f32.partialorder %v1363_v57, 0.0  ;;  %v1383_v60 = vmul.f32 0.01, %v1363_v57  ;;  %v1392_v19 = vsel %vm1372_vm15, %v1362_v33, %v1382_v35 }
 0x1aa   : > { %v1326_v3 = vpop.f32.mrb[92].mxu0 }
 0x1ab   : > { %v1393_v12 = vsel %vm1373_vm3, %v1363_v57, %v1383_v60  ;;  %v1347_v10 = vadd.f32 %v1326_v3, %v2488_v11  ;;  %v1949_v4 = vpop.f32.mrb[93].mxu0  ;;  %v1999_v57 = vld [vmem:[%s2077_s29 + $0x38] sm:$0xff] }
 0x1ac   : > { %v1329_v5 = vpop.f32.mrb[94].mxu0  ;;  %v1400_v23 = vpack.c.bf16 %v1393_v12, %v1392_v19  ;;  %v1538_v60 = vrot.slane %v1999_v57, 3  ;;  %v1537_v19 = vsel %vm1238_vm8, %v1534_v1, %v1536_v49 }
 0x1ad   : > { %v1364_v55 = vadd.f32 %v2499_v0, %v1347_v10  ;;  %v1348_v47 = vadd.f32 %v1329_v5, %v2490_v63  ;;  %v1950_v52 = vpop.f32.mrb[95].mxu0 }
 0x1ae   : > { %1968 = vmatmul.mubr.msk.bf16.gmra.mrb[88].mxu1 %vm1426_vm12, %v1400_v23  ;;  %v1539_v5 = vsel %vm1238_vm8, %v1536_v49, %v1538_v60  ;;  %v2000_v52 = vld [vmem:[%s2077_s29 + $0x40] sm:$0xff] }
 0x1af   : > { %v1384_v8 = vmul.f32 0.01, %v1364_v55  ;;  %v1365_v9 = vadd.f32 %v2499_v0, %v1348_v47  ;;  %1971 = vmatprep.mubr.msk.bf16.mxu1 %vm2013_vm1, %v2012_v2  ;;  %vm1374_vm4 = vcmp.gt.f32.partialorder %v1364_v55, 0.0 }
 0x1b1   : > { %vm1375_vm5 = vcmp.gt.f32.partialorder %v1365_v9, 0.0  ;;  %v1385_v53 = vmul.f32 0.01, %v1365_v9  ;;  %v1394_v54 = vsel %vm1374_vm4, %v1364_v55, %v1384_v8  ;;  %v1540_v8 = vrot.slane %v2000_v52, 3 }
 0x1b2   : > { %v1334_v11 = vpop.f32.mrb[96].mxu0 }
 0x1b3   : > { %v1395_v40 = vsel %vm1375_vm5, %v1365_v9, %v1385_v53  ;;  %v1349_v46 = vadd.f32 %v1334_v11, %v2492_v22  ;;  %v1953_v32 = vpop.f32.mrb[97].mxu0  ;;  %v2001_v53 = vld [vmem:[%s2077_s29 + $0x48] sm:$0xff] }
 0x1b4   : > { %v1337_v20 = vpop.f32.mrb[98].mxu0  ;;  %v1401_v63 = vpack.c.bf16 %v1395_v40, %v1394_v54  ;;  %v1542_v11 = vrot.slane %v2001_v53, 3  ;;  %v1541_v40 = vsel %vm1238_vm8, %v1538_v60, %v1540_v8 }
 0x1b5   : > { %v1366_v25 = vadd.f32 %v2499_v0, %v1349_v46  ;;  %v1350_v27 = vadd.f32 %v1337_v20, %v2494_v18  ;;  %v1954_v21 = vpop.f32.mrb[99].mxu0  ;;  %v1993_v18 = vld [vmem:[%s2077_s29 + $0x8] sm:$0xff] }
 0x1b6   : > { %1972 = vmatmul.mubr.msk.bf16.gmra.mrb[92].mxu1 %vm1426_vm12, %v1401_v63  ;;  %v1527_v37 = vrot.slane %v1993_v18, 3  ;;  %v1543_v63 = vsel %vm1238_vm8, %v1540_v8, %v1542_v11 }
 0x1b7   : > { %v1386_v13 = vmul.f32 0.01, %v1366_v25  ;;  %v1367_v14 = vadd.f32 %v2499_v0, %v1350_v27  ;;  %1975 = vmatprep.mubr.msk.bf16.mxu1 %vm2013_vm1, %v2012_v2  ;;  %vm1376_vm6 = vcmp.gt.f32.partialorder %v1366_v25, 0.0  ;;  %v2534_v0 = vld [vmem:[%s2597_s4] ss:$0 sm:$0xff]  ;;  %v1995_v2 = vld [vmem:[%s2077_s29 + $0x18] sm:$0xff] }
 0x1b8   : > { %v1530_v16 = vrot.slane %v1995_v2, 3  ;;  %v1529_v38 = vsel %vm1238_vm8, %v1527_v37, %v1528_v17 }
 0x1b9   : > { %vm1377_vm7 = vcmp.gt.f32.partialorder %v1367_v14, 0.0  ;;  %v1387_v22 = vmul.f32 0.01, %v1367_v14  ;;  %v1396_v30 = vsel %vm1376_vm6, %v1366_v25, %v1386_v13  ;;  %v2002_v13 = vld [vmem:[%s2077_s29 + $0x50] sm:$0xff] }
 0x1ba   : > { %v1531_v39 = vsel %vm1238_vm8, %v1528_v17, %v1530_v16  ;;  %v1533_v58 = vsel %vm1238_vm8, %v1530_v16, %v1532_v31 }
 0x1bb   : > { %v1397_v15 = vsel %vm1377_vm7, %v1367_v14, %v1387_v22  ;;  %v1544_v14 = vrot.slane %v2002_v13, 3 }
 0x1bc   : > { %v1402_v59 = vpack.c.bf16 %v1397_v15, %v1396_v30  ;;  %v2003_v30 = vld [vmem:[%s2077_s29 + $0x58] sm:$0xff] }
 0x1bd   : > { %v1546_v15 = vrot.slane %v2003_v30, 3  ;;  %v1545_v18 = vsel %vm1238_vm8, %v1542_v11, %v1544_v14 }
 0x1be   : > { %1976 = vmatmul.mubr.msk.bf16.gmra.mrb[96].mxu1 %vm1426_vm12, %v1402_v59 }
 0x1bf   : > { %v1547_v2 = vsel %vm1238_vm8, %v1544_v14, %v1546_v15 }
 0x271   : > { %v1476_v42 = vpop.f32.mrb[80].mxu1 }
 0x272   : > { %v1477_v41 = vadd.f32 %v2534_v0, %v1476_v42  ;;  %v1961_v7 = vpop.f32.mrb[81].mxu1 }
 0x273   : > { %v1479_v36 = vpop.f32.mrb[82].mxu1 }
 0x274   : > { %v1558_v24 = vadd.f32 %v1529_v38, %v1477_v41  ;;  %v1480_v50 = vadd.f32 %v2534_v0, %v1479_v36  ;;  %v1962_v43 = vpop.f32.mrb[83].mxu1 }
 0x276   : > { %1568 = vst.msk [vmem:[%s2542_s6] sm:$0xff] %vm343_vm2, %v1558_v24  ;;  %v1559_v26 = vadd.f32 %v1531_v39, %v1480_v50 }
 0x278   : > { %1569 = vst.msk [vmem:[%s2542_s6 + $0x8] sm:$0xff] %vm343_vm2, %v1559_v26 }
 0x279   : > { %v1484_v6 = vpop.f32.mrb[84].mxu1 }
 0x27a   : > { %v1485_v61 = vadd.f32 %v2534_v0, %v1484_v6  ;;  %v1965_v29 = vpop.f32.mrb[85].mxu1 }
 0x27b   : > { %v1487_v34 = vpop.f32.mrb[86].mxu1 }
 0x27c   : > { %v1560_v48 = vadd.f32 %v1533_v58, %v1485_v61  ;;  %v1488_v51 = vadd.f32 %v2534_v0, %v1487_v34  ;;  %v1966_v33 = vpop.f32.mrb[87].mxu1 }
 0x27e   : > { %1570 = vst.msk [vmem:[%s2542_s6 + $0x10] sm:$0xff] %vm343_vm2, %v1560_v48  ;;  %v1561_v35 = vadd.f32 %v1535_v28, %v1488_v51 }
 0x280   : > { %1571 = vst.msk [vmem:[%s2542_s6 + $0x18] sm:$0xff] %vm343_vm2, %v1561_v35 }
 0x281   : > { %v1492_v3 = vpop.f32.mrb[88].mxu1 }
 0x282   : > { %v1493_v12 = vadd.f32 %v2534_v0, %v1492_v3  ;;  %v1969_v10 = vpop.f32.mrb[89].mxu1 }
 0x283   : > { %v1495_v4 = vpop.f32.mrb[90].mxu1 }
 0x284   : > { %v1562_v23 = vadd.f32 %v1537_v19, %v1493_v12  ;;  %v1496_v55 = vadd.f32 %v2534_v0, %v1495_v4  ;;  %v1970_v47 = vpop.f32.mrb[91].mxu1 }
 0x286   : > { %1572 = vst.msk [vmem:[%s2542_s6 + $0x20] sm:$0xff] %vm343_vm2, %v1562_v23  ;;  %v1563_v9 = vadd.f32 %v1539_v5, %v1496_v55 }
 0x288   : > { %1573 = vst.msk [vmem:[%s2542_s6 + $0x28] sm:$0xff] %vm343_vm2, %v1563_v9 }
 0x289   : > { %v1500_v54 = vpop.f32.mrb[92].mxu1 }
 0x28a   : > { %v1501_v46 = vadd.f32 %v2534_v0, %v1500_v54  ;;  %v1973_v32 = vpop.f32.mrb[93].mxu1 }
 0x28b   : > { %v1503_v20 = vpop.f32.mrb[94].mxu1 }
 0x28c   : > { %v1564_v25 = vadd.f32 %v1541_v40, %v1501_v46  ;;  %v1504_v27 = vadd.f32 %v2534_v0, %v1503_v20  ;;  %v1974_v21 = vpop.f32.mrb[95].mxu1 }
 0x28e   : > { %1574 = vst.msk [vmem:[%s2542_s6 + $0x30] sm:$0xff] %vm343_vm2, %v1564_v25  ;;  %v1565_v22 = vadd.f32 %v1543_v63, %v1504_v27 }
 0x290   : > { %1575 = vst.msk [vmem:[%s2542_s6 + $0x38] sm:$0xff] %vm343_vm2, %v1565_v22 }
 0x291   : > { %v1508_v59 = vpop.f32.mrb[96].mxu1 }
 0x292   : > { %v1509_v37 = vadd.f32 %v2534_v0, %v1508_v59  ;;  %v1977_v45 = vpop.f32.mrb[97].mxu1 }
 0x293   : > { %v1511_v17 = vpop.f32.mrb[98].mxu1 }
 0x294   : > { %v1566_v16 = vadd.f32 %v1545_v18, %v1509_v37  ;;  %v1512_v42 = vadd.f32 %v2534_v0, %v1511_v17  ;;  %v1978_v38 = vpop.f32.mrb[99].mxu1 }
 0x296   : > { %1576 = vst.msk [vmem:[%s2542_s6 + $0x40] sm:$0xff] %vm343_vm2, %v1566_v16  ;;  %v1567_v41 = vadd.f32 %v1547_v2, %v1512_v42 }
 0x298   : > { %1577 = vst.msk [vmem:[%s2542_s6 + $0x48] sm:$0xff] %vm343_vm2, %v1567_v41 }
 0x299 PF: > { %s15_s18 = sadd.s32 1, %s2010_s18  }
 0x29a   : > { %p12_p4 = scmp.ge.s32.totalorder %s15_s18, 4  }
 0x29c   :  { %14 = sbr.rel (!%p12_p4) target bundleno = 1 (0x1), region = 70 }

// kernel: encoder_forward.17
= control target key start
LH: loop header
LB: loop body
LE: loop exit
PB: predicated region body
PF: predicated region fallthrough
CT: control target
= control target key end

     0   :  { %vm68_vm0 = vcmask 523264   ;;  %vm136_vm2 = vcmask 64512   ;;  %s235_s1 = inlined_call_operand.vmem [shape: bf16[64,8], index: 1, kind: input, shape index: {}]   ;;  %s236_s0 = inlined_call_operand.vmem [shape: bf16[32,64], index: 0, kind: input, shape index: {}]   ;;  %s237_s2 = inlined_call_operand.vmem [shape: f32[1,8], index: 2, kind: input, shape index: {}]   ;;  %s238_s3 = inlined_call_operand.vmem [shape: f32[32,8], index: 3, kind: output, shape index: {}]  }
   0x1   :  { %v172_v0 = vld [vmem:[%s235_s1] sm:$0xff]   ;;  %v173_v1 = vld [vmem:[%s235_s1 + $0x8] sm:$0xff]   ;;  %v174_v2 = vld [vmem:[%s235_s1 + $0x10] sm:$0xff]  }
   0x2   :  { %160 = vmatprep.subr.bf16.mxu0 %v172_v0  ;;  %v176_v3 = vld [vmem:[%s236_s0] sm:$0xff]   ;;  %v175_v4 = vld [vmem:[%s235_s1 + $0x18] sm:$0xff]   ;;  %v177_v5 = vld [vmem:[%s236_s0 + $0x8] sm:$0xff]  }
   0x3   :  { %161 = vmatpush3.bf16.msra.mxu0 %v172_v0  ;;  %168 = vmatprep.mubr.msk.bf16.mxu0 %vm68_vm0, %v176_v3  ;;  %v145_v6 = vld [vmem:[%s237_s2] ss:$0 sm:$0xff] }
   0x4   :  { %162 = vmatprep.subr.bf16.mxu0 %v173_v1 }
   0x7   :  { %163 = vmatpush3.bf16.msra.mxu0 %v173_v1 }
   0x8   :  { %164 = vmatprep.subr.bf16.mxu0 %v174_v2 }
   0xb   :  { %165 = vmatpush3.bf16.msra.mxu0 %v174_v2 }
   0xc   :  { %166 = vmatprep.subr.bf16.mxu0 %v175_v4 }
   0xf   :  { %167 = vmatpush3.bf16.msra.mxu0 %v175_v4 }
  0x12   :  { %169 = vmatmul.mubr.msk.bf16.vlgmr.msra.gmra.mrb[0].mxu0 %vm68_vm0, %v177_v5 }
  0xe5   :  { %v170_v7 = vpop.f32.mrb[0].mxu0 }
  0xe6   :  { %v118_v8 = vadd.f32 %v170_v7, %v145_v6  ;;  %v109_v9 = vpop.f32.mrb[1].mxu0 }
  0xe7   :  { %v110_v10 = vadd.f32 %v145_v6, %v109_v9  ;;  %v171_v11 = vpop.f32.mrb[2].mxu0 }
  0xe8   :  { %vm126_vm1 = vcmp.gt.f32.partialorder %v118_v8, 0.0  ;;  %v130_v12 = vmul.f32 0.01, %v118_v8  ;;  %v121_v13 = vadd.f32 %v171_v11, %v145_v6  ;;  %v112_v14 = vpop.f32.mrb[3].mxu0 }
  0xe9   :  { %vm124_vm3 = vcmp.gt.f32.partialorder %v110_v10, 0.0  ;;  %v128_v15 = vmul.f32 0.01, %v110_v10  ;;  %v113_v16 = vadd.f32 %v145_v6, %v112_v14 }
  0xea   :  { %v134_v17 = vsel %vm126_vm1, %v118_v8, %v130_v12  ;;  %vm127_vm4 = vcmp.gt.f32.partialorder %v121_v13, 0.0  ;;  %v131_v18 = vmul.f32 0.01, %v121_v13 }
  0xeb   :  { %139 = vst.msk [vmem:[%s238_s3 + $0x10] sm:$0xff] %vm136_vm2, %v134_v17  ;;  %v132_v19 = vsel %vm124_vm3, %v110_v10, %v128_v15  ;;  %vm125_vm5 = vcmp.gt.f32.partialorder %v113_v16, 0.0  ;;  %v129_v20 = vmul.f32 0.01, %v113_v16 }
  0xec   :  { %137 = vst.msk [vmem:[%s238_s3] sm:$0xff] %vm136_vm2, %v132_v19  ;;  %v135_v21 = vsel %vm127_vm4, %v121_v13, %v131_v18 }
  0xed   :  { %140 = vst.msk [vmem:[%s238_s3 + $0x18] sm:$0xff] %vm136_vm2, %v135_v21  ;;  %v133_v22 = vsel %vm125_vm5, %v113_v16, %v129_v20 }
  0xee   :  { %138 = vst.msk [vmem:[%s238_s3 + $0x8] sm:$0xff] %vm136_vm2, %v133_v22 }

// kernel: encoder_forward.18
= control target key start
LH: loop header
LB: loop body
LE: loop exit
PB: predicated region body
PF: predicated region fallthrough
CT: control target
= control target key end

     0   :  { %s1016_s12 = smov 0   ;;  %s1140_s0 = inlined_call_operand.vmem [shape: f32[2,44,8], index: 0, kind: input, shape index: {}]   ;;  %s1141_s1 = inlined_call_operand.vmem [shape: bf16[9,8,8], index: 1, kind: input, shape index: {}]   ;;  %s1142_s2 = inlined_call_operand.vmem [shape: f32[1,8], index: 2, kind: input, shape index: {}]   ;;  %s1143_s3 = inlined_call_operand.vmem [shape: f32[2,24,8], index: 3, kind: output, shape index: {}]  }
   0x1 LB: > { %s860_s13 = sadd.s32 4294967295, %s994_s12   ;;  %p864_p0 = scmp.ge.s32.totalorder %s994_s12, 1  ;;  %s994_s12 = sphi %s1016_s12, %s13_s12  }
   0x2   : > { %p137_p1 = scmp.lt.s32.totalorder %s994_s12, 3 }
   0x4   : > { %p138_p2 = pnand %p864_p0, %p137_p1 }
   0x5   : > { %v182_v0 = vld [vmem:[%s1141_s1 + $0x4] sm:$0xf] (!%p138_p2)  ;;  %vm213_vm0 = vcmask (!%p138_p2), 1043456   ;;  %v181_v1 = vld [vmem:[%s1141_s1] sm:$0xf] (!%p138_p2)  ;;  %p161_p3 = scmp.lt.s32.totalorder (!%p138_p2), %s860_s13, 1 }
   0x6   : > { %141 = sbr.rel (%p138_p2) target bundleno = 280 (0x118), region = 32  ;;  %969 = vmatprep.subr.msk.bf16.mxu0 (!%p138_p2), %vm213_vm0, %v182_v0  ;;  %v215_v2 = vsel (!%p138_p2), %vm213_vm0, %v182_v0, 0  ;;  %970 = vmatprep.subr.msk.bf16.mxu1 (!%p138_p2), %vm213_vm0, %v181_v1  ;;  %v270_v3 = vsel (!%p138_p2), %vm213_vm0, %v181_v1, 0  ;;  %v183_v4 = vld [vmem:[%s1141_s1 + $0x8] sm:$0xf] (!%p138_p2)  ;;  %vm206_vm1 = vcmask (!%p138_p2), 64512  }
   0x7   : > { %916 = vmatpush3.bf16.msra.mxu0 (!%p138_p2), %v215_v2  ;;  %922 = vmatpush3.bf16.msra.mxu1 (!%p138_p2), %v270_v3  ;;  %v184_v5 = vld [vmem:[%s1141_s1 + $0xc] sm:$0xf] (!%p138_p2)  ;;  %vm386_vm2 = vcmask (!%p138_p2), 1044480   ;;  %v186_v16 = vld [vmem:[%s1141_s1 + $0x14] sm:$0xf] (!%p138_p2)  ;;  %vm322_vm4 = vcmask (!%p138_p2), 1046528  }
   0x8   : > { %971 = vmatprep.subr.msk.bf16.mxu0 (!%p138_p2), %vm213_vm0, %v183_v4  ;;  %972 = vmatprep.subr.msk.bf16.mxu1 (!%p138_p2), %vm213_vm0, %v184_v5  ;;  %v397_v12 = vsel (!%p138_p2), %vm213_vm0, %v184_v5, 0  ;;  %vm190_vm3 = vsmask.f32 (!%p138_p2), 7424  ;;  %v333_v31 = vsel (!%p138_p2), %vm213_vm0, %v183_v4, 0  ;;  %v185_v38 = vld [vmem:[%s1141_s1 + $0x10] sm:$0xf] (!%p138_p2) }
   0x9   : > { %v529_v39 = vsel (!%p138_p2), %vm213_vm0, %v186_v16, 0  ;;  %v188_v46 = vld [vmem:[%s1141_s1 + $0x1c] sm:$0xf] (!%p138_p2)  ;;  %vm450_vm5 = vsmask.f32 (!%p138_p2), 4352  ;;  %v465_v53 = vsel (!%p138_p2), %vm213_vm0, %v185_v38, 0 }
   0xa   : > { %vm649_vm6 = vsmask.f32 (!%p138_p2), 1280  ;;  %v187_v55 = vld [vmem:[%s1141_s1 + $0x18] sm:$0xf] (!%p138_p2)  ;;  %v673_v58 = vsel (!%p138_p2), %vm213_vm0, %v188_v46, 0  ;;  %vm583_vm7 = vcmask (!%p138_p2), 1041408  }
   0xb   : > { %v596_v63 = vsel (!%p138_p2), %vm213_vm0, %v187_v55, 0  ;;  %v189_v1 = vld [vmem:[%s1141_s1 + $0x20] sm:$0xf] (!%p138_p2)  ;;  %vm726_vm8 = vcmask (!%p138_p2), 1040384  }
   0xd   : > { %s1145_s13 = smov (!%p161_p3, %s860_s13), 1 }
   0xe   : > { %s978_s22 = smul.u32 48, %s1145_s13 }
   0xf   : > { %s979_s9 = smul.u32 24, %s1145_s13 }
  0x10   : > { %s1048_s25 = scalar_lea.vmem %s1140_s0, %s978_s22 }
  0x11   : > { %v172_v6 = vld [vmem:[%s1048_s25] sm:$0xff]  ;;  %v173_v7 = vld [vmem:[%s1048_s25 + $0x8] sm:$0xff]  ;;  %v174_v8 = vld [vmem:[%s1048_s25 + $0x10] sm:$0xff]  ;;  %s170_s16 = scalar_lea.vmem %s1143_s3, %s979_s9 }
  0x12   : > { %v175_v9 = vld [vmem:[%s1048_s25 + $0x18] sm:$0xff]  ;;  %v1054_v10 = vpack.c.bf16 %v173_v7, %v172_v6  ;;  %v176_v28 = vld [vmem:[%s1048_s25 + $0x20] sm:$0xff]  ;;  %v177_v29 = vld [vmem:[%s1048_s25 + $0x28] sm:$0xf]  ;;  %v739_v7 = vsel %vm213_vm0, %v189_v1, 0 }
  0x13   : > { %v1056_v11 = vpack.c.bf16 %v175_v9, %v174_v8  ;;  %v180_v41 = vpack.c.bf16 %v177_v29, %v176_v28 }
  0x14   : > { %v192_v13 = vshrl.u32 %v1054_v10, 16  ;;  %v194_v14 = vshll.u32 %v1054_v10, 16  ;;  %923 = vmatprep.mubr.msk.bf16.mxu1 %vm206_vm1, %v1054_v10  ;;  %v387_v15 = vrot.slane %v1054_v10, 3  ;;  %v323_v21 = vrot.slane %v1054_v10, 1 }
  0x15   : > { %v199_v17 = vshll.u32 %v1056_v11, 16  ;;  %v203_v18 = vshrl.u32 %v1056_v11, 16  ;;  %924 = vmatmul.mubr.msk.bf16.vlgmr.msra.gmra.mrb[0].mxu1 %vm206_vm1, %v1056_v11  ;;  %v388_v19 = vrot.slane %v1056_v11, 3  ;;  %v324_v22 = vrot.slane %v1056_v11, 1 }
  0x16   : > { %v196_v20 = vrot.slane %v194_v14, 1  ;;  %934 = vmatpush3.bf16.msra.mxu1 %v397_v12  ;;  %v519_v25 = vrot.slane %v1054_v10, 4  ;;  %v520_v27 = vrot.slane %v1056_v11, 4  ;;  %v451_v32 = vrot.slane %v192_v13, 3 }
  0x17   : > { %v201_v23 = vrot.slane %v199_v17, 1  ;;  %v389_v24 = vsel %vm386_vm2, %v387_v15, %v388_v19  ;;  %974 = vmatprep.subr.msk.bf16.mxu1 %vm213_vm0, %v186_v16  ;;  %v452_v33 = vrot.slane %v194_v14, 4  ;;  %v325_v35 = vsel %vm322_vm4, %v323_v21, %v324_v22 }
  0x18   : > { %v197_v26 = vor.u32 %v196_v20, %v192_v13  ;;  %935 = vmatprep.mubr.msk.bf16.mxu1 %vm206_vm1, %v389_v24  ;;  %v454_v36 = vrot.slane %v203_v18, 3  ;;  %v455_v37 = vrot.slane %v199_v17, 4  ;;  %v521_v40 = vsel %vm213_vm0, %v519_v25, %v520_v27 }
  0x19   : > { %v205_v30 = vor.u32 %v203_v18, %v201_v23  ;;  %v650_v42 = vrot.slane %v192_v13, 6  ;;  %v651_v43 = vrot.slane %v194_v14, 7  ;;  %v653_v44 = vrot.slane %v203_v18, 6 }
  0x1a   : > { %v202_v34 = vsel %vm190_vm3, %v197_v26, %v201_v23  ;;  %v654_v45 = vrot.slane %v199_v17, 7  ;;  %v453_v47 = vor.u32 %v452_v33, %v451_v32  ;;  %v456_v48 = vor.u32 %v455_v37, %v454_v36 }
  0x1b   : > { %917 = vmatprep.mubr.msk.bf16.mxu0 %vm206_vm1, %v202_v34  ;;  %v658_v49 = vshrl.u32 %v180_v41, 16  ;;  %v661_v50 = vshll.u32 %v180_v41, 16  ;;  %v652_v51 = vor.u32 %v651_v43, %v650_v42  ;;  %v584_v60 = vrot.slane %v1054_v10, 6 }
  0x1c   : > { %918 = vmatmul.mubr.msk.bf16.vlgmr.msra.gmra.mrb[0].mxu0 %vm206_vm1, %v205_v30  ;;  %v655_v52 = vor.u32 %v654_v45, %v653_v44  ;;  %v457_v54 = vsel %vm450_vm5, %v453_v47, %v456_v48  ;;  %v585_v61 = vrot.slane %v1056_v11, 6  ;;  %v587_v3 = vrot.slane %v180_v41, 6 }
  0x1d   : > { %928 = vmatpush3.bf16.msra.mxu0 %v333_v31  ;;  %929 = vmatprep.mubr.msk.bf16.mxu0 %vm206_vm1, %v325_v35  ;;  %v660_v56 = vrot.slane %v658_v49, 6  ;;  %v663_v57 = vrot.slane %v661_v50, 7  ;;  %v727_v4 = vrot.slane %v1054_v10, 7  ;;  %v728_v5 = vrot.slane %v1056_v11, 7 }
  0x1e   : > { %973 = vmatprep.subr.msk.bf16.mxu0 %vm213_vm0, %v185_v38  ;;  %936 = vmatmul.mubr.msk.bf16.vlgmr.msra.gmra.mrb[4].mxu1 %vm206_vm1, %v388_v19  ;;  %v656_v59 = vsel %vm649_vm6, %v652_v51, %v655_v52  ;;  %v586_v0 = vsel %vm583_vm7, %v584_v60, %v585_v61  ;;  %v588_v6 = vsel %vm583_vm7, %v585_v61, %v587_v3  ;;  %v730_v9 = vrot.slane %v180_v41, 7 }
  0x1f   : > { %946 = vmatpush3.bf16.msra.mxu1 %v529_v39  ;;  %947 = vmatprep.mubr.msk.bf16.mxu1 %vm206_vm1, %v521_v40  ;;  %v664_v62 = vor.u32 %v663_v57, %v660_v56  ;;  %v729_v8 = vsel %vm726_vm8, %v727_v4, %v728_v5 }
  0x20   : > { %976 = vmatprep.subr.msk.bf16.mxu1 %vm213_vm0, %v188_v46  ;;  %v731_v12 = vsel %vm726_vm8, %v728_v5, %v730_v9 }
  0x21   : > { %v665_v2 = vsel %vm649_vm6, %v655_v52, %v664_v62 }
  0x24   : > { %930 = vmatmul.mubr.msk.bf16.vlgmr.msra.gmra.mrb[4].mxu0 %vm206_vm1, %v324_v22 }
  0x25   : > { %940 = vmatpush3.bf16.msra.mxu0 %v465_v53  ;;  %941 = vmatprep.mubr.msk.bf16.mxu0 %vm206_vm1, %v457_v54 }
  0x26   : > { %975 = vmatprep.subr.msk.bf16.mxu0 %vm213_vm0, %v187_v55  ;;  %948 = vmatmul.mubr.msk.bf16.vlgmr.msra.gmra.mrb[8].mxu1 %vm206_vm1, %v520_v27 }
  0x27   : > { %958 = vmatpush3.bf16.msra.mxu1 %v673_v58  ;;  %959 = vmatprep.mubr.msk.bf16.mxu1 %vm206_vm1, %v656_v59 }
  0x2c   : > { %942 = vmatmul.mubr.msk.bf16.vlgmr.msra.gmra.mrb[8].mxu0 %vm206_vm1, %v456_v48 }
  0x2d   : > { %952 = vmatpush3.bf16.msra.mxu0 %v596_v63  ;;  %953 = vmatprep.mubr.msk.bf16.mxu0 %vm206_vm1, %v586_v0 }
  0x2e   : > { %977 = vmatprep.subr.msk.bf16.mxu0 %vm213_vm0, %v189_v1  ;;  %960 = vmatmul.mubr.msk.bf16.vlgmr.msra.gmra.mrb[12].mxu1 %vm206_vm1, %v665_v2  ;;  %v885_v1 = vld [vmem:[%s1142_s2] ss:$0 sm:$0xff] }
  0x34   : > { %954 = vmatmul.mubr.msk.bf16.vlgmr.msra.gmra.mrb[12].mxu0 %vm206_vm1, %v588_v6 }
  0x35   : > { %964 = vmatpush3.bf16.msra.mxu0 %v739_v7  ;;  %965 = vmatprep.mubr.msk.bf16.mxu0 %vm206_vm1, %v729_v8 }
  0x3c   : > { %966 = vmatmul.mubr.msk.bf16.vlgmr.msra.gmra.mrb[16].mxu0 %vm206_vm1, %v731_v12 }
  0xe8   : > { %v925_v13 = vpop.f32.mrb[0].mxu1 }
  0xe9   : > { %v306_v14 = vpop.f32.mrb[1].mxu1 }
  0xea   : > { %v926_v10 = vpop.f32.mrb[2].mxu1 }
  0xeb   : > { %v309_v15 = vpop.f32.mrb[3].mxu1 }
  0xef   : > { %v919_v11 = vpop.f32.mrb[0].mxu0 }
  0xf0   : > { %v315_v16 = vadd.f32 %v925_v13, %v919_v11  ;;  %v251_v17 = vpop.f32.mrb[1].mxu0 }
  0xf1   : > { %v307_v18 = vadd.f32 %v306_v14, %v251_v17  ;;  %v920_v19 = vpop.f32.mrb[2].mxu0  ;;  %v937_v20 = vpop.f32.mrb[4].mxu1 }
  0xf2   : > { %v254_v21 = vpop.f32.mrb[3].mxu0  ;;  %v433_v22 = vpop.f32.mrb[5].mxu1 }
  0xf3   : > { %v310_v23 = vadd.f32 %v309_v15, %v254_v21  ;;  %v938_v24 = vpop.f32.mrb[6].mxu1 }
  0xf4   : > { %v436_v25 = vpop.f32.mrb[7].mxu1 }
  0xf7   : > { %v931_v26 = vpop.f32.mrb[4].mxu0 }
  0xf8   : > { %v385_v27 = vadd.f32 %v931_v26, %v315_v16  ;;  %v369_v28 = vpop.f32.mrb[5].mxu0 }
  0xf9   : > { %v383_v29 = vadd.f32 %v369_v28, %v307_v18  ;;  %v932_v30 = vpop.f32.mrb[6].mxu0  ;;  %v949_v31 = vpop.f32.mrb[8].mxu1 }
  0xfa   : > { %v449_v32 = vadd.f32 %v937_v20, %v385_v27  ;;  %v372_v33 = vpop.f32.mrb[7].mxu0  ;;  %v565_v34 = vpop.f32.mrb[9].mxu1 }
  0xfb   : > { %v384_v35 = vadd.f32 %v372_v33, %v310_v23  ;;  %v447_v36 = vadd.f32 %v433_v22, %v383_v29  ;;  %v950_v37 = vpop.f32.mrb[10].mxu1 }
  0xfc   : > { %v568_v38 = vpop.f32.mrb[11].mxu1 }
  0xfd   : > { %v448_v39 = vadd.f32 %v436_v25, %v384_v35 }
  0xff   : > { %v943_v40 = vpop.f32.mrb[8].mxu0 }
 0x100   : > { %v517_v41 = vadd.f32 %v943_v40, %v449_v32  ;;  %v501_v42 = vpop.f32.mrb[9].mxu0 }
 0x101   : > { %v515_v43 = vadd.f32 %v501_v42, %v447_v36  ;;  %v944_v44 = vpop.f32.mrb[10].mxu0  ;;  %v961_v45 = vpop.f32.mrb[12].mxu1 }
 0x102   : > { %v581_v46 = vadd.f32 %v949_v31, %v517_v41  ;;  %v504_v47 = vpop.f32.mrb[11].mxu0  ;;  %v709_v48 = vpop.f32.mrb[13].mxu1 }
 0x103   : > { %v516_v49 = vadd.f32 %v504_v47, %v448_v39  ;;  %v579_v50 = vadd.f32 %v565_v34, %v515_v43  ;;  %v962_v51 = vpop.f32.mrb[14].mxu1 }
 0x104   : > { %v712_v52 = vpop.f32.mrb[15].mxu1 }
 0x105   : > { %v580_v53 = vadd.f32 %v568_v38, %v516_v49 }
 0x107   : > { %v955_v54 = vpop.f32.mrb[12].mxu0 }
 0x108   : > { %v648_v55 = vadd.f32 %v955_v54, %v581_v46  ;;  %v632_v56 = vpop.f32.mrb[13].mxu0 }
 0x109   : > { %v646_v57 = vadd.f32 %v632_v56, %v579_v50  ;;  %v956_v58 = vpop.f32.mrb[14].mxu0 }
 0x10a   : > { %v725_v59 = vadd.f32 %v961_v45, %v648_v55  ;;  %v635_v60 = vpop.f32.mrb[15].mxu0 }
 0x10b   : > { %v647_v61 = vadd.f32 %v635_v60, %v580_v53  ;;  %v723_v62 = vadd.f32 %v709_v48, %v646_v57 }
 0x10d   : > { %v724_v63 = vadd.f32 %v712_v52, %v647_v61 }
 0x10f   : > { %v967_v0 = vpop.f32.mrb[16].mxu0 }
 0x110   : > { %v791_v2 = vadd.f32 %v967_v0, %v725_v59  ;;  %v775_v3 = vpop.f32.mrb[17].mxu0 }
 0x111   : > { %v789_v4 = vadd.f32 %v775_v3, %v723_v62  ;;  %v968_v5 = vpop.f32.mrb[18].mxu0 }
 0x112   : > { %v801_v6 = vadd.f32 %v885_v1, %v791_v2  ;;  %v778_v7 = vpop.f32.mrb[19].mxu0 }
 0x113   : > { %v799_v8 = vadd.f32 %v885_v1, %v789_v4  ;;  %v790_v9 = vadd.f32 %v778_v7, %v724_v63 }
 0x114   : > { %804 = vst.msk [vmem:[%s170_s16 + $0x10] sm:$0xff] %vm206_vm1, %v801_v6 }
 0x115   : > { %802 = vst.msk [vmem:[%s170_s16] sm:$0xff] %vm206_vm1, %v799_v8  ;;  %v800_v12 = vadd.f32 %v885_v1, %v790_v9 }
 0x117   : > { %803 = vst.msk [vmem:[%s170_s16 + $0x8] sm:$0xff] %vm206_vm1, %v800_v12 }
 0x118 PF: > { %s13_s12 = sadd.s32 1, %s994_s12  }
 0x119   : > { %p10_p4 = scmp.ge.s32.totalorder %s13_s12, 4  }
 0x11b   :  { %12 = sbr.rel (!%p10_p4) target bundleno = 1 (0x1), region = 62 }

// kernel: encoder_forward.19
= control target key start
LH: loop header
LB: loop body
LE: loop exit
PB: predicated region body
PF: predicated region fallthrough
CT: control target
= control target key end

     0   :  { %s1224_s18 = smov 0   ;;  %s1380_s0 = inlined_call_operand.vmem [shape: f32[2,44,8], index: 0, kind: input, shape index: {}]   ;;  %s1381_s1 = inlined_call_operand.vmem [shape: bf16[9,8,32], index: 1, kind: input, shape index: {}]   ;;  %s1382_s2 = inlined_call_operand.vmem [shape: f32[1,32], index: 2, kind: input, shape index: {}]   ;;  %s1383_s3 = inlined_call_operand.vmem [shape: bf16[32,8], index: 3, kind: input, shape index: {}]   ;;  %s1384_s4 = inlined_call_operand.vmem [shape: f32[1,8], index: 4, kind: input, shape index: {}]   ;;  %s1385_s5 = inlined_call_operand.vmem [shape: f32[2,24,8], index: 5, kind: output, shape index: {}]  }
   0x1 LB: > { %s1039_s19 = sadd.s32 4294967295, %s1192_s18   ;;  %p1043_p0 = scmp.ge.s32.totalorder %s1192_s18, 1  ;;  %s1192_s18 = sphi %s1224_s18, %s15_s18  }
   0x2   : > { %p187_p1 = scmp.lt.s32.totalorder %s1192_s18, 3 }
   0x4   : > { %p188_p2 = pnand %p1043_p0, %p187_p1 }
   0x5   : > { %v254_v0 = vld [vmem:[%s1381_s1 + $0x4] sm:$0xf] (!%p188_p2)  ;;  %vm285_vm0 = vcmask (!%p188_p2), 1043456   ;;  %v253_v1 = vld [vmem:[%s1381_s1] sm:$0xf] (!%p188_p2)  ;;  %p215_p3 = scmp.lt.s32.totalorder (!%p188_p2), %s1039_s19, 1 }
   0x6   : > { %191 = sbr.rel (%p188_p2) target bundleno = 509 (0x1fd), region = 40  ;;  %1165 = vmatprep.subr.msk.bf16.mxu0 (!%p188_p2), %vm285_vm0, %v254_v0  ;;  %v287_v2 = vsel (!%p188_p2), %vm285_vm0, %v254_v0, 0  ;;  %1166 = vmatprep.subr.msk.bf16.mxu1 (!%p188_p2), %vm285_vm0, %v253_v1  ;;  %v342_v3 = vsel (!%p188_p2), %vm285_vm0, %v253_v1, 0  ;;  %v255_v4 = vld [vmem:[%s1381_s1 + $0x8] sm:$0xf] (!%p188_p2)  ;;  %vm278_vm6 = vcmask (!%p188_p2), 64512  }
   0x7   : > { %1104 = vmatpush3.bf16.msra.mxu0 (!%p188_p2), %v287_v2  ;;  %1110 = vmatpush3.bf16.msra.mxu1 (!%p188_p2), %v342_v3  ;;  %v256_v5 = vld [vmem:[%s1381_s1 + $0xc] sm:$0xf] (!%p188_p2)  ;;  %vm262_vm5 = vsmask.f32 (!%p188_p2), 7424  ;;  %vm458_vm7 = vcmask (!%p188_p2), 1044480   ;;  %vm394_vm10 = vcmask (!%p188_p2), 1046528  }
   0x8   : > { %1167 = vmatprep.subr.msk.bf16.mxu0 (!%p188_p2), %vm285_vm0, %v255_v4  ;;  %1168 = vmatprep.subr.msk.bf16.mxu1 (!%p188_p2), %vm285_vm0, %v256_v5  ;;  %v469_v18 = vsel (!%p188_p2), %vm285_vm0, %v256_v5, 0  ;;  %v258_v23 = vld [vmem:[%s1381_s1 + $0x14] sm:$0xf] (!%p188_p2)  ;;  %v405_v39 = vsel (!%p188_p2), %vm285_vm0, %v255_v4, 0  ;;  %v257_v50 = vld [vmem:[%s1381_s1 + $0x10] sm:$0xf] (!%p188_p2) }
   0x9   : > { %v601_v51 = vsel (!%p188_p2), %vm285_vm0, %v258_v23, 0  ;;  %v260_v58 = vld [vmem:[%s1381_s1 + $0x1c] sm:$0xf] (!%p188_p2)  ;;  %vm522_vm11 = vsmask.f32 (!%p188_p2), 4352  ;;  %v537_v1 = vsel (!%p188_p2), %vm285_vm0, %v257_v50, 0 }
   0xa   : > { %vm721_vm12 = vsmask.f32 (!%p188_p2), 1280  ;;  %v259_v3 = vld [vmem:[%s1381_s1 + $0x18] sm:$0xf] (!%p188_p2)  ;;  %vm655_vm13 = vcmask (!%p188_p2), 1041408   ;;  %vm798_vm14 = vcmask (!%p188_p2), 1040384  }
   0xd   : > { %s1387_s19 = smov (!%p215_p3, %s1039_s19), 1 }
   0xe   : > { %s1174_s28 = smul.u32 48, %s1387_s19 }
   0xf   : > { %s1175_s25 = smul.u32 24, %s1387_s19 }
  0x10   : > { %s219_s6 = scalar_lea.vmem %s1380_s0, %s1174_s28 }
  0x11   : > { %v1256_v6 = vld [vmem:[%s219_s6] sm:$0xff]  ;;  %v1258_v7 = vld [vmem:[%s219_s6 + $0x8] sm:$0xff]  ;;  %v1260_v8 = vld [vmem:[%s219_s6 + $0x10] sm:$0xff]  ;;  %s224_s30 = scalar_lea.vmem %s1385_s5, %s1175_s25 }
  0x12   : > { %v1262_v9 = vld [vmem:[%s219_s6 + $0x18] sm:$0xff]  ;;  %vm232_vm1 = vcmp.gt.f32.partialorder %v1256_v6, 0.0  ;;  %vm233_vm2 = vcmp.gt.f32.partialorder %v1258_v7, 0.0  ;;  %vm234_vm3 = vcmp.gt.f32.partialorder %v1260_v8, 0.0  ;;  %v238_v10 = vmul.f32 0.01, %v1256_v6 }
  0x13   : > { %vm235_vm4 = vcmp.gt.f32.partialorder %v1262_v9, 0.0  ;;  %v239_v11 = vmul.f32 0.01, %v1258_v7  ;;  %v240_v12 = vmul.f32 0.01, %v1260_v8  ;;  %v230_v15 = vld [vmem:[%s219_s6 + $0x20] sm:$0xff] }
  0x14   : > { %v241_v13 = vmul.f32 0.01, %v1262_v9  ;;  %v244_v14 = vsel %vm232_vm1, %v1256_v6, %v238_v10  ;;  %v231_v21 = vld [vmem:[%s219_s6 + $0x28] sm:$0xf]  ;;  %vm236_vm8 = vcmp.gt.f32.partialorder %v230_v15, 0.0  ;;  %v745_v10 = vsel %vm285_vm0, %v260_v58, 0 }
  0x15   : > { %v245_v16 = vsel %vm233_vm2, %v1258_v7, %v239_v11  ;;  %v246_v17 = vsel %vm234_vm3, %v1260_v8, %v240_v12  ;;  %v242_v27 = vmul.f32 0.01, %v230_v15  ;;  %v243_v31 = vmul.f32 0.01, %v231_v21 }
  0x16   : > { %v247_v19 = vsel %vm235_vm4, %v1262_v9, %v241_v13  ;;  %v1277_v20 = vpack.c.bf16 %v245_v16, %v244_v14  ;;  %vm237_vm9 = vcmp.gt.f32.partialorder %v231_v21, 0.0  ;;  %vm908_vm2 = vcmask 261120  }
  0x17   : > { %v1279_v22 = vpack.c.bf16 %v247_v19, %v246_v17  ;;  %v248_v41 = vsel %vm236_vm8, %v230_v15, %v242_v27  ;;  %v249_v45 = vsel %vm237_vm9, %v231_v21, %v243_v31  ;;  %v668_v15 = vsel %vm285_vm0, %v259_v3, 0  ;;  %v261_v17 = vld [vmem:[%s1381_s1 + $0x20] sm:$0xf] }
  0x18   : > { %v264_v24 = vshrl.u32 %v1277_v20, 16  ;;  %v266_v25 = vshll.u32 %v1277_v20, 16  ;;  %1111 = vmatprep.mubr.msk.bf16.mxu1 %vm278_vm6, %v1277_v20  ;;  %v459_v26 = vrot.slane %v1277_v20, 3  ;;  %v395_v33 = vrot.slane %v1277_v20, 1 }
  0x19   : > { %v271_v28 = vshll.u32 %v1279_v22, 16  ;;  %v275_v29 = vshrl.u32 %v1279_v22, 16  ;;  %1112 = vmatmul.mubr.msk.bf16.vlgmr.msra.gmra.mrb[0].mxu1 %vm278_vm6, %v1279_v22  ;;  %v460_v30 = vrot.slane %v1279_v22, 3  ;;  %v396_v34 = vrot.slane %v1279_v22, 1 }
  0x1a   : > { %v268_v32 = vrot.slane %v266_v25, 1  ;;  %1122 = vmatpush3.bf16.msra.mxu1 %v469_v18  ;;  %v591_v37 = vrot.slane %v1277_v20, 4  ;;  %v592_v40 = vrot.slane %v1279_v22, 4  ;;  %v523_v43 = vrot.slane %v264_v24, 3 }
  0x1b   : > { %v273_v35 = vrot.slane %v271_v28, 1  ;;  %v461_v36 = vsel %vm458_vm7, %v459_v26, %v460_v30  ;;  %1170 = vmatprep.subr.msk.bf16.mxu1 %vm285_vm0, %v258_v23  ;;  %v524_v44 = vrot.slane %v266_v25, 4  ;;  %v397_v47 = vsel %vm394_vm10, %v395_v33, %v396_v34 }
  0x1c   : > { %v269_v38 = vor.u32 %v268_v32, %v264_v24  ;;  %1123 = vmatprep.mubr.msk.bf16.mxu1 %vm278_vm6, %v461_v36  ;;  %v526_v48 = vrot.slane %v275_v29, 3  ;;  %v527_v49 = vrot.slane %v271_v28, 4  ;;  %v593_v52 = vsel %vm285_vm0, %v591_v37, %v592_v40 }
  0x1d   : > { %v277_v42 = vor.u32 %v275_v29, %v273_v35  ;;  %v252_v53 = vpack.c.bf16 %v249_v45, %v248_v41  ;;  %v722_v54 = vrot.slane %v264_v24, 6  ;;  %v723_v55 = vrot.slane %v266_v25, 7 }
  0x1e   : > { %v274_v46 = vsel %vm262_vm5, %v269_v38, %v273_v35  ;;  %v725_v56 = vrot.slane %v275_v29, 6  ;;  %v726_v57 = vrot.slane %v271_v28, 7  ;;  %v525_v59 = vor.u32 %v524_v44, %v523_v43 }
  0x1f   : > { %1105 = vmatprep.mubr.msk.bf16.mxu0 %vm278_vm6, %v274_v46  ;;  %v528_v60 = vor.u32 %v527_v49, %v526_v48  ;;  %v730_v61 = vshrl.u32 %v252_v53, 16  ;;  %v733_v62 = vshll.u32 %v252_v53, 16  ;;  %v724_v63 = vor.u32 %v723_v55, %v722_v54 }
  0x20   : > { %1106 = vmatmul.mubr.msk.bf16.vlgmr.msra.gmra.mrb[0].mxu0 %vm278_vm6, %v277_v42  ;;  %v727_v0 = vor.u32 %v726_v57, %v725_v56  ;;  %v656_v12 = vrot.slane %v1277_v20, 6  ;;  %v657_v13 = vrot.slane %v1279_v22, 6  ;;  %v659_v19 = vrot.slane %v252_v53, 6 }
  0x21   : > { %1116 = vmatpush3.bf16.msra.mxu0 %v405_v39  ;;  %1117 = vmatprep.mubr.msk.bf16.mxu0 %vm278_vm6, %v397_v47  ;;  %v529_v2 = vsel %vm522_vm11, %v525_v59, %v528_v60  ;;  %v732_v4 = vrot.slane %v730_v61, 6  ;;  %v735_v5 = vrot.slane %v733_v62, 7  ;;  %v799_v21 = vrot.slane %v1277_v20, 7  ;;  %v1184_v20 = vld [vmem:[%s1383_s3] sm:$0xff]  }
  0x22   : > { %1169 = vmatprep.subr.msk.bf16.mxu0 %vm285_vm0, %v257_v50  ;;  %1124 = vmatmul.mubr.msk.bf16.vlgmr.msra.gmra.mrb[4].mxu1 %vm278_vm6, %v460_v30  ;;  %v728_v11 = vsel %vm721_vm12, %v724_v63, %v727_v0  ;;  %v658_v16 = vsel %vm655_vm13, %v656_v12, %v657_v13  ;;  %v800_v23 = vrot.slane %v1279_v22, 7  ;;  %v660_v24 = vsel %vm655_vm13, %v657_v13, %v659_v19  ;;  %v1185_v22 = vld [vmem:[%s1383_s3 + $0x8] sm:$0xff]  }
  0x23   : > { %1134 = vmatpush3.bf16.msra.mxu1 %v601_v51  ;;  %1135 = vmatprep.mubr.msk.bf16.mxu1 %vm278_vm6, %v593_v52  ;;  %v736_v14 = vor.u32 %v735_v5, %v732_v4  ;;  %v811_v25 = vsel %vm285_vm0, %v261_v17, 0  ;;  %v802_v27 = vrot.slane %v252_v53, 7 }
  0x24   : > { %1172 = vmatprep.subr.msk.bf16.mxu1 %vm285_vm0, %v260_v58  ;;  %v801_v26 = vsel %vm798_vm14, %v799_v21, %v800_v23 }
  0x25   : > { %v737_v18 = vsel %vm721_vm12, %v727_v0, %v736_v14  ;;  %v803_v28 = vsel %vm798_vm14, %v800_v23, %v802_v27 }
  0x28   : > { %1118 = vmatmul.mubr.msk.bf16.vlgmr.msra.gmra.mrb[4].mxu0 %vm278_vm6, %v396_v34 }
  0x29   : > { %1128 = vmatpush3.bf16.msra.mxu0 %v537_v1  ;;  %1129 = vmatprep.mubr.msk.bf16.mxu0 %vm278_vm6, %v529_v2 }
  0x2a   : > { %1171 = vmatprep.subr.msk.bf16.mxu0 %vm285_vm0, %v259_v3  ;;  %1136 = vmatmul.mubr.msk.bf16.vlgmr.msra.gmra.mrb[8].mxu1 %vm278_vm6, %v592_v40 }
  0x2b   : > { %1146 = vmatpush3.bf16.msra.mxu1 %v745_v10  ;;  %1147 = vmatprep.mubr.msk.bf16.mxu1 %vm278_vm6, %v728_v11 }
  0x2c   : > { %1157 = vmatprep.subr.bf16.mxu1 %v1184_v20 }
  0x30   : > { %1130 = vmatmul.mubr.msk.bf16.vlgmr.msra.gmra.mrb[8].mxu0 %vm278_vm6, %v528_v60 }
  0x31   : > { %1140 = vmatpush3.bf16.msra.mxu0 %v668_v15  ;;  %1141 = vmatprep.mubr.msk.bf16.mxu0 %vm278_vm6, %v658_v16 }
  0x32   : > { %1173 = vmatprep.subr.msk.bf16.mxu0 %vm285_vm0, %v261_v17  ;;  %1148 = vmatmul.mubr.msk.bf16.vlgmr.msra.gmra.mrb[12].mxu1 %vm278_vm6, %v737_v18 }
  0x33   : > { %1158 = vmatpush3.bf16.msra.mxu1 %v1184_v20 }
  0x34   : > { %1159 = vmatprep.subr.bf16.mxu1 %v1185_v22 }
  0x37   : > { %1160 = vmatpush3.bf16.msra.mxu1 %v1185_v22 }
  0x38   : > { %1142 = vmatmul.mubr.msk.bf16.vlgmr.msra.gmra.mrb[12].mxu0 %vm278_vm6, %v660_v24 }
  0x39   : > { %1152 = vmatpush3.bf16.msra.mxu0 %v811_v25  ;;  %1153 = vmatprep.mubr.msk.bf16.mxu0 %vm278_vm6, %v801_v26  ;;  %v1064_v25 = vld [vmem:[%s1382_s2] ss:$0 sm:$0xff] }
  0x40   : > { %1154 = vmatmul.mubr.msk.bf16.vlgmr.msra.gmra.mrb[16].mxu0 %vm278_vm6, %v803_v28 }
  0xec   : > { %v1113_v29 = vpop.f32.mrb[0].mxu1 }
  0xed   : > { %v378_v30 = vpop.f32.mrb[1].mxu1 }
  0xee   : > { %v1114_v31 = vpop.f32.mrb[2].mxu1 }
  0xef   : > { %v381_v32 = vpop.f32.mrb[3].mxu1 }
  0xf3   : > { %v1107_v33 = vpop.f32.mrb[0].mxu0 }
  0xf4   : > { %v387_v34 = vadd.f32 %v1113_v29, %v1107_v33  ;;  %v323_v35 = vpop.f32.mrb[1].mxu0 }
  0xf5   : > { %v379_v36 = vadd.f32 %v378_v30, %v323_v35  ;;  %v1108_v37 = vpop.f32.mrb[2].mxu0  ;;  %v1125_v38 = vpop.f32.mrb[4].mxu1 }
  0xf6   : > { %v326_v39 = vpop.f32.mrb[3].mxu0  ;;  %v505_v40 = vpop.f32.mrb[5].mxu1 }
  0xf7   : > { %v382_v41 = vadd.f32 %v381_v32, %v326_v39  ;;  %v1126_v42 = vpop.f32.mrb[6].mxu1 }
  0xf8   : > { %v508_v43 = vpop.f32.mrb[7].mxu1  ;;  %v973_v42 = vrot.slane %v1262_v9, 7 }
  0xfb   : > { %v1119_v44 = vpop.f32.mrb[4].mxu0 }
  0xfc   : > { %v457_v45 = vadd.f32 %v1119_v44, %v387_v34  ;;  %v441_v46 = vpop.f32.mrb[5].mxu0  ;;  %v969_v44 = vrot.slane %v1258_v7, 7 }
  0xfd   : > { %v455_v47 = vadd.f32 %v441_v46, %v379_v36  ;;  %v1120_v48 = vpop.f32.mrb[6].mxu0  ;;  %v1137_v49 = vpop.f32.mrb[8].mxu1 }
  0xfe   : > { %v521_v50 = vadd.f32 %v1125_v38, %v457_v45  ;;  %v444_v51 = vpop.f32.mrb[7].mxu0  ;;  %v637_v52 = vpop.f32.mrb[9].mxu1  ;;  %v1065_v45 = vld [vmem:[%s1384_s4] ss:$0 sm:$0xff] }
  0xff   : > { %v456_v53 = vadd.f32 %v444_v51, %v382_v41  ;;  %v519_v54 = vadd.f32 %v505_v40, %v455_v47  ;;  %v1138_v55 = vpop.f32.mrb[10].mxu1  ;;  %v971_v41 = vrot.slane %v1260_v8, 7 }
 0x100   : > { %v640_v56 = vpop.f32.mrb[11].mxu1 }
 0x101   : > { %v520_v57 = vadd.f32 %v508_v43, %v456_v53  ;;  %v968_v43 = vrot.slane %v1256_v6, 7  ;;  %v974_v47 = vsel %vm798_vm14, %v971_v41, %v973_v42  ;;  %v972_v51 = vsel %vm798_vm14, %v969_v44, %v971_v41 }
 0x103   : > { %v1131_v58 = vpop.f32.mrb[8].mxu0 }
 0x104   : > { %v589_v59 = vadd.f32 %v1131_v58, %v521_v50  ;;  %v573_v60 = vpop.f32.mrb[9].mxu0  ;;  %v970_v50 = vsel %vm798_vm14, %v968_v43, %v969_v44 }
 0x105   : > { %v587_v61 = vadd.f32 %v573_v60, %v519_v54  ;;  %v1132_v62 = vpop.f32.mrb[10].mxu0  ;;  %v1149_v63 = vpop.f32.mrb[12].mxu1 }
 0x106   : > { %v653_v0 = vadd.f32 %v1137_v49, %v589_v59  ;;  %v576_v1 = vpop.f32.mrb[11].mxu0  ;;  %v781_v2 = vpop.f32.mrb[13].mxu1 }
 0x107   : > { %v588_v3 = vadd.f32 %v576_v1, %v520_v57  ;;  %v651_v4 = vadd.f32 %v637_v52, %v587_v61  ;;  %v1150_v5 = vpop.f32.mrb[14].mxu1 }
 0x108   : > { %v784_v10 = vpop.f32.mrb[15].mxu1 }
 0x109   : > { %v652_v11 = vadd.f32 %v640_v56, %v588_v3 }
 0x10b   : > { %v1143_v12 = vpop.f32.mrb[12].mxu0 }
 0x10c   : > { %v720_v13 = vadd.f32 %v1143_v12, %v653_v0  ;;  %v704_v14 = vpop.f32.mrb[13].mxu0 }
 0x10d   : > { %v718_v15 = vadd.f32 %v704_v14, %v651_v4  ;;  %v1144_v16 = vpop.f32.mrb[14].mxu0 }
 0x10e   : > { %v797_v17 = vadd.f32 %v1149_v63, %v720_v13  ;;  %v707_v18 = vpop.f32.mrb[15].mxu0 }
 0x10f   : > { %v719_v19 = vadd.f32 %v707_v18, %v652_v11  ;;  %v795_v21 = vadd.f32 %v781_v2, %v718_v15 }
 0x111   : > { %v796_v23 = vadd.f32 %v784_v10, %v719_v19 }
 0x113   : > { %v1155_v24 = vpop.f32.mrb[16].mxu0 }
 0x114   : > { %v863_v26 = vadd.f32 %v1155_v24, %v797_v17  ;;  %v847_v27 = vpop.f32.mrb[17].mxu0 }
 0x115   : > { %v861_v28 = vadd.f32 %v847_v27, %v795_v21  ;;  %v1156_v20 = vpop.f32.mrb[18].mxu0 }
 0x116   : > { %v873_v22 = vadd.f32 %v1064_v25, %v863_v26  ;;  %v850_v29 = vpop.f32.mrb[19].mxu0 }
 0x117   : > { %v871_v30 = vadd.f32 %v1064_v25, %v861_v28  ;;  %v862_v31 = vadd.f32 %v850_v29, %v796_v23 }
 0x118   : > { %v879_v32 = vmul.f32 0.01, %v873_v22  ;;  %vm876_vm15 = vcmp.gt.f32.partialorder %v873_v22, 0.0 }
 0x119   : > { %v877_v33 = vmul.f32 0.01, %v871_v30  ;;  %v872_v34 = vadd.f32 %v1064_v25, %v862_v31  ;;  %vm874_vm0 = vcmp.gt.f32.partialorder %v871_v30, 0.0 }
 0x11a   : > { %v882_v36 = vsel %vm876_vm15, %v873_v22, %v879_v32 }
 0x11b   : > { %vm875_vm1 = vcmp.gt.f32.partialorder %v872_v34, 0.0  ;;  %v878_v35 = vmul.f32 0.01, %v872_v34  ;;  %v880_v37 = vsel %vm874_vm0, %v871_v30, %v877_v33  ;;  %v884_v40 = vpack.c.bf16 %v882_v36, %v882_v36 }
 0x11d   : > { %v881_v38 = vsel %vm875_vm1, %v872_v34, %v878_v35 }
 0x11e   : > { %v883_v39 = vpack.c.bf16 %v881_v38, %v880_v37 }
 0x120   : > { %1161 = vmatprep.mubr.msk.bf16.mxu1 %vm908_vm2, %v883_v39 }
 0x121   : > { %1162 = vmatmul.mubr.msk.bf16.vlgmr.msra.gmra.mrb[16].mxu1 %vm908_vm2, %v884_v40 }
 0x1f4   : > { %v1163_v46 = vpop.f32.mrb[16].mxu1 }
 0x1f5   : > { %v958_v48 = vadd.f32 %v1163_v46, %v1065_v45  ;;  %v949_v49 = vpop.f32.mrb[17].mxu1 }
 0x1f6   : > { %v950_v8 = vadd.f32 %v1065_v45, %v949_v49  ;;  %v1164_v6 = vpop.f32.mrb[18].mxu1 }
 0x1f7   : > { %v980_v9 = vadd.f32 %v974_v47, %v958_v48  ;;  %v952_v7 = vpop.f32.mrb[19].mxu1 }
 0x1f8   : > { %v978_v52 = vadd.f32 %v970_v50, %v950_v8  ;;  %v953_v53 = vadd.f32 %v1065_v45, %v952_v7 }
 0x1f9   : > { %983 = vst.msk [vmem:[%s224_s30 + $0x10] sm:$0xff] %vm278_vm6, %v980_v9 }
 0x1fa   : > { %981 = vst.msk [vmem:[%s224_s30] sm:$0xff] %vm278_vm6, %v978_v52  ;;  %v979_v54 = vadd.f32 %v972_v51, %v953_v53 }
 0x1fc   : > { %982 = vst.msk [vmem:[%s224_s30 + $0x8] sm:$0xff] %vm278_vm6, %v979_v54 }
 0x1fd PF: > { %s15_s18 = sadd.s32 1, %s1192_s18  }
 0x1fe   : > { %p12_p4 = scmp.ge.s32.totalorder %s15_s18, 4  }
 0x200   :  { %14 = sbr.rel (!%p12_p4) target bundleno = 1 (0x1), region = 70 }

// kernel: encoder_forward.20
= control target key start
LH: loop header
LB: loop body
LE: loop exit
PB: predicated region body
PF: predicated region fallthrough
CT: control target
= control target key end

     0   :  { %s1025_s12 = smov 0   ;;  %s1149_s0 = inlined_call_operand.vmem [shape: f32[2,44,8], index: 0, kind: input, shape index: {}]   ;;  %s1150_s1 = inlined_call_operand.vmem [shape: bf16[9,8,8], index: 1, kind: input, shape index: {}]   ;;  %s1151_s2 = inlined_call_operand.vmem [shape: f32[1,8], index: 2, kind: input, shape index: {}]   ;;  %s1152_s3 = inlined_call_operand.vmem [shape: f32[2,24,8], index: 3, kind: output, shape index: {}]  }
   0x1 LB: > { %s869_s13 = sadd.s32 4294967295, %s1003_s12   ;;  %p873_p0 = scmp.ge.s32.totalorder %s1003_s12, 1  ;;  %s1003_s12 = sphi %s1025_s12, %s13_s12  }
   0x2   : > { %p137_p1 = scmp.lt.s32.totalorder %s1003_s12, 3 }
   0x4   : > { %p138_p2 = pnand %p873_p0, %p137_p1 }
   0x5   : > { %v182_v0 = vld [vmem:[%s1150_s1 + $0x4] sm:$0xf] (!%p138_p2)  ;;  %vm213_vm0 = vcmask (!%p138_p2), 1043456   ;;  %v181_v1 = vld [vmem:[%s1150_s1] sm:$0xf] (!%p138_p2)  ;;  %p161_p3 = scmp.lt.s32.totalorder (!%p138_p2), %s869_s13, 1 }
   0x6   : > { %141 = sbr.rel (%p138_p2) target bundleno = 283 (0x11b), region = 32  ;;  %978 = vmatprep.subr.msk.bf16.mxu0 (!%p138_p2), %vm213_vm0, %v182_v0  ;;  %v215_v2 = vsel (!%p138_p2), %vm213_vm0, %v182_v0, 0  ;;  %979 = vmatprep.subr.msk.bf16.mxu1 (!%p138_p2), %vm213_vm0, %v181_v1  ;;  %v270_v3 = vsel (!%p138_p2), %vm213_vm0, %v181_v1, 0  ;;  %v183_v4 = vld [vmem:[%s1150_s1 + $0x8] sm:$0xf] (!%p138_p2)  ;;  %vm206_vm1 = vcmask (!%p138_p2), 64512  }
   0x7   : > { %925 = vmatpush3.bf16.msra.mxu0 (!%p138_p2), %v215_v2  ;;  %931 = vmatpush3.bf16.msra.mxu1 (!%p138_p2), %v270_v3  ;;  %v184_v5 = vld [vmem:[%s1150_s1 + $0xc] sm:$0xf] (!%p138_p2)  ;;  %vm386_vm2 = vcmask (!%p138_p2), 1044480   ;;  %v186_v16 = vld [vmem:[%s1150_s1 + $0x14] sm:$0xf] (!%p138_p2)  ;;  %vm322_vm4 = vcmask (!%p138_p2), 1046528  }
   0x8   : > { %980 = vmatprep.subr.msk.bf16.mxu0 (!%p138_p2), %vm213_vm0, %v183_v4  ;;  %981 = vmatprep.subr.msk.bf16.mxu1 (!%p138_p2), %vm213_vm0, %v184_v5  ;;  %v397_v12 = vsel (!%p138_p2), %vm213_vm0, %v184_v5, 0  ;;  %vm190_vm3 = vsmask.f32 (!%p138_p2), 7424  ;;  %v333_v31 = vsel (!%p138_p2), %vm213_vm0, %v183_v4, 0  ;;  %v185_v38 = vld [vmem:[%s1150_s1 + $0x10] sm:$0xf] (!%p138_p2) }
   0x9   : > { %v529_v39 = vsel (!%p138_p2), %vm213_vm0, %v186_v16, 0  ;;  %v188_v46 = vld [vmem:[%s1150_s1 + $0x1c] sm:$0xf] (!%p138_p2)  ;;  %vm450_vm5 = vsmask.f32 (!%p138_p2), 4352  ;;  %v465_v53 = vsel (!%p138_p2), %vm213_vm0, %v185_v38, 0 }
   0xa   : > { %vm649_vm6 = vsmask.f32 (!%p138_p2), 1280  ;;  %v187_v55 = vld [vmem:[%s1150_s1 + $0x18] sm:$0xf] (!%p138_p2)  ;;  %v673_v58 = vsel (!%p138_p2), %vm213_vm0, %v188_v46, 0  ;;  %vm583_vm7 = vcmask (!%p138_p2), 1041408  }
   0xb   : > { %v596_v63 = vsel (!%p138_p2), %vm213_vm0, %v187_v55, 0  ;;  %v189_v1 = vld [vmem:[%s1150_s1 + $0x20] sm:$0xf] (!%p138_p2)  ;;  %vm726_vm8 = vcmask (!%p138_p2), 1040384  }
   0xd   : > { %s1154_s13 = smov (!%p161_p3, %s869_s13), 1 }
   0xe   : > { %s987_s22 = smul.u32 48, %s1154_s13 }
   0xf   : > { %s988_s11 = smul.u32 24, %s1154_s13 }
  0x10   : > { %s1057_s25 = scalar_lea.vmem %s1149_s0, %s987_s22 }
  0x11   : > { %v172_v6 = vld [vmem:[%s1057_s25] sm:$0xff]  ;;  %v173_v7 = vld [vmem:[%s1057_s25 + $0x8] sm:$0xff]  ;;  %v174_v8 = vld [vmem:[%s1057_s25 + $0x10] sm:$0xff]  ;;  %s170_s16 = scalar_lea.vmem %s1152_s3, %s988_s11 }
  0x12   : > { %v175_v9 = vld [vmem:[%s1057_s25 + $0x18] sm:$0xff]  ;;  %v1063_v10 = vpack.c.bf16 %v173_v7, %v172_v6  ;;  %v176_v28 = vld [vmem:[%s1057_s25 + $0x20] sm:$0xff]  ;;  %v177_v29 = vld [vmem:[%s1057_s25 + $0x28] sm:$0xf]  ;;  %v739_v7 = vsel %vm213_vm0, %v189_v1, 0 }
  0x13   : > { %v1065_v11 = vpack.c.bf16 %v175_v9, %v174_v8  ;;  %v180_v41 = vpack.c.bf16 %v177_v29, %v176_v28 }
  0x14   : > { %v192_v13 = vshrl.u32 %v1063_v10, 16  ;;  %v194_v14 = vshll.u32 %v1063_v10, 16  ;;  %932 = vmatprep.mubr.msk.bf16.mxu1 %vm206_vm1, %v1063_v10  ;;  %v387_v15 = vrot.slane %v1063_v10, 3  ;;  %v323_v21 = vrot.slane %v1063_v10, 1 }
  0x15   : > { %v199_v17 = vshll.u32 %v1065_v11, 16  ;;  %v203_v18 = vshrl.u32 %v1065_v11, 16  ;;  %933 = vmatmul.mubr.msk.bf16.vlgmr.msra.gmra.mrb[0].mxu1 %vm206_vm1, %v1065_v11  ;;  %v388_v19 = vrot.slane %v1065_v11, 3  ;;  %v324_v22 = vrot.slane %v1065_v11, 1 }
  0x16   : > { %v196_v20 = vrot.slane %v194_v14, 1  ;;  %943 = vmatpush3.bf16.msra.mxu1 %v397_v12  ;;  %v519_v25 = vrot.slane %v1063_v10, 4  ;;  %v520_v27 = vrot.slane %v1065_v11, 4  ;;  %v451_v32 = vrot.slane %v192_v13, 3 }
  0x17   : > { %v201_v23 = vrot.slane %v199_v17, 1  ;;  %v389_v24 = vsel %vm386_vm2, %v387_v15, %v388_v19  ;;  %983 = vmatprep.subr.msk.bf16.mxu1 %vm213_vm0, %v186_v16  ;;  %v452_v33 = vrot.slane %v194_v14, 4  ;;  %v325_v35 = vsel %vm322_vm4, %v323_v21, %v324_v22 }
  0x18   : > { %v197_v26 = vor.u32 %v196_v20, %v192_v13  ;;  %944 = vmatprep.mubr.msk.bf16.mxu1 %vm206_vm1, %v389_v24  ;;  %v454_v36 = vrot.slane %v203_v18, 3  ;;  %v455_v37 = vrot.slane %v199_v17, 4  ;;  %v521_v40 = vsel %vm213_vm0, %v519_v25, %v520_v27 }
  0x19   : > { %v205_v30 = vor.u32 %v203_v18, %v201_v23  ;;  %v650_v42 = vrot.slane %v192_v13, 6  ;;  %v651_v43 = vrot.slane %v194_v14, 7  ;;  %v653_v44 = vrot.slane %v203_v18, 6 }
  0x1a   : > { %v202_v34 = vsel %vm190_vm3, %v197_v26, %v201_v23  ;;  %v654_v45 = vrot.slane %v199_v17, 7  ;;  %v453_v47 = vor.u32 %v452_v33, %v451_v32  ;;  %v456_v48 = vor.u32 %v455_v37, %v454_v36 }
  0x1b   : > { %926 = vmatprep.mubr.msk.bf16.mxu0 %vm206_vm1, %v202_v34  ;;  %v658_v49 = vshrl.u32 %v180_v41, 16  ;;  %v661_v50 = vshll.u32 %v180_v41, 16  ;;  %v652_v51 = vor.u32 %v651_v43, %v650_v42  ;;  %v584_v60 = vrot.slane %v1063_v10, 6 }
  0x1c   : > { %927 = vmatmul.mubr.msk.bf16.vlgmr.msra.gmra.mrb[0].mxu0 %vm206_vm1, %v205_v30  ;;  %v655_v52 = vor.u32 %v654_v45, %v653_v44  ;;  %v457_v54 = vsel %vm450_vm5, %v453_v47, %v456_v48  ;;  %v585_v61 = vrot.slane %v1065_v11, 6  ;;  %v587_v3 = vrot.slane %v180_v41, 6 }
  0x1d   : > { %937 = vmatpush3.bf16.msra.mxu0 %v333_v31  ;;  %938 = vmatprep.mubr.msk.bf16.mxu0 %vm206_vm1, %v325_v35  ;;  %v660_v56 = vrot.slane %v658_v49, 6  ;;  %v663_v57 = vrot.slane %v661_v50, 7  ;;  %v727_v4 = vrot.slane %v1063_v10, 7  ;;  %v728_v5 = vrot.slane %v1065_v11, 7 }
  0x1e   : > { %982 = vmatprep.subr.msk.bf16.mxu0 %vm213_vm0, %v185_v38  ;;  %945 = vmatmul.mubr.msk.bf16.vlgmr.msra.gmra.mrb[4].mxu1 %vm206_vm1, %v388_v19  ;;  %v656_v59 = vsel %vm649_vm6, %v652_v51, %v655_v52  ;;  %v586_v0 = vsel %vm583_vm7, %v584_v60, %v585_v61  ;;  %v588_v6 = vsel %vm583_vm7, %v585_v61, %v587_v3  ;;  %v730_v9 = vrot.slane %v180_v41, 7 }
  0x1f   : > { %955 = vmatpush3.bf16.msra.mxu1 %v529_v39  ;;  %956 = vmatprep.mubr.msk.bf16.mxu1 %vm206_vm1, %v521_v40  ;;  %v664_v62 = vor.u32 %v663_v57, %v660_v56  ;;  %v729_v8 = vsel %vm726_vm8, %v727_v4, %v728_v5 }
  0x20   : > { %985 = vmatprep.subr.msk.bf16.mxu1 %vm213_vm0, %v188_v46  ;;  %v731_v12 = vsel %vm726_vm8, %v728_v5, %v730_v9 }
  0x21   : > { %v665_v2 = vsel %vm649_vm6, %v655_v52, %v664_v62 }
  0x24   : > { %939 = vmatmul.mubr.msk.bf16.vlgmr.msra.gmra.mrb[4].mxu0 %vm206_vm1, %v324_v22 }
  0x25   : > { %949 = vmatpush3.bf16.msra.mxu0 %v465_v53  ;;  %950 = vmatprep.mubr.msk.bf16.mxu0 %vm206_vm1, %v457_v54 }
  0x26   : > { %984 = vmatprep.subr.msk.bf16.mxu0 %vm213_vm0, %v187_v55  ;;  %957 = vmatmul.mubr.msk.bf16.vlgmr.msra.gmra.mrb[8].mxu1 %vm206_vm1, %v520_v27 }
  0x27   : > { %967 = vmatpush3.bf16.msra.mxu1 %v673_v58  ;;  %968 = vmatprep.mubr.msk.bf16.mxu1 %vm206_vm1, %v656_v59 }
  0x2c   : > { %951 = vmatmul.mubr.msk.bf16.vlgmr.msra.gmra.mrb[8].mxu0 %vm206_vm1, %v456_v48 }
  0x2d   : > { %961 = vmatpush3.bf16.msra.mxu0 %v596_v63  ;;  %962 = vmatprep.mubr.msk.bf16.mxu0 %vm206_vm1, %v586_v0 }
  0x2e   : > { %986 = vmatprep.subr.msk.bf16.mxu0 %vm213_vm0, %v189_v1  ;;  %969 = vmatmul.mubr.msk.bf16.vlgmr.msra.gmra.mrb[12].mxu1 %vm206_vm1, %v665_v2  ;;  %v894_v1 = vld [vmem:[%s1151_s2] ss:$0 sm:$0xff] }
  0x34   : > { %963 = vmatmul.mubr.msk.bf16.vlgmr.msra.gmra.mrb[12].mxu0 %vm206_vm1, %v588_v6 }
  0x35   : > { %973 = vmatpush3.bf16.msra.mxu0 %v739_v7  ;;  %974 = vmatprep.mubr.msk.bf16.mxu0 %vm206_vm1, %v729_v8 }
  0x3c   : > { %975 = vmatmul.mubr.msk.bf16.vlgmr.msra.gmra.mrb[16].mxu0 %vm206_vm1, %v731_v12 }
  0xe8   : > { %v934_v13 = vpop.f32.mrb[0].mxu1 }
  0xe9   : > { %v306_v14 = vpop.f32.mrb[1].mxu1 }
  0xea   : > { %v935_v10 = vpop.f32.mrb[2].mxu1 }
  0xeb   : > { %v309_v15 = vpop.f32.mrb[3].mxu1 }
  0xef   : > { %v928_v11 = vpop.f32.mrb[0].mxu0 }
  0xf0   : > { %v315_v16 = vadd.f32 %v934_v13, %v928_v11  ;;  %v251_v17 = vpop.f32.mrb[1].mxu0 }
  0xf1   : > { %v307_v18 = vadd.f32 %v306_v14, %v251_v17  ;;  %v929_v19 = vpop.f32.mrb[2].mxu0  ;;  %v946_v20 = vpop.f32.mrb[4].mxu1 }
  0xf2   : > { %v254_v21 = vpop.f32.mrb[3].mxu0  ;;  %v433_v22 = vpop.f32.mrb[5].mxu1 }
  0xf3   : > { %v310_v23 = vadd.f32 %v309_v15, %v254_v21  ;;  %v947_v24 = vpop.f32.mrb[6].mxu1 }
  0xf4   : > { %v436_v25 = vpop.f32.mrb[7].mxu1 }
  0xf7   : > { %v940_v26 = vpop.f32.mrb[4].mxu0 }
  0xf8   : > { %v385_v27 = vadd.f32 %v940_v26, %v315_v16  ;;  %v369_v28 = vpop.f32.mrb[5].mxu0 }
  0xf9   : > { %v383_v29 = vadd.f32 %v369_v28, %v307_v18  ;;  %v941_v30 = vpop.f32.mrb[6].mxu0  ;;  %v958_v31 = vpop.f32.mrb[8].mxu1 }
  0xfa   : > { %v449_v32 = vadd.f32 %v946_v20, %v385_v27  ;;  %v372_v33 = vpop.f32.mrb[7].mxu0  ;;  %v565_v34 = vpop.f32.mrb[9].mxu1 }
  0xfb   : > { %v384_v35 = vadd.f32 %v372_v33, %v310_v23  ;;  %v447_v36 = vadd.f32 %v433_v22, %v383_v29  ;;  %v959_v37 = vpop.f32.mrb[10].mxu1 }
  0xfc   : > { %v568_v38 = vpop.f32.mrb[11].mxu1 }
  0xfd   : > { %v448_v39 = vadd.f32 %v436_v25, %v384_v35 }
  0xff   : > { %v952_v40 = vpop.f32.mrb[8].mxu0 }
 0x100   : > { %v517_v41 = vadd.f32 %v952_v40, %v449_v32  ;;  %v501_v42 = vpop.f32.mrb[9].mxu0 }
 0x101   : > { %v515_v43 = vadd.f32 %v501_v42, %v447_v36  ;;  %v953_v44 = vpop.f32.mrb[10].mxu0  ;;  %v970_v45 = vpop.f32.mrb[12].mxu1 }
 0x102   : > { %v581_v46 = vadd.f32 %v958_v31, %v517_v41  ;;  %v504_v47 = vpop.f32.mrb[11].mxu0  ;;  %v709_v48 = vpop.f32.mrb[13].mxu1 }
 0x103   : > { %v516_v49 = vadd.f32 %v504_v47, %v448_v39  ;;  %v579_v50 = vadd.f32 %v565_v34, %v515_v43  ;;  %v971_v51 = vpop.f32.mrb[14].mxu1 }
 0x104   : > { %v712_v52 = vpop.f32.mrb[15].mxu1 }
 0x105   : > { %v580_v53 = vadd.f32 %v568_v38, %v516_v49 }
 0x107   : > { %v964_v54 = vpop.f32.mrb[12].mxu0 }
 0x108   : > { %v648_v55 = vadd.f32 %v964_v54, %v581_v46  ;;  %v632_v56 = vpop.f32.mrb[13].mxu0 }
 0x109   : > { %v646_v57 = vadd.f32 %v632_v56, %v579_v50  ;;  %v965_v58 = vpop.f32.mrb[14].mxu0 }
 0x10a   : > { %v725_v59 = vadd.f32 %v970_v45, %v648_v55  ;;  %v635_v60 = vpop.f32.mrb[15].mxu0 }
 0x10b   : > { %v647_v61 = vadd.f32 %v635_v60, %v580_v53  ;;  %v723_v62 = vadd.f32 %v709_v48, %v646_v57 }
 0x10d   : > { %v724_v63 = vadd.f32 %v712_v52, %v647_v61 }
 0x10f   : > { %v976_v0 = vpop.f32.mrb[16].mxu0 }
 0x110   : > { %v791_v2 = vadd.f32 %v976_v0, %v725_v59  ;;  %v775_v3 = vpop.f32.mrb[17].mxu0 }
 0x111   : > { %v789_v4 = vadd.f32 %v775_v3, %v723_v62  ;;  %v977_v5 = vpop.f32.mrb[18].mxu0 }
 0x112   : > { %v801_v6 = vadd.f32 %v894_v1, %v791_v2  ;;  %v778_v7 = vpop.f32.mrb[19].mxu0 }
 0x113   : > { %v799_v8 = vadd.f32 %v894_v1, %v789_v4  ;;  %v790_v9 = vadd.f32 %v778_v7, %v724_v63 }
 0x114   : > { %vm804_vm9 = vcmp.gt.f32.partialorder %v801_v6, 0.0  ;;  %v807_v12 = vmul.f32 0.01, %v801_v6 }
 0x115   : > { %vm802_vm10 = vcmp.gt.f32.partialorder %v799_v8, 0.0  ;;  %v805_v13 = vmul.f32 0.01, %v799_v8  ;;  %v800_v14 = vadd.f32 %v894_v1, %v790_v9 }
 0x116   : > { %v810_v10 = vsel %vm804_vm9, %v801_v6, %v807_v12 }
 0x117   : > { %813 = vst.msk [vmem:[%s170_s16 + $0x10] sm:$0xff] %vm206_vm1, %v810_v10  ;;  %v808_v15 = vsel %vm802_vm10, %v799_v8, %v805_v13  ;;  %vm803_vm11 = vcmp.gt.f32.partialorder %v800_v14, 0.0  ;;  %v806_v11 = vmul.f32 0.01, %v800_v14 }
 0x118   : > { %811 = vst.msk [vmem:[%s170_s16] sm:$0xff] %vm206_vm1, %v808_v15 }
 0x119   : > { %v809_v16 = vsel %vm803_vm11, %v800_v14, %v806_v11 }
 0x11a   : > { %812 = vst.msk [vmem:[%s170_s16 + $0x8] sm:$0xff] %vm206_vm1, %v809_v16 }
 0x11b PF: > { %s13_s12 = sadd.s32 1, %s1003_s12  }
 0x11c   : > { %p10_p4 = scmp.ge.s32.totalorder %s13_s12, 4  }
 0x11e   :  { %12 = sbr.rel (!%p10_p4) target bundleno = 1 (0x1), region = 62 }

// kernel: encoder_forward.21
= control target key start
LH: loop header
LB: loop body
LE: loop exit
PB: predicated region body
PF: predicated region fallthrough
CT: control target
= control target key end

     0   :  { %v184_v0 = vmov 0.0   ;;  %vm185_vm0 = vmmov 0   ;;  %vm130_vm2 = vcmask 64512   ;;  %s239_s1 = inlined_call_operand.vmem [shape: bf16[128,8], index: 1, kind: input, shape index: {}]   ;;  %s240_s0 = inlined_call_operand.vmem [shape: bf16[8,128], index: 0, kind: input, shape index: {}]   ;;  %s241_s2 = inlined_call_operand.vmem [shape: f32[1,8], index: 2, kind: input, shape index: {}]   ;;  %s242_s3 = inlined_call_operand.vmem [shape: f32[8,8], index: 3, kind: output, shape index: {}]  }
   0x1   :  { %154 = vmatprep.subr.bf16.mxu0 %v184_v0  ;;  %v176_v1 = vld [vmem:[%s239_s1] sm:$0xff]   ;;  %170 = vmatprep.mubr.msk.bf16.mxu0 %vm185_vm0, %v184_v0  ;;  %v177_v2 = vld [vmem:[%s239_s1 + $0x8] sm:$0xff]   ;;  %v178_v3 = vld [vmem:[%s239_s1 + $0x10] sm:$0xff]  }
   0x2   :  { %155 = vmatpush3.bf16.msra.mxu0 %v176_v1  ;;  %v179_v4 = vld [vmem:[%s239_s1 + $0x18] sm:$0xff]   ;;  %v180_v5 = vld [vmem:[%s239_s1 + $0x20] sm:$0xff]   ;;  %v181_v6 = vld [vmem:[%s239_s1 + $0x28] sm:$0xff]  }
   0x3   :  { %156 = vmatprep.subr.bf16.mxu0 %v184_v0  ;;  %v182_v7 = vld [vmem:[%s239_s1 + $0x30] sm:$0xff]   ;;  %v183_v8 = vld [vmem:[%s239_s1 + $0x38] sm:$0xff]   ;;  %v15_v9 = vld [vmem:[%s240_s0] sm:$0xf] }
   0x4   :  { %v136_v10 = vld [vmem:[%s241_s2] ss:$0 sm:$0xff] }
   0x6   :  { %157 = vmatpush3.bf16.msra.mxu0 %v177_v2 }
   0x7   :  { %158 = vmatprep.subr.bf16.mxu0 %v184_v0 }
   0xa   :  { %159 = vmatpush3.bf16.msra.mxu0 %v178_v3 }
   0xb   :  { %160 = vmatprep.subr.bf16.mxu0 %v184_v0 }
   0xe   :  { %161 = vmatpush3.bf16.msra.mxu0 %v179_v4 }
   0xf   :  { %162 = vmatprep.subr.bf16.mxu0 %v184_v0 }
  0x12   :  { %163 = vmatpush3.bf16.msra.mxu0 %v180_v5 }
  0x13   :  { %164 = vmatprep.subr.bf16.mxu0 %v184_v0 }
  0x16   :  { %165 = vmatpush3.bf16.msra.mxu0 %v181_v6 }
  0x17   :  { %166 = vmatprep.subr.bf16.mxu0 %v184_v0 }
  0x1a   :  { %167 = vmatpush3.bf16.msra.mxu0 %v182_v7 }
  0x1b   :  { %168 = vmatprep.subr.bf16.mxu0 %v184_v0 }
  0x1e   :  { %169 = vmatpush3.bf16.msra.mxu0 %v183_v8 }
  0x21   :  { %171 = vmatmul.mubr.bf16.vlgmr.msra.gmra.mrb[0].mxu0 %v15_v9 }
  0xf4   :  { %v121_v11 = vpop.f32.mrb[0].mxu0 }
  0xf5   :  { %v122_v12 = vadd.f32 %v136_v10, %v121_v11  ;;  %v172_v13 = vpop.f32.mrb[1].mxu0 }
  0xf6   :  { %v124_v14 = vpop.f32.mrb[2].mxu0 }
  0xf7   :  { %vm127_vm1 = vcmp.gt.f32.partialorder %v122_v12, 0.0  ;;  %v128_v15 = vmul.f32 0.01, %v122_v12  ;;  %v173_v16 = vpop.f32.mrb[3].mxu0 }
  0xf9   :  { %v129_v17 = vsel %vm127_vm1, %v122_v12, %v128_v15 }
  0xfa   :  { %131 = vst.msk [vmem:[%s242_s3] sm:$0xff] %vm130_vm2, %v129_v17 }

// kernel: encoder_forward.22
= control target key start
LH: loop header
LB: loop body
LE: loop exit
PB: predicated region body
PF: predicated region fallthrough
CT: control target
= control target key end

     0   :  { %s829_s12 = smov 0   ;;  %s936_s0 = inlined_call_operand.vmem [shape: f32[2,24,8], index: 0, kind: input, shape index: {}]   ;;  %s937_s1 = inlined_call_operand.vmem [shape: bf16[9,8,8], index: 1, kind: input, shape index: {}]   ;;  %s938_s2 = inlined_call_operand.vmem [shape: f32[1,8], index: 2, kind: input, shape index: {}]   ;;  %s939_s3 = inlined_call_operand.vmem [shape: f32[2,8,8], index: 3, kind: output, shape index: {}]  }
   0x1 LB: > { %s697_s13 = sadd.s32 4294967295, %s805_s12   ;;  %p701_p0 = scmp.ge.s32.totalorder %s805_s12, 1  ;;  %s805_s12 = sphi %s829_s12, %s13_s12  }
   0x2   : > { %p137_p1 = scmp.lt.s32.totalorder %s805_s12, 3 }
   0x4   : > { %p138_p2 = pnand %p701_p0, %p137_p1 }
   0x5   : > { %v176_v0 = vld [vmem:[%s937_s1 + $0x4] sm:$0xf] (!%p138_p2)  ;;  %vm195_vm0 = vcmask (!%p138_p2), 1043456   ;;  %v175_v1 = vld [vmem:[%s937_s1] sm:$0xf] (!%p138_p2)  ;;  %v807_v2 = vmov (!%p138_p2), 0.0  }
   0x6   : > { %141 = sbr.rel (%p138_p2) target bundleno = 275 (0x113), region = 32  ;;  %734 = vmatprep.subr.bf16.mxu0 (!%p138_p2), %v807_v2  ;;  %v197_v3 = vsel (!%p138_p2), %vm195_vm0, %v176_v0, 0  ;;  %740 = vmatprep.subr.bf16.mxu1 (!%p138_p2), %v807_v2  ;;  %v242_v4 = vsel (!%p138_p2), %vm195_vm0, %v175_v1, 0  ;;  %p160_p3 = scmp.lt.s32.totalorder (!%p138_p2), %s697_s13, 1  ;;  %vm808_vm1 = vmmov (!%p138_p2), 0   ;;  %vm191_vm2 = vcmask (!%p138_p2), 64512  }
   0x7   : > { %735 = vmatpush3.bf16.msra.mxu0 (!%p138_p2), %v197_v3  ;;  %741 = vmatpush3.bf16.msra.mxu1 (!%p138_p2), %v242_v4  ;;  %v178_v5 = vld [vmem:[%s937_s1 + $0xc] sm:$0xf] (!%p138_p2)  ;;  %v177_v12 = vld [vmem:[%s937_s1 + $0x8] sm:$0xf] (!%p138_p2)  ;;  %v180_v14 = vld [vmem:[%s937_s1 + $0x14] sm:$0xf] (!%p138_p2) }
   0x8   : > { %736 = vmatprep.mubr.msk.bf16.mxu0 (!%p138_p2), %vm808_vm1, %v807_v2  ;;  %742 = vmatprep.mubr.msk.bf16.mxu1 (!%p138_p2), %vm808_vm1, %v807_v2  ;;  %v338_v9 = vsel (!%p138_p2), %vm195_vm0, %v178_v5, 0  ;;  %v290_v16 = vsel (!%p138_p2), %vm195_vm0, %v177_v12, 0  ;;  %v436_v18 = vsel (!%p138_p2), %vm195_vm0, %v180_v14, 0  ;;  %v179_v20 = vld [vmem:[%s937_s1 + $0x10] sm:$0xf] (!%p138_p2)  ;;  %vm584_vm4 = vcmask (!%p138_p2), 1042432  }
   0x9   : > { %746 = vmatprep.subr.bf16.mxu0 (!%p138_p2), %v807_v2  ;;  %752 = vmatprep.subr.bf16.mxu1 (!%p138_p2), %v807_v2  ;;  %v182_v23 = vld [vmem:[%s937_s1 + $0x1c] sm:$0xf] (!%p138_p2)  ;;  %v388_v24 = vsel (!%p138_p2), %vm195_vm0, %v179_v20, 0  ;;  %v181_v32 = vld [vmem:[%s937_s1 + $0x18] sm:$0xf] (!%p138_p2) }
   0xa   : > { %v540_v31 = vsel (!%p138_p2), %vm195_vm0, %v182_v23, 0  ;;  %vm527_vm3 = vsmask.f32 (!%p138_p2), 3328  ;;  %v484_v36 = vsel (!%p138_p2), %vm195_vm0, %v181_v32, 0  ;;  %v183_v38 = vld [vmem:[%s937_s1 + $0x20] sm:$0xf] (!%p138_p2) }
   0xb   : > { %v592_v40 = vsel (!%p138_p2), %vm195_vm0, %v183_v38, 0  ;;  %v713_v20 = vld [vmem:[%s938_s2] ss:$0 sm:$0xff] (!%p138_p2) }
   0xd   : > { %s941_s13 = smov (!%p160_p3, %s697_s13), 1 }
   0xe   : > { %s788_s18 = smul.u32 24, %s941_s13  ;;  %s703_s9 = sshll.u32 %s941_s13, 3 }
   0xf   : > { %s168_s16 = scalar_lea.vmem %s939_s3, %s703_s9 }
  0x10   : > { %s164_s23 = scalar_lea.vmem %s936_s0, %s788_s18 }
  0x11   : > { %v170_v6 = vld [vmem:[%s164_s23] sm:$0xff]  ;;  %v171_v7 = vld [vmem:[%s164_s23 + $0x8] sm:$0xff]  ;;  %v172_v19 = vld [vmem:[%s164_s23 + $0x10] sm:$0xff] }
  0x12   : > { %v862_v8 = vpack.c.bf16 %v171_v7, %v170_v6  ;;  %v174_v21 = vpack.c.bf16 %v172_v19, %v172_v19 }
  0x14   : > { %v185_v10 = vshrl.u32 %v862_v8, 16  ;;  %v187_v11 = vshll.u32 %v862_v8, 16  ;;  %743 = vmatmul.mubr.msk.bf16.vlgmr.msra.gmra.mrb[0].mxu1 %vm191_vm2, %v862_v8  ;;  %v333_v17 = vrot.slane %v862_v8, 2  ;;  %v285_v22 = vrot.slane %v862_v8, 1 }
  0x15   : > { %753 = vmatpush3.bf16.msra.mxu1 %v338_v9  ;;  %754 = vmatprep.mubr.msk.bf16.mxu1 %vm808_vm1, %v807_v2  ;;  %v431_v25 = vrot.slane %v862_v8, 3  ;;  %v532_v28 = vshll.u32 %v174_v21, 16  ;;  %v479_v39 = vrot.slane %v862_v8, 4  ;;  %v585_v41 = vrot.slane %v862_v8, 5 }
  0x16   : > { %v189_v13 = vrot.slane %v187_v11, 1  ;;  %764 = vmatprep.subr.bf16.mxu1 %v807_v2  ;;  %v528_v26 = vrot.slane %v185_v10, 4  ;;  %v529_v27 = vrot.slane %v187_v11, 5  ;;  %v381_v29 = vrot.slane %v185_v10, 2 }
  0x17   : > { %v382_v30 = vrot.slane %v187_v11, 3  ;;  %v534_v34 = vrot.slane %v532_v28, 5  ;;  %v586_v42 = vrot.slane %v174_v21, 5 }
  0x18   : > { %v190_v15 = vor.u32 %v189_v13, %v185_v10  ;;  %v530_v33 = vor.u32 %v529_v27, %v528_v26 }
  0x19   : > { %v383_v35 = vor.u32 %v382_v30, %v381_v29  ;;  %v587_v43 = vsel %vm584_vm4, %v585_v41, %v586_v42 }
  0x1a   : > { %737 = vmatmul.mubr.msk.bf16.vlgmr.msra.gmra.mrb[0].mxu0 %vm191_vm2, %v190_v15  ;;  %v535_v37 = vsel %vm527_vm3, %v530_v33, %v534_v34 }
  0x1b   : > { %747 = vmatpush3.bf16.msra.mxu0 %v290_v16  ;;  %748 = vmatprep.mubr.msk.bf16.mxu0 %vm808_vm1, %v807_v2 }
  0x1c   : > { %758 = vmatprep.subr.bf16.mxu0 %v807_v2  ;;  %755 = vmatmul.mubr.msk.bf16.vlgmr.msra.gmra.mrb[4].mxu1 %vm191_vm2, %v333_v17 }
  0x1d   : > { %765 = vmatpush3.bf16.msra.mxu1 %v436_v18  ;;  %766 = vmatprep.mubr.msk.bf16.mxu1 %vm808_vm1, %v807_v2 }
  0x1e   : > { %776 = vmatprep.subr.bf16.mxu1 %v807_v2 }
  0x22   : > { %749 = vmatmul.mubr.msk.bf16.vlgmr.msra.gmra.mrb[4].mxu0 %vm191_vm2, %v285_v22 }
  0x23   : > { %759 = vmatpush3.bf16.msra.mxu0 %v388_v24  ;;  %760 = vmatprep.mubr.msk.bf16.mxu0 %vm808_vm1, %v807_v2 }
  0x24   : > { %770 = vmatprep.subr.bf16.mxu0 %v807_v2  ;;  %767 = vmatmul.mubr.msk.bf16.vlgmr.msra.gmra.mrb[8].mxu1 %vm191_vm2, %v431_v25 }
  0x25   : > { %777 = vmatpush3.bf16.msra.mxu1 %v540_v31  ;;  %778 = vmatprep.mubr.msk.bf16.mxu1 %vm808_vm1, %v807_v2 }
  0x2a   : > { %761 = vmatmul.mubr.msk.bf16.vlgmr.msra.gmra.mrb[8].mxu0 %vm191_vm2, %v383_v35 }
  0x2b   : > { %771 = vmatpush3.bf16.msra.mxu0 %v484_v36  ;;  %772 = vmatprep.mubr.msk.bf16.mxu0 %vm808_vm1, %v807_v2 }
  0x2c   : > { %782 = vmatprep.subr.bf16.mxu0 %v807_v2  ;;  %779 = vmatmul.mubr.msk.bf16.vlgmr.msra.gmra.mrb[12].mxu1 %vm191_vm2, %v535_v37 }
  0x32   : > { %773 = vmatmul.mubr.msk.bf16.vlgmr.msra.gmra.mrb[12].mxu0 %vm191_vm2, %v479_v39 }
  0x33   : > { %783 = vmatpush3.bf16.msra.mxu0 %v592_v40  ;;  %784 = vmatprep.mubr.msk.bf16.mxu0 %vm808_vm1, %v807_v2 }
  0x3a   : > { %785 = vmatmul.mubr.msk.bf16.vlgmr.msra.gmra.mrb[16].mxu0 %vm191_vm2, %v587_v43 }
  0xe7   : > { %v278_v44 = vpop.f32.mrb[0].mxu1 }
  0xe8   : > { %v744_v45 = vpop.f32.mrb[1].mxu1 }
  0xe9   : > { %v281_v46 = vpop.f32.mrb[2].mxu1 }
  0xea   : > { %v745_v47 = vpop.f32.mrb[3].mxu1 }
  0xed   : > { %v233_v48 = vpop.f32.mrb[0].mxu0 }
  0xee   : > { %v279_v49 = vadd.f32 %v278_v44, %v233_v48  ;;  %v738_v50 = vpop.f32.mrb[1].mxu0 }
  0xef   : > { %v236_v51 = vpop.f32.mrb[2].mxu0  ;;  %v374_v52 = vpop.f32.mrb[4].mxu1 }
  0xf0   : > { %v739_v53 = vpop.f32.mrb[3].mxu0  ;;  %v756_v54 = vpop.f32.mrb[5].mxu1 }
  0xf1   : > { %v377_v55 = vpop.f32.mrb[6].mxu1 }
  0xf2   : > { %v757_v56 = vpop.f32.mrb[7].mxu1 }
  0xf5   : > { %v326_v57 = vpop.f32.mrb[4].mxu0 }
  0xf6   : > { %v332_v58 = vadd.f32 %v326_v57, %v279_v49  ;;  %v750_v59 = vpop.f32.mrb[5].mxu0 }
  0xf7   : > { %v329_v60 = vpop.f32.mrb[6].mxu0  ;;  %v472_v61 = vpop.f32.mrb[8].mxu1 }
  0xf8   : > { %v380_v62 = vadd.f32 %v374_v52, %v332_v58  ;;  %v751_v63 = vpop.f32.mrb[7].mxu0  ;;  %v768_v0 = vpop.f32.mrb[9].mxu1 }
  0xf9   : > { %v475_v1 = vpop.f32.mrb[10].mxu1 }
  0xfa   : > { %v769_v2 = vpop.f32.mrb[11].mxu1 }
  0xfd   : > { %v424_v3 = vpop.f32.mrb[8].mxu0 }
  0xfe   : > { %v430_v4 = vadd.f32 %v424_v3, %v380_v62  ;;  %v762_v5 = vpop.f32.mrb[9].mxu0 }
  0xff   : > { %v427_v6 = vpop.f32.mrb[10].mxu0  ;;  %v576_v7 = vpop.f32.mrb[12].mxu1 }
 0x100   : > { %v478_v8 = vadd.f32 %v472_v61, %v430_v4  ;;  %v763_v9 = vpop.f32.mrb[11].mxu0  ;;  %v780_v10 = vpop.f32.mrb[13].mxu1 }
 0x101   : > { %v579_v11 = vpop.f32.mrb[14].mxu1 }
 0x102   : > { %v781_v12 = vpop.f32.mrb[15].mxu1 }
 0x105   : > { %v520_v13 = vpop.f32.mrb[12].mxu0 }
 0x106   : > { %v526_v14 = vadd.f32 %v520_v13, %v478_v8  ;;  %v774_v15 = vpop.f32.mrb[13].mxu0 }
 0x107   : > { %v523_v16 = vpop.f32.mrb[14].mxu0 }
 0x108   : > { %v582_v17 = vadd.f32 %v576_v7, %v526_v14  ;;  %v775_v18 = vpop.f32.mrb[15].mxu0 }
 0x10d   : > { %v628_v19 = vpop.f32.mrb[16].mxu0 }
 0x10e   : > { %v634_v21 = vadd.f32 %v628_v19, %v582_v17  ;;  %v786_v22 = vpop.f32.mrb[17].mxu0 }
 0x10f   : > { %v631_v23 = vpop.f32.mrb[18].mxu0 }
 0x110   : > { %v642_v24 = vadd.f32 %v713_v20, %v634_v21  ;;  %v787_v25 = vpop.f32.mrb[19].mxu0 }
 0x112   : > { %643 = vst.msk [vmem:[%s168_s16] sm:$0xff] %vm191_vm2, %v642_v24 }
 0x113 PF: > { %s13_s12 = sadd.s32 1, %s805_s12  }
 0x114   : > { %p10_p4 = scmp.ge.s32.totalorder %s13_s12, 4  }
 0x116   :  { %12 = sbr.rel (!%p10_p4) target bundleno = 1 (0x1), region = 62 }

// kernel: encoder_forward.23
= control target key start
LH: loop header
LB: loop body
LE: loop exit
PB: predicated region body
PF: predicated region fallthrough
CT: control target
= control target key end

     0   :  { %v147_v1 = vmov 0.0   ;;  %vm148_vm0 = vmmov 0   ;;  %s194_s0 = inlined_call_operand.vmem [shape: bf16[2,32], index: 0, kind: input, shape index: {}]   ;;  %s195_s1 = inlined_call_operand.vmem [shape: bf16[32,32], index: 1, kind: input, shape index: {}]   ;;  %s196_s2 = inlined_call_operand.vmem [shape: f32[1,32], index: 2, kind: input, shape index: {}]   ;;  %s197_s3 = inlined_call_operand.hbm [shape: f32[2,32], index: 3, kind: output, shape index: {}]  }
   0x1   :  { %v121_v0 = vld [vmem:[%s195_s1] sm:$0xff]   ;;  %110 = vmatprep.subr.bf16.mxu0 %v147_v1  ;;  %v122_v2 = vld [vmem:[%s195_s1 + $0x8] sm:$0xff]   ;;  %114 = vmatprep.mubr.msk.bf16.mxu0 %vm148_vm0, %v147_v1 }
   0x2   :  { %111 = vmatpush3.bf16.msra.mxu0 %v121_v0 }
   0x3   :  { %112 = vmatprep.subr.bf16.mxu0 %v147_v1 }
   0x4   :  { %8 = vsyncpa [#allocation3], 0  ;;  %v16_v3 = vld [vmem:[%s194_s0] sm:$0x1]  ;;  %vm40_vm1 = vcmask 261120   ;;  %s149_s20 = smov [#allocation2]  }
   0x5   :  { %v103_v4 = vld [vmem:[%s196_s2] ss:$0 sm:$0xff]  ;;  %s95_s1 = sshll.u32 %s149_s20, 4  ;;  %vm87_vm3 = vcmask 254976   ;;  %s96_s1 = int_to_ptr.vmem [resolvable:$true] %s95_s1 }
   0x6   :  { %113 = vmatpush3.bf16.msra.mxu0 %v122_v2  ;;  %s123_s0 = scalar_lea.vmem %s96_s1, 32  ;;  %p128_p1 = scmp.lt.s32.totalorder %s96_s1, %s96_s1 }
   0x7   :  { %p124_p0 = scmp.ne.s32.totalorder %s96_s1, %s123_s0  ;;  %p129_p2 = scmp.lt.s32.totalorder %s123_s0, %s123_s0 }
   0x9   :  { %115 = vmatmul.mubr.msk.bf16.vlgmr.msra.gmra.mrb[0].mxu0 %vm40_vm1, %v16_v3  ;;  %p130_p3 = por %p129_p2, %p128_p1 }
   0xb   :  { %p131_p4 = pnand %p130_p3, %p124_p0 }
  0xdc   :  { %v78_v5 = vpop.f32.mrb[0].mxu0 }
  0xdd   :  { %v79_v6 = vadd.f32 %v103_v4, %v78_v5  ;;  %v116_v7 = vpop.f32.mrb[1].mxu0 }
  0xde   :  { %v81_v8 = vpop.f32.mrb[2].mxu0 }
  0xdf   :  { %v85_v9 = vmul.f32 0.01, %v79_v6  ;;  %v117_v10 = vpop.f32.mrb[3].mxu0  ;;  %vm84_vm2 = vcmp.gt.f32.partialorder %v79_v6, 0.0 }
  0xe1   :  { %v86_v11 = vsel %vm84_vm2, %v79_v6, %v85_v9 }
  0xe2   :  { %88 = vst.msk [vmem:[#allocation2] sm:$0x3] %vm87_vm3, %v86_v11 }
  0xe3   :  { %134 = shalt.err (!%p131_p4)
}
  0xe4   :  { %s135_s22 = scalar_lea.hbm %s197_s3, 32 }
  0xe5   :  { %p136_p5 = scmp.ne.s32.totalorder %s197_s3, %s135_s22  ;;  %p139_p6 = scmp.lt.u32.totalorder %s135_s22, %s197_s3 }
  0xe7   :  { %p141_p7 = pnand %p139_p6, %p136_p5 }
  0xe9   :  { %144 = shalt.err (!%p141_p7)
}
  0xea   :  { %98 = dma.vmem_to_hbm [thread:$0]  %s96_s1, 32, %s197_s3, [#allocation3]  }
  0xeb   :  { %145 = dma.done.wait [#allocation3], 32  }
  0xec   :  { %146 = vsyncadd [#allocation3], 4294967264 }
  0xed   :  { %102 = vsyncpa [#allocation3], 1 }

</bundles_post_ra>
